<compile_context>
chip_gen: v7x
topology: tpu7x:2x2x1
jax: 0.10.0
libtpu: 0.0.40
codegen_flags: <defaults>
</compile_context>

<pallas_src>
import math
import functools

import jax
import jax.numpy as jnp
from jax import lax
from jax.experimental import pallas as pl
from jax.experimental.pallas import tpu as pltpu  # noqa: F401  (TPU backend assumed)

# ---------------- small hyper-params (structure-consistent, scaled down) --------
D_MODEL = 32
NUM_HEADS = 4
D_K = D_MODEL // NUM_HEADS
D_FF = 64
NUM_LAYERS = 2
SRC_VOCAB = 50
TGT_VOCAB = 50
MAX_SEQ = 16
BATCH = 2
SEQ = 8

LOGIT_PAD = 128  # pad classifier output to 128 lanes -> dense stores

# Ordered key lists used both for packing args and unpacking refs in the kernel.
FIXED_ARGS = ('src_ids', 'tgt_ids', 'enc_emb', 'dec_emb', 'pe_src', 'pe_tgt',
              'enc_bias', 'dec_bias', 'cross_bias', 'fc_w', 'fc_b')
ENC_KEYS = ('wqkv', 'bqkv', 'wo', 'bo', 'g1', 'be1',
            'w1', 'bf1', 'w2', 'bf2', 'g2', 'be2')
DEC_KEYS = ('s_wqkv', 's_bqkv', 's_wo', 's_bo', 'g1', 'be1',
            'c_wq', 'c_bq', 'c_wkv', 'c_bkv', 'c_wo', 'c_bo', 'g2', 'be2',
            'w1', 'bf1', 'w2', 'bf2', 'g3', 'be3')


# =========================== shared math helpers (jnp) ==========================

def _add_ln(x, y, g, b):
    # LayerNorm(x + y), eps = 1e-5 (PyTorch default), biased variance.
    z = x + y
    mu = jnp.mean(z, axis=-1, keepdims=True)
    var = jnp.mean(jnp.square(z - mu), axis=-1, keepdims=True)
    return (z - mu) * lax.rsqrt(var + 1e-5) * g + b


def _mha_flat(q, k, v, bias_ref, batch, sq, sk, num_heads, d_k):
    # q: [batch*sq, D], k/v: [batch*sk, D]; bias_ref: [batch, sq, sk] additive
    # (0 keep / -1e9 masked).  1/sqrt(d_k) is already folded into the Q weights.
    # Heads are static lane slices; batch is a static Python loop (B=2) so
    # everything stays in one basic block -- no per-(b,h) grid steps, no XLU
    # transposes (dot_general contracts on d_k of both operands).
    outs = []
    for b in range(batch):
        qb = q[b * sq:(b + 1) * sq]
        kb = k[b * sk:(b + 1) * sk]
        vb = v[b * sk:(b + 1) * sk]
        bias = bias_ref[b]                                   # [sq, sk]
        head_outs = []
        for h in range(num_heads):
            sl = slice(h * d_k, (h + 1) * d_k)
            s = lax.dot_general(qb[:, sl], kb[:, sl], (((1,), (1,)), ((), ())),
                                preferred_element_type=jnp.float32) + bias
            s = s - jnp.max(s, axis=-1, keepdims=True)
            p = jnp.exp(s)
            p = p / jnp.sum(p, axis=-1, keepdims=True)       # exact softmax
            head_outs.append(jnp.dot(p, vb[:, sl],
                                     preferred_element_type=jnp.float32))
        outs.append(jnp.concatenate(head_outs, axis=-1))
    return jnp.concatenate(outs, axis=0)                     # [batch*sq, D]


# ============================== fused forward kernel ============================

def _fused_transformer_kernel(*refs, num_layers, num_heads, d_k, batch,
                              seq_src, seq_tgt, src_vocab, tgt_vocab):
    d = num_heads * d_k
    n_fixed, n_enc, n_dec = len(FIXED_ARGS), len(ENC_KEYS), len(DEC_KEYS)
    (src_ids_ref, tgt_ids_ref, enc_emb_ref, dec_emb_ref, pe_src_ref, pe_tgt_ref,
     enc_bias_ref, dec_bias_ref, cross_bias_ref, fc_w_ref, fc_b_ref) = refs[:n_fixed]
    enc_p = dict(zip(ENC_KEYS, refs[n_fixed:n_fixed + n_enc]))
    dec_p = dict(zip(DEC_KEYS, refs[n_fixed + n_enc:n_fixed + n_enc + n_dec]))
    o_ref = refs[n_fixed + n_enc + n_dec]

    # ---- embedding lookup (one-hot matmul gather) + positional encoding ----
    def embed(ids_ref, table_ref, pe_ref, vocab):
        ids = ids_ref[...]                                   # [B*S, 1] int32
        cols = lax.broadcasted_iota(jnp.int32, (ids.shape[0], vocab), 1)
        onehot = (ids == cols).astype(jnp.float32)           # [B*S, vocab]
        return jnp.dot(onehot, table_ref[...],
                       preferred_element_type=jnp.float32) + pe_ref[...]

    enc = embed(src_ids_ref, enc_emb_ref, pe_src_ref, src_vocab)   # [B*Ss, D]
    x = embed(tgt_ids_ref, dec_emb_ref, pe_tgt_ref, tgt_vocab)     # [B*St, D]

    # ---- encoder stack (static layer loop over stacked weights) ----
    for l in range(num_layers):
        p = {k: enc_p[k][l] for k in ENC_KEYS}
        qkv = jnp.dot(enc, p['wqkv'], preferred_element_type=jnp.float32) + p['bqkv']
        attn = _mha_flat(qkv[:, :d], qkv[:, d:2 * d], qkv[:, 2 * d:],
                         enc_bias_ref, batch, seq_src, seq_src, num_heads, d_k)
        attn = jnp.dot(attn, p['wo'], preferred_element_type=jnp.float32) + p['bo']
        enc = _add_ln(enc, attn, p['g1'], p['be1'])
        h = jnp.maximum(jnp.dot(enc, p['w1'], preferred_element_type=jnp.float32)
                        + p['bf1'], 0.0)
        ff = jnp.dot(h, p['w2'], preferred_element_type=jnp.float32) + p['bf2']
        enc = _add_ln(enc, ff, p['g2'], p['be2'])

    # ---- decoder stack ----
    for l in range(num_layers):
        p = {k: dec_p[k][l] for k in DEC_KEYS}
        # masked self-attention + add&LN
        qkv = jnp.dot(x, p['s_wqkv'], preferred_element_type=jnp.float32) + p['s_bqkv']
        attn = _mha_flat(qkv[:, :d], qkv[:, d:2 * d], qkv[:, 2 * d:],
                         dec_bias_ref, batch, seq_tgt, seq_tgt, num_heads, d_k)
        attn = jnp.dot(attn, p['s_wo'], preferred_element_type=jnp.float32) + p['s_bo']
        x = _add_ln(x, attn, p['g1'], p['be1'])
        # cross-attention + add&LN
        q = jnp.dot(x, p['c_wq'], preferred_element_type=jnp.float32) + p['c_bq']
        kv = jnp.dot(enc, p['c_wkv'], preferred_element_type=jnp.float32) + p['c_bkv']
        attn = _mha_flat(q, kv[:, :d], kv[:, d:],
                         cross_bias_ref, batch, seq_tgt, seq_src, num_heads, d_k)
        attn = jnp.dot(attn, p['c_wo'], preferred_element_type=jnp.float32) + p['c_bo']
        x = _add_ln(x, attn, p['g2'], p['be2'])
        # FFN + add&LN
        h = jnp.maximum(jnp.dot(x, p['w1'], preferred_element_type=jnp.float32)
                        + p['bf1'], 0.0)
        ff = jnp.dot(h, p['w2'], preferred_element_type=jnp.float32) + p['bf2']
        x = _add_ln(x, ff, p['g3'], p['be3'])

    # ---- classifier: padded to 128 lanes -> dense store ----
    o_ref[...] = (jnp.dot(x, fc_w_ref[...], preferred_element_type=jnp.float32)
                  + fc_b_ref[...])


# ================================ pallas wrapper ================================

def transformer_forward_pallas(kparams, src, tgt):
    B, Ss = src.shape
    _, St = tgt.shape

    # Additive attention biases (0 keep / -1e9 mask), matching masked_fill==0.
    src_keep = (src != 0)
    tgt_keep = (tgt != 0)
    nopeak = jnp.tril(jnp.ones((St, St), dtype=bool))
    enc_bias = jnp.where(jnp.broadcast_to(src_keep[:, None, :], (B, Ss, Ss)),
                         0.0, -1e9).astype(jnp.float32)
    cross_bias = jnp.where(jnp.broadcast_to(src_keep[:, None, :], (B, St, Ss)),
                           0.0, -1e9).astype(jnp.float32)
    dec_bias = jnp.where(tgt_keep[:, :, None] & nopeak[None, :, :],
                         0.0, -1e9).astype(jnp.float32)

    src_ids = src.reshape(B * Ss, 1).astype(jnp.int32)
    tgt_ids = tgt.reshape(B * St, 1).astype(jnp.int32)

    args = [src_ids, tgt_ids, kparams['enc_emb'], kparams['dec_emb'],
            kparams['pe_src'], kparams['pe_tgt'],
            enc_bias, dec_bias, cross_bias,
            kparams['fc_w'], kparams['fc_b']]
    args += [kparams['enc'][k] for k in ENC_KEYS]
    args += [kparams['dec'][k] for k in DEC_KEYS]

    kern = functools.partial(
        _fused_transformer_kernel,
        num_layers=NUM_LAYERS, num_heads=NUM_HEADS, d_k=D_K, batch=B,
        seq_src=Ss, seq_tgt=St, src_vocab=SRC_VOCAB, tgt_vocab=TGT_VOCAB)

    # Single grid-less invocation: every operand is a full-array VMEM block,
    # weights stay resident for the whole fused forward.  Total working set is
    # well under the 32 MiB default scoped-VMEM limit on all generations
    # (including v7x's 64 MiB physical VMEM), so no tiling is needed.
    logits_pad = pl.pallas_call(
        kern,
        out_shape=jax.ShapeDtypeStruct((B * St, LOGIT_PAD), jnp.float32),
    )(*args)
    return logits_pad[:, :TGT_VOCAB].reshape(B, St, TGT_VOCAB)


forward_pallas = jax.jit(transformer_forward_pallas)


# ============================ parameter construction ============================

def positional_encoding(max_len, d):
    pos = jnp.arange(max_len, dtype=jnp.float32)[:, None]
    div = jnp.exp(jnp.arange(0, d, 2, dtype=jnp.float32) * -(math.log(10000.0) / d))
    pe = jnp.zeros((max_len, d), jnp.float32)
    pe = pe.at[:, 0::2].set(jnp.sin(pos * div))
    pe = pe.at[:, 1::2].set(jnp.cos(pos * div))
    return pe


def init_params(key):
    # PyTorch-style init; Linear weights stored [in, out] so y = x @ W + b.
    def lin(k, i, o):
        k1, k2 = jax.random.split(k)
        bound = 1.0 / math.sqrt(i)
        w = jax.random.uniform(k1, (i, o), jnp.float32, -bound, bound)
        b = jax.random.uniform(k2, (1, o), jnp.float32, -bound, bound)
        return w, b

    def lnp():
        return (jnp.ones((1, D_MODEL), jnp.float32),
                jnp.zeros((1, D_MODEL), jnp.float32))

    def mha_self(k):
        kq, kk, kv, ko = jax.random.split(k, 4)
        wq, bq = lin(kq, D_MODEL, D_MODEL)
        wk, bk = lin(kk, D_MODEL, D_MODEL)
        wv, bv = lin(kv, D_MODEL, D_MODEL)
        wo, bo = lin(ko, D_MODEL, D_MODEL)
        return {'wqkv': jnp.concatenate([wq, wk, wv], axis=1),
                'bqkv': jnp.concatenate([bq, bk, bv], axis=1),
                'wo': wo, 'bo': bo}

    def mha_cross(k):
        kq, kk, kv, ko = jax.random.split(k, 4)
        wq, bq = lin(kq, D_MODEL, D_MODEL)
        wk, bk = lin(kk, D_MODEL, D_MODEL)
        wv, bv = lin(kv, D_MODEL, D_MODEL)
        wo, bo = lin(ko, D_MODEL, D_MODEL)
        return {'wq': wq, 'bq': bq,
                'wkv': jnp.concatenate([wk, wv], axis=1),
                'bkv': jnp.concatenate([bk, bv], axis=1),
                'wo': wo, 'bo': bo}

    def ffn_params(k):
        k1, k2 = jax.random.split(k)
        w1, b1 = lin(k1, D_MODEL, D_FF)
        w2, b2 = lin(k2, D_FF, D_MODEL)
        return {'w1': w1, 'bf1': b1, 'w2': w2, 'bf2': b2}

    keys = jax.random.split(key, 5)
    params = {
        'enc_emb': jax.random.normal(keys[0], (SRC_VOCAB, D_MODEL), jnp.float32),
        'dec_emb': jax.random.normal(keys[1], (TGT_VOCAB, D_MODEL), jnp.float32),
        'fc': lin(keys[4], D_MODEL, TGT_VOCAB),
        'enc_layers': [], 'dec_layers': [],
    }
    ek = jax.random.split(keys[2], NUM_LAYERS)
    for i in range(NUM_LAYERS):
        k1, k2 = jax.random.split(ek[i])
        params['enc_layers'].append({**mha_self(k1), **ffn_params(k2),
                                     'ln1': lnp(), 'ln2': lnp()})
    dk = jax.random.split(keys[3], NUM_LAYERS)
    for i in range(NUM_LAYERS):
        k1, k2, k3 = jax.random.split(dk[i], 3)
        params['dec_layers'].append({'self': mha_self(k1), 'cross': mha_cross(k2),
                                     **ffn_params(k3),
                                     'ln1': lnp(), 'ln2': lnp(), 'ln3': lnp()})
    return params


def pack_kernel_params(params):
    # One-time packing (outside the jitted forward): stack per-layer weights,
    # fold 1/sqrt(d_k) into the Q projections, pad the classifier to 128 lanes,
    # pre-tile the positional encoding for the flattened [B*S, D] layout.
    scale = 1.0 / math.sqrt(D_K)

    def scale_q(wqkv, bqkv):
        return (wqkv.at[:, :D_MODEL].multiply(scale),
                bqkv.at[:, :D_MODEL].multiply(scale))

    enc_layers = []
    for lp in params['enc_layers']:
        wqkv, bqkv = scale_q(lp['wqkv'], lp['bqkv'])
        enc_layers.append({'wqkv': wqkv, 'bqkv': bqkv,
                           'wo': lp['wo'], 'bo': lp['bo'],
                           'g1': lp['ln1'][0], 'be1': lp['ln1'][1],
                           'w1': lp['w1'], 'bf1': lp['bf1'],
                           'w2': lp['w2'], 'bf2': lp['bf2'],
                           'g2': lp['ln2'][0], 'be2': lp['ln2'][1]})
    enc = {k: jnp.stack([d[k] for d in enc_layers]) for k in ENC_KEYS}

    dec_layers = []
    for lp in params['dec_layers']:
        s_wqkv, s_bqkv = scale_q(lp['self']['wqkv'], lp['self']['bqkv'])
        c = lp['cross']
        dec_layers.append({'s_wqkv': s_wqkv, 's_bqkv': s_bqkv,
                           's_wo': lp['self']['wo'], 's_bo': lp['self']['bo'],
                           'g1': lp['ln1'][0], 'be1': lp['ln1'][1],
                           'c_wq': c['wq'] * scale, 'c_bq': c['bq'] * scale,
                           'c_wkv': c['wkv'], 'c_bkv': c['bkv'],
                           'c_wo': c['wo'], 'c_bo': c['bo'],
                           'g2': lp['ln2'][0], 'be2': lp['ln2'][1],
                           'w1': lp['w1'], 'bf1': lp['bf1'],
                           'w2': lp['w2'], 'bf2': lp['bf2'],
                           'g3': lp['ln3'][0], 'be3': lp['ln3'][1]})
    dec = {k: jnp.stack([d[k] for d in dec_layers]) for k in DEC_KEYS}

    fc_w, fc_b = params['fc']
    fc_w_pad = jnp.zeros((D_MODEL, LOGIT_PAD), jnp.float32).at[:, :TGT_VOCAB].set(fc_w)
    fc_b_pad = jnp.zeros((1, LOGIT_PAD), jnp.float32).at[:, :TGT_VOCAB].set(fc_b)

    pe = positional_encoding(MAX_SEQ, D_MODEL)
    pe_tiled = jnp.tile(pe[:SEQ], (BATCH, 1))                # rows match [B*S, D]

    return {'enc_emb': params['enc_emb'], 'dec_emb': params['dec_emb'],
            'pe_src': pe_tiled, 'pe_tgt': pe_tiled,
            'fc_w': fc_w_pad, 'fc_b': fc_b_pad,
            'enc': enc, 'dec': dec}


# ============================ pure-JAX reference ================================

def _mha_ref(q, k, v, mask, num_heads, d_k):
    B, Sq, D = q.shape
    Sk = k.shape[1]
    qh = q.reshape(B, Sq, num_heads, d_k).transpose(0, 2, 1, 3)
    kh = k.reshape(B, Sk, num_heads, d_k).transpose(0, 2, 1, 3)
    vh = v.reshape(B, Sk, num_heads, d_k).transpose(0, 2, 1, 3)
    s = jnp.einsum('bhqd,bhkd->bhqk', qh, kh) / math.sqrt(d_k)
    s = jnp.where(mask[:, None] > 0, s, -1e9)
    p = jax.nn.softmax(s, axis=-1)
    o = jnp.einsum('bhqk,bhkd->bhqd', p, vh)
    return o.transpose(0, 2, 1, 3).reshape(B, Sq, D)


def encoder_layer_ref(x, mask, lp):
    d = D_MODEL
    qkv = x @ lp['wqkv'] + lp['bqkv']
    attn = _mha_ref(qkv[..., :d], qkv[..., d:2 * d], qkv[..., 2 * d:],
                    mask, NUM_HEADS, D_K)
    x = _add_ln(x, attn @ lp['wo'] + lp['bo'], *lp['ln1'])
    ff = jnp.maximum(x @ lp['w1'] + lp['bf1'], 0.0) @ lp['w2'] + lp['bf2']
    return _add_ln(x, ff, *lp['ln2'])


def decoder_layer_ref(x, enc, tgt_mask, src_mask, lp):
    d = D_MODEL
    s, c = lp['self'], lp['cross']
    qkv = x @ s['wqkv'] + s['bqkv']
    attn = _mha_ref(qkv[..., :d], qkv[..., d:2 * d], qkv[..., 2 * d:],
                    tgt_mask, NUM_HEADS, D_K)
    x = _add_ln(x, attn @ s['wo'] + s['bo'], *lp['ln1'])
    q = x @ c['wq'] + c['bq']
    kv = enc @ c['wkv'] + c['bkv']
    attn = _mha_ref(q, kv[..., :d], kv[..., d:], src_mask, NUM_HEADS, D_K)
    x = _add_ln(x, attn @ c['wo'] + c['bo'], *lp['ln2'])
    ff = jnp.maximum(x @ lp['w1'] + lp['bf1'], 0.0) @ lp['w2'] + lp['bf2']
    return _add_ln(x, ff, *lp['ln3'])


def transformer_forward_ref(params, src, tgt):
    B, Ss = src.shape
    _, St = tgt.shape
    pe = positional_encoding(MAX_SEQ, D_MODEL)
    src_pad = (src != 0)
    tgt_pad = (tgt != 0)
    nopeak = jnp.tril(jnp.ones((St, St), dtype=bool))
    enc_mask = jnp.broadcast_to(src_pad[:, None, :], (B, Ss, Ss)).astype(jnp.float32)
    cross_mask = jnp.broadcast_to(src_pad[:, None, :], (B, St, Ss)).astype(jnp.float32)
    dec_mask = (tgt_pad[:, :, None] & nopeak[None, :, :]).astype(jnp.float32)
    # dropout == identity in eval mode
    enc = params['enc_emb'][src] + pe[None, :Ss]
    x = params['dec_emb'][tgt] + pe[None, :St]
    for lp in params['enc_layers']:
        enc = encoder_layer_ref(enc, enc_mask, lp)
    for lp in params['dec_layers']:
        x = decoder_layer_ref(x, enc, dec_mask, cross_mask, lp)
    w, b = params['fc']
    return (x.reshape(B * St, D_MODEL) @ w + b).reshape(B, St, TGT_VOCAB)


forward_ref = jax.jit(transformer_forward_ref)


# ===================================== main =====================================

if __name__ == "__main__":
    key = jax.random.PRNGKey(0)
    kp, ks, kt = jax.random.split(key, 3)
    params = init_params(kp)
    kparams = pack_kernel_params(params)   # one-time packing for the fused kernel

    src = jax.random.randint(ks, (BATCH, SEQ), 0, SRC_VOCAB, dtype=jnp.int32)
    tgt = jax.random.randint(kt, (BATCH, SEQ), 0, TGT_VOCAB, dtype=jnp.int32)

    out = forward_pallas(kparams, src, tgt)
    out = jax.block_until_ready(out)

    ref = forward_ref(params, src, tgt)
    assert out.shape == (BATCH, SEQ, TGT_VOCAB), out.shape
    assert bool(jnp.all(jnp.isfinite(out)))
    err = float(jnp.max(jnp.abs(out - ref)))
    assert bool(jnp.allclose(out, ref, atol=5e-3, rtol=5e-3)), err
    print("KERNEL_OK")
</pallas_src>

<mosaic_0001>
module attributes {stable_mosaic.version = 11 : i64} {
  func.func @_fused_transformer_kernel(%arg0: memref<16x1xi32, #tpu.memory_space<vmem>>, %arg1: memref<16x1xi32, #tpu.memory_space<vmem>>, %arg2: memref<50x32xf32, #tpu.memory_space<vmem>>, %arg3: memref<50x32xf32, #tpu.memory_space<vmem>>, %arg4: memref<16x32xf32, #tpu.memory_space<vmem>>, %arg5: memref<16x32xf32, #tpu.memory_space<vmem>>, %arg6: memref<2x8x8xf32, #tpu.memory_space<vmem>>, %arg7: memref<2x8x8xf32, #tpu.memory_space<vmem>>, %arg8: memref<2x8x8xf32, #tpu.memory_space<vmem>>, %arg9: memref<32x128xf32, #tpu.memory_space<vmem>>, %arg10: memref<1x128xf32, #tpu.memory_space<vmem>>, %arg11: memref<2x32x96xf32, #tpu.memory_space<vmem>>, %arg12: memref<2x1x96xf32, #tpu.memory_space<vmem>>, %arg13: memref<2x32x32xf32, #tpu.memory_space<vmem>>, %arg14: memref<2x1x32xf32, #tpu.memory_space<vmem>>, %arg15: memref<2x1x32xf32, #tpu.memory_space<vmem>>, %arg16: memref<2x1x32xf32, #tpu.memory_space<vmem>>, %arg17: memref<2x32x64xf32, #tpu.memory_space<vmem>>, %arg18: memref<2x1x64xf32, #tpu.memory_space<vmem>>, %arg19: memref<2x64x32xf32, #tpu.memory_space<vmem>>, %arg20: memref<2x1x32xf32, #tpu.memory_space<vmem>>, %arg21: memref<2x1x32xf32, #tpu.memory_space<vmem>>, %arg22: memref<2x1x32xf32, #tpu.memory_space<vmem>>, %arg23: memref<2x32x96xf32, #tpu.memory_space<vmem>>, %arg24: memref<2x1x96xf32, #tpu.memory_space<vmem>>, %arg25: memref<2x32x32xf32, #tpu.memory_space<vmem>>, %arg26: memref<2x1x32xf32, #tpu.memory_space<vmem>>, %arg27: memref<2x1x32xf32, #tpu.memory_space<vmem>>, %arg28: memref<2x1x32xf32, #tpu.memory_space<vmem>>, %arg29: memref<2x32x32xf32, #tpu.memory_space<vmem>>, %arg30: memref<2x1x32xf32, #tpu.memory_space<vmem>>, %arg31: memref<2x32x64xf32, #tpu.memory_space<vmem>>, %arg32: memref<2x1x64xf32, #tpu.memory_space<vmem>>, %arg33: memref<2x32x32xf32, #tpu.memory_space<vmem>>, %arg34: memref<2x1x32xf32, #tpu.memory_space<vmem>>, %arg35: memref<2x1x32xf32, #tpu.memory_space<vmem>>, %arg36: memref<2x1x32xf32, #tpu.memory_space<vmem>>, %arg37: memref<2x32x64xf32, #tpu.memory_space<vmem>>, %arg38: memref<2x1x64xf32, #tpu.memory_space<vmem>>, %arg39: memref<2x64x32xf32, #tpu.memory_space<vmem>>, %arg40: memref<2x1x32xf32, #tpu.memory_space<vmem>>, %arg41: memref<2x1x32xf32, #tpu.memory_space<vmem>>, %arg42: memref<2x1x32xf32, #tpu.memory_space<vmem>>, %arg43: memref<16x128xf32, #tpu.memory_space<vmem>>) attributes {dimension_semantics = [], scalar_prefetch = 0 : i64, scratch_operands = 0 : i64, tpu.core_type = #tpu.core_type<tc>} {
    %c0 = arith.constant 0 : index
    %c0_0 = arith.constant 0 : index
    %0 = vector.load %arg0[%c0, %c0_0] : memref<16x1xi32, #tpu.memory_space<vmem>>, vector<16x1xi32>
    %1 = tpu.iota {dimensions = array<i32: 1>} : vector<16x50xi32>
    %2 = vector.broadcast %0 : vector<16x1xi32> to vector<16x50xi32>
    %3 = arith.cmpi eq, %2, %1 : vector<16x50xi32>
    %4 = arith.extui %3 : vector<16x50xi1> to vector<16x50xi32>
    %5 = arith.sitofp %4 : vector<16x50xi32> to vector<16x50xf32>
    %c0_1 = arith.constant 0 : index
    %c0_2 = arith.constant 0 : index
    %6 = vector.load %arg2[%c0_1, %c0_2] : memref<50x32xf32, #tpu.memory_space<vmem>>, vector<50x32xf32>
    %cst = arith.constant dense<0.000000e+00> : vector<16x32xf32>
    %7 = tpu.matmul %5, %6, %cst {dimension_numbers = #tpu.dot_dimension_numbers<[1], [0], [0], [1], [0, 0, 1, 1], [], []>} : vector<16x50xf32>, vector<50x32xf32>, vector<16x32xf32> -> vector<16x32xf32>
    %c0_3 = arith.constant 0 : index
    %c0_4 = arith.constant 0 : index
    %8 = vector.load %arg4[%c0_3, %c0_4] : memref<16x32xf32, #tpu.memory_space<vmem>>, vector<16x32xf32>
    %9 = arith.addf %7, %8 : vector<16x32xf32>
    %c0_5 = arith.constant 0 : index
    %c0_6 = arith.constant 0 : index
    %10 = vector.load %arg1[%c0_5, %c0_6] : memref<16x1xi32, #tpu.memory_space<vmem>>, vector<16x1xi32>
    %11 = tpu.iota {dimensions = array<i32: 1>} : vector<16x50xi32>
    %12 = vector.broadcast %10 : vector<16x1xi32> to vector<16x50xi32>
    %13 = arith.cmpi eq, %12, %11 : vector<16x50xi32>
    %14 = arith.extui %13 : vector<16x50xi1> to vector<16x50xi32>
    %15 = arith.sitofp %14 : vector<16x50xi32> to vector<16x50xf32>
    %c0_7 = arith.constant 0 : index
    %c0_8 = arith.constant 0 : index
    %16 = vector.load %arg3[%c0_7, %c0_8] : memref<50x32xf32, #tpu.memory_space<vmem>>, vector<50x32xf32>
    %cst_9 = arith.constant dense<0.000000e+00> : vector<16x32xf32>
    %17 = tpu.matmul %15, %16, %cst_9 {dimension_numbers = #tpu.dot_dimension_numbers<[1], [0], [0], [1], [0, 0, 1, 1], [], []>} : vector<16x50xf32>, vector<50x32xf32>, vector<16x32xf32> -> vector<16x32xf32>
    %c0_10 = arith.constant 0 : index
    %c0_11 = arith.constant 0 : index
    %18 = vector.load %arg5[%c0_10, %c0_11] : memref<16x32xf32, #tpu.memory_space<vmem>>, vector<16x32xf32>
    %19 = arith.addf %17, %18 : vector<16x32xf32>
    %c0_12 = arith.constant 0 : index
    %c0_13 = arith.constant 0 : index
    %c0_14 = arith.constant 0 : index
    %20 = vector.load %arg11[%c0_12, %c0_13, %c0_14] : memref<2x32x96xf32, #tpu.memory_space<vmem>>, vector<1x32x96xf32>
    %21 = vector.shape_cast %20 : vector<1x32x96xf32> to vector<32x96xf32>
    %c0_15 = arith.constant 0 : index
    %c0_16 = arith.constant 0 : index
    %c0_17 = arith.constant 0 : index
    %22 = vector.load %arg12[%c0_15, %c0_16, %c0_17] : memref<2x1x96xf32, #tpu.memory_space<vmem>>, vector<1x1x96xf32>
    %23 = vector.shape_cast %22 : vector<1x1x96xf32> to vector<1x96xf32>
    %c0_18 = arith.constant 0 : index
    %c0_19 = arith.constant 0 : index
    %c0_20 = arith.constant 0 : index
    %24 = vector.load %arg13[%c0_18, %c0_19, %c0_20] : memref<2x32x32xf32, #tpu.memory_space<vmem>>, vector<1x32x32xf32>
    %25 = vector.shape_cast %24 : vector<1x32x32xf32> to vector<32x32xf32>
    %c0_21 = arith.constant 0 : index
    %c0_22 = arith.constant 0 : index
    %c0_23 = arith.constant 0 : index
    %26 = vector.load %arg14[%c0_21, %c0_22, %c0_23] : memref<2x1x32xf32, #tpu.memory_space<vmem>>, vector<1x1x32xf32>
    %27 = vector.shape_cast %26 : vector<1x1x32xf32> to vector<1x32xf32>
    %c0_24 = arith.constant 0 : index
    %c0_25 = arith.constant 0 : index
    %c0_26 = arith.constant 0 : index
    %28 = vector.load %arg15[%c0_24, %c0_25, %c0_26] : memref<2x1x32xf32, #tpu.memory_space<vmem>>, vector<1x1x32xf32>
    %29 = vector.shape_cast %28 : vector<1x1x32xf32> to vector<1x32xf32>
    %c0_27 = arith.constant 0 : index
    %c0_28 = arith.constant 0 : index
    %c0_29 = arith.constant 0 : index
    %30 = vector.load %arg16[%c0_27, %c0_28, %c0_29] : memref<2x1x32xf32, #tpu.memory_space<vmem>>, vector<1x1x32xf32>
    %31 = vector.shape_cast %30 : vector<1x1x32xf32> to vector<1x32xf32>
    %c0_30 = arith.constant 0 : index
    %c0_31 = arith.constant 0 : index
    %c0_32 = arith.constant 0 : index
    %32 = vector.load %arg17[%c0_30, %c0_31, %c0_32] : memref<2x32x64xf32, #tpu.memory_space<vmem>>, vector<1x32x64xf32>
    %33 = vector.shape_cast %32 : vector<1x32x64xf32> to vector<32x64xf32>
    %c0_33 = arith.constant 0 : index
    %c0_34 = arith.constant 0 : index
    %c0_35 = arith.constant 0 : index
    %34 = vector.load %arg18[%c0_33, %c0_34, %c0_35] : memref<2x1x64xf32, #tpu.memory_space<vmem>>, vector<1x1x64xf32>
    %35 = vector.shape_cast %34 : vector<1x1x64xf32> to vector<1x64xf32>
    %c0_36 = arith.constant 0 : index
    %c0_37 = arith.constant 0 : index
    %c0_38 = arith.constant 0 : index
    %36 = vector.load %arg19[%c0_36, %c0_37, %c0_38] : memref<2x64x32xf32, #tpu.memory_space<vmem>>, vector<1x64x32xf32>
    %37 = vector.shape_cast %36 : vector<1x64x32xf32> to vector<64x32xf32>
    %c0_39 = arith.constant 0 : index
    %c0_40 = arith.constant 0 : index
    %c0_41 = arith.constant 0 : index
    %38 = vector.load %arg20[%c0_39, %c0_40, %c0_41] : memref<2x1x32xf32, #tpu.memory_space<vmem>>, vector<1x1x32xf32>
    %39 = vector.shape_cast %38 : vector<1x1x32xf32> to vector<1x32xf32>
    %c0_42 = arith.constant 0 : index
    %c0_43 = arith.constant 0 : index
    %c0_44 = arith.constant 0 : index
    %40 = vector.load %arg21[%c0_42, %c0_43, %c0_44] : memref<2x1x32xf32, #tpu.memory_space<vmem>>, vector<1x1x32xf32>
    %41 = vector.shape_cast %40 : vector<1x1x32xf32> to vector<1x32xf32>
    %c0_45 = arith.constant 0 : index
    %c0_46 = arith.constant 0 : index
    %c0_47 = arith.constant 0 : index
    %42 = vector.load %arg22[%c0_45, %c0_46, %c0_47] : memref<2x1x32xf32, #tpu.memory_space<vmem>>, vector<1x1x32xf32>
    %43 = vector.shape_cast %42 : vector<1x1x32xf32> to vector<1x32xf32>
    %cst_48 = arith.constant dense<0.000000e+00> : vector<16x96xf32>
    %44 = tpu.matmul %9, %21, %cst_48 {dimension_numbers = #tpu.dot_dimension_numbers<[1], [0], [0], [1], [0, 0, 1, 1], [], []>} : vector<16x32xf32>, vector<32x96xf32>, vector<16x96xf32> -> vector<16x96xf32>
    %45 = vector.broadcast %23 : vector<1x96xf32> to vector<16x96xf32>
    %46 = arith.addf %44, %45 : vector<16x96xf32>
    %47 = vector.extract_strided_slice %46 {offsets = [0, 0], sizes = [16, 32], strides = [1, 1]} : vector<16x96xf32> to vector<16x32xf32>
    %48 = vector.extract_strided_slice %46 {offsets = [0, 32], sizes = [16, 32], strides = [1, 1]} : vector<16x96xf32> to vector<16x32xf32>
    %49 = vector.extract_strided_slice %46 {offsets = [0, 64], sizes = [16, 32], strides = [1, 1]} : vector<16x96xf32> to vector<16x32xf32>
    %50 = vector.extract_strided_slice %47 {offsets = [0, 0], sizes = [8, 32], strides = [1, 1]} : vector<16x32xf32> to vector<8x32xf32>
    %51 = vector.extract_strided_slice %48 {offsets = [0, 0], sizes = [8, 32], strides = [1, 1]} : vector<16x32xf32> to vector<8x32xf32>
    %52 = vector.extract_strided_slice %49 {offsets = [0, 0], sizes = [8, 32], strides = [1, 1]} : vector<16x32xf32> to vector<8x32xf32>
    %c0_49 = arith.constant 0 : index
    %c0_50 = arith.constant 0 : index
    %c0_51 = arith.constant 0 : index
    %53 = vector.load %arg6[%c0_49, %c0_50, %c0_51] : memref<2x8x8xf32, #tpu.memory_space<vmem>>, vector<1x8x8xf32>
    %54 = vector.shape_cast %53 : vector<1x8x8xf32> to vector<8x8xf32>
    %55 = vector.extract_strided_slice %50 {offsets = [0, 0], sizes = [8, 8], strides = [1, 1]} : vector<8x32xf32> to vector<8x8xf32>
    %56 = vector.extract_strided_slice %51 {offsets = [0, 0], sizes = [8, 8], strides = [1, 1]} : vector<8x32xf32> to vector<8x8xf32>
    %cst_52 = arith.constant dense<0.000000e+00> : vector<8x8xf32>
    %57 = tpu.matmul %55, %56, %cst_52 {dimension_numbers = #tpu.dot_dimension_numbers<[1], [1], [0], [0], [0, 0, 1, 0], [], []>} : vector<8x8xf32>, vector<8x8xf32>, vector<8x8xf32> -> vector<8x8xf32>
    %58 = arith.addf %57, %54 : vector<8x8xf32>
    %cst_53 = arith.constant dense<0xFF800000> : vector<8xf32>
    %59 = vector.multi_reduction <maximumf>, %58, %cst_53 [1] : vector<8x8xf32> to vector<8xf32>
    %60 = vector.shape_cast %59 : vector<8xf32> to vector<8x1xf32>
    %61 = vector.broadcast %60 : vector<8x1xf32> to vector<8x8xf32>
    %62 = arith.subf %58, %61 : vector<8x8xf32>
    %63 = math.exp %62 : vector<8x8xf32>
    %cst_54 = arith.constant dense<0.000000e+00> : vector<8xf32>
    %64 = vector.multi_reduction <add>, %63, %cst_54 [1] : vector<8x8xf32> to vector<8xf32>
    %65 = vector.shape_cast %64 : vector<8xf32> to vector<8x1xf32>
    %66 = vector.broadcast %65 : vector<8x1xf32> to vector<8x8xf32>
    %67 = arith.divf %63, %66 : vector<8x8xf32>
    %68 = vector.extract_strided_slice %52 {offsets = [0, 0], sizes = [8, 8], strides = [1, 1]} : vector<8x32xf32> to vector<8x8xf32>
    %cst_55 = arith.constant dense<0.000000e+00> : vector<8x8xf32>
    %69 = tpu.matmul %67, %68, %cst_55 {dimension_numbers = #tpu.dot_dimension_numbers<[1], [0], [0], [1], [0, 0, 1, 1], [], []>} : vector<8x8xf32>, vector<8x8xf32>, vector<8x8xf32> -> vector<8x8xf32>
    %70 = vector.extract_strided_slice %50 {offsets = [0, 8], sizes = [8, 8], strides = [1, 1]} : vector<8x32xf32> to vector<8x8xf32>
    %71 = vector.extract_strided_slice %51 {offsets = [0, 8], sizes = [8, 8], strides = [1, 1]} : vector<8x32xf32> to vector<8x8xf32>
    %cst_56 = arith.constant dense<0.000000e+00> : vector<8x8xf32>
    %72 = tpu.matmul %70, %71, %cst_56 {dimension_numbers = #tpu.dot_dimension_numbers<[1], [1], [0], [0], [0, 0, 1, 0], [], []>} : vector<8x8xf32>, vector<8x8xf32>, vector<8x8xf32> -> vector<8x8xf32>
    %73 = arith.addf %72, %54 : vector<8x8xf32>
    %cst_57 = arith.constant dense<0xFF800000> : vector<8xf32>
    %74 = vector.multi_reduction <maximumf>, %73, %cst_57 [1] : vector<8x8xf32> to vector<8xf32>
    %75 = vector.shape_cast %74 : vector<8xf32> to vector<8x1xf32>
    %76 = vector.broadcast %75 : vector<8x1xf32> to vector<8x8xf32>
    %77 = arith.subf %73, %76 : vector<8x8xf32>
    %78 = math.exp %77 : vector<8x8xf32>
    %cst_58 = arith.constant dense<0.000000e+00> : vector<8xf32>
    %79 = vector.multi_reduction <add>, %78, %cst_58 [1] : vector<8x8xf32> to vector<8xf32>
    %80 = vector.shape_cast %79 : vector<8xf32> to vector<8x1xf32>
    %81 = vector.broadcast %80 : vector<8x1xf32> to vector<8x8xf32>
    %82 = arith.divf %78, %81 : vector<8x8xf32>
    %83 = vector.extract_strided_slice %52 {offsets = [0, 8], sizes = [8, 8], strides = [1, 1]} : vector<8x32xf32> to vector<8x8xf32>
    %cst_59 = arith.constant dense<0.000000e+00> : vector<8x8xf32>
    %84 = tpu.matmul %82, %83, %cst_59 {dimension_numbers = #tpu.dot_dimension_numbers<[1], [0], [0], [1], [0, 0, 1, 1], [], []>} : vector<8x8xf32>, vector<8x8xf32>, vector<8x8xf32> -> vector<8x8xf32>
    %85 = vector.extract_strided_slice %50 {offsets = [0, 16], sizes = [8, 8], strides = [1, 1]} : vector<8x32xf32> to vector<8x8xf32>
    %86 = vector.extract_strided_slice %51 {offsets = [0, 16], sizes = [8, 8], strides = [1, 1]} : vector<8x32xf32> to vector<8x8xf32>
    %cst_60 = arith.constant dense<0.000000e+00> : vector<8x8xf32>
    %87 = tpu.matmul %85, %86, %cst_60 {dimension_numbers = #tpu.dot_dimension_numbers<[1], [1], [0], [0], [0, 0, 1, 0], [], []>} : vector<8x8xf32>, vector<8x8xf32>, vector<8x8xf32> -> vector<8x8xf32>
    %88 = arith.addf %87, %54 : vector<8x8xf32>
    %cst_61 = arith.constant dense<0xFF800000> : vector<8xf32>
    %89 = vector.multi_reduction <maximumf>, %88, %cst_61 [1] : vector<8x8xf32> to vector<8xf32>
    %90 = vector.shape_cast %89 : vector<8xf32> to vector<8x1xf32>
    %91 = vector.broadcast %90 : vector<8x1xf32> to vector<8x8xf32>
    %92 = arith.subf %88, %91 : vector<8x8xf32>
    %93 = math.exp %92 : vector<8x8xf32>
    %cst_62 = arith.constant dense<0.000000e+00> : vector<8xf32>
    %94 = vector.multi_reduction <add>, %93, %cst_62 [1] : vector<8x8xf32> to vector<8xf32>
    %95 = vector.shape_cast %94 : vector<8xf32> to vector<8x1xf32>
    %96 = vector.broadcast %95 : vector<8x1xf32> to vector<8x8xf32>
    %97 = arith.divf %93, %96 : vector<8x8xf32>
    %98 = vector.extract_strided_slice %52 {offsets = [0, 16], sizes = [8, 8], strides = [1, 1]} : vector<8x32xf32> to vector<8x8xf32>
    %cst_63 = arith.constant dense<0.000000e+00> : vector<8x8xf32>
    %99 = tpu.matmul %97, %98, %cst_63 {dimension_numbers = #tpu.dot_dimension_numbers<[1], [0], [0], [1], [0, 0, 1, 1], [], []>} : vector<8x8xf32>, vector<8x8xf32>, vector<8x8xf32> -> vector<8x8xf32>
    %100 = vector.extract_strided_slice %50 {offsets = [0, 24], sizes = [8, 8], strides = [1, 1]} : vector<8x32xf32> to vector<8x8xf32>
    %101 = vector.extract_strided_slice %51 {offsets = [0, 24], sizes = [8, 8], strides = [1, 1]} : vector<8x32xf32> to vector<8x8xf32>
    %cst_64 = arith.constant dense<0.000000e+00> : vector<8x8xf32>
    %102 = tpu.matmul %100, %101, %cst_64 {dimension_numbers = #tpu.dot_dimension_numbers<[1], [1], [0], [0], [0, 0, 1, 0], [], []>} : vector<8x8xf32>, vector<8x8xf32>, vector<8x8xf32> -> vector<8x8xf32>
    %103 = arith.addf %102, %54 : vector<8x8xf32>
    %cst_65 = arith.constant dense<0xFF800000> : vector<8xf32>
    %104 = vector.multi_reduction <maximumf>, %103, %cst_65 [1] : vector<8x8xf32> to vector<8xf32>
    %105 = vector.shape_cast %104 : vector<8xf32> to vector<8x1xf32>
    %106 = vector.broadcast %105 : vector<8x1xf32> to vector<8x8xf32>
    %107 = arith.subf %103, %106 : vector<8x8xf32>
    %108 = math.exp %107 : vector<8x8xf32>
    %cst_66 = arith.constant dense<0.000000e+00> : vector<8xf32>
    %109 = vector.multi_reduction <add>, %108, %cst_66 [1] : vector<8x8xf32> to vector<8xf32>
    %110 = vector.shape_cast %109 : vector<8xf32> to vector<8x1xf32>
    %111 = vector.broadcast %110 : vector<8x1xf32> to vector<8x8xf32>
    %112 = arith.divf %108, %111 : vector<8x8xf32>
    %113 = vector.extract_strided_slice %52 {offsets = [0, 24], sizes = [8, 8], strides = [1, 1]} : vector<8x32xf32> to vector<8x8xf32>
    %cst_67 = arith.constant dense<0.000000e+00> : vector<8x8xf32>
    %114 = tpu.matmul %112, %113, %cst_67 {dimension_numbers = #tpu.dot_dimension_numbers<[1], [0], [0], [1], [0, 0, 1, 1], [], []>} : vector<8x8xf32>, vector<8x8xf32>, vector<8x8xf32> -> vector<8x8xf32>
    %115 = tpu.concatenate %69, %84, %99, %114 in 1 : vector<8x8xf32>, vector<8x8xf32>, vector<8x8xf32>, vector<8x8xf32> -> vector<8x32xf32>
    %116 = vector.extract_strided_slice %47 {offsets = [8, 0], sizes = [8, 32], strides = [1, 1]} : vector<16x32xf32> to vector<8x32xf32>
    %117 = vector.extract_strided_slice %48 {offsets = [8, 0], sizes = [8, 32], strides = [1, 1]} : vector<16x32xf32> to vector<8x32xf32>
    %118 = vector.extract_strided_slice %49 {offsets = [8, 0], sizes = [8, 32], strides = [1, 1]} : vector<16x32xf32> to vector<8x32xf32>
    %c1 = arith.constant 1 : index
    %c0_68 = arith.constant 0 : index
    %c0_69 = arith.constant 0 : index
    %119 = vector.load %arg6[%c1, %c0_68, %c0_69] : memref<2x8x8xf32, #tpu.memory_space<vmem>>, vector<1x8x8xf32>
    %120 = vector.shape_cast %119 : vector<1x8x8xf32> to vector<8x8xf32>
    %121 = vector.extract_strided_slice %116 {offsets = [0, 0], sizes = [8, 8], strides = [1, 1]} : vector<8x32xf32> to vector<8x8xf32>
    %122 = vector.extract_strided_slice %117 {offsets = [0, 0], sizes = [8, 8], strides = [1, 1]} : vector<8x32xf32> to vector<8x8xf32>
    %cst_70 = arith.constant dense<0.000000e+00> : vector<8x8xf32>
    %123 = tpu.matmul %121, %122, %cst_70 {dimension_numbers = #tpu.dot_dimension_numbers<[1], [1], [0], [0], [0, 0, 1, 0], [], []>} : vector<8x8xf32>, vector<8x8xf32>, vector<8x8xf32> -> vector<8x8xf32>
    %124 = arith.addf %123, %120 : vector<8x8xf32>
    %cst_71 = arith.constant dense<0xFF800000> : vector<8xf32>
    %125 = vector.multi_reduction <maximumf>, %124, %cst_71 [1] : vector<8x8xf32> to vector<8xf32>
    %126 = vector.shape_cast %125 : vector<8xf32> to vector<8x1xf32>
    %127 = vector.broadcast %126 : vector<8x1xf32> to vector<8x8xf32>
    %128 = arith.subf %124, %127 : vector<8x8xf32>
    %129 = math.exp %128 : vector<8x8xf32>
    %cst_72 = arith.constant dense<0.000000e+00> : vector<8xf32>
    %130 = vector.multi_reduction <add>, %129, %cst_72 [1] : vector<8x8xf32> to vector<8xf32>
    %131 = vector.shape_cast %130 : vector<8xf32> to vector<8x1xf32>
    %132 = vector.broadcast %131 : vector<8x1xf32> to vector<8x8xf32>
    %133 = arith.divf %129, %132 : vector<8x8xf32>
    %134 = vector.extract_strided_slice %118 {offsets = [0, 0], sizes = [8, 8], strides = [1, 1]} : vector<8x32xf32> to vector<8x8xf32>
    %cst_73 = arith.constant dense<0.000000e+00> : vector<8x8xf32>
    %135 = tpu.matmul %133, %134, %cst_73 {dimension_numbers = #tpu.dot_dimension_numbers<[1], [0], [0], [1], [0, 0, 1, 1], [], []>} : vector<8x8xf32>, vector<8x8xf32>, vector<8x8xf32> -> vector<8x8xf32>
    %136 = vector.extract_strided_slice %116 {offsets = [0, 8], sizes = [8, 8], strides = [1, 1]} : vector<8x32xf32> to vector<8x8xf32>
    %137 = vector.extract_strided_slice %117 {offsets = [0, 8], sizes = [8, 8], strides = [1, 1]} : vector<8x32xf32> to vector<8x8xf32>
    %cst_74 = arith.constant dense<0.000000e+00> : vector<8x8xf32>
    %138 = tpu.matmul %136, %137, %cst_74 {dimension_numbers = #tpu.dot_dimension_numbers<[1], [1], [0], [0], [0, 0, 1, 0], [], []>} : vector<8x8xf32>, vector<8x8xf32>, vector<8x8xf32> -> vector<8x8xf32>
    %139 = arith.addf %138, %120 : vector<8x8xf32>
    %cst_75 = arith.constant dense<0xFF800000> : vector<8xf32>
    %140 = vector.multi_reduction <maximumf>, %139, %cst_75 [1] : vector<8x8xf32> to vector<8xf32>
    %141 = vector.shape_cast %140 : vector<8xf32> to vector<8x1xf32>
    %142 = vector.broadcast %141 : vector<8x1xf32> to vector<8x8xf32>
    %143 = arith.subf %139, %142 : vector<8x8xf32>
    %144 = math.exp %143 : vector<8x8xf32>
    %cst_76 = arith.constant dense<0.000000e+00> : vector<8xf32>
    %145 = vector.multi_reduction <add>, %144, %cst_76 [1] : vector<8x8xf32> to vector<8xf32>
    %146 = vector.shape_cast %145 : vector<8xf32> to vector<8x1xf32>
    %147 = vector.broadcast %146 : vector<8x1xf32> to vector<8x8xf32>
    %148 = arith.divf %144, %147 : vector<8x8xf32>
    %149 = vector.extract_strided_slice %118 {offsets = [0, 8], sizes = [8, 8], strides = [1, 1]} : vector<8x32xf32> to vector<8x8xf32>
    %cst_77 = arith.constant dense<0.000000e+00> : vector<8x8xf32>
    %150 = tpu.matmul %148, %149, %cst_77 {dimension_numbers = #tpu.dot_dimension_numbers<[1], [0], [0], [1], [0, 0, 1, 1], [], []>} : vector<8x8xf32>, vector<8x8xf32>, vector<8x8xf32> -> vector<8x8xf32>
    %151 = vector.extract_strided_slice %116 {offsets = [0, 16], sizes = [8, 8], strides = [1, 1]} : vector<8x32xf32> to vector<8x8xf32>
    %152 = vector.extract_strided_slice %117 {offsets = [0, 16], sizes = [8, 8], strides = [1, 1]} : vector<8x32xf32> to vector<8x8xf32>
    %cst_78 = arith.constant dense<0.000000e+00> : vector<8x8xf32>
    %153 = tpu.matmul %151, %152, %cst_78 {dimension_numbers = #tpu.dot_dimension_numbers<[1], [1], [0], [0], [0, 0, 1, 0], [], []>} : vector<8x8xf32>, vector<8x8xf32>, vector<8x8xf32> -> vector<8x8xf32>
    %154 = arith.addf %153, %120 : vector<8x8xf32>
    %cst_79 = arith.constant dense<0xFF800000> : vector<8xf32>
    %155 = vector.multi_reduction <maximumf>, %154, %cst_79 [1] : vector<8x8xf32> to vector<8xf32>
    %156 = vector.shape_cast %155 : vector<8xf32> to vector<8x1xf32>
    %157 = vector.broadcast %156 : vector<8x1xf32> to vector<8x8xf32>
    %158 = arith.subf %154, %157 : vector<8x8xf32>
    %159 = math.exp %158 : vector<8x8xf32>
    %cst_80 = arith.constant dense<0.000000e+00> : vector<8xf32>
    %160 = vector.multi_reduction <add>, %159, %cst_80 [1] : vector<8x8xf32> to vector<8xf32>
    %161 = vector.shape_cast %160 : vector<8xf32> to vector<8x1xf32>
    %162 = vector.broadcast %161 : vector<8x1xf32> to vector<8x8xf32>
    %163 = arith.divf %159, %162 : vector<8x8xf32>
    %164 = vector.extract_strided_slice %118 {offsets = [0, 16], sizes = [8, 8], strides = [1, 1]} : vector<8x32xf32> to vector<8x8xf32>
    %cst_81 = arith.constant dense<0.000000e+00> : vector<8x8xf32>
    %165 = tpu.matmul %163, %164, %cst_81 {dimension_numbers = #tpu.dot_dimension_numbers<[1], [0], [0], [1], [0, 0, 1, 1], [], []>} : vector<8x8xf32>, vector<8x8xf32>, vector<8x8xf32> -> vector<8x8xf32>
    %166 = vector.extract_strided_slice %116 {offsets = [0, 24], sizes = [8, 8], strides = [1, 1]} : vector<8x32xf32> to vector<8x8xf32>
    %167 = vector.extract_strided_slice %117 {offsets = [0, 24], sizes = [8, 8], strides = [1, 1]} : vector<8x32xf32> to vector<8x8xf32>
    %cst_82 = arith.constant dense<0.000000e+00> : vector<8x8xf32>
    %168 = tpu.matmul %166, %167, %cst_82 {dimension_numbers = #tpu.dot_dimension_numbers<[1], [1], [0], [0], [0, 0, 1, 0], [], []>} : vector<8x8xf32>, vector<8x8xf32>, vector<8x8xf32> -> vector<8x8xf32>
    %169 = arith.addf %168, %120 : vector<8x8xf32>
    %cst_83 = arith.constant dense<0xFF800000> : vector<8xf32>
    %170 = vector.multi_reduction <maximumf>, %169, %cst_83 [1] : vector<8x8xf32> to vector<8xf32>
    %171 = vector.shape_cast %170 : vector<8xf32> to vector<8x1xf32>
    %172 = vector.broadcast %171 : vector<8x1xf32> to vector<8x8xf32>
    %173 = arith.subf %169, %172 : vector<8x8xf32>
    %174 = math.exp %173 : vector<8x8xf32>
    %cst_84 = arith.constant dense<0.000000e+00> : vector<8xf32>
    %175 = vector.multi_reduction <add>, %174, %cst_84 [1] : vector<8x8xf32> to vector<8xf32>
    %176 = vector.shape_cast %175 : vector<8xf32> to vector<8x1xf32>
    %177 = vector.broadcast %176 : vector<8x1xf32> to vector<8x8xf32>
    %178 = arith.divf %174, %177 : vector<8x8xf32>
    %179 = vector.extract_strided_slice %118 {offsets = [0, 24], sizes = [8, 8], strides = [1, 1]} : vector<8x32xf32> to vector<8x8xf32>
    %cst_85 = arith.constant dense<0.000000e+00> : vector<8x8xf32>
    %180 = tpu.matmul %178, %179, %cst_85 {dimension_numbers = #tpu.dot_dimension_numbers<[1], [0], [0], [1], [0, 0, 1, 1], [], []>} : vector<8x8xf32>, vector<8x8xf32>, vector<8x8xf32> -> vector<8x8xf32>
    %181 = tpu.concatenate %135, %150, %165, %180 in 1 : vector<8x8xf32>, vector<8x8xf32>, vector<8x8xf32>, vector<8x8xf32> -> vector<8x32xf32>
    %182 = tpu.concatenate %115, %181 in 0 : vector<8x32xf32>, vector<8x32xf32> -> vector<16x32xf32>
    %cst_86 = arith.constant dense<0.000000e+00> : vector<16x32xf32>
    %183 = tpu.matmul %182, %25, %cst_86 {dimension_numbers = #tpu.dot_dimension_numbers<[1], [0], [0], [1], [0, 0, 1, 1], [], []>} : vector<16x32xf32>, vector<32x32xf32>, vector<16x32xf32> -> vector<16x32xf32>
    %184 = vector.broadcast %27 : vector<1x32xf32> to vector<16x32xf32>
    %185 = arith.addf %183, %184 : vector<16x32xf32>
    %186 = arith.addf %9, %185 : vector<16x32xf32>
    %cst_87 = arith.constant dense<0.000000e+00> : vector<16xf32>
    %187 = vector.multi_reduction <add>, %186, %cst_87 [1] : vector<16x32xf32> to vector<16xf32>
    %188 = vector.shape_cast %187 : vector<16xf32> to vector<16x1xf32>
    %cst_88 = arith.constant 3.200000e+01 : f32
    %189 = vector.broadcast %cst_88 : f32 to vector<16x1xf32>
    %190 = arith.divf %188, %189 : vector<16x1xf32>
    %191 = vector.broadcast %190 : vector<16x1xf32> to vector<16x32xf32>
    %192 = arith.subf %186, %191 : vector<16x32xf32>
    %193 = arith.mulf %192, %192 : vector<16x32xf32>
    %cst_89 = arith.constant dense<0.000000e+00> : vector<16xf32>
    %194 = vector.multi_reduction <add>, %193, %cst_89 [1] : vector<16x32xf32> to vector<16xf32>
    %195 = vector.shape_cast %194 : vector<16xf32> to vector<16x1xf32>
    %cst_90 = arith.constant 3.200000e+01 : f32
    %196 = vector.broadcast %cst_90 : f32 to vector<16x1xf32>
    %197 = arith.divf %195, %196 : vector<16x1xf32>
    %198 = vector.broadcast %190 : vector<16x1xf32> to vector<16x32xf32>
    %199 = arith.subf %186, %198 : vector<16x32xf32>
    %cst_91 = arith.constant 9.99999974E-6 : f32
    %200 = vector.broadcast %cst_91 : f32 to vector<16x1xf32>
    %201 = arith.addf %197, %200 : vector<16x1xf32>
    %202 = math.rsqrt %201 : vector<16x1xf32>
    %203 = vector.broadcast %202 : vector<16x1xf32> to vector<16x32xf32>
    %204 = arith.mulf %199, %203 : vector<16x32xf32>
    %205 = vector.broadcast %29 : vector<1x32xf32> to vector<16x32xf32>
    %206 = arith.mulf %204, %205 : vector<16x32xf32>
    %207 = vector.broadcast %31 : vector<1x32xf32> to vector<16x32xf32>
    %208 = arith.addf %206, %207 : vector<16x32xf32>
    %cst_92 = arith.constant dense<0.000000e+00> : vector<16x64xf32>
    %209 = tpu.matmul %208, %33, %cst_92 {dimension_numbers = #tpu.dot_dimension_numbers<[1], [0], [0], [1], [0, 0, 1, 1], [], []>} : vector<16x32xf32>, vector<32x64xf32>, vector<16x64xf32> -> vector<16x64xf32>
    %210 = vector.broadcast %35 : vector<1x64xf32> to vector<16x64xf32>
    %211 = arith.addf %209, %210 : vector<16x64xf32>
    %cst_93 = arith.constant 0.000000e+00 : f32
    %212 = vector.broadcast %cst_93 : f32 to vector<16x64xf32>
    %213 = arith.maximumf %211, %212 : vector<16x64xf32>
    %cst_94 = arith.constant dense<0.000000e+00> : vector<16x32xf32>
    %214 = tpu.matmul %213, %37, %cst_94 {dimension_numbers = #tpu.dot_dimension_numbers<[1], [0], [0], [1], [0, 0, 1, 1], [], []>} : vector<16x64xf32>, vector<64x32xf32>, vector<16x32xf32> -> vector<16x32xf32>
    %215 = vector.broadcast %39 : vector<1x32xf32> to vector<16x32xf32>
    %216 = arith.addf %214, %215 : vector<16x32xf32>
    %217 = arith.addf %208, %216 : vector<16x32xf32>
    %cst_95 = arith.constant dense<0.000000e+00> : vector<16xf32>
    %218 = vector.multi_reduction <add>, %217, %cst_95 [1] : vector<16x32xf32> to vector<16xf32>
    %219 = vector.shape_cast %218 : vector<16xf32> to vector<16x1xf32>
    %cst_96 = arith.constant 3.200000e+01 : f32
    %220 = vector.broadcast %cst_96 : f32 to vector<16x1xf32>
    %221 = arith.divf %219, %220 : vector<16x1xf32>
    %222 = vector.broadcast %221 : vector<16x1xf32> to vector<16x32xf32>
    %223 = arith.subf %217, %222 : vector<16x32xf32>
    %224 = arith.mulf %223, %223 : vector<16x32xf32>
    %cst_97 = arith.constant dense<0.000000e+00> : vector<16xf32>
    %225 = vector.multi_reduction <add>, %224, %cst_97 [1] : vector<16x32xf32> to vector<16xf32>
    %226 = vector.shape_cast %225 : vector<16xf32> to vector<16x1xf32>
    %cst_98 = arith.constant 3.200000e+01 : f32
    %227 = vector.broadcast %cst_98 : f32 to vector<16x1xf32>
    %228 = arith.divf %226, %227 : vector<16x1xf32>
    %229 = vector.broadcast %221 : vector<16x1xf32> to vector<16x32xf32>
    %230 = arith.subf %217, %229 : vector<16x32xf32>
    %cst_99 = arith.constant 9.99999974E-6 : f32
    %231 = vector.broadcast %cst_99 : f32 to vector<16x1xf32>
    %232 = arith.addf %228, %231 : vector<16x1xf32>
    %233 = math.rsqrt %232 : vector<16x1xf32>
    %234 = vector.broadcast %233 : vector<16x1xf32> to vector<16x32xf32>
    %235 = arith.mulf %230, %234 : vector<16x32xf32>
    %236 = vector.broadcast %41 : vector<1x32xf32> to vector<16x32xf32>
    %237 = arith.mulf %235, %236 : vector<16x32xf32>
    %238 = vector.broadcast %43 : vector<1x32xf32> to vector<16x32xf32>
    %239 = arith.addf %237, %238 : vector<16x32xf32>
    %c1_100 = arith.constant 1 : index
    %c0_101 = arith.constant 0 : index
    %c0_102 = arith.constant 0 : index
    %240 = vector.load %arg11[%c1_100, %c0_101, %c0_102] : memref<2x32x96xf32, #tpu.memory_space<vmem>>, vector<1x32x96xf32>
    %241 = vector.shape_cast %240 : vector<1x32x96xf32> to vector<32x96xf32>
    %c1_103 = arith.constant 1 : index
    %c0_104 = arith.constant 0 : index
    %c0_105 = arith.constant 0 : index
    %242 = vector.load %arg12[%c1_103, %c0_104, %c0_105] : memref<2x1x96xf32, #tpu.memory_space<vmem>>, vector<1x1x96xf32>
    %243 = vector.shape_cast %242 : vector<1x1x96xf32> to vector<1x96xf32>
    %c1_106 = arith.constant 1 : index
    %c0_107 = arith.constant 0 : index
    %c0_108 = arith.constant 0 : index
    %244 = vector.load %arg13[%c1_106, %c0_107, %c0_108] : memref<2x32x32xf32, #tpu.memory_space<vmem>>, vector<1x32x32xf32>
    %245 = vector.shape_cast %244 : vector<1x32x32xf32> to vector<32x32xf32>
    %c1_109 = arith.constant 1 : index
    %c0_110 = arith.constant 0 : index
    %c0_111 = arith.constant 0 : index
    %246 = vector.load %arg14[%c1_109, %c0_110, %c0_111] : memref<2x1x32xf32, #tpu.memory_space<vmem>>, vector<1x1x32xf32>
    %247 = vector.shape_cast %246 : vector<1x1x32xf32> to vector<1x32xf32>
    %c1_112 = arith.constant 1 : index
    %c0_113 = arith.constant 0 : index
    %c0_114 = arith.constant 0 : index
    %248 = vector.load %arg15[%c1_112, %c0_113, %c0_114] : memref<2x1x32xf32, #tpu.memory_space<vmem>>, vector<1x1x32xf32>
    %249 = vector.shape_cast %248 : vector<1x1x32xf32> to vector<1x32xf32>
    %c1_115 = arith.constant 1 : index
    %c0_116 = arith.constant 0 : index
    %c0_117 = arith.constant 0 : index
    %250 = vector.load %arg16[%c1_115, %c0_116, %c0_117] : memref<2x1x32xf32, #tpu.memory_space<vmem>>, vector<1x1x32xf32>
    %251 = vector.shape_cast %250 : vector<1x1x32xf32> to vector<1x32xf32>
    %c1_118 = arith.constant 1 : index
    %c0_119 = arith.constant 0 : index
    %c0_120 = arith.constant 0 : index
    %252 = vector.load %arg17[%c1_118, %c0_119, %c0_120] : memref<2x32x64xf32, #tpu.memory_space<vmem>>, vector<1x32x64xf32>
    %253 = vector.shape_cast %252 : vector<1x32x64xf32> to vector<32x64xf32>
    %c1_121 = arith.constant 1 : index
    %c0_122 = arith.constant 0 : index
    %c0_123 = arith.constant 0 : index
    %254 = vector.load %arg18[%c1_121, %c0_122, %c0_123] : memref<2x1x64xf32, #tpu.memory_space<vmem>>, vector<1x1x64xf32>
    %255 = vector.shape_cast %254 : vector<1x1x64xf32> to vector<1x64xf32>
    %c1_124 = arith.constant 1 : index
    %c0_125 = arith.constant 0 : index
    %c0_126 = arith.constant 0 : index
    %256 = vector.load %arg19[%c1_124, %c0_125, %c0_126] : memref<2x64x32xf32, #tpu.memory_space<vmem>>, vector<1x64x32xf32>
    %257 = vector.shape_cast %256 : vector<1x64x32xf32> to vector<64x32xf32>
    %c1_127 = arith.constant 1 : index
    %c0_128 = arith.constant 0 : index
    %c0_129 = arith.constant 0 : index
    %258 = vector.load %arg20[%c1_127, %c0_128, %c0_129] : memref<2x1x32xf32, #tpu.memory_space<vmem>>, vector<1x1x32xf32>
    %259 = vector.shape_cast %258 : vector<1x1x32xf32> to vector<1x32xf32>
    %c1_130 = arith.constant 1 : index
    %c0_131 = arith.constant 0 : index
    %c0_132 = arith.constant 0 : index
    %260 = vector.load %arg21[%c1_130, %c0_131, %c0_132] : memref<2x1x32xf32, #tpu.memory_space<vmem>>, vector<1x1x32xf32>
    %261 = vector.shape_cast %260 : vector<1x1x32xf32> to vector<1x32xf32>
    %c1_133 = arith.constant 1 : index
    %c0_134 = arith.constant 0 : index
    %c0_135 = arith.constant 0 : index
    %262 = vector.load %arg22[%c1_133, %c0_134, %c0_135] : memref<2x1x32xf32, #tpu.memory_space<vmem>>, vector<1x1x32xf32>
    %263 = vector.shape_cast %262 : vector<1x1x32xf32> to vector<1x32xf32>
    %cst_136 = arith.constant dense<0.000000e+00> : vector<16x96xf32>
    %264 = tpu.matmul %239, %241, %cst_136 {dimension_numbers = #tpu.dot_dimension_numbers<[1], [0], [0], [1], [0, 0, 1, 1], [], []>} : vector<16x32xf32>, vector<32x96xf32>, vector<16x96xf32> -> vector<16x96xf32>
    %265 = vector.broadcast %243 : vector<1x96xf32> to vector<16x96xf32>
    %266 = arith.addf %264, %265 : vector<16x96xf32>
    %267 = vector.extract_strided_slice %266 {offsets = [0, 0], sizes = [16, 32], strides = [1, 1]} : vector<16x96xf32> to vector<16x32xf32>
    %268 = vector.extract_strided_slice %266 {offsets = [0, 32], sizes = [16, 32], strides = [1, 1]} : vector<16x96xf32> to vector<16x32xf32>
    %269 = vector.extract_strided_slice %266 {offsets = [0, 64], sizes = [16, 32], strides = [1, 1]} : vector<16x96xf32> to vector<16x32xf32>
    %270 = vector.extract_strided_slice %267 {offsets = [0, 0], sizes = [8, 32], strides = [1, 1]} : vector<16x32xf32> to vector<8x32xf32>
    %271 = vector.extract_strided_slice %268 {offsets = [0, 0], sizes = [8, 32], strides = [1, 1]} : vector<16x32xf32> to vector<8x32xf32>
    %272 = vector.extract_strided_slice %269 {offsets = [0, 0], sizes = [8, 32], strides = [1, 1]} : vector<16x32xf32> to vector<8x32xf32>
    %c0_137 = arith.constant 0 : index
    %c0_138 = arith.constant 0 : index
    %c0_139 = arith.constant 0 : index
    %273 = vector.load %arg6[%c0_137, %c0_138, %c0_139] : memref<2x8x8xf32, #tpu.memory_space<vmem>>, vector<1x8x8xf32>
    %274 = vector.shape_cast %273 : vector<1x8x8xf32> to vector<8x8xf32>
    %275 = vector.extract_strided_slice %270 {offsets = [0, 0], sizes = [8, 8], strides = [1, 1]} : vector<8x32xf32> to vector<8x8xf32>
    %276 = vector.extract_strided_slice %271 {offsets = [0, 0], sizes = [8, 8], strides = [1, 1]} : vector<8x32xf32> to vector<8x8xf32>
    %cst_140 = arith.constant dense<0.000000e+00> : vector<8x8xf32>
    %277 = tpu.matmul %275, %276, %cst_140 {dimension_numbers = #tpu.dot_dimension_numbers<[1], [1], [0], [0], [0, 0, 1, 0], [], []>} : vector<8x8xf32>, vector<8x8xf32>, vector<8x8xf32> -> vector<8x8xf32>
    %278 = arith.addf %277, %274 : vector<8x8xf32>
    %cst_141 = arith.constant dense<0xFF800000> : vector<8xf32>
    %279 = vector.multi_reduction <maximumf>, %278, %cst_141 [1] : vector<8x8xf32> to vector<8xf32>
    %280 = vector.shape_cast %279 : vector<8xf32> to vector<8x1xf32>
    %281 = vector.broadcast %280 : vector<8x1xf32> to vector<8x8xf32>
    %282 = arith.subf %278, %281 : vector<8x8xf32>
    %283 = math.exp %282 : vector<8x8xf32>
    %cst_142 = arith.constant dense<0.000000e+00> : vector<8xf32>
    %284 = vector.multi_reduction <add>, %283, %cst_142 [1] : vector<8x8xf32> to vector<8xf32>
    %285 = vector.shape_cast %284 : vector<8xf32> to vector<8x1xf32>
    %286 = vector.broadcast %285 : vector<8x1xf32> to vector<8x8xf32>
    %287 = arith.divf %283, %286 : vector<8x8xf32>
    %288 = vector.extract_strided_slice %272 {offsets = [0, 0], sizes = [8, 8], strides = [1, 1]} : vector<8x32xf32> to vector<8x8xf32>
    %cst_143 = arith.constant dense<0.000000e+00> : vector<8x8xf32>
    %289 = tpu.matmul %287, %288, %cst_143 {dimension_numbers = #tpu.dot_dimension_numbers<[1], [0], [0], [1], [0, 0, 1, 1], [], []>} : vector<8x8xf32>, vector<8x8xf32>, vector<8x8xf32> -> vector<8x8xf32>
    %290 = vector.extract_strided_slice %270 {offsets = [0, 8], sizes = [8, 8], strides = [1, 1]} : vector<8x32xf32> to vector<8x8xf32>
    %291 = vector.extract_strided_slice %271 {offsets = [0, 8], sizes = [8, 8], strides = [1, 1]} : vector<8x32xf32> to vector<8x8xf32>
    %cst_144 = arith.constant dense<0.000000e+00> : vector<8x8xf32>
    %292 = tpu.matmul %290, %291, %cst_144 {dimension_numbers = #tpu.dot_dimension_numbers<[1], [1], [0], [0], [0, 0, 1, 0], [], []>} : vector<8x8xf32>, vector<8x8xf32>, vector<8x8xf32> -> vector<8x8xf32>
    %293 = arith.addf %292, %274 : vector<8x8xf32>
    %cst_145 = arith.constant dense<0xFF800000> : vector<8xf32>
    %294 = vector.multi_reduction <maximumf>, %293, %cst_145 [1] : vector<8x8xf32> to vector<8xf32>
    %295 = vector.shape_cast %294 : vector<8xf32> to vector<8x1xf32>
    %296 = vector.broadcast %295 : vector<8x1xf32> to vector<8x8xf32>
    %297 = arith.subf %293, %296 : vector<8x8xf32>
    %298 = math.exp %297 : vector<8x8xf32>
    %cst_146 = arith.constant dense<0.000000e+00> : vector<8xf32>
    %299 = vector.multi_reduction <add>, %298, %cst_146 [1] : vector<8x8xf32> to vector<8xf32>
    %300 = vector.shape_cast %299 : vector<8xf32> to vector<8x1xf32>
    %301 = vector.broadcast %300 : vector<8x1xf32> to vector<8x8xf32>
    %302 = arith.divf %298, %301 : vector<8x8xf32>
    %303 = vector.extract_strided_slice %272 {offsets = [0, 8], sizes = [8, 8], strides = [1, 1]} : vector<8x32xf32> to vector<8x8xf32>
    %cst_147 = arith.constant dense<0.000000e+00> : vector<8x8xf32>
    %304 = tpu.matmul %302, %303, %cst_147 {dimension_numbers = #tpu.dot_dimension_numbers<[1], [0], [0], [1], [0, 0, 1, 1], [], []>} : vector<8x8xf32>, vector<8x8xf32>, vector<8x8xf32> -> vector<8x8xf32>
    %305 = vector.extract_strided_slice %270 {offsets = [0, 16], sizes = [8, 8], strides = [1, 1]} : vector<8x32xf32> to vector<8x8xf32>
    %306 = vector.extract_strided_slice %271 {offsets = [0, 16], sizes = [8, 8], strides = [1, 1]} : vector<8x32xf32> to vector<8x8xf32>
    %cst_148 = arith.constant dense<0.000000e+00> : vector<8x8xf32>
    %307 = tpu.matmul %305, %306, %cst_148 {dimension_numbers = #tpu.dot_dimension_numbers<[1], [1], [0], [0], [0, 0, 1, 0], [], []>} : vector<8x8xf32>, vector<8x8xf32>, vector<8x8xf32> -> vector<8x8xf32>
    %308 = arith.addf %307, %274 : vector<8x8xf32>
    %cst_149 = arith.constant dense<0xFF800000> : vector<8xf32>
    %309 = vector.multi_reduction <maximumf>, %308, %cst_149 [1] : vector<8x8xf32> to vector<8xf32>
    %310 = vector.shape_cast %309 : vector<8xf32> to vector<8x1xf32>
    %311 = vector.broadcast %310 : vector<8x1xf32> to vector<8x8xf32>
    %312 = arith.subf %308, %311 : vector<8x8xf32>
    %313 = math.exp %312 : vector<8x8xf32>
    %cst_150 = arith.constant dense<0.000000e+00> : vector<8xf32>
    %314 = vector.multi_reduction <add>, %313, %cst_150 [1] : vector<8x8xf32> to vector<8xf32>
    %315 = vector.shape_cast %314 : vector<8xf32> to vector<8x1xf32>
    %316 = vector.broadcast %315 : vector<8x1xf32> to vector<8x8xf32>
    %317 = arith.divf %313, %316 : vector<8x8xf32>
    %318 = vector.extract_strided_slice %272 {offsets = [0, 16], sizes = [8, 8], strides = [1, 1]} : vector<8x32xf32> to vector<8x8xf32>
    %cst_151 = arith.constant dense<0.000000e+00> : vector<8x8xf32>
    %319 = tpu.matmul %317, %318, %cst_151 {dimension_numbers = #tpu.dot_dimension_numbers<[1], [0], [0], [1], [0, 0, 1, 1], [], []>} : vector<8x8xf32>, vector<8x8xf32>, vector<8x8xf32> -> vector<8x8xf32>
    %320 = vector.extract_strided_slice %270 {offsets = [0, 24], sizes = [8, 8], strides = [1, 1]} : vector<8x32xf32> to vector<8x8xf32>
    %321 = vector.extract_strided_slice %271 {offsets = [0, 24], sizes = [8, 8], strides = [1, 1]} : vector<8x32xf32> to vector<8x8xf32>
    %cst_152 = arith.constant dense<0.000000e+00> : vector<8x8xf32>
    %322 = tpu.matmul %320, %321, %cst_152 {dimension_numbers = #tpu.dot_dimension_numbers<[1], [1], [0], [0], [0, 0, 1, 0], [], []>} : vector<8x8xf32>, vector<8x8xf32>, vector<8x8xf32> -> vector<8x8xf32>
    %323 = arith.addf %322, %274 : vector<8x8xf32>
    %cst_153 = arith.constant dense<0xFF800000> : vector<8xf32>
    %324 = vector.multi_reduction <maximumf>, %323, %cst_153 [1] : vector<8x8xf32> to vector<8xf32>
    %325 = vector.shape_cast %324 : vector<8xf32> to vector<8x1xf32>
    %326 = vector.broadcast %325 : vector<8x1xf32> to vector<8x8xf32>
    %327 = arith.subf %323, %326 : vector<8x8xf32>
    %328 = math.exp %327 : vector<8x8xf32>
    %cst_154 = arith.constant dense<0.000000e+00> : vector<8xf32>
    %329 = vector.multi_reduction <add>, %328, %cst_154 [1] : vector<8x8xf32> to vector<8xf32>
    %330 = vector.shape_cast %329 : vector<8xf32> to vector<8x1xf32>
    %331 = vector.broadcast %330 : vector<8x1xf32> to vector<8x8xf32>
    %332 = arith.divf %328, %331 : vector<8x8xf32>
    %333 = vector.extract_strided_slice %272 {offsets = [0, 24], sizes = [8, 8], strides = [1, 1]} : vector<8x32xf32> to vector<8x8xf32>
    %cst_155 = arith.constant dense<0.000000e+00> : vector<8x8xf32>
    %334 = tpu.matmul %332, %333, %cst_155 {dimension_numbers = #tpu.dot_dimension_numbers<[1], [0], [0], [1], [0, 0, 1, 1], [], []>} : vector<8x8xf32>, vector<8x8xf32>, vector<8x8xf32> -> vector<8x8xf32>
    %335 = tpu.concatenate %289, %304, %319, %334 in 1 : vector<8x8xf32>, vector<8x8xf32>, vector<8x8xf32>, vector<8x8xf32> -> vector<8x32xf32>
    %336 = vector.extract_strided_slice %267 {offsets = [8, 0], sizes = [8, 32], strides = [1, 1]} : vector<16x32xf32> to vector<8x32xf32>
    %337 = vector.extract_strided_slice %268 {offsets = [8, 0], sizes = [8, 32], strides = [1, 1]} : vector<16x32xf32> to vector<8x32xf32>
    %338 = vector.extract_strided_slice %269 {offsets = [8, 0], sizes = [8, 32], strides = [1, 1]} : vector<16x32xf32> to vector<8x32xf32>
    %c1_156 = arith.constant 1 : index
    %c0_157 = arith.constant 0 : index
    %c0_158 = arith.constant 0 : index
    %339 = vector.load %arg6[%c1_156, %c0_157, %c0_158] : memref<2x8x8xf32, #tpu.memory_space<vmem>>, vector<1x8x8xf32>
    %340 = vector.shape_cast %339 : vector<1x8x8xf32> to vector<8x8xf32>
    %341 = vector.extract_strided_slice %336 {offsets = [0, 0], sizes = [8, 8], strides = [1, 1]} : vector<8x32xf32> to vector<8x8xf32>
    %342 = vector.extract_strided_slice %337 {offsets = [0, 0], sizes = [8, 8], strides = [1, 1]} : vector<8x32xf32> to vector<8x8xf32>
    %cst_159 = arith.constant dense<0.000000e+00> : vector<8x8xf32>
    %343 = tpu.matmul %341, %342, %cst_159 {dimension_numbers = #tpu.dot_dimension_numbers<[1], [1], [0], [0], [0, 0, 1, 0], [], []>} : vector<8x8xf32>, vector<8x8xf32>, vector<8x8xf32> -> vector<8x8xf32>
    %344 = arith.addf %343, %340 : vector<8x8xf32>
    %cst_160 = arith.constant dense<0xFF800000> : vector<8xf32>
    %345 = vector.multi_reduction <maximumf>, %344, %cst_160 [1] : vector<8x8xf32> to vector<8xf32>
    %346 = vector.shape_cast %345 : vector<8xf32> to vector<8x1xf32>
    %347 = vector.broadcast %346 : vector<8x1xf32> to vector<8x8xf32>
    %348 = arith.subf %344, %347 : vector<8x8xf32>
    %349 = math.exp %348 : vector<8x8xf32>
    %cst_161 = arith.constant dense<0.000000e+00> : vector<8xf32>
    %350 = vector.multi_reduction <add>, %349, %cst_161 [1] : vector<8x8xf32> to vector<8xf32>
    %351 = vector.shape_cast %350 : vector<8xf32> to vector<8x1xf32>
    %352 = vector.broadcast %351 : vector<8x1xf32> to vector<8x8xf32>
    %353 = arith.divf %349, %352 : vector<8x8xf32>
    %354 = vector.extract_strided_slice %338 {offsets = [0, 0], sizes = [8, 8], strides = [1, 1]} : vector<8x32xf32> to vector<8x8xf32>
    %cst_162 = arith.constant dense<0.000000e+00> : vector<8x8xf32>
    %355 = tpu.matmul %353, %354, %cst_162 {dimension_numbers = #tpu.dot_dimension_numbers<[1], [0], [0], [1], [0, 0, 1, 1], [], []>} : vector<8x8xf32>, vector<8x8xf32>, vector<8x8xf32> -> vector<8x8xf32>
    %356 = vector.extract_strided_slice %336 {offsets = [0, 8], sizes = [8, 8], strides = [1, 1]} : vector<8x32xf32> to vector<8x8xf32>
    %357 = vector.extract_strided_slice %337 {offsets = [0, 8], sizes = [8, 8], strides = [1, 1]} : vector<8x32xf32> to vector<8x8xf32>
    %cst_163 = arith.constant dense<0.000000e+00> : vector<8x8xf32>
    %358 = tpu.matmul %356, %357, %cst_163 {dimension_numbers = #tpu.dot_dimension_numbers<[1], [1], [0], [0], [0, 0, 1, 0], [], []>} : vector<8x8xf32>, vector<8x8xf32>, vector<8x8xf32> -> vector<8x8xf32>
    %359 = arith.addf %358, %340 : vector<8x8xf32>
    %cst_164 = arith.constant dense<0xFF800000> : vector<8xf32>
    %360 = vector.multi_reduction <maximumf>, %359, %cst_164 [1] : vector<8x8xf32> to vector<8xf32>
    %361 = vector.shape_cast %360 : vector<8xf32> to vector<8x1xf32>
    %362 = vector.broadcast %361 : vector<8x1xf32> to vector<8x8xf32>
    %363 = arith.subf %359, %362 : vector<8x8xf32>
    %364 = math.exp %363 : vector<8x8xf32>
    %cst_165 = arith.constant dense<0.000000e+00> : vector<8xf32>
    %365 = vector.multi_reduction <add>, %364, %cst_165 [1] : vector<8x8xf32> to vector<8xf32>
    %366 = vector.shape_cast %365 : vector<8xf32> to vector<8x1xf32>
    %367 = vector.broadcast %366 : vector<8x1xf32> to vector<8x8xf32>
    %368 = arith.divf %364, %367 : vector<8x8xf32>
    %369 = vector.extract_strided_slice %338 {offsets = [0, 8], sizes = [8, 8], strides = [1, 1]} : vector<8x32xf32> to vector<8x8xf32>
    %cst_166 = arith.constant dense<0.000000e+00> : vector<8x8xf32>
    %370 = tpu.matmul %368, %369, %cst_166 {dimension_numbers = #tpu.dot_dimension_numbers<[1], [0], [0], [1], [0, 0, 1, 1], [], []>} : vector<8x8xf32>, vector<8x8xf32>, vector<8x8xf32> -> vector<8x8xf32>
    %371 = vector.extract_strided_slice %336 {offsets = [0, 16], sizes = [8, 8], strides = [1, 1]} : vector<8x32xf32> to vector<8x8xf32>
    %372 = vector.extract_strided_slice %337 {offsets = [0, 16], sizes = [8, 8], strides = [1, 1]} : vector<8x32xf32> to vector<8x8xf32>
    %cst_167 = arith.constant dense<0.000000e+00> : vector<8x8xf32>
    %373 = tpu.matmul %371, %372, %cst_167 {dimension_numbers = #tpu.dot_dimension_numbers<[1], [1], [0], [0], [0, 0, 1, 0], [], []>} : vector<8x8xf32>, vector<8x8xf32>, vector<8x8xf32> -> vector<8x8xf32>
    %374 = arith.addf %373, %340 : vector<8x8xf32>
    %cst_168 = arith.constant dense<0xFF800000> : vector<8xf32>
    %375 = vector.multi_reduction <maximumf>, %374, %cst_168 [1] : vector<8x8xf32> to vector<8xf32>
    %376 = vector.shape_cast %375 : vector<8xf32> to vector<8x1xf32>
    %377 = vector.broadcast %376 : vector<8x1xf32> to vector<8x8xf32>
    %378 = arith.subf %374, %377 : vector<8x8xf32>
    %379 = math.exp %378 : vector<8x8xf32>
    %cst_169 = arith.constant dense<0.000000e+00> : vector<8xf32>
    %380 = vector.multi_reduction <add>, %379, %cst_169 [1] : vector<8x8xf32> to vector<8xf32>
    %381 = vector.shape_cast %380 : vector<8xf32> to vector<8x1xf32>
    %382 = vector.broadcast %381 : vector<8x1xf32> to vector<8x8xf32>
    %383 = arith.divf %379, %382 : vector<8x8xf32>
    %384 = vector.extract_strided_slice %338 {offsets = [0, 16], sizes = [8, 8], strides = [1, 1]} : vector<8x32xf32> to vector<8x8xf32>
    %cst_170 = arith.constant dense<0.000000e+00> : vector<8x8xf32>
    %385 = tpu.matmul %383, %384, %cst_170 {dimension_numbers = #tpu.dot_dimension_numbers<[1], [0], [0], [1], [0, 0, 1, 1], [], []>} : vector<8x8xf32>, vector<8x8xf32>, vector<8x8xf32> -> vector<8x8xf32>
    %386 = vector.extract_strided_slice %336 {offsets = [0, 24], sizes = [8, 8], strides = [1, 1]} : vector<8x32xf32> to vector<8x8xf32>
    %387 = vector.extract_strided_slice %337 {offsets = [0, 24], sizes = [8, 8], strides = [1, 1]} : vector<8x32xf32> to vector<8x8xf32>
    %cst_171 = arith.constant dense<0.000000e+00> : vector<8x8xf32>
    %388 = tpu.matmul %386, %387, %cst_171 {dimension_numbers = #tpu.dot_dimension_numbers<[1], [1], [0], [0], [0, 0, 1, 0], [], []>} : vector<8x8xf32>, vector<8x8xf32>, vector<8x8xf32> -> vector<8x8xf32>
    %389 = arith.addf %388, %340 : vector<8x8xf32>
    %cst_172 = arith.constant dense<0xFF800000> : vector<8xf32>
    %390 = vector.multi_reduction <maximumf>, %389, %cst_172 [1] : vector<8x8xf32> to vector<8xf32>
    %391 = vector.shape_cast %390 : vector<8xf32> to vector<8x1xf32>
    %392 = vector.broadcast %391 : vector<8x1xf32> to vector<8x8xf32>
    %393 = arith.subf %389, %392 : vector<8x8xf32>
    %394 = math.exp %393 : vector<8x8xf32>
    %cst_173 = arith.constant dense<0.000000e+00> : vector<8xf32>
    %395 = vector.multi_reduction <add>, %394, %cst_173 [1] : vector<8x8xf32> to vector<8xf32>
    %396 = vector.shape_cast %395 : vector<8xf32> to vector<8x1xf32>
    %397 = vector.broadcast %396 : vector<8x1xf32> to vector<8x8xf32>
    %398 = arith.divf %394, %397 : vector<8x8xf32>
    %399 = vector.extract_strided_slice %338 {offsets = [0, 24], sizes = [8, 8], strides = [1, 1]} : vector<8x32xf32> to vector<8x8xf32>
    %cst_174 = arith.constant dense<0.000000e+00> : vector<8x8xf32>
    %400 = tpu.matmul %398, %399, %cst_174 {dimension_numbers = #tpu.dot_dimension_numbers<[1], [0], [0], [1], [0, 0, 1, 1], [], []>} : vector<8x8xf32>, vector<8x8xf32>, vector<8x8xf32> -> vector<8x8xf32>
    %401 = tpu.concatenate %355, %370, %385, %400 in 1 : vector<8x8xf32>, vector<8x8xf32>, vector<8x8xf32>, vector<8x8xf32> -> vector<8x32xf32>
    %402 = tpu.concatenate %335, %401 in 0 : vector<8x32xf32>, vector<8x32xf32> -> vector<16x32xf32>
    %cst_175 = arith.constant dense<0.000000e+00> : vector<16x32xf32>
    %403 = tpu.matmul %402, %245, %cst_175 {dimension_numbers = #tpu.dot_dimension_numbers<[1], [0], [0], [1], [0, 0, 1, 1], [], []>} : vector<16x32xf32>, vector<32x32xf32>, vector<16x32xf32> -> vector<16x32xf32>
    %404 = vector.broadcast %247 : vector<1x32xf32> to vector<16x32xf32>
    %405 = arith.addf %403, %404 : vector<16x32xf32>
    %406 = arith.addf %239, %405 : vector<16x32xf32>
    %cst_176 = arith.constant dense<0.000000e+00> : vector<16xf32>
    %407 = vector.multi_reduction <add>, %406, %cst_176 [1] : vector<16x32xf32> to vector<16xf32>
    %408 = vector.shape_cast %407 : vector<16xf32> to vector<16x1xf32>
    %cst_177 = arith.constant 3.200000e+01 : f32
    %409 = vector.broadcast %cst_177 : f32 to vector<16x1xf32>
    %410 = arith.divf %408, %409 : vector<16x1xf32>
    %411 = vector.broadcast %410 : vector<16x1xf32> to vector<16x32xf32>
    %412 = arith.subf %406, %411 : vector<16x32xf32>
    %413 = arith.mulf %412, %412 : vector<16x32xf32>
    %cst_178 = arith.constant dense<0.000000e+00> : vector<16xf32>
    %414 = vector.multi_reduction <add>, %413, %cst_178 [1] : vector<16x32xf32> to vector<16xf32>
    %415 = vector.shape_cast %414 : vector<16xf32> to vector<16x1xf32>
    %cst_179 = arith.constant 3.200000e+01 : f32
    %416 = vector.broadcast %cst_179 : f32 to vector<16x1xf32>
    %417 = arith.divf %415, %416 : vector<16x1xf32>
    %418 = vector.broadcast %410 : vector<16x1xf32> to vector<16x32xf32>
    %419 = arith.subf %406, %418 : vector<16x32xf32>
    %cst_180 = arith.constant 9.99999974E-6 : f32
    %420 = vector.broadcast %cst_180 : f32 to vector<16x1xf32>
    %421 = arith.addf %417, %420 : vector<16x1xf32>
    %422 = math.rsqrt %421 : vector<16x1xf32>
    %423 = vector.broadcast %422 : vector<16x1xf32> to vector<16x32xf32>
    %424 = arith.mulf %419, %423 : vector<16x32xf32>
    %425 = vector.broadcast %249 : vector<1x32xf32> to vector<16x32xf32>
    %426 = arith.mulf %424, %425 : vector<16x32xf32>
    %427 = vector.broadcast %251 : vector<1x32xf32> to vector<16x32xf32>
    %428 = arith.addf %426, %427 : vector<16x32xf32>
    %cst_181 = arith.constant dense<0.000000e+00> : vector<16x64xf32>
    %429 = tpu.matmul %428, %253, %cst_181 {dimension_numbers = #tpu.dot_dimension_numbers<[1], [0], [0], [1], [0, 0, 1, 1], [], []>} : vector<16x32xf32>, vector<32x64xf32>, vector<16x64xf32> -> vector<16x64xf32>
    %430 = vector.broadcast %255 : vector<1x64xf32> to vector<16x64xf32>
    %431 = arith.addf %429, %430 : vector<16x64xf32>
    %cst_182 = arith.constant 0.000000e+00 : f32
    %432 = vector.broadcast %cst_182 : f32 to vector<16x64xf32>
    %433 = arith.maximumf %431, %432 : vector<16x64xf32>
    %cst_183 = arith.constant dense<0.000000e+00> : vector<16x32xf32>
    %434 = tpu.matmul %433, %257, %cst_183 {dimension_numbers = #tpu.dot_dimension_numbers<[1], [0], [0], [1], [0, 0, 1, 1], [], []>} : vector<16x64xf32>, vector<64x32xf32>, vector<16x32xf32> -> vector<16x32xf32>
    %435 = vector.broadcast %259 : vector<1x32xf32> to vector<16x32xf32>
    %436 = arith.addf %434, %435 : vector<16x32xf32>
    %437 = arith.addf %428, %436 : vector<16x32xf32>
    %cst_184 = arith.constant dense<0.000000e+00> : vector<16xf32>
    %438 = vector.multi_reduction <add>, %437, %cst_184 [1] : vector<16x32xf32> to vector<16xf32>
    %439 = vector.shape_cast %438 : vector<16xf32> to vector<16x1xf32>
    %cst_185 = arith.constant 3.200000e+01 : f32
    %440 = vector.broadcast %cst_185 : f32 to vector<16x1xf32>
    %441 = arith.divf %439, %440 : vector<16x1xf32>
    %442 = vector.broadcast %441 : vector<16x1xf32> to vector<16x32xf32>
    %443 = arith.subf %437, %442 : vector<16x32xf32>
    %444 = arith.mulf %443, %443 : vector<16x32xf32>
    %cst_186 = arith.constant dense<0.000000e+00> : vector<16xf32>
    %445 = vector.multi_reduction <add>, %444, %cst_186 [1] : vector<16x32xf32> to vector<16xf32>
    %446 = vector.shape_cast %445 : vector<16xf32> to vector<16x1xf32>
    %cst_187 = arith.constant 3.200000e+01 : f32
    %447 = vector.broadcast %cst_187 : f32 to vector<16x1xf32>
    %448 = arith.divf %446, %447 : vector<16x1xf32>
    %449 = vector.broadcast %441 : vector<16x1xf32> to vector<16x32xf32>
    %450 = arith.subf %437, %449 : vector<16x32xf32>
    %cst_188 = arith.constant 9.99999974E-6 : f32
    %451 = vector.broadcast %cst_188 : f32 to vector<16x1xf32>
    %452 = arith.addf %448, %451 : vector<16x1xf32>
    %453 = math.rsqrt %452 : vector<16x1xf32>
    %454 = vector.broadcast %453 : vector<16x1xf32> to vector<16x32xf32>
    %455 = arith.mulf %450, %454 : vector<16x32xf32>
    %456 = vector.broadcast %261 : vector<1x32xf32> to vector<16x32xf32>
    %457 = arith.mulf %455, %456 : vector<16x32xf32>
    %458 = vector.broadcast %263 : vector<1x32xf32> to vector<16x32xf32>
    %459 = arith.addf %457, %458 : vector<16x32xf32>
    %c0_189 = arith.constant 0 : index
    %c0_190 = arith.constant 0 : index
    %c0_191 = arith.constant 0 : index
    %460 = vector.load %arg23[%c0_189, %c0_190, %c0_191] : memref<2x32x96xf32, #tpu.memory_space<vmem>>, vector<1x32x96xf32>
    %461 = vector.shape_cast %460 : vector<1x32x96xf32> to vector<32x96xf32>
    %c0_192 = arith.constant 0 : index
    %c0_193 = arith.constant 0 : index
    %c0_194 = arith.constant 0 : index
    %462 = vector.load %arg24[%c0_192, %c0_193, %c0_194] : memref<2x1x96xf32, #tpu.memory_space<vmem>>, vector<1x1x96xf32>
    %463 = vector.shape_cast %462 : vector<1x1x96xf32> to vector<1x96xf32>
    %c0_195 = arith.constant 0 : index
    %c0_196 = arith.constant 0 : index
    %c0_197 = arith.constant 0 : index
    %464 = vector.load %arg25[%c0_195, %c0_196, %c0_197] : memref<2x32x32xf32, #tpu.memory_space<vmem>>, vector<1x32x32xf32>
    %465 = vector.shape_cast %464 : vector<1x32x32xf32> to vector<32x32xf32>
    %c0_198 = arith.constant 0 : index
    %c0_199 = arith.constant 0 : index
    %c0_200 = arith.constant 0 : index
    %466 = vector.load %arg26[%c0_198, %c0_199, %c0_200] : memref<2x1x32xf32, #tpu.memory_space<vmem>>, vector<1x1x32xf32>
    %467 = vector.shape_cast %466 : vector<1x1x32xf32> to vector<1x32xf32>
    %c0_201 = arith.constant 0 : index
    %c0_202 = arith.constant 0 : index
    %c0_203 = arith.constant 0 : index
    %468 = vector.load %arg27[%c0_201, %c0_202, %c0_203] : memref<2x1x32xf32, #tpu.memory_space<vmem>>, vector<1x1x32xf32>
    %469 = vector.shape_cast %468 : vector<1x1x32xf32> to vector<1x32xf32>
    %c0_204 = arith.constant 0 : index
    %c0_205 = arith.constant 0 : index
    %c0_206 = arith.constant 0 : index
    %470 = vector.load %arg28[%c0_204, %c0_205, %c0_206] : memref<2x1x32xf32, #tpu.memory_space<vmem>>, vector<1x1x32xf32>
    %471 = vector.shape_cast %470 : vector<1x1x32xf32> to vector<1x32xf32>
    %c0_207 = arith.constant 0 : index
    %c0_208 = arith.constant 0 : index
    %c0_209 = arith.constant 0 : index
    %472 = vector.load %arg29[%c0_207, %c0_208, %c0_209] : memref<2x32x32xf32, #tpu.memory_space<vmem>>, vector<1x32x32xf32>
    %473 = vector.shape_cast %472 : vector<1x32x32xf32> to vector<32x32xf32>
    %c0_210 = arith.constant 0 : index
    %c0_211 = arith.constant 0 : index
    %c0_212 = arith.constant 0 : index
    %474 = vector.load %arg30[%c0_210, %c0_211, %c0_212] : memref<2x1x32xf32, #tpu.memory_space<vmem>>, vector<1x1x32xf32>
    %475 = vector.shape_cast %474 : vector<1x1x32xf32> to vector<1x32xf32>
    %c0_213 = arith.constant 0 : index
    %c0_214 = arith.constant 0 : index
    %c0_215 = arith.constant 0 : index
    %476 = vector.load %arg31[%c0_213, %c0_214, %c0_215] : memref<2x32x64xf32, #tpu.memory_space<vmem>>, vector<1x32x64xf32>
    %477 = vector.shape_cast %476 : vector<1x32x64xf32> to vector<32x64xf32>
    %c0_216 = arith.constant 0 : index
    %c0_217 = arith.constant 0 : index
    %c0_218 = arith.constant 0 : index
    %478 = vector.load %arg32[%c0_216, %c0_217, %c0_218] : memref<2x1x64xf32, #tpu.memory_space<vmem>>, vector<1x1x64xf32>
    %479 = vector.shape_cast %478 : vector<1x1x64xf32> to vector<1x64xf32>
    %c0_219 = arith.constant 0 : index
    %c0_220 = arith.constant 0 : index
    %c0_221 = arith.constant 0 : index
    %480 = vector.load %arg33[%c0_219, %c0_220, %c0_221] : memref<2x32x32xf32, #tpu.memory_space<vmem>>, vector<1x32x32xf32>
    %481 = vector.shape_cast %480 : vector<1x32x32xf32> to vector<32x32xf32>
    %c0_222 = arith.constant 0 : index
    %c0_223 = arith.constant 0 : index
    %c0_224 = arith.constant 0 : index
    %482 = vector.load %arg34[%c0_222, %c0_223, %c0_224] : memref<2x1x32xf32, #tpu.memory_space<vmem>>, vector<1x1x32xf32>
    %483 = vector.shape_cast %482 : vector<1x1x32xf32> to vector<1x32xf32>
    %c0_225 = arith.constant 0 : index
    %c0_226 = arith.constant 0 : index
    %c0_227 = arith.constant 0 : index
    %484 = vector.load %arg35[%c0_225, %c0_226, %c0_227] : memref<2x1x32xf32, #tpu.memory_space<vmem>>, vector<1x1x32xf32>
    %485 = vector.shape_cast %484 : vector<1x1x32xf32> to vector<1x32xf32>
    %c0_228 = arith.constant 0 : index
    %c0_229 = arith.constant 0 : index
    %c0_230 = arith.constant 0 : index
    %486 = vector.load %arg36[%c0_228, %c0_229, %c0_230] : memref<2x1x32xf32, #tpu.memory_space<vmem>>, vector<1x1x32xf32>
    %487 = vector.shape_cast %486 : vector<1x1x32xf32> to vector<1x32xf32>
    %c0_231 = arith.constant 0 : index
    %c0_232 = arith.constant 0 : index
    %c0_233 = arith.constant 0 : index
    %488 = vector.load %arg37[%c0_231, %c0_232, %c0_233] : memref<2x32x64xf32, #tpu.memory_space<vmem>>, vector<1x32x64xf32>
    %489 = vector.shape_cast %488 : vector<1x32x64xf32> to vector<32x64xf32>
    %c0_234 = arith.constant 0 : index
    %c0_235 = arith.constant 0 : index
    %c0_236 = arith.constant 0 : index
    %490 = vector.load %arg38[%c0_234, %c0_235, %c0_236] : memref<2x1x64xf32, #tpu.memory_space<vmem>>, vector<1x1x64xf32>
    %491 = vector.shape_cast %490 : vector<1x1x64xf32> to vector<1x64xf32>
    %c0_237 = arith.constant 0 : index
    %c0_238 = arith.constant 0 : index
    %c0_239 = arith.constant 0 : index
    %492 = vector.load %arg39[%c0_237, %c0_238, %c0_239] : memref<2x64x32xf32, #tpu.memory_space<vmem>>, vector<1x64x32xf32>
    %493 = vector.shape_cast %492 : vector<1x64x32xf32> to vector<64x32xf32>
    %c0_240 = arith.constant 0 : index
    %c0_241 = arith.constant 0 : index
    %c0_242 = arith.constant 0 : index
    %494 = vector.load %arg40[%c0_240, %c0_241, %c0_242] : memref<2x1x32xf32, #tpu.memory_space<vmem>>, vector<1x1x32xf32>
    %495 = vector.shape_cast %494 : vector<1x1x32xf32> to vector<1x32xf32>
    %c0_243 = arith.constant 0 : index
    %c0_244 = arith.constant 0 : index
    %c0_245 = arith.constant 0 : index
    %496 = vector.load %arg41[%c0_243, %c0_244, %c0_245] : memref<2x1x32xf32, #tpu.memory_space<vmem>>, vector<1x1x32xf32>
    %497 = vector.shape_cast %496 : vector<1x1x32xf32> to vector<1x32xf32>
    %c0_246 = arith.constant 0 : index
    %c0_247 = arith.constant 0 : index
    %c0_248 = arith.constant 0 : index
    %498 = vector.load %arg42[%c0_246, %c0_247, %c0_248] : memref<2x1x32xf32, #tpu.memory_space<vmem>>, vector<1x1x32xf32>
    %499 = vector.shape_cast %498 : vector<1x1x32xf32> to vector<1x32xf32>
    %cst_249 = arith.constant dense<0.000000e+00> : vector<16x96xf32>
    %500 = tpu.matmul %19, %461, %cst_249 {dimension_numbers = #tpu.dot_dimension_numbers<[1], [0], [0], [1], [0, 0, 1, 1], [], []>} : vector<16x32xf32>, vector<32x96xf32>, vector<16x96xf32> -> vector<16x96xf32>
    %501 = vector.broadcast %463 : vector<1x96xf32> to vector<16x96xf32>
    %502 = arith.addf %500, %501 : vector<16x96xf32>
    %503 = vector.extract_strided_slice %502 {offsets = [0, 0], sizes = [16, 32], strides = [1, 1]} : vector<16x96xf32> to vector<16x32xf32>
    %504 = vector.extract_strided_slice %502 {offsets = [0, 32], sizes = [16, 32], strides = [1, 1]} : vector<16x96xf32> to vector<16x32xf32>
    %505 = vector.extract_strided_slice %502 {offsets = [0, 64], sizes = [16, 32], strides = [1, 1]} : vector<16x96xf32> to vector<16x32xf32>
    %506 = vector.extract_strided_slice %503 {offsets = [0, 0], sizes = [8, 32], strides = [1, 1]} : vector<16x32xf32> to vector<8x32xf32>
    %507 = vector.extract_strided_slice %504 {offsets = [0, 0], sizes = [8, 32], strides = [1, 1]} : vector<16x32xf32> to vector<8x32xf32>
    %508 = vector.extract_strided_slice %505 {offsets = [0, 0], sizes = [8, 32], strides = [1, 1]} : vector<16x32xf32> to vector<8x32xf32>
    %c0_250 = arith.constant 0 : index
    %c0_251 = arith.constant 0 : index
    %c0_252 = arith.constant 0 : index
    %509 = vector.load %arg7[%c0_250, %c0_251, %c0_252] : memref<2x8x8xf32, #tpu.memory_space<vmem>>, vector<1x8x8xf32>
    %510 = vector.shape_cast %509 : vector<1x8x8xf32> to vector<8x8xf32>
    %511 = vector.extract_strided_slice %506 {offsets = [0, 0], sizes = [8, 8], strides = [1, 1]} : vector<8x32xf32> to vector<8x8xf32>
    %512 = vector.extract_strided_slice %507 {offsets = [0, 0], sizes = [8, 8], strides = [1, 1]} : vector<8x32xf32> to vector<8x8xf32>
    %cst_253 = arith.constant dense<0.000000e+00> : vector<8x8xf32>
    %513 = tpu.matmul %511, %512, %cst_253 {dimension_numbers = #tpu.dot_dimension_numbers<[1], [1], [0], [0], [0, 0, 1, 0], [], []>} : vector<8x8xf32>, vector<8x8xf32>, vector<8x8xf32> -> vector<8x8xf32>
    %514 = arith.addf %513, %510 : vector<8x8xf32>
    %cst_254 = arith.constant dense<0xFF800000> : vector<8xf32>
    %515 = vector.multi_reduction <maximumf>, %514, %cst_254 [1] : vector<8x8xf32> to vector<8xf32>
    %516 = vector.shape_cast %515 : vector<8xf32> to vector<8x1xf32>
    %517 = vector.broadcast %516 : vector<8x1xf32> to vector<8x8xf32>
    %518 = arith.subf %514, %517 : vector<8x8xf32>
    %519 = math.exp %518 : vector<8x8xf32>
    %cst_255 = arith.constant dense<0.000000e+00> : vector<8xf32>
    %520 = vector.multi_reduction <add>, %519, %cst_255 [1] : vector<8x8xf32> to vector<8xf32>
    %521 = vector.shape_cast %520 : vector<8xf32> to vector<8x1xf32>
    %522 = vector.broadcast %521 : vector<8x1xf32> to vector<8x8xf32>
    %523 = arith.divf %519, %522 : vector<8x8xf32>
    %524 = vector.extract_strided_slice %508 {offsets = [0, 0], sizes = [8, 8], strides = [1, 1]} : vector<8x32xf32> to vector<8x8xf32>
    %cst_256 = arith.constant dense<0.000000e+00> : vector<8x8xf32>
    %525 = tpu.matmul %523, %524, %cst_256 {dimension_numbers = #tpu.dot_dimension_numbers<[1], [0], [0], [1], [0, 0, 1, 1], [], []>} : vector<8x8xf32>, vector<8x8xf32>, vector<8x8xf32> -> vector<8x8xf32>
    %526 = vector.extract_strided_slice %506 {offsets = [0, 8], sizes = [8, 8], strides = [1, 1]} : vector<8x32xf32> to vector<8x8xf32>
    %527 = vector.extract_strided_slice %507 {offsets = [0, 8], sizes = [8, 8], strides = [1, 1]} : vector<8x32xf32> to vector<8x8xf32>
    %cst_257 = arith.constant dense<0.000000e+00> : vector<8x8xf32>
    %528 = tpu.matmul %526, %527, %cst_257 {dimension_numbers = #tpu.dot_dimension_numbers<[1], [1], [0], [0], [0, 0, 1, 0], [], []>} : vector<8x8xf32>, vector<8x8xf32>, vector<8x8xf32> -> vector<8x8xf32>
    %529 = arith.addf %528, %510 : vector<8x8xf32>
    %cst_258 = arith.constant dense<0xFF800000> : vector<8xf32>
    %530 = vector.multi_reduction <maximumf>, %529, %cst_258 [1] : vector<8x8xf32> to vector<8xf32>
    %531 = vector.shape_cast %530 : vector<8xf32> to vector<8x1xf32>
    %532 = vector.broadcast %531 : vector<8x1xf32> to vector<8x8xf32>
    %533 = arith.subf %529, %532 : vector<8x8xf32>
    %534 = math.exp %533 : vector<8x8xf32>
    %cst_259 = arith.constant dense<0.000000e+00> : vector<8xf32>
    %535 = vector.multi_reduction <add>, %534, %cst_259 [1] : vector<8x8xf32> to vector<8xf32>
    %536 = vector.shape_cast %535 : vector<8xf32> to vector<8x1xf32>
    %537 = vector.broadcast %536 : vector<8x1xf32> to vector<8x8xf32>
    %538 = arith.divf %534, %537 : vector<8x8xf32>
    %539 = vector.extract_strided_slice %508 {offsets = [0, 8], sizes = [8, 8], strides = [1, 1]} : vector<8x32xf32> to vector<8x8xf32>
    %cst_260 = arith.constant dense<0.000000e+00> : vector<8x8xf32>
    %540 = tpu.matmul %538, %539, %cst_260 {dimension_numbers = #tpu.dot_dimension_numbers<[1], [0], [0], [1], [0, 0, 1, 1], [], []>} : vector<8x8xf32>, vector<8x8xf32>, vector<8x8xf32> -> vector<8x8xf32>
    %541 = vector.extract_strided_slice %506 {offsets = [0, 16], sizes = [8, 8], strides = [1, 1]} : vector<8x32xf32> to vector<8x8xf32>
    %542 = vector.extract_strided_slice %507 {offsets = [0, 16], sizes = [8, 8], strides = [1, 1]} : vector<8x32xf32> to vector<8x8xf32>
    %cst_261 = arith.constant dense<0.000000e+00> : vector<8x8xf32>
    %543 = tpu.matmul %541, %542, %cst_261 {dimension_numbers = #tpu.dot_dimension_numbers<[1], [1], [0], [0], [0, 0, 1, 0], [], []>} : vector<8x8xf32>, vector<8x8xf32>, vector<8x8xf32> -> vector<8x8xf32>
    %544 = arith.addf %543, %510 : vector<8x8xf32>
    %cst_262 = arith.constant dense<0xFF800000> : vector<8xf32>
    %545 = vector.multi_reduction <maximumf>, %544, %cst_262 [1] : vector<8x8xf32> to vector<8xf32>
    %546 = vector.shape_cast %545 : vector<8xf32> to vector<8x1xf32>
    %547 = vector.broadcast %546 : vector<8x1xf32> to vector<8x8xf32>
    %548 = arith.subf %544, %547 : vector<8x8xf32>
    %549 = math.exp %548 : vector<8x8xf32>
    %cst_263 = arith.constant dense<0.000000e+00> : vector<8xf32>
    %550 = vector.multi_reduction <add>, %549, %cst_263 [1] : vector<8x8xf32> to vector<8xf32>
    %551 = vector.shape_cast %550 : vector<8xf32> to vector<8x1xf32>
    %552 = vector.broadcast %551 : vector<8x1xf32> to vector<8x8xf32>
    %553 = arith.divf %549, %552 : vector<8x8xf32>
    %554 = vector.extract_strided_slice %508 {offsets = [0, 16], sizes = [8, 8], strides = [1, 1]} : vector<8x32xf32> to vector<8x8xf32>
    %cst_264 = arith.constant dense<0.000000e+00> : vector<8x8xf32>
    %555 = tpu.matmul %553, %554, %cst_264 {dimension_numbers = #tpu.dot_dimension_numbers<[1], [0], [0], [1], [0, 0, 1, 1], [], []>} : vector<8x8xf32>, vector<8x8xf32>, vector<8x8xf32> -> vector<8x8xf32>
    %556 = vector.extract_strided_slice %506 {offsets = [0, 24], sizes = [8, 8], strides = [1, 1]} : vector<8x32xf32> to vector<8x8xf32>
    %557 = vector.extract_strided_slice %507 {offsets = [0, 24], sizes = [8, 8], strides = [1, 1]} : vector<8x32xf32> to vector<8x8xf32>
    %cst_265 = arith.constant dense<0.000000e+00> : vector<8x8xf32>
    %558 = tpu.matmul %556, %557, %cst_265 {dimension_numbers = #tpu.dot_dimension_numbers<[1], [1], [0], [0], [0, 0, 1, 0], [], []>} : vector<8x8xf32>, vector<8x8xf32>, vector<8x8xf32> -> vector<8x8xf32>
    %559 = arith.addf %558, %510 : vector<8x8xf32>
    %cst_266 = arith.constant dense<0xFF800000> : vector<8xf32>
    %560 = vector.multi_reduction <maximumf>, %559, %cst_266 [1] : vector<8x8xf32> to vector<8xf32>
    %561 = vector.shape_cast %560 : vector<8xf32> to vector<8x1xf32>
    %562 = vector.broadcast %561 : vector<8x1xf32> to vector<8x8xf32>
    %563 = arith.subf %559, %562 : vector<8x8xf32>
    %564 = math.exp %563 : vector<8x8xf32>
    %cst_267 = arith.constant dense<0.000000e+00> : vector<8xf32>
    %565 = vector.multi_reduction <add>, %564, %cst_267 [1] : vector<8x8xf32> to vector<8xf32>
    %566 = vector.shape_cast %565 : vector<8xf32> to vector<8x1xf32>
    %567 = vector.broadcast %566 : vector<8x1xf32> to vector<8x8xf32>
    %568 = arith.divf %564, %567 : vector<8x8xf32>
    %569 = vector.extract_strided_slice %508 {offsets = [0, 24], sizes = [8, 8], strides = [1, 1]} : vector<8x32xf32> to vector<8x8xf32>
    %cst_268 = arith.constant dense<0.000000e+00> : vector<8x8xf32>
    %570 = tpu.matmul %568, %569, %cst_268 {dimension_numbers = #tpu.dot_dimension_numbers<[1], [0], [0], [1], [0, 0, 1, 1], [], []>} : vector<8x8xf32>, vector<8x8xf32>, vector<8x8xf32> -> vector<8x8xf32>
    %571 = tpu.concatenate %525, %540, %555, %570 in 1 : vector<8x8xf32>, vector<8x8xf32>, vector<8x8xf32>, vector<8x8xf32> -> vector<8x32xf32>
    %572 = vector.extract_strided_slice %503 {offsets = [8, 0], sizes = [8, 32], strides = [1, 1]} : vector<16x32xf32> to vector<8x32xf32>
    %573 = vector.extract_strided_slice %504 {offsets = [8, 0], sizes = [8, 32], strides = [1, 1]} : vector<16x32xf32> to vector<8x32xf32>
    %574 = vector.extract_strided_slice %505 {offsets = [8, 0], sizes = [8, 32], strides = [1, 1]} : vector<16x32xf32> to vector<8x32xf32>
    %c1_269 = arith.constant 1 : index
    %c0_270 = arith.constant 0 : index
    %c0_271 = arith.constant 0 : index
    %575 = vector.load %arg7[%c1_269, %c0_270, %c0_271] : memref<2x8x8xf32, #tpu.memory_space<vmem>>, vector<1x8x8xf32>
    %576 = vector.shape_cast %575 : vector<1x8x8xf32> to vector<8x8xf32>
    %577 = vector.extract_strided_slice %572 {offsets = [0, 0], sizes = [8, 8], strides = [1, 1]} : vector<8x32xf32> to vector<8x8xf32>
    %578 = vector.extract_strided_slice %573 {offsets = [0, 0], sizes = [8, 8], strides = [1, 1]} : vector<8x32xf32> to vector<8x8xf32>
    %cst_272 = arith.constant dense<0.000000e+00> : vector<8x8xf32>
    %579 = tpu.matmul %577, %578, %cst_272 {dimension_numbers = #tpu.dot_dimension_numbers<[1], [1], [0], [0], [0, 0, 1, 0], [], []>} : vector<8x8xf32>, vector<8x8xf32>, vector<8x8xf32> -> vector<8x8xf32>
    %580 = arith.addf %579, %576 : vector<8x8xf32>
    %cst_273 = arith.constant dense<0xFF800000> : vector<8xf32>
    %581 = vector.multi_reduction <maximumf>, %580, %cst_273 [1] : vector<8x8xf32> to vector<8xf32>
    %582 = vector.shape_cast %581 : vector<8xf32> to vector<8x1xf32>
    %583 = vector.broadcast %582 : vector<8x1xf32> to vector<8x8xf32>
    %584 = arith.subf %580, %583 : vector<8x8xf32>
    %585 = math.exp %584 : vector<8x8xf32>
    %cst_274 = arith.constant dense<0.000000e+00> : vector<8xf32>
    %586 = vector.multi_reduction <add>, %585, %cst_274 [1] : vector<8x8xf32> to vector<8xf32>
    %587 = vector.shape_cast %586 : vector<8xf32> to vector<8x1xf32>
    %588 = vector.broadcast %587 : vector<8x1xf32> to vector<8x8xf32>
    %589 = arith.divf %585, %588 : vector<8x8xf32>
    %590 = vector.extract_strided_slice %574 {offsets = [0, 0], sizes = [8, 8], strides = [1, 1]} : vector<8x32xf32> to vector<8x8xf32>
    %cst_275 = arith.constant dense<0.000000e+00> : vector<8x8xf32>
    %591 = tpu.matmul %589, %590, %cst_275 {dimension_numbers = #tpu.dot_dimension_numbers<[1], [0], [0], [1], [0, 0, 1, 1], [], []>} : vector<8x8xf32>, vector<8x8xf32>, vector<8x8xf32> -> vector<8x8xf32>
    %592 = vector.extract_strided_slice %572 {offsets = [0, 8], sizes = [8, 8], strides = [1, 1]} : vector<8x32xf32> to vector<8x8xf32>
    %593 = vector.extract_strided_slice %573 {offsets = [0, 8], sizes = [8, 8], strides = [1, 1]} : vector<8x32xf32> to vector<8x8xf32>
    %cst_276 = arith.constant dense<0.000000e+00> : vector<8x8xf32>
    %594 = tpu.matmul %592, %593, %cst_276 {dimension_numbers = #tpu.dot_dimension_numbers<[1], [1], [0], [0], [0, 0, 1, 0], [], []>} : vector<8x8xf32>, vector<8x8xf32>, vector<8x8xf32> -> vector<8x8xf32>
    %595 = arith.addf %594, %576 : vector<8x8xf32>
    %cst_277 = arith.constant dense<0xFF800000> : vector<8xf32>
    %596 = vector.multi_reduction <maximumf>, %595, %cst_277 [1] : vector<8x8xf32> to vector<8xf32>
    %597 = vector.shape_cast %596 : vector<8xf32> to vector<8x1xf32>
    %598 = vector.broadcast %597 : vector<8x1xf32> to vector<8x8xf32>
    %599 = arith.subf %595, %598 : vector<8x8xf32>
    %600 = math.exp %599 : vector<8x8xf32>
    %cst_278 = arith.constant dense<0.000000e+00> : vector<8xf32>
    %601 = vector.multi_reduction <add>, %600, %cst_278 [1] : vector<8x8xf32> to vector<8xf32>
    %602 = vector.shape_cast %601 : vector<8xf32> to vector<8x1xf32>
    %603 = vector.broadcast %602 : vector<8x1xf32> to vector<8x8xf32>
    %604 = arith.divf %600, %603 : vector<8x8xf32>
    %605 = vector.extract_strided_slice %574 {offsets = [0, 8], sizes = [8, 8], strides = [1, 1]} : vector<8x32xf32> to vector<8x8xf32>
    %cst_279 = arith.constant dense<0.000000e+00> : vector<8x8xf32>
    %606 = tpu.matmul %604, %605, %cst_279 {dimension_numbers = #tpu.dot_dimension_numbers<[1], [0], [0], [1], [0, 0, 1, 1], [], []>} : vector<8x8xf32>, vector<8x8xf32>, vector<8x8xf32> -> vector<8x8xf32>
    %607 = vector.extract_strided_slice %572 {offsets = [0, 16], sizes = [8, 8], strides = [1, 1]} : vector<8x32xf32> to vector<8x8xf32>
    %608 = vector.extract_strided_slice %573 {offsets = [0, 16], sizes = [8, 8], strides = [1, 1]} : vector<8x32xf32> to vector<8x8xf32>
    %cst_280 = arith.constant dense<0.000000e+00> : vector<8x8xf32>
    %609 = tpu.matmul %607, %608, %cst_280 {dimension_numbers = #tpu.dot_dimension_numbers<[1], [1], [0], [0], [0, 0, 1, 0], [], []>} : vector<8x8xf32>, vector<8x8xf32>, vector<8x8xf32> -> vector<8x8xf32>
    %610 = arith.addf %609, %576 : vector<8x8xf32>
    %cst_281 = arith.constant dense<0xFF800000> : vector<8xf32>
    %611 = vector.multi_reduction <maximumf>, %610, %cst_281 [1] : vector<8x8xf32> to vector<8xf32>
    %612 = vector.shape_cast %611 : vector<8xf32> to vector<8x1xf32>
    %613 = vector.broadcast %612 : vector<8x1xf32> to vector<8x8xf32>
    %614 = arith.subf %610, %613 : vector<8x8xf32>
    %615 = math.exp %614 : vector<8x8xf32>
    %cst_282 = arith.constant dense<0.000000e+00> : vector<8xf32>
    %616 = vector.multi_reduction <add>, %615, %cst_282 [1] : vector<8x8xf32> to vector<8xf32>
    %617 = vector.shape_cast %616 : vector<8xf32> to vector<8x1xf32>
    %618 = vector.broadcast %617 : vector<8x1xf32> to vector<8x8xf32>
    %619 = arith.divf %615, %618 : vector<8x8xf32>
    %620 = vector.extract_strided_slice %574 {offsets = [0, 16], sizes = [8, 8], strides = [1, 1]} : vector<8x32xf32> to vector<8x8xf32>
    %cst_283 = arith.constant dense<0.000000e+00> : vector<8x8xf32>
    %621 = tpu.matmul %619, %620, %cst_283 {dimension_numbers = #tpu.dot_dimension_numbers<[1], [0], [0], [1], [0, 0, 1, 1], [], []>} : vector<8x8xf32>, vector<8x8xf32>, vector<8x8xf32> -> vector<8x8xf32>
    %622 = vector.extract_strided_slice %572 {offsets = [0, 24], sizes = [8, 8], strides = [1, 1]} : vector<8x32xf32> to vector<8x8xf32>
    %623 = vector.extract_strided_slice %573 {offsets = [0, 24], sizes = [8, 8], strides = [1, 1]} : vector<8x32xf32> to vector<8x8xf32>
    %cst_284 = arith.constant dense<0.000000e+00> : vector<8x8xf32>
    %624 = tpu.matmul %622, %623, %cst_284 {dimension_numbers = #tpu.dot_dimension_numbers<[1], [1], [0], [0], [0, 0, 1, 0], [], []>} : vector<8x8xf32>, vector<8x8xf32>, vector<8x8xf32> -> vector<8x8xf32>
    %625 = arith.addf %624, %576 : vector<8x8xf32>
    %cst_285 = arith.constant dense<0xFF800000> : vector<8xf32>
    %626 = vector.multi_reduction <maximumf>, %625, %cst_285 [1] : vector<8x8xf32> to vector<8xf32>
    %627 = vector.shape_cast %626 : vector<8xf32> to vector<8x1xf32>
    %628 = vector.broadcast %627 : vector<8x1xf32> to vector<8x8xf32>
    %629 = arith.subf %625, %628 : vector<8x8xf32>
    %630 = math.exp %629 : vector<8x8xf32>
    %cst_286 = arith.constant dense<0.000000e+00> : vector<8xf32>
    %631 = vector.multi_reduction <add>, %630, %cst_286 [1] : vector<8x8xf32> to vector<8xf32>
    %632 = vector.shape_cast %631 : vector<8xf32> to vector<8x1xf32>
    %633 = vector.broadcast %632 : vector<8x1xf32> to vector<8x8xf32>
    %634 = arith.divf %630, %633 : vector<8x8xf32>
    %635 = vector.extract_strided_slice %574 {offsets = [0, 24], sizes = [8, 8], strides = [1, 1]} : vector<8x32xf32> to vector<8x8xf32>
    %cst_287 = arith.constant dense<0.000000e+00> : vector<8x8xf32>
    %636 = tpu.matmul %634, %635, %cst_287 {dimension_numbers = #tpu.dot_dimension_numbers<[1], [0], [0], [1], [0, 0, 1, 1], [], []>} : vector<8x8xf32>, vector<8x8xf32>, vector<8x8xf32> -> vector<8x8xf32>
    %637 = tpu.concatenate %591, %606, %621, %636 in 1 : vector<8x8xf32>, vector<8x8xf32>, vector<8x8xf32>, vector<8x8xf32> -> vector<8x32xf32>
    %638 = tpu.concatenate %571, %637 in 0 : vector<8x32xf32>, vector<8x32xf32> -> vector<16x32xf32>
    %cst_288 = arith.constant dense<0.000000e+00> : vector<16x32xf32>
    %639 = tpu.matmul %638, %465, %cst_288 {dimension_numbers = #tpu.dot_dimension_numbers<[1], [0], [0], [1], [0, 0, 1, 1], [], []>} : vector<16x32xf32>, vector<32x32xf32>, vector<16x32xf32> -> vector<16x32xf32>
    %640 = vector.broadcast %467 : vector<1x32xf32> to vector<16x32xf32>
    %641 = arith.addf %639, %640 : vector<16x32xf32>
    %642 = arith.addf %19, %641 : vector<16x32xf32>
    %cst_289 = arith.constant dense<0.000000e+00> : vector<16xf32>
    %643 = vector.multi_reduction <add>, %642, %cst_289 [1] : vector<16x32xf32> to vector<16xf32>
    %644 = vector.shape_cast %643 : vector<16xf32> to vector<16x1xf32>
    %cst_290 = arith.constant 3.200000e+01 : f32
    %645 = vector.broadcast %cst_290 : f32 to vector<16x1xf32>
    %646 = arith.divf %644, %645 : vector<16x1xf32>
    %647 = vector.broadcast %646 : vector<16x1xf32> to vector<16x32xf32>
    %648 = arith.subf %642, %647 : vector<16x32xf32>
    %649 = arith.mulf %648, %648 : vector<16x32xf32>
    %cst_291 = arith.constant dense<0.000000e+00> : vector<16xf32>
    %650 = vector.multi_reduction <add>, %649, %cst_291 [1] : vector<16x32xf32> to vector<16xf32>
    %651 = vector.shape_cast %650 : vector<16xf32> to vector<16x1xf32>
    %cst_292 = arith.constant 3.200000e+01 : f32
    %652 = vector.broadcast %cst_292 : f32 to vector<16x1xf32>
    %653 = arith.divf %651, %652 : vector<16x1xf32>
    %654 = vector.broadcast %646 : vector<16x1xf32> to vector<16x32xf32>
    %655 = arith.subf %642, %654 : vector<16x32xf32>
    %cst_293 = arith.constant 9.99999974E-6 : f32
    %656 = vector.broadcast %cst_293 : f32 to vector<16x1xf32>
    %657 = arith.addf %653, %656 : vector<16x1xf32>
    %658 = math.rsqrt %657 : vector<16x1xf32>
    %659 = vector.broadcast %658 : vector<16x1xf32> to vector<16x32xf32>
    %660 = arith.mulf %655, %659 : vector<16x32xf32>
    %661 = vector.broadcast %469 : vector<1x32xf32> to vector<16x32xf32>
    %662 = arith.mulf %660, %661 : vector<16x32xf32>
    %663 = vector.broadcast %471 : vector<1x32xf32> to vector<16x32xf32>
    %664 = arith.addf %662, %663 : vector<16x32xf32>
    %cst_294 = arith.constant dense<0.000000e+00> : vector<16x32xf32>
    %665 = tpu.matmul %664, %473, %cst_294 {dimension_numbers = #tpu.dot_dimension_numbers<[1], [0], [0], [1], [0, 0, 1, 1], [], []>} : vector<16x32xf32>, vector<32x32xf32>, vector<16x32xf32> -> vector<16x32xf32>
    %666 = vector.broadcast %475 : vector<1x32xf32> to vector<16x32xf32>
    %667 = arith.addf %665, %666 : vector<16x32xf32>
    %cst_295 = arith.constant dense<0.000000e+00> : vector<16x64xf32>
    %668 = tpu.matmul %459, %477, %cst_295 {dimension_numbers = #tpu.dot_dimension_numbers<[1], [0], [0], [1], [0, 0, 1, 1], [], []>} : vector<16x32xf32>, vector<32x64xf32>, vector<16x64xf32> -> vector<16x64xf32>
    %669 = vector.broadcast %479 : vector<1x64xf32> to vector<16x64xf32>
    %670 = arith.addf %668, %669 : vector<16x64xf32>
    %671 = vector.extract_strided_slice %670 {offsets = [0, 0], sizes = [16, 32], strides = [1, 1]} : vector<16x64xf32> to vector<16x32xf32>
    %672 = vector.extract_strided_slice %670 {offsets = [0, 32], sizes = [16, 32], strides = [1, 1]} : vector<16x64xf32> to vector<16x32xf32>
    %673 = vector.extract_strided_slice %667 {offsets = [0, 0], sizes = [8, 32], strides = [1, 1]} : vector<16x32xf32> to vector<8x32xf32>
    %674 = vector.extract_strided_slice %671 {offsets = [0, 0], sizes = [8, 32], strides = [1, 1]} : vector<16x32xf32> to vector<8x32xf32>
    %675 = vector.extract_strided_slice %672 {offsets = [0, 0], sizes = [8, 32], strides = [1, 1]} : vector<16x32xf32> to vector<8x32xf32>
    %c0_296 = arith.constant 0 : index
    %c0_297 = arith.constant 0 : index
    %c0_298 = arith.constant 0 : index
    %676 = vector.load %arg8[%c0_296, %c0_297, %c0_298] : memref<2x8x8xf32, #tpu.memory_space<vmem>>, vector<1x8x8xf32>
    %677 = vector.shape_cast %676 : vector<1x8x8xf32> to vector<8x8xf32>
    %678 = vector.extract_strided_slice %673 {offsets = [0, 0], sizes = [8, 8], strides = [1, 1]} : vector<8x32xf32> to vector<8x8xf32>
    %679 = vector.extract_strided_slice %674 {offsets = [0, 0], sizes = [8, 8], strides = [1, 1]} : vector<8x32xf32> to vector<8x8xf32>
    %cst_299 = arith.constant dense<0.000000e+00> : vector<8x8xf32>
    %680 = tpu.matmul %678, %679, %cst_299 {dimension_numbers = #tpu.dot_dimension_numbers<[1], [1], [0], [0], [0, 0, 1, 0], [], []>} : vector<8x8xf32>, vector<8x8xf32>, vector<8x8xf32> -> vector<8x8xf32>
    %681 = arith.addf %680, %677 : vector<8x8xf32>
    %cst_300 = arith.constant dense<0xFF800000> : vector<8xf32>
    %682 = vector.multi_reduction <maximumf>, %681, %cst_300 [1] : vector<8x8xf32> to vector<8xf32>
    %683 = vector.shape_cast %682 : vector<8xf32> to vector<8x1xf32>
    %684 = vector.broadcast %683 : vector<8x1xf32> to vector<8x8xf32>
    %685 = arith.subf %681, %684 : vector<8x8xf32>
    %686 = math.exp %685 : vector<8x8xf32>
    %cst_301 = arith.constant dense<0.000000e+00> : vector<8xf32>
    %687 = vector.multi_reduction <add>, %686, %cst_301 [1] : vector<8x8xf32> to vector<8xf32>
    %688 = vector.shape_cast %687 : vector<8xf32> to vector<8x1xf32>
    %689 = vector.broadcast %688 : vector<8x1xf32> to vector<8x8xf32>
    %690 = arith.divf %686, %689 : vector<8x8xf32>
    %691 = vector.extract_strided_slice %675 {offsets = [0, 0], sizes = [8, 8], strides = [1, 1]} : vector<8x32xf32> to vector<8x8xf32>
    %cst_302 = arith.constant dense<0.000000e+00> : vector<8x8xf32>
    %692 = tpu.matmul %690, %691, %cst_302 {dimension_numbers = #tpu.dot_dimension_numbers<[1], [0], [0], [1], [0, 0, 1, 1], [], []>} : vector<8x8xf32>, vector<8x8xf32>, vector<8x8xf32> -> vector<8x8xf32>
    %693 = vector.extract_strided_slice %673 {offsets = [0, 8], sizes = [8, 8], strides = [1, 1]} : vector<8x32xf32> to vector<8x8xf32>
    %694 = vector.extract_strided_slice %674 {offsets = [0, 8], sizes = [8, 8], strides = [1, 1]} : vector<8x32xf32> to vector<8x8xf32>
    %cst_303 = arith.constant dense<0.000000e+00> : vector<8x8xf32>
    %695 = tpu.matmul %693, %694, %cst_303 {dimension_numbers = #tpu.dot_dimension_numbers<[1], [1], [0], [0], [0, 0, 1, 0], [], []>} : vector<8x8xf32>, vector<8x8xf32>, vector<8x8xf32> -> vector<8x8xf32>
    %696 = arith.addf %695, %677 : vector<8x8xf32>
    %cst_304 = arith.constant dense<0xFF800000> : vector<8xf32>
    %697 = vector.multi_reduction <maximumf>, %696, %cst_304 [1] : vector<8x8xf32> to vector<8xf32>
    %698 = vector.shape_cast %697 : vector<8xf32> to vector<8x1xf32>
    %699 = vector.broadcast %698 : vector<8x1xf32> to vector<8x8xf32>
    %700 = arith.subf %696, %699 : vector<8x8xf32>
    %701 = math.exp %700 : vector<8x8xf32>
    %cst_305 = arith.constant dense<0.000000e+00> : vector<8xf32>
    %702 = vector.multi_reduction <add>, %701, %cst_305 [1] : vector<8x8xf32> to vector<8xf32>
    %703 = vector.shape_cast %702 : vector<8xf32> to vector<8x1xf32>
    %704 = vector.broadcast %703 : vector<8x1xf32> to vector<8x8xf32>
    %705 = arith.divf %701, %704 : vector<8x8xf32>
    %706 = vector.extract_strided_slice %675 {offsets = [0, 8], sizes = [8, 8], strides = [1, 1]} : vector<8x32xf32> to vector<8x8xf32>
    %cst_306 = arith.constant dense<0.000000e+00> : vector<8x8xf32>
    %707 = tpu.matmul %705, %706, %cst_306 {dimension_numbers = #tpu.dot_dimension_numbers<[1], [0], [0], [1], [0, 0, 1, 1], [], []>} : vector<8x8xf32>, vector<8x8xf32>, vector<8x8xf32> -> vector<8x8xf32>
    %708 = vector.extract_strided_slice %673 {offsets = [0, 16], sizes = [8, 8], strides = [1, 1]} : vector<8x32xf32> to vector<8x8xf32>
    %709 = vector.extract_strided_slice %674 {offsets = [0, 16], sizes = [8, 8], strides = [1, 1]} : vector<8x32xf32> to vector<8x8xf32>
    %cst_307 = arith.constant dense<0.000000e+00> : vector<8x8xf32>
    %710 = tpu.matmul %708, %709, %cst_307 {dimension_numbers = #tpu.dot_dimension_numbers<[1], [1], [0], [0], [0, 0, 1, 0], [], []>} : vector<8x8xf32>, vector<8x8xf32>, vector<8x8xf32> -> vector<8x8xf32>
    %711 = arith.addf %710, %677 : vector<8x8xf32>
    %cst_308 = arith.constant dense<0xFF800000> : vector<8xf32>
    %712 = vector.multi_reduction <maximumf>, %711, %cst_308 [1] : vector<8x8xf32> to vector<8xf32>
    %713 = vector.shape_cast %712 : vector<8xf32> to vector<8x1xf32>
    %714 = vector.broadcast %713 : vector<8x1xf32> to vector<8x8xf32>
    %715 = arith.subf %711, %714 : vector<8x8xf32>
    %716 = math.exp %715 : vector<8x8xf32>
    %cst_309 = arith.constant dense<0.000000e+00> : vector<8xf32>
    %717 = vector.multi_reduction <add>, %716, %cst_309 [1] : vector<8x8xf32> to vector<8xf32>
    %718 = vector.shape_cast %717 : vector<8xf32> to vector<8x1xf32>
    %719 = vector.broadcast %718 : vector<8x1xf32> to vector<8x8xf32>
    %720 = arith.divf %716, %719 : vector<8x8xf32>
    %721 = vector.extract_strided_slice %675 {offsets = [0, 16], sizes = [8, 8], strides = [1, 1]} : vector<8x32xf32> to vector<8x8xf32>
    %cst_310 = arith.constant dense<0.000000e+00> : vector<8x8xf32>
    %722 = tpu.matmul %720, %721, %cst_310 {dimension_numbers = #tpu.dot_dimension_numbers<[1], [0], [0], [1], [0, 0, 1, 1], [], []>} : vector<8x8xf32>, vector<8x8xf32>, vector<8x8xf32> -> vector<8x8xf32>
    %723 = vector.extract_strided_slice %673 {offsets = [0, 24], sizes = [8, 8], strides = [1, 1]} : vector<8x32xf32> to vector<8x8xf32>
    %724 = vector.extract_strided_slice %674 {offsets = [0, 24], sizes = [8, 8], strides = [1, 1]} : vector<8x32xf32> to vector<8x8xf32>
    %cst_311 = arith.constant dense<0.000000e+00> : vector<8x8xf32>
    %725 = tpu.matmul %723, %724, %cst_311 {dimension_numbers = #tpu.dot_dimension_numbers<[1], [1], [0], [0], [0, 0, 1, 0], [], []>} : vector<8x8xf32>, vector<8x8xf32>, vector<8x8xf32> -> vector<8x8xf32>
    %726 = arith.addf %725, %677 : vector<8x8xf32>
    %cst_312 = arith.constant dense<0xFF800000> : vector<8xf32>
    %727 = vector.multi_reduction <maximumf>, %726, %cst_312 [1] : vector<8x8xf32> to vector<8xf32>
    %728 = vector.shape_cast %727 : vector<8xf32> to vector<8x1xf32>
    %729 = vector.broadcast %728 : vector<8x1xf32> to vector<8x8xf32>
    %730 = arith.subf %726, %729 : vector<8x8xf32>
    %731 = math.exp %730 : vector<8x8xf32>
    %cst_313 = arith.constant dense<0.000000e+00> : vector<8xf32>
    %732 = vector.multi_reduction <add>, %731, %cst_313 [1] : vector<8x8xf32> to vector<8xf32>
    %733 = vector.shape_cast %732 : vector<8xf32> to vector<8x1xf32>
    %734 = vector.broadcast %733 : vector<8x1xf32> to vector<8x8xf32>
    %735 = arith.divf %731, %734 : vector<8x8xf32>
    %736 = vector.extract_strided_slice %675 {offsets = [0, 24], sizes = [8, 8], strides = [1, 1]} : vector<8x32xf32> to vector<8x8xf32>
    %cst_314 = arith.constant dense<0.000000e+00> : vector<8x8xf32>
    %737 = tpu.matmul %735, %736, %cst_314 {dimension_numbers = #tpu.dot_dimension_numbers<[1], [0], [0], [1], [0, 0, 1, 1], [], []>} : vector<8x8xf32>, vector<8x8xf32>, vector<8x8xf32> -> vector<8x8xf32>
    %738 = tpu.concatenate %692, %707, %722, %737 in 1 : vector<8x8xf32>, vector<8x8xf32>, vector<8x8xf32>, vector<8x8xf32> -> vector<8x32xf32>
    %739 = vector.extract_strided_slice %667 {offsets = [8, 0], sizes = [8, 32], strides = [1, 1]} : vector<16x32xf32> to vector<8x32xf32>
    %740 = vector.extract_strided_slice %671 {offsets = [8, 0], sizes = [8, 32], strides = [1, 1]} : vector<16x32xf32> to vector<8x32xf32>
    %741 = vector.extract_strided_slice %672 {offsets = [8, 0], sizes = [8, 32], strides = [1, 1]} : vector<16x32xf32> to vector<8x32xf32>
    %c1_315 = arith.constant 1 : index
    %c0_316 = arith.constant 0 : index
    %c0_317 = arith.constant 0 : index
    %742 = vector.load %arg8[%c1_315, %c0_316, %c0_317] : memref<2x8x8xf32, #tpu.memory_space<vmem>>, vector<1x8x8xf32>
    %743 = vector.shape_cast %742 : vector<1x8x8xf32> to vector<8x8xf32>
    %744 = vector.extract_strided_slice %739 {offsets = [0, 0], sizes = [8, 8], strides = [1, 1]} : vector<8x32xf32> to vector<8x8xf32>
    %745 = vector.extract_strided_slice %740 {offsets = [0, 0], sizes = [8, 8], strides = [1, 1]} : vector<8x32xf32> to vector<8x8xf32>
    %cst_318 = arith.constant dense<0.000000e+00> : vector<8x8xf32>
    %746 = tpu.matmul %744, %745, %cst_318 {dimension_numbers = #tpu.dot_dimension_numbers<[1], [1], [0], [0], [0, 0, 1, 0], [], []>} : vector<8x8xf32>, vector<8x8xf32>, vector<8x8xf32> -> vector<8x8xf32>
    %747 = arith.addf %746, %743 : vector<8x8xf32>
    %cst_319 = arith.constant dense<0xFF800000> : vector<8xf32>
    %748 = vector.multi_reduction <maximumf>, %747, %cst_319 [1] : vector<8x8xf32> to vector<8xf32>
    %749 = vector.shape_cast %748 : vector<8xf32> to vector<8x1xf32>
    %750 = vector.broadcast %749 : vector<8x1xf32> to vector<8x8xf32>
    %751 = arith.subf %747, %750 : vector<8x8xf32>
    %752 = math.exp %751 : vector<8x8xf32>
    %cst_320 = arith.constant dense<0.000000e+00> : vector<8xf32>
    %753 = vector.multi_reduction <add>, %752, %cst_320 [1] : vector<8x8xf32> to vector<8xf32>
    %754 = vector.shape_cast %753 : vector<8xf32> to vector<8x1xf32>
    %755 = vector.broadcast %754 : vector<8x1xf32> to vector<8x8xf32>
    %756 = arith.divf %752, %755 : vector<8x8xf32>
    %757 = vector.extract_strided_slice %741 {offsets = [0, 0], sizes = [8, 8], strides = [1, 1]} : vector<8x32xf32> to vector<8x8xf32>
    %cst_321 = arith.constant dense<0.000000e+00> : vector<8x8xf32>
    %758 = tpu.matmul %756, %757, %cst_321 {dimension_numbers = #tpu.dot_dimension_numbers<[1], [0], [0], [1], [0, 0, 1, 1], [], []>} : vector<8x8xf32>, vector<8x8xf32>, vector<8x8xf32> -> vector<8x8xf32>
    %759 = vector.extract_strided_slice %739 {offsets = [0, 8], sizes = [8, 8], strides = [1, 1]} : vector<8x32xf32> to vector<8x8xf32>
    %760 = vector.extract_strided_slice %740 {offsets = [0, 8], sizes = [8, 8], strides = [1, 1]} : vector<8x32xf32> to vector<8x8xf32>
    %cst_322 = arith.constant dense<0.000000e+00> : vector<8x8xf32>
    %761 = tpu.matmul %759, %760, %cst_322 {dimension_numbers = #tpu.dot_dimension_numbers<[1], [1], [0], [0], [0, 0, 1, 0], [], []>} : vector<8x8xf32>, vector<8x8xf32>, vector<8x8xf32> -> vector<8x8xf32>
    %762 = arith.addf %761, %743 : vector<8x8xf32>
    %cst_323 = arith.constant dense<0xFF800000> : vector<8xf32>
    %763 = vector.multi_reduction <maximumf>, %762, %cst_323 [1] : vector<8x8xf32> to vector<8xf32>
    %764 = vector.shape_cast %763 : vector<8xf32> to vector<8x1xf32>
    %765 = vector.broadcast %764 : vector<8x1xf32> to vector<8x8xf32>
    %766 = arith.subf %762, %765 : vector<8x8xf32>
    %767 = math.exp %766 : vector<8x8xf32>
    %cst_324 = arith.constant dense<0.000000e+00> : vector<8xf32>
    %768 = vector.multi_reduction <add>, %767, %cst_324 [1] : vector<8x8xf32> to vector<8xf32>
    %769 = vector.shape_cast %768 : vector<8xf32> to vector<8x1xf32>
    %770 = vector.broadcast %769 : vector<8x1xf32> to vector<8x8xf32>
    %771 = arith.divf %767, %770 : vector<8x8xf32>
    %772 = vector.extract_strided_slice %741 {offsets = [0, 8], sizes = [8, 8], strides = [1, 1]} : vector<8x32xf32> to vector<8x8xf32>
    %cst_325 = arith.constant dense<0.000000e+00> : vector<8x8xf32>
    %773 = tpu.matmul %771, %772, %cst_325 {dimension_numbers = #tpu.dot_dimension_numbers<[1], [0], [0], [1], [0, 0, 1, 1], [], []>} : vector<8x8xf32>, vector<8x8xf32>, vector<8x8xf32> -> vector<8x8xf32>
    %774 = vector.extract_strided_slice %739 {offsets = [0, 16], sizes = [8, 8], strides = [1, 1]} : vector<8x32xf32> to vector<8x8xf32>
    %775 = vector.extract_strided_slice %740 {offsets = [0, 16], sizes = [8, 8], strides = [1, 1]} : vector<8x32xf32> to vector<8x8xf32>
    %cst_326 = arith.constant dense<0.000000e+00> : vector<8x8xf32>
    %776 = tpu.matmul %774, %775, %cst_326 {dimension_numbers = #tpu.dot_dimension_numbers<[1], [1], [0], [0], [0, 0, 1, 0], [], []>} : vector<8x8xf32>, vector<8x8xf32>, vector<8x8xf32> -> vector<8x8xf32>
    %777 = arith.addf %776, %743 : vector<8x8xf32>
    %cst_327 = arith.constant dense<0xFF800000> : vector<8xf32>
    %778 = vector.multi_reduction <maximumf>, %777, %cst_327 [1] : vector<8x8xf32> to vector<8xf32>
    %779 = vector.shape_cast %778 : vector<8xf32> to vector<8x1xf32>
    %780 = vector.broadcast %779 : vector<8x1xf32> to vector<8x8xf32>
    %781 = arith.subf %777, %780 : vector<8x8xf32>
    %782 = math.exp %781 : vector<8x8xf32>
    %cst_328 = arith.constant dense<0.000000e+00> : vector<8xf32>
    %783 = vector.multi_reduction <add>, %782, %cst_328 [1] : vector<8x8xf32> to vector<8xf32>
    %784 = vector.shape_cast %783 : vector<8xf32> to vector<8x1xf32>
    %785 = vector.broadcast %784 : vector<8x1xf32> to vector<8x8xf32>
    %786 = arith.divf %782, %785 : vector<8x8xf32>
    %787 = vector.extract_strided_slice %741 {offsets = [0, 16], sizes = [8, 8], strides = [1, 1]} : vector<8x32xf32> to vector<8x8xf32>
    %cst_329 = arith.constant dense<0.000000e+00> : vector<8x8xf32>
    %788 = tpu.matmul %786, %787, %cst_329 {dimension_numbers = #tpu.dot_dimension_numbers<[1], [0], [0], [1], [0, 0, 1, 1], [], []>} : vector<8x8xf32>, vector<8x8xf32>, vector<8x8xf32> -> vector<8x8xf32>
    %789 = vector.extract_strided_slice %739 {offsets = [0, 24], sizes = [8, 8], strides = [1, 1]} : vector<8x32xf32> to vector<8x8xf32>
    %790 = vector.extract_strided_slice %740 {offsets = [0, 24], sizes = [8, 8], strides = [1, 1]} : vector<8x32xf32> to vector<8x8xf32>
    %cst_330 = arith.constant dense<0.000000e+00> : vector<8x8xf32>
    %791 = tpu.matmul %789, %790, %cst_330 {dimension_numbers = #tpu.dot_dimension_numbers<[1], [1], [0], [0], [0, 0, 1, 0], [], []>} : vector<8x8xf32>, vector<8x8xf32>, vector<8x8xf32> -> vector<8x8xf32>
    %792 = arith.addf %791, %743 : vector<8x8xf32>
    %cst_331 = arith.constant dense<0xFF800000> : vector<8xf32>
    %793 = vector.multi_reduction <maximumf>, %792, %cst_331 [1] : vector<8x8xf32> to vector<8xf32>
    %794 = vector.shape_cast %793 : vector<8xf32> to vector<8x1xf32>
    %795 = vector.broadcast %794 : vector<8x1xf32> to vector<8x8xf32>
    %796 = arith.subf %792, %795 : vector<8x8xf32>
    %797 = math.exp %796 : vector<8x8xf32>
    %cst_332 = arith.constant dense<0.000000e+00> : vector<8xf32>
    %798 = vector.multi_reduction <add>, %797, %cst_332 [1] : vector<8x8xf32> to vector<8xf32>
    %799 = vector.shape_cast %798 : vector<8xf32> to vector<8x1xf32>
    %800 = vector.broadcast %799 : vector<8x1xf32> to vector<8x8xf32>
    %801 = arith.divf %797, %800 : vector<8x8xf32>
    %802 = vector.extract_strided_slice %741 {offsets = [0, 24], sizes = [8, 8], strides = [1, 1]} : vector<8x32xf32> to vector<8x8xf32>
    %cst_333 = arith.constant dense<0.000000e+00> : vector<8x8xf32>
    %803 = tpu.matmul %801, %802, %cst_333 {dimension_numbers = #tpu.dot_dimension_numbers<[1], [0], [0], [1], [0, 0, 1, 1], [], []>} : vector<8x8xf32>, vector<8x8xf32>, vector<8x8xf32> -> vector<8x8xf32>
    %804 = tpu.concatenate %758, %773, %788, %803 in 1 : vector<8x8xf32>, vector<8x8xf32>, vector<8x8xf32>, vector<8x8xf32> -> vector<8x32xf32>
    %805 = tpu.concatenate %738, %804 in 0 : vector<8x32xf32>, vector<8x32xf32> -> vector<16x32xf32>
    %cst_334 = arith.constant dense<0.000000e+00> : vector<16x32xf32>
    %806 = tpu.matmul %805, %481, %cst_334 {dimension_numbers = #tpu.dot_dimension_numbers<[1], [0], [0], [1], [0, 0, 1, 1], [], []>} : vector<16x32xf32>, vector<32x32xf32>, vector<16x32xf32> -> vector<16x32xf32>
    %807 = vector.broadcast %483 : vector<1x32xf32> to vector<16x32xf32>
    %808 = arith.addf %806, %807 : vector<16x32xf32>
    %809 = arith.addf %664, %808 : vector<16x32xf32>
    %cst_335 = arith.constant dense<0.000000e+00> : vector<16xf32>
    %810 = vector.multi_reduction <add>, %809, %cst_335 [1] : vector<16x32xf32> to vector<16xf32>
    %811 = vector.shape_cast %810 : vector<16xf32> to vector<16x1xf32>
    %cst_336 = arith.constant 3.200000e+01 : f32
    %812 = vector.broadcast %cst_336 : f32 to vector<16x1xf32>
    %813 = arith.divf %811, %812 : vector<16x1xf32>
    %814 = vector.broadcast %813 : vector<16x1xf32> to vector<16x32xf32>
    %815 = arith.subf %809, %814 : vector<16x32xf32>
    %816 = arith.mulf %815, %815 : vector<16x32xf32>
    %cst_337 = arith.constant dense<0.000000e+00> : vector<16xf32>
    %817 = vector.multi_reduction <add>, %816, %cst_337 [1] : vector<16x32xf32> to vector<16xf32>
    %818 = vector.shape_cast %817 : vector<16xf32> to vector<16x1xf32>
    %cst_338 = arith.constant 3.200000e+01 : f32
    %819 = vector.broadcast %cst_338 : f32 to vector<16x1xf32>
    %820 = arith.divf %818, %819 : vector<16x1xf32>
    %821 = vector.broadcast %813 : vector<16x1xf32> to vector<16x32xf32>
    %822 = arith.subf %809, %821 : vector<16x32xf32>
    %cst_339 = arith.constant 9.99999974E-6 : f32
    %823 = vector.broadcast %cst_339 : f32 to vector<16x1xf32>
    %824 = arith.addf %820, %823 : vector<16x1xf32>
    %825 = math.rsqrt %824 : vector<16x1xf32>
    %826 = vector.broadcast %825 : vector<16x1xf32> to vector<16x32xf32>
    %827 = arith.mulf %822, %826 : vector<16x32xf32>
    %828 = vector.broadcast %485 : vector<1x32xf32> to vector<16x32xf32>
    %829 = arith.mulf %827, %828 : vector<16x32xf32>
    %830 = vector.broadcast %487 : vector<1x32xf32> to vector<16x32xf32>
    %831 = arith.addf %829, %830 : vector<16x32xf32>
    %cst_340 = arith.constant dense<0.000000e+00> : vector<16x64xf32>
    %832 = tpu.matmul %831, %489, %cst_340 {dimension_numbers = #tpu.dot_dimension_numbers<[1], [0], [0], [1], [0, 0, 1, 1], [], []>} : vector<16x32xf32>, vector<32x64xf32>, vector<16x64xf32> -> vector<16x64xf32>
    %833 = vector.broadcast %491 : vector<1x64xf32> to vector<16x64xf32>
    %834 = arith.addf %832, %833 : vector<16x64xf32>
    %cst_341 = arith.constant 0.000000e+00 : f32
    %835 = vector.broadcast %cst_341 : f32 to vector<16x64xf32>
    %836 = arith.maximumf %834, %835 : vector<16x64xf32>
    %cst_342 = arith.constant dense<0.000000e+00> : vector<16x32xf32>
    %837 = tpu.matmul %836, %493, %cst_342 {dimension_numbers = #tpu.dot_dimension_numbers<[1], [0], [0], [1], [0, 0, 1, 1], [], []>} : vector<16x64xf32>, vector<64x32xf32>, vector<16x32xf32> -> vector<16x32xf32>
    %838 = vector.broadcast %495 : vector<1x32xf32> to vector<16x32xf32>
    %839 = arith.addf %837, %838 : vector<16x32xf32>
    %840 = arith.addf %831, %839 : vector<16x32xf32>
    %cst_343 = arith.constant dense<0.000000e+00> : vector<16xf32>
    %841 = vector.multi_reduction <add>, %840, %cst_343 [1] : vector<16x32xf32> to vector<16xf32>
    %842 = vector.shape_cast %841 : vector<16xf32> to vector<16x1xf32>
    %cst_344 = arith.constant 3.200000e+01 : f32
    %843 = vector.broadcast %cst_344 : f32 to vector<16x1xf32>
    %844 = arith.divf %842, %843 : vector<16x1xf32>
    %845 = vector.broadcast %844 : vector<16x1xf32> to vector<16x32xf32>
    %846 = arith.subf %840, %845 : vector<16x32xf32>
    %847 = arith.mulf %846, %846 : vector<16x32xf32>
    %cst_345 = arith.constant dense<0.000000e+00> : vector<16xf32>
    %848 = vector.multi_reduction <add>, %847, %cst_345 [1] : vector<16x32xf32> to vector<16xf32>
    %849 = vector.shape_cast %848 : vector<16xf32> to vector<16x1xf32>
    %cst_346 = arith.constant 3.200000e+01 : f32
    %850 = vector.broadcast %cst_346 : f32 to vector<16x1xf32>
    %851 = arith.divf %849, %850 : vector<16x1xf32>
    %852 = vector.broadcast %844 : vector<16x1xf32> to vector<16x32xf32>
    %853 = arith.subf %840, %852 : vector<16x32xf32>
    %cst_347 = arith.constant 9.99999974E-6 : f32
    %854 = vector.broadcast %cst_347 : f32 to vector<16x1xf32>
    %855 = arith.addf %851, %854 : vector<16x1xf32>
    %856 = math.rsqrt %855 : vector<16x1xf32>
    %857 = vector.broadcast %856 : vector<16x1xf32> to vector<16x32xf32>
    %858 = arith.mulf %853, %857 : vector<16x32xf32>
    %859 = vector.broadcast %497 : vector<1x32xf32> to vector<16x32xf32>
    %860 = arith.mulf %858, %859 : vector<16x32xf32>
    %861 = vector.broadcast %499 : vector<1x32xf32> to vector<16x32xf32>
    %862 = arith.addf %860, %861 : vector<16x32xf32>
    %c1_348 = arith.constant 1 : index
    %c0_349 = arith.constant 0 : index
    %c0_350 = arith.constant 0 : index
    %863 = vector.load %arg23[%c1_348, %c0_349, %c0_350] : memref<2x32x96xf32, #tpu.memory_space<vmem>>, vector<1x32x96xf32>
    %864 = vector.shape_cast %863 : vector<1x32x96xf32> to vector<32x96xf32>
    %c1_351 = arith.constant 1 : index
    %c0_352 = arith.constant 0 : index
    %c0_353 = arith.constant 0 : index
    %865 = vector.load %arg24[%c1_351, %c0_352, %c0_353] : memref<2x1x96xf32, #tpu.memory_space<vmem>>, vector<1x1x96xf32>
    %866 = vector.shape_cast %865 : vector<1x1x96xf32> to vector<1x96xf32>
    %c1_354 = arith.constant 1 : index
    %c0_355 = arith.constant 0 : index
    %c0_356 = arith.constant 0 : index
    %867 = vector.load %arg25[%c1_354, %c0_355, %c0_356] : memref<2x32x32xf32, #tpu.memory_space<vmem>>, vector<1x32x32xf32>
    %868 = vector.shape_cast %867 : vector<1x32x32xf32> to vector<32x32xf32>
    %c1_357 = arith.constant 1 : index
    %c0_358 = arith.constant 0 : index
    %c0_359 = arith.constant 0 : index
    %869 = vector.load %arg26[%c1_357, %c0_358, %c0_359] : memref<2x1x32xf32, #tpu.memory_space<vmem>>, vector<1x1x32xf32>
    %870 = vector.shape_cast %869 : vector<1x1x32xf32> to vector<1x32xf32>
    %c1_360 = arith.constant 1 : index
    %c0_361 = arith.constant 0 : index
    %c0_362 = arith.constant 0 : index
    %871 = vector.load %arg27[%c1_360, %c0_361, %c0_362] : memref<2x1x32xf32, #tpu.memory_space<vmem>>, vector<1x1x32xf32>
    %872 = vector.shape_cast %871 : vector<1x1x32xf32> to vector<1x32xf32>
    %c1_363 = arith.constant 1 : index
    %c0_364 = arith.constant 0 : index
    %c0_365 = arith.constant 0 : index
    %873 = vector.load %arg28[%c1_363, %c0_364, %c0_365] : memref<2x1x32xf32, #tpu.memory_space<vmem>>, vector<1x1x32xf32>
    %874 = vector.shape_cast %873 : vector<1x1x32xf32> to vector<1x32xf32>
    %c1_366 = arith.constant 1 : index
    %c0_367 = arith.constant 0 : index
    %c0_368 = arith.constant 0 : index
    %875 = vector.load %arg29[%c1_366, %c0_367, %c0_368] : memref<2x32x32xf32, #tpu.memory_space<vmem>>, vector<1x32x32xf32>
    %876 = vector.shape_cast %875 : vector<1x32x32xf32> to vector<32x32xf32>
    %c1_369 = arith.constant 1 : index
    %c0_370 = arith.constant 0 : index
    %c0_371 = arith.constant 0 : index
    %877 = vector.load %arg30[%c1_369, %c0_370, %c0_371] : memref<2x1x32xf32, #tpu.memory_space<vmem>>, vector<1x1x32xf32>
    %878 = vector.shape_cast %877 : vector<1x1x32xf32> to vector<1x32xf32>
    %c1_372 = arith.constant 1 : index
    %c0_373 = arith.constant 0 : index
    %c0_374 = arith.constant 0 : index
    %879 = vector.load %arg31[%c1_372, %c0_373, %c0_374] : memref<2x32x64xf32, #tpu.memory_space<vmem>>, vector<1x32x64xf32>
    %880 = vector.shape_cast %879 : vector<1x32x64xf32> to vector<32x64xf32>
    %c1_375 = arith.constant 1 : index
    %c0_376 = arith.constant 0 : index
    %c0_377 = arith.constant 0 : index
    %881 = vector.load %arg32[%c1_375, %c0_376, %c0_377] : memref<2x1x64xf32, #tpu.memory_space<vmem>>, vector<1x1x64xf32>
    %882 = vector.shape_cast %881 : vector<1x1x64xf32> to vector<1x64xf32>
    %c1_378 = arith.constant 1 : index
    %c0_379 = arith.constant 0 : index
    %c0_380 = arith.constant 0 : index
    %883 = vector.load %arg33[%c1_378, %c0_379, %c0_380] : memref<2x32x32xf32, #tpu.memory_space<vmem>>, vector<1x32x32xf32>
    %884 = vector.shape_cast %883 : vector<1x32x32xf32> to vector<32x32xf32>
    %c1_381 = arith.constant 1 : index
    %c0_382 = arith.constant 0 : index
    %c0_383 = arith.constant 0 : index
    %885 = vector.load %arg34[%c1_381, %c0_382, %c0_383] : memref<2x1x32xf32, #tpu.memory_space<vmem>>, vector<1x1x32xf32>
    %886 = vector.shape_cast %885 : vector<1x1x32xf32> to vector<1x32xf32>
    %c1_384 = arith.constant 1 : index
    %c0_385 = arith.constant 0 : index
    %c0_386 = arith.constant 0 : index
    %887 = vector.load %arg35[%c1_384, %c0_385, %c0_386] : memref<2x1x32xf32, #tpu.memory_space<vmem>>, vector<1x1x32xf32>
    %888 = vector.shape_cast %887 : vector<1x1x32xf32> to vector<1x32xf32>
    %c1_387 = arith.constant 1 : index
    %c0_388 = arith.constant 0 : index
    %c0_389 = arith.constant 0 : index
    %889 = vector.load %arg36[%c1_387, %c0_388, %c0_389] : memref<2x1x32xf32, #tpu.memory_space<vmem>>, vector<1x1x32xf32>
    %890 = vector.shape_cast %889 : vector<1x1x32xf32> to vector<1x32xf32>
    %c1_390 = arith.constant 1 : index
    %c0_391 = arith.constant 0 : index
    %c0_392 = arith.constant 0 : index
    %891 = vector.load %arg37[%c1_390, %c0_391, %c0_392] : memref<2x32x64xf32, #tpu.memory_space<vmem>>, vector<1x32x64xf32>
    %892 = vector.shape_cast %891 : vector<1x32x64xf32> to vector<32x64xf32>
    %c1_393 = arith.constant 1 : index
    %c0_394 = arith.constant 0 : index
    %c0_395 = arith.constant 0 : index
    %893 = vector.load %arg38[%c1_393, %c0_394, %c0_395] : memref<2x1x64xf32, #tpu.memory_space<vmem>>, vector<1x1x64xf32>
    %894 = vector.shape_cast %893 : vector<1x1x64xf32> to vector<1x64xf32>
    %c1_396 = arith.constant 1 : index
    %c0_397 = arith.constant 0 : index
    %c0_398 = arith.constant 0 : index
    %895 = vector.load %arg39[%c1_396, %c0_397, %c0_398] : memref<2x64x32xf32, #tpu.memory_space<vmem>>, vector<1x64x32xf32>
    %896 = vector.shape_cast %895 : vector<1x64x32xf32> to vector<64x32xf32>
    %c1_399 = arith.constant 1 : index
    %c0_400 = arith.constant 0 : index
    %c0_401 = arith.constant 0 : index
    %897 = vector.load %arg40[%c1_399, %c0_400, %c0_401] : memref<2x1x32xf32, #tpu.memory_space<vmem>>, vector<1x1x32xf32>
    %898 = vector.shape_cast %897 : vector<1x1x32xf32> to vector<1x32xf32>
    %c1_402 = arith.constant 1 : index
    %c0_403 = arith.constant 0 : index
    %c0_404 = arith.constant 0 : index
    %899 = vector.load %arg41[%c1_402, %c0_403, %c0_404] : memref<2x1x32xf32, #tpu.memory_space<vmem>>, vector<1x1x32xf32>
    %900 = vector.shape_cast %899 : vector<1x1x32xf32> to vector<1x32xf32>
    %c1_405 = arith.constant 1 : index
    %c0_406 = arith.constant 0 : index
    %c0_407 = arith.constant 0 : index
    %901 = vector.load %arg42[%c1_405, %c0_406, %c0_407] : memref<2x1x32xf32, #tpu.memory_space<vmem>>, vector<1x1x32xf32>
    %902 = vector.shape_cast %901 : vector<1x1x32xf32> to vector<1x32xf32>
    %cst_408 = arith.constant dense<0.000000e+00> : vector<16x96xf32>
    %903 = tpu.matmul %862, %864, %cst_408 {dimension_numbers = #tpu.dot_dimension_numbers<[1], [0], [0], [1], [0, 0, 1, 1], [], []>} : vector<16x32xf32>, vector<32x96xf32>, vector<16x96xf32> -> vector<16x96xf32>
    %904 = vector.broadcast %866 : vector<1x96xf32> to vector<16x96xf32>
    %905 = arith.addf %903, %904 : vector<16x96xf32>
    %906 = vector.extract_strided_slice %905 {offsets = [0, 0], sizes = [16, 32], strides = [1, 1]} : vector<16x96xf32> to vector<16x32xf32>
    %907 = vector.extract_strided_slice %905 {offsets = [0, 32], sizes = [16, 32], strides = [1, 1]} : vector<16x96xf32> to vector<16x32xf32>
    %908 = vector.extract_strided_slice %905 {offsets = [0, 64], sizes = [16, 32], strides = [1, 1]} : vector<16x96xf32> to vector<16x32xf32>
    %909 = vector.extract_strided_slice %906 {offsets = [0, 0], sizes = [8, 32], strides = [1, 1]} : vector<16x32xf32> to vector<8x32xf32>
    %910 = vector.extract_strided_slice %907 {offsets = [0, 0], sizes = [8, 32], strides = [1, 1]} : vector<16x32xf32> to vector<8x32xf32>
    %911 = vector.extract_strided_slice %908 {offsets = [0, 0], sizes = [8, 32], strides = [1, 1]} : vector<16x32xf32> to vector<8x32xf32>
    %c0_409 = arith.constant 0 : index
    %c0_410 = arith.constant 0 : index
    %c0_411 = arith.constant 0 : index
    %912 = vector.load %arg7[%c0_409, %c0_410, %c0_411] : memref<2x8x8xf32, #tpu.memory_space<vmem>>, vector<1x8x8xf32>
    %913 = vector.shape_cast %912 : vector<1x8x8xf32> to vector<8x8xf32>
    %914 = vector.extract_strided_slice %909 {offsets = [0, 0], sizes = [8, 8], strides = [1, 1]} : vector<8x32xf32> to vector<8x8xf32>
    %915 = vector.extract_strided_slice %910 {offsets = [0, 0], sizes = [8, 8], strides = [1, 1]} : vector<8x32xf32> to vector<8x8xf32>
    %cst_412 = arith.constant dense<0.000000e+00> : vector<8x8xf32>
    %916 = tpu.matmul %914, %915, %cst_412 {dimension_numbers = #tpu.dot_dimension_numbers<[1], [1], [0], [0], [0, 0, 1, 0], [], []>} : vector<8x8xf32>, vector<8x8xf32>, vector<8x8xf32> -> vector<8x8xf32>
    %917 = arith.addf %916, %913 : vector<8x8xf32>
    %cst_413 = arith.constant dense<0xFF800000> : vector<8xf32>
    %918 = vector.multi_reduction <maximumf>, %917, %cst_413 [1] : vector<8x8xf32> to vector<8xf32>
    %919 = vector.shape_cast %918 : vector<8xf32> to vector<8x1xf32>
    %920 = vector.broadcast %919 : vector<8x1xf32> to vector<8x8xf32>
    %921 = arith.subf %917, %920 : vector<8x8xf32>
    %922 = math.exp %921 : vector<8x8xf32>
    %cst_414 = arith.constant dense<0.000000e+00> : vector<8xf32>
    %923 = vector.multi_reduction <add>, %922, %cst_414 [1] : vector<8x8xf32> to vector<8xf32>
    %924 = vector.shape_cast %923 : vector<8xf32> to vector<8x1xf32>
    %925 = vector.broadcast %924 : vector<8x1xf32> to vector<8x8xf32>
    %926 = arith.divf %922, %925 : vector<8x8xf32>
    %927 = vector.extract_strided_slice %911 {offsets = [0, 0], sizes = [8, 8], strides = [1, 1]} : vector<8x32xf32> to vector<8x8xf32>
    %cst_415 = arith.constant dense<0.000000e+00> : vector<8x8xf32>
    %928 = tpu.matmul %926, %927, %cst_415 {dimension_numbers = #tpu.dot_dimension_numbers<[1], [0], [0], [1], [0, 0, 1, 1], [], []>} : vector<8x8xf32>, vector<8x8xf32>, vector<8x8xf32> -> vector<8x8xf32>
    %929 = vector.extract_strided_slice %909 {offsets = [0, 8], sizes = [8, 8], strides = [1, 1]} : vector<8x32xf32> to vector<8x8xf32>
    %930 = vector.extract_strided_slice %910 {offsets = [0, 8], sizes = [8, 8], strides = [1, 1]} : vector<8x32xf32> to vector<8x8xf32>
    %cst_416 = arith.constant dense<0.000000e+00> : vector<8x8xf32>
    %931 = tpu.matmul %929, %930, %cst_416 {dimension_numbers = #tpu.dot_dimension_numbers<[1], [1], [0], [0], [0, 0, 1, 0], [], []>} : vector<8x8xf32>, vector<8x8xf32>, vector<8x8xf32> -> vector<8x8xf32>
    %932 = arith.addf %931, %913 : vector<8x8xf32>
    %cst_417 = arith.constant dense<0xFF800000> : vector<8xf32>
    %933 = vector.multi_reduction <maximumf>, %932, %cst_417 [1] : vector<8x8xf32> to vector<8xf32>
    %934 = vector.shape_cast %933 : vector<8xf32> to vector<8x1xf32>
    %935 = vector.broadcast %934 : vector<8x1xf32> to vector<8x8xf32>
    %936 = arith.subf %932, %935 : vector<8x8xf32>
    %937 = math.exp %936 : vector<8x8xf32>
    %cst_418 = arith.constant dense<0.000000e+00> : vector<8xf32>
    %938 = vector.multi_reduction <add>, %937, %cst_418 [1] : vector<8x8xf32> to vector<8xf32>
    %939 = vector.shape_cast %938 : vector<8xf32> to vector<8x1xf32>
    %940 = vector.broadcast %939 : vector<8x1xf32> to vector<8x8xf32>
    %941 = arith.divf %937, %940 : vector<8x8xf32>
    %942 = vector.extract_strided_slice %911 {offsets = [0, 8], sizes = [8, 8], strides = [1, 1]} : vector<8x32xf32> to vector<8x8xf32>
    %cst_419 = arith.constant dense<0.000000e+00> : vector<8x8xf32>
    %943 = tpu.matmul %941, %942, %cst_419 {dimension_numbers = #tpu.dot_dimension_numbers<[1], [0], [0], [1], [0, 0, 1, 1], [], []>} : vector<8x8xf32>, vector<8x8xf32>, vector<8x8xf32> -> vector<8x8xf32>
    %944 = vector.extract_strided_slice %909 {offsets = [0, 16], sizes = [8, 8], strides = [1, 1]} : vector<8x32xf32> to vector<8x8xf32>
    %945 = vector.extract_strided_slice %910 {offsets = [0, 16], sizes = [8, 8], strides = [1, 1]} : vector<8x32xf32> to vector<8x8xf32>
    %cst_420 = arith.constant dense<0.000000e+00> : vector<8x8xf32>
    %946 = tpu.matmul %944, %945, %cst_420 {dimension_numbers = #tpu.dot_dimension_numbers<[1], [1], [0], [0], [0, 0, 1, 0], [], []>} : vector<8x8xf32>, vector<8x8xf32>, vector<8x8xf32> -> vector<8x8xf32>
    %947 = arith.addf %946, %913 : vector<8x8xf32>
    %cst_421 = arith.constant dense<0xFF800000> : vector<8xf32>
    %948 = vector.multi_reduction <maximumf>, %947, %cst_421 [1] : vector<8x8xf32> to vector<8xf32>
    %949 = vector.shape_cast %948 : vector<8xf32> to vector<8x1xf32>
    %950 = vector.broadcast %949 : vector<8x1xf32> to vector<8x8xf32>
    %951 = arith.subf %947, %950 : vector<8x8xf32>
    %952 = math.exp %951 : vector<8x8xf32>
    %cst_422 = arith.constant dense<0.000000e+00> : vector<8xf32>
    %953 = vector.multi_reduction <add>, %952, %cst_422 [1] : vector<8x8xf32> to vector<8xf32>
    %954 = vector.shape_cast %953 : vector<8xf32> to vector<8x1xf32>
    %955 = vector.broadcast %954 : vector<8x1xf32> to vector<8x8xf32>
    %956 = arith.divf %952, %955 : vector<8x8xf32>
    %957 = vector.extract_strided_slice %911 {offsets = [0, 16], sizes = [8, 8], strides = [1, 1]} : vector<8x32xf32> to vector<8x8xf32>
    %cst_423 = arith.constant dense<0.000000e+00> : vector<8x8xf32>
    %958 = tpu.matmul %956, %957, %cst_423 {dimension_numbers = #tpu.dot_dimension_numbers<[1], [0], [0], [1], [0, 0, 1, 1], [], []>} : vector<8x8xf32>, vector<8x8xf32>, vector<8x8xf32> -> vector<8x8xf32>
    %959 = vector.extract_strided_slice %909 {offsets = [0, 24], sizes = [8, 8], strides = [1, 1]} : vector<8x32xf32> to vector<8x8xf32>
    %960 = vector.extract_strided_slice %910 {offsets = [0, 24], sizes = [8, 8], strides = [1, 1]} : vector<8x32xf32> to vector<8x8xf32>
    %cst_424 = arith.constant dense<0.000000e+00> : vector<8x8xf32>
    %961 = tpu.matmul %959, %960, %cst_424 {dimension_numbers = #tpu.dot_dimension_numbers<[1], [1], [0], [0], [0, 0, 1, 0], [], []>} : vector<8x8xf32>, vector<8x8xf32>, vector<8x8xf32> -> vector<8x8xf32>
    %962 = arith.addf %961, %913 : vector<8x8xf32>
    %cst_425 = arith.constant dense<0xFF800000> : vector<8xf32>
    %963 = vector.multi_reduction <maximumf>, %962, %cst_425 [1] : vector<8x8xf32> to vector<8xf32>
    %964 = vector.shape_cast %963 : vector<8xf32> to vector<8x1xf32>
    %965 = vector.broadcast %964 : vector<8x1xf32> to vector<8x8xf32>
    %966 = arith.subf %962, %965 : vector<8x8xf32>
    %967 = math.exp %966 : vector<8x8xf32>
    %cst_426 = arith.constant dense<0.000000e+00> : vector<8xf32>
    %968 = vector.multi_reduction <add>, %967, %cst_426 [1] : vector<8x8xf32> to vector<8xf32>
    %969 = vector.shape_cast %968 : vector<8xf32> to vector<8x1xf32>
    %970 = vector.broadcast %969 : vector<8x1xf32> to vector<8x8xf32>
    %971 = arith.divf %967, %970 : vector<8x8xf32>
    %972 = vector.extract_strided_slice %911 {offsets = [0, 24], sizes = [8, 8], strides = [1, 1]} : vector<8x32xf32> to vector<8x8xf32>
    %cst_427 = arith.constant dense<0.000000e+00> : vector<8x8xf32>
    %973 = tpu.matmul %971, %972, %cst_427 {dimension_numbers = #tpu.dot_dimension_numbers<[1], [0], [0], [1], [0, 0, 1, 1], [], []>} : vector<8x8xf32>, vector<8x8xf32>, vector<8x8xf32> -> vector<8x8xf32>
    %974 = tpu.concatenate %928, %943, %958, %973 in 1 : vector<8x8xf32>, vector<8x8xf32>, vector<8x8xf32>, vector<8x8xf32> -> vector<8x32xf32>
    %975 = vector.extract_strided_slice %906 {offsets = [8, 0], sizes = [8, 32], strides = [1, 1]} : vector<16x32xf32> to vector<8x32xf32>
    %976 = vector.extract_strided_slice %907 {offsets = [8, 0], sizes = [8, 32], strides = [1, 1]} : vector<16x32xf32> to vector<8x32xf32>
    %977 = vector.extract_strided_slice %908 {offsets = [8, 0], sizes = [8, 32], strides = [1, 1]} : vector<16x32xf32> to vector<8x32xf32>
    %c1_428 = arith.constant 1 : index
    %c0_429 = arith.constant 0 : index
    %c0_430 = arith.constant 0 : index
    %978 = vector.load %arg7[%c1_428, %c0_429, %c0_430] : memref<2x8x8xf32, #tpu.memory_space<vmem>>, vector<1x8x8xf32>
    %979 = vector.shape_cast %978 : vector<1x8x8xf32> to vector<8x8xf32>
    %980 = vector.extract_strided_slice %975 {offsets = [0, 0], sizes = [8, 8], strides = [1, 1]} : vector<8x32xf32> to vector<8x8xf32>
    %981 = vector.extract_strided_slice %976 {offsets = [0, 0], sizes = [8, 8], strides = [1, 1]} : vector<8x32xf32> to vector<8x8xf32>
    %cst_431 = arith.constant dense<0.000000e+00> : vector<8x8xf32>
    %982 = tpu.matmul %980, %981, %cst_431 {dimension_numbers = #tpu.dot_dimension_numbers<[1], [1], [0], [0], [0, 0, 1, 0], [], []>} : vector<8x8xf32>, vector<8x8xf32>, vector<8x8xf32> -> vector<8x8xf32>
    %983 = arith.addf %982, %979 : vector<8x8xf32>
    %cst_432 = arith.constant dense<0xFF800000> : vector<8xf32>
    %984 = vector.multi_reduction <maximumf>, %983, %cst_432 [1] : vector<8x8xf32> to vector<8xf32>
    %985 = vector.shape_cast %984 : vector<8xf32> to vector<8x1xf32>
    %986 = vector.broadcast %985 : vector<8x1xf32> to vector<8x8xf32>
    %987 = arith.subf %983, %986 : vector<8x8xf32>
    %988 = math.exp %987 : vector<8x8xf32>
    %cst_433 = arith.constant dense<0.000000e+00> : vector<8xf32>
    %989 = vector.multi_reduction <add>, %988, %cst_433 [1] : vector<8x8xf32> to vector<8xf32>
    %990 = vector.shape_cast %989 : vector<8xf32> to vector<8x1xf32>
    %991 = vector.broadcast %990 : vector<8x1xf32> to vector<8x8xf32>
    %992 = arith.divf %988, %991 : vector<8x8xf32>
    %993 = vector.extract_strided_slice %977 {offsets = [0, 0], sizes = [8, 8], strides = [1, 1]} : vector<8x32xf32> to vector<8x8xf32>
    %cst_434 = arith.constant dense<0.000000e+00> : vector<8x8xf32>
    %994 = tpu.matmul %992, %993, %cst_434 {dimension_numbers = #tpu.dot_dimension_numbers<[1], [0], [0], [1], [0, 0, 1, 1], [], []>} : vector<8x8xf32>, vector<8x8xf32>, vector<8x8xf32> -> vector<8x8xf32>
    %995 = vector.extract_strided_slice %975 {offsets = [0, 8], sizes = [8, 8], strides = [1, 1]} : vector<8x32xf32> to vector<8x8xf32>
    %996 = vector.extract_strided_slice %976 {offsets = [0, 8], sizes = [8, 8], strides = [1, 1]} : vector<8x32xf32> to vector<8x8xf32>
    %cst_435 = arith.constant dense<0.000000e+00> : vector<8x8xf32>
    %997 = tpu.matmul %995, %996, %cst_435 {dimension_numbers = #tpu.dot_dimension_numbers<[1], [1], [0], [0], [0, 0, 1, 0], [], []>} : vector<8x8xf32>, vector<8x8xf32>, vector<8x8xf32> -> vector<8x8xf32>
    %998 = arith.addf %997, %979 : vector<8x8xf32>
    %cst_436 = arith.constant dense<0xFF800000> : vector<8xf32>
    %999 = vector.multi_reduction <maximumf>, %998, %cst_436 [1] : vector<8x8xf32> to vector<8xf32>
    %1000 = vector.shape_cast %999 : vector<8xf32> to vector<8x1xf32>
    %1001 = vector.broadcast %1000 : vector<8x1xf32> to vector<8x8xf32>
    %1002 = arith.subf %998, %1001 : vector<8x8xf32>
    %1003 = math.exp %1002 : vector<8x8xf32>
    %cst_437 = arith.constant dense<0.000000e+00> : vector<8xf32>
    %1004 = vector.multi_reduction <add>, %1003, %cst_437 [1] : vector<8x8xf32> to vector<8xf32>
    %1005 = vector.shape_cast %1004 : vector<8xf32> to vector<8x1xf32>
    %1006 = vector.broadcast %1005 : vector<8x1xf32> to vector<8x8xf32>
    %1007 = arith.divf %1003, %1006 : vector<8x8xf32>
    %1008 = vector.extract_strided_slice %977 {offsets = [0, 8], sizes = [8, 8], strides = [1, 1]} : vector<8x32xf32> to vector<8x8xf32>
    %cst_438 = arith.constant dense<0.000000e+00> : vector<8x8xf32>
    %1009 = tpu.matmul %1007, %1008, %cst_438 {dimension_numbers = #tpu.dot_dimension_numbers<[1], [0], [0], [1], [0, 0, 1, 1], [], []>} : vector<8x8xf32>, vector<8x8xf32>, vector<8x8xf32> -> vector<8x8xf32>
    %1010 = vector.extract_strided_slice %975 {offsets = [0, 16], sizes = [8, 8], strides = [1, 1]} : vector<8x32xf32> to vector<8x8xf32>
    %1011 = vector.extract_strided_slice %976 {offsets = [0, 16], sizes = [8, 8], strides = [1, 1]} : vector<8x32xf32> to vector<8x8xf32>
    %cst_439 = arith.constant dense<0.000000e+00> : vector<8x8xf32>
    %1012 = tpu.matmul %1010, %1011, %cst_439 {dimension_numbers = #tpu.dot_dimension_numbers<[1], [1], [0], [0], [0, 0, 1, 0], [], []>} : vector<8x8xf32>, vector<8x8xf32>, vector<8x8xf32> -> vector<8x8xf32>
    %1013 = arith.addf %1012, %979 : vector<8x8xf32>
    %cst_440 = arith.constant dense<0xFF800000> : vector<8xf32>
    %1014 = vector.multi_reduction <maximumf>, %1013, %cst_440 [1] : vector<8x8xf32> to vector<8xf32>
    %1015 = vector.shape_cast %1014 : vector<8xf32> to vector<8x1xf32>
    %1016 = vector.broadcast %1015 : vector<8x1xf32> to vector<8x8xf32>
    %1017 = arith.subf %1013, %1016 : vector<8x8xf32>
    %1018 = math.exp %1017 : vector<8x8xf32>
    %cst_441 = arith.constant dense<0.000000e+00> : vector<8xf32>
    %1019 = vector.multi_reduction <add>, %1018, %cst_441 [1] : vector<8x8xf32> to vector<8xf32>
    %1020 = vector.shape_cast %1019 : vector<8xf32> to vector<8x1xf32>
    %1021 = vector.broadcast %1020 : vector<8x1xf32> to vector<8x8xf32>
    %1022 = arith.divf %1018, %1021 : vector<8x8xf32>
    %1023 = vector.extract_strided_slice %977 {offsets = [0, 16], sizes = [8, 8], strides = [1, 1]} : vector<8x32xf32> to vector<8x8xf32>
    %cst_442 = arith.constant dense<0.000000e+00> : vector<8x8xf32>
    %1024 = tpu.matmul %1022, %1023, %cst_442 {dimension_numbers = #tpu.dot_dimension_numbers<[1], [0], [0], [1], [0, 0, 1, 1], [], []>} : vector<8x8xf32>, vector<8x8xf32>, vector<8x8xf32> -> vector<8x8xf32>
    %1025 = vector.extract_strided_slice %975 {offsets = [0, 24], sizes = [8, 8], strides = [1, 1]} : vector<8x32xf32> to vector<8x8xf32>
    %1026 = vector.extract_strided_slice %976 {offsets = [0, 24], sizes = [8, 8], strides = [1, 1]} : vector<8x32xf32> to vector<8x8xf32>
    %cst_443 = arith.constant dense<0.000000e+00> : vector<8x8xf32>
    %1027 = tpu.matmul %1025, %1026, %cst_443 {dimension_numbers = #tpu.dot_dimension_numbers<[1], [1], [0], [0], [0, 0, 1, 0], [], []>} : vector<8x8xf32>, vector<8x8xf32>, vector<8x8xf32> -> vector<8x8xf32>
    %1028 = arith.addf %1027, %979 : vector<8x8xf32>
    %cst_444 = arith.constant dense<0xFF800000> : vector<8xf32>
    %1029 = vector.multi_reduction <maximumf>, %1028, %cst_444 [1] : vector<8x8xf32> to vector<8xf32>
    %1030 = vector.shape_cast %1029 : vector<8xf32> to vector<8x1xf32>
    %1031 = vector.broadcast %1030 : vector<8x1xf32> to vector<8x8xf32>
    %1032 = arith.subf %1028, %1031 : vector<8x8xf32>
    %1033 = math.exp %1032 : vector<8x8xf32>
    %cst_445 = arith.constant dense<0.000000e+00> : vector<8xf32>
    %1034 = vector.multi_reduction <add>, %1033, %cst_445 [1] : vector<8x8xf32> to vector<8xf32>
    %1035 = vector.shape_cast %1034 : vector<8xf32> to vector<8x1xf32>
    %1036 = vector.broadcast %1035 : vector<8x1xf32> to vector<8x8xf32>
    %1037 = arith.divf %1033, %1036 : vector<8x8xf32>
    %1038 = vector.extract_strided_slice %977 {offsets = [0, 24], sizes = [8, 8], strides = [1, 1]} : vector<8x32xf32> to vector<8x8xf32>
    %cst_446 = arith.constant dense<0.000000e+00> : vector<8x8xf32>
    %1039 = tpu.matmul %1037, %1038, %cst_446 {dimension_numbers = #tpu.dot_dimension_numbers<[1], [0], [0], [1], [0, 0, 1, 1], [], []>} : vector<8x8xf32>, vector<8x8xf32>, vector<8x8xf32> -> vector<8x8xf32>
    %1040 = tpu.concatenate %994, %1009, %1024, %1039 in 1 : vector<8x8xf32>, vector<8x8xf32>, vector<8x8xf32>, vector<8x8xf32> -> vector<8x32xf32>
    %1041 = tpu.concatenate %974, %1040 in 0 : vector<8x32xf32>, vector<8x32xf32> -> vector<16x32xf32>
    %cst_447 = arith.constant dense<0.000000e+00> : vector<16x32xf32>
    %1042 = tpu.matmul %1041, %868, %cst_447 {dimension_numbers = #tpu.dot_dimension_numbers<[1], [0], [0], [1], [0, 0, 1, 1], [], []>} : vector<16x32xf32>, vector<32x32xf32>, vector<16x32xf32> -> vector<16x32xf32>
    %1043 = vector.broadcast %870 : vector<1x32xf32> to vector<16x32xf32>
    %1044 = arith.addf %1042, %1043 : vector<16x32xf32>
    %1045 = arith.addf %862, %1044 : vector<16x32xf32>
    %cst_448 = arith.constant dense<0.000000e+00> : vector<16xf32>
    %1046 = vector.multi_reduction <add>, %1045, %cst_448 [1] : vector<16x32xf32> to vector<16xf32>
    %1047 = vector.shape_cast %1046 : vector<16xf32> to vector<16x1xf32>
    %cst_449 = arith.constant 3.200000e+01 : f32
    %1048 = vector.broadcast %cst_449 : f32 to vector<16x1xf32>
    %1049 = arith.divf %1047, %1048 : vector<16x1xf32>
    %1050 = vector.broadcast %1049 : vector<16x1xf32> to vector<16x32xf32>
    %1051 = arith.subf %1045, %1050 : vector<16x32xf32>
    %1052 = arith.mulf %1051, %1051 : vector<16x32xf32>
    %cst_450 = arith.constant dense<0.000000e+00> : vector<16xf32>
    %1053 = vector.multi_reduction <add>, %1052, %cst_450 [1] : vector<16x32xf32> to vector<16xf32>
    %1054 = vector.shape_cast %1053 : vector<16xf32> to vector<16x1xf32>
    %cst_451 = arith.constant 3.200000e+01 : f32
    %1055 = vector.broadcast %cst_451 : f32 to vector<16x1xf32>
    %1056 = arith.divf %1054, %1055 : vector<16x1xf32>
    %1057 = vector.broadcast %1049 : vector<16x1xf32> to vector<16x32xf32>
    %1058 = arith.subf %1045, %1057 : vector<16x32xf32>
    %cst_452 = arith.constant 9.99999974E-6 : f32
    %1059 = vector.broadcast %cst_452 : f32 to vector<16x1xf32>
    %1060 = arith.addf %1056, %1059 : vector<16x1xf32>
    %1061 = math.rsqrt %1060 : vector<16x1xf32>
    %1062 = vector.broadcast %1061 : vector<16x1xf32> to vector<16x32xf32>
    %1063 = arith.mulf %1058, %1062 : vector<16x32xf32>
    %1064 = vector.broadcast %872 : vector<1x32xf32> to vector<16x32xf32>
    %1065 = arith.mulf %1063, %1064 : vector<16x32xf32>
    %1066 = vector.broadcast %874 : vector<1x32xf32> to vector<16x32xf32>
    %1067 = arith.addf %1065, %1066 : vector<16x32xf32>
    %cst_453 = arith.constant dense<0.000000e+00> : vector<16x32xf32>
    %1068 = tpu.matmul %1067, %876, %cst_453 {dimension_numbers = #tpu.dot_dimension_numbers<[1], [0], [0], [1], [0, 0, 1, 1], [], []>} : vector<16x32xf32>, vector<32x32xf32>, vector<16x32xf32> -> vector<16x32xf32>
    %1069 = vector.broadcast %878 : vector<1x32xf32> to vector<16x32xf32>
    %1070 = arith.addf %1068, %1069 : vector<16x32xf32>
    %cst_454 = arith.constant dense<0.000000e+00> : vector<16x64xf32>
    %1071 = tpu.matmul %459, %880, %cst_454 {dimension_numbers = #tpu.dot_dimension_numbers<[1], [0], [0], [1], [0, 0, 1, 1], [], []>} : vector<16x32xf32>, vector<32x64xf32>, vector<16x64xf32> -> vector<16x64xf32>
    %1072 = vector.broadcast %882 : vector<1x64xf32> to vector<16x64xf32>
    %1073 = arith.addf %1071, %1072 : vector<16x64xf32>
    %1074 = vector.extract_strided_slice %1073 {offsets = [0, 0], sizes = [16, 32], strides = [1, 1]} : vector<16x64xf32> to vector<16x32xf32>
    %1075 = vector.extract_strided_slice %1073 {offsets = [0, 32], sizes = [16, 32], strides = [1, 1]} : vector<16x64xf32> to vector<16x32xf32>
    %1076 = vector.extract_strided_slice %1070 {offsets = [0, 0], sizes = [8, 32], strides = [1, 1]} : vector<16x32xf32> to vector<8x32xf32>
    %1077 = vector.extract_strided_slice %1074 {offsets = [0, 0], sizes = [8, 32], strides = [1, 1]} : vector<16x32xf32> to vector<8x32xf32>
    %1078 = vector.extract_strided_slice %1075 {offsets = [0, 0], sizes = [8, 32], strides = [1, 1]} : vector<16x32xf32> to vector<8x32xf32>
    %c0_455 = arith.constant 0 : index
    %c0_456 = arith.constant 0 : index
    %c0_457 = arith.constant 0 : index
    %1079 = vector.load %arg8[%c0_455, %c0_456, %c0_457] : memref<2x8x8xf32, #tpu.memory_space<vmem>>, vector<1x8x8xf32>
    %1080 = vector.shape_cast %1079 : vector<1x8x8xf32> to vector<8x8xf32>
    %1081 = vector.extract_strided_slice %1076 {offsets = [0, 0], sizes = [8, 8], strides = [1, 1]} : vector<8x32xf32> to vector<8x8xf32>
    %1082 = vector.extract_strided_slice %1077 {offsets = [0, 0], sizes = [8, 8], strides = [1, 1]} : vector<8x32xf32> to vector<8x8xf32>
    %cst_458 = arith.constant dense<0.000000e+00> : vector<8x8xf32>
    %1083 = tpu.matmul %1081, %1082, %cst_458 {dimension_numbers = #tpu.dot_dimension_numbers<[1], [1], [0], [0], [0, 0, 1, 0], [], []>} : vector<8x8xf32>, vector<8x8xf32>, vector<8x8xf32> -> vector<8x8xf32>
    %1084 = arith.addf %1083, %1080 : vector<8x8xf32>
    %cst_459 = arith.constant dense<0xFF800000> : vector<8xf32>
    %1085 = vector.multi_reduction <maximumf>, %1084, %cst_459 [1] : vector<8x8xf32> to vector<8xf32>
    %1086 = vector.shape_cast %1085 : vector<8xf32> to vector<8x1xf32>
    %1087 = vector.broadcast %1086 : vector<8x1xf32> to vector<8x8xf32>
    %1088 = arith.subf %1084, %1087 : vector<8x8xf32>
    %1089 = math.exp %1088 : vector<8x8xf32>
    %cst_460 = arith.constant dense<0.000000e+00> : vector<8xf32>
    %1090 = vector.multi_reduction <add>, %1089, %cst_460 [1] : vector<8x8xf32> to vector<8xf32>
    %1091 = vector.shape_cast %1090 : vector<8xf32> to vector<8x1xf32>
    %1092 = vector.broadcast %1091 : vector<8x1xf32> to vector<8x8xf32>
    %1093 = arith.divf %1089, %1092 : vector<8x8xf32>
    %1094 = vector.extract_strided_slice %1078 {offsets = [0, 0], sizes = [8, 8], strides = [1, 1]} : vector<8x32xf32> to vector<8x8xf32>
    %cst_461 = arith.constant dense<0.000000e+00> : vector<8x8xf32>
    %1095 = tpu.matmul %1093, %1094, %cst_461 {dimension_numbers = #tpu.dot_dimension_numbers<[1], [0], [0], [1], [0, 0, 1, 1], [], []>} : vector<8x8xf32>, vector<8x8xf32>, vector<8x8xf32> -> vector<8x8xf32>
    %1096 = vector.extract_strided_slice %1076 {offsets = [0, 8], sizes = [8, 8], strides = [1, 1]} : vector<8x32xf32> to vector<8x8xf32>
    %1097 = vector.extract_strided_slice %1077 {offsets = [0, 8], sizes = [8, 8], strides = [1, 1]} : vector<8x32xf32> to vector<8x8xf32>
    %cst_462 = arith.constant dense<0.000000e+00> : vector<8x8xf32>
    %1098 = tpu.matmul %1096, %1097, %cst_462 {dimension_numbers = #tpu.dot_dimension_numbers<[1], [1], [0], [0], [0, 0, 1, 0], [], []>} : vector<8x8xf32>, vector<8x8xf32>, vector<8x8xf32> -> vector<8x8xf32>
    %1099 = arith.addf %1098, %1080 : vector<8x8xf32>
    %cst_463 = arith.constant dense<0xFF800000> : vector<8xf32>
    %1100 = vector.multi_reduction <maximumf>, %1099, %cst_463 [1] : vector<8x8xf32> to vector<8xf32>
    %1101 = vector.shape_cast %1100 : vector<8xf32> to vector<8x1xf32>
    %1102 = vector.broadcast %1101 : vector<8x1xf32> to vector<8x8xf32>
    %1103 = arith.subf %1099, %1102 : vector<8x8xf32>
    %1104 = math.exp %1103 : vector<8x8xf32>
    %cst_464 = arith.constant dense<0.000000e+00> : vector<8xf32>
    %1105 = vector.multi_reduction <add>, %1104, %cst_464 [1] : vector<8x8xf32> to vector<8xf32>
    %1106 = vector.shape_cast %1105 : vector<8xf32> to vector<8x1xf32>
    %1107 = vector.broadcast %1106 : vector<8x1xf32> to vector<8x8xf32>
    %1108 = arith.divf %1104, %1107 : vector<8x8xf32>
    %1109 = vector.extract_strided_slice %1078 {offsets = [0, 8], sizes = [8, 8], strides = [1, 1]} : vector<8x32xf32> to vector<8x8xf32>
    %cst_465 = arith.constant dense<0.000000e+00> : vector<8x8xf32>
    %1110 = tpu.matmul %1108, %1109, %cst_465 {dimension_numbers = #tpu.dot_dimension_numbers<[1], [0], [0], [1], [0, 0, 1, 1], [], []>} : vector<8x8xf32>, vector<8x8xf32>, vector<8x8xf32> -> vector<8x8xf32>
    %1111 = vector.extract_strided_slice %1076 {offsets = [0, 16], sizes = [8, 8], strides = [1, 1]} : vector<8x32xf32> to vector<8x8xf32>
    %1112 = vector.extract_strided_slice %1077 {offsets = [0, 16], sizes = [8, 8], strides = [1, 1]} : vector<8x32xf32> to vector<8x8xf32>
    %cst_466 = arith.constant dense<0.000000e+00> : vector<8x8xf32>
    %1113 = tpu.matmul %1111, %1112, %cst_466 {dimension_numbers = #tpu.dot_dimension_numbers<[1], [1], [0], [0], [0, 0, 1, 0], [], []>} : vector<8x8xf32>, vector<8x8xf32>, vector<8x8xf32> -> vector<8x8xf32>
    %1114 = arith.addf %1113, %1080 : vector<8x8xf32>
    %cst_467 = arith.constant dense<0xFF800000> : vector<8xf32>
    %1115 = vector.multi_reduction <maximumf>, %1114, %cst_467 [1] : vector<8x8xf32> to vector<8xf32>
    %1116 = vector.shape_cast %1115 : vector<8xf32> to vector<8x1xf32>
    %1117 = vector.broadcast %1116 : vector<8x1xf32> to vector<8x8xf32>
    %1118 = arith.subf %1114, %1117 : vector<8x8xf32>
    %1119 = math.exp %1118 : vector<8x8xf32>
    %cst_468 = arith.constant dense<0.000000e+00> : vector<8xf32>
    %1120 = vector.multi_reduction <add>, %1119, %cst_468 [1] : vector<8x8xf32> to vector<8xf32>
    %1121 = vector.shape_cast %1120 : vector<8xf32> to vector<8x1xf32>
    %1122 = vector.broadcast %1121 : vector<8x1xf32> to vector<8x8xf32>
    %1123 = arith.divf %1119, %1122 : vector<8x8xf32>
    %1124 = vector.extract_strided_slice %1078 {offsets = [0, 16], sizes = [8, 8], strides = [1, 1]} : vector<8x32xf32> to vector<8x8xf32>
    %cst_469 = arith.constant dense<0.000000e+00> : vector<8x8xf32>
    %1125 = tpu.matmul %1123, %1124, %cst_469 {dimension_numbers = #tpu.dot_dimension_numbers<[1], [0], [0], [1], [0, 0, 1, 1], [], []>} : vector<8x8xf32>, vector<8x8xf32>, vector<8x8xf32> -> vector<8x8xf32>
    %1126 = vector.extract_strided_slice %1076 {offsets = [0, 24], sizes = [8, 8], strides = [1, 1]} : vector<8x32xf32> to vector<8x8xf32>
    %1127 = vector.extract_strided_slice %1077 {offsets = [0, 24], sizes = [8, 8], strides = [1, 1]} : vector<8x32xf32> to vector<8x8xf32>
    %cst_470 = arith.constant dense<0.000000e+00> : vector<8x8xf32>
    %1128 = tpu.matmul %1126, %1127, %cst_470 {dimension_numbers = #tpu.dot_dimension_numbers<[1], [1], [0], [0], [0, 0, 1, 0], [], []>} : vector<8x8xf32>, vector<8x8xf32>, vector<8x8xf32> -> vector<8x8xf32>
    %1129 = arith.addf %1128, %1080 : vector<8x8xf32>
    %cst_471 = arith.constant dense<0xFF800000> : vector<8xf32>
    %1130 = vector.multi_reduction <maximumf>, %1129, %cst_471 [1] : vector<8x8xf32> to vector<8xf32>
    %1131 = vector.shape_cast %1130 : vector<8xf32> to vector<8x1xf32>
    %1132 = vector.broadcast %1131 : vector<8x1xf32> to vector<8x8xf32>
    %1133 = arith.subf %1129, %1132 : vector<8x8xf32>
    %1134 = math.exp %1133 : vector<8x8xf32>
    %cst_472 = arith.constant dense<0.000000e+00> : vector<8xf32>
    %1135 = vector.multi_reduction <add>, %1134, %cst_472 [1] : vector<8x8xf32> to vector<8xf32>
    %1136 = vector.shape_cast %1135 : vector<8xf32> to vector<8x1xf32>
    %1137 = vector.broadcast %1136 : vector<8x1xf32> to vector<8x8xf32>
    %1138 = arith.divf %1134, %1137 : vector<8x8xf32>
    %1139 = vector.extract_strided_slice %1078 {offsets = [0, 24], sizes = [8, 8], strides = [1, 1]} : vector<8x32xf32> to vector<8x8xf32>
    %cst_473 = arith.constant dense<0.000000e+00> : vector<8x8xf32>
    %1140 = tpu.matmul %1138, %1139, %cst_473 {dimension_numbers = #tpu.dot_dimension_numbers<[1], [0], [0], [1], [0, 0, 1, 1], [], []>} : vector<8x8xf32>, vector<8x8xf32>, vector<8x8xf32> -> vector<8x8xf32>
    %1141 = tpu.concatenate %1095, %1110, %1125, %1140 in 1 : vector<8x8xf32>, vector<8x8xf32>, vector<8x8xf32>, vector<8x8xf32> -> vector<8x32xf32>
    %1142 = vector.extract_strided_slice %1070 {offsets = [8, 0], sizes = [8, 32], strides = [1, 1]} : vector<16x32xf32> to vector<8x32xf32>
    %1143 = vector.extract_strided_slice %1074 {offsets = [8, 0], sizes = [8, 32], strides = [1, 1]} : vector<16x32xf32> to vector<8x32xf32>
    %1144 = vector.extract_strided_slice %1075 {offsets = [8, 0], sizes = [8, 32], strides = [1, 1]} : vector<16x32xf32> to vector<8x32xf32>
    %c1_474 = arith.constant 1 : index
    %c0_475 = arith.constant 0 : index
    %c0_476 = arith.constant 0 : index
    %1145 = vector.load %arg8[%c1_474, %c0_475, %c0_476] : memref<2x8x8xf32, #tpu.memory_space<vmem>>, vector<1x8x8xf32>
    %1146 = vector.shape_cast %1145 : vector<1x8x8xf32> to vector<8x8xf32>
    %1147 = vector.extract_strided_slice %1142 {offsets = [0, 0], sizes = [8, 8], strides = [1, 1]} : vector<8x32xf32> to vector<8x8xf32>
    %1148 = vector.extract_strided_slice %1143 {offsets = [0, 0], sizes = [8, 8], strides = [1, 1]} : vector<8x32xf32> to vector<8x8xf32>
    %cst_477 = arith.constant dense<0.000000e+00> : vector<8x8xf32>
    %1149 = tpu.matmul %1147, %1148, %cst_477 {dimension_numbers = #tpu.dot_dimension_numbers<[1], [1], [0], [0], [0, 0, 1, 0], [], []>} : vector<8x8xf32>, vector<8x8xf32>, vector<8x8xf32> -> vector<8x8xf32>
    %1150 = arith.addf %1149, %1146 : vector<8x8xf32>
    %cst_478 = arith.constant dense<0xFF800000> : vector<8xf32>
    %1151 = vector.multi_reduction <maximumf>, %1150, %cst_478 [1] : vector<8x8xf32> to vector<8xf32>
    %1152 = vector.shape_cast %1151 : vector<8xf32> to vector<8x1xf32>
    %1153 = vector.broadcast %1152 : vector<8x1xf32> to vector<8x8xf32>
    %1154 = arith.subf %1150, %1153 : vector<8x8xf32>
    %1155 = math.exp %1154 : vector<8x8xf32>
    %cst_479 = arith.constant dense<0.000000e+00> : vector<8xf32>
    %1156 = vector.multi_reduction <add>, %1155, %cst_479 [1] : vector<8x8xf32> to vector<8xf32>
    %1157 = vector.shape_cast %1156 : vector<8xf32> to vector<8x1xf32>
    %1158 = vector.broadcast %1157 : vector<8x1xf32> to vector<8x8xf32>
    %1159 = arith.divf %1155, %1158 : vector<8x8xf32>
    %1160 = vector.extract_strided_slice %1144 {offsets = [0, 0], sizes = [8, 8], strides = [1, 1]} : vector<8x32xf32> to vector<8x8xf32>
    %cst_480 = arith.constant dense<0.000000e+00> : vector<8x8xf32>
    %1161 = tpu.matmul %1159, %1160, %cst_480 {dimension_numbers = #tpu.dot_dimension_numbers<[1], [0], [0], [1], [0, 0, 1, 1], [], []>} : vector<8x8xf32>, vector<8x8xf32>, vector<8x8xf32> -> vector<8x8xf32>
    %1162 = vector.extract_strided_slice %1142 {offsets = [0, 8], sizes = [8, 8], strides = [1, 1]} : vector<8x32xf32> to vector<8x8xf32>
    %1163 = vector.extract_strided_slice %1143 {offsets = [0, 8], sizes = [8, 8], strides = [1, 1]} : vector<8x32xf32> to vector<8x8xf32>
    %cst_481 = arith.constant dense<0.000000e+00> : vector<8x8xf32>
    %1164 = tpu.matmul %1162, %1163, %cst_481 {dimension_numbers = #tpu.dot_dimension_numbers<[1], [1], [0], [0], [0, 0, 1, 0], [], []>} : vector<8x8xf32>, vector<8x8xf32>, vector<8x8xf32> -> vector<8x8xf32>
    %1165 = arith.addf %1164, %1146 : vector<8x8xf32>
    %cst_482 = arith.constant dense<0xFF800000> : vector<8xf32>
    %1166 = vector.multi_reduction <maximumf>, %1165, %cst_482 [1] : vector<8x8xf32> to vector<8xf32>
    %1167 = vector.shape_cast %1166 : vector<8xf32> to vector<8x1xf32>
    %1168 = vector.broadcast %1167 : vector<8x1xf32> to vector<8x8xf32>
    %1169 = arith.subf %1165, %1168 : vector<8x8xf32>
    %1170 = math.exp %1169 : vector<8x8xf32>
    %cst_483 = arith.constant dense<0.000000e+00> : vector<8xf32>
    %1171 = vector.multi_reduction <add>, %1170, %cst_483 [1] : vector<8x8xf32> to vector<8xf32>
    %1172 = vector.shape_cast %1171 : vector<8xf32> to vector<8x1xf32>
    %1173 = vector.broadcast %1172 : vector<8x1xf32> to vector<8x8xf32>
    %1174 = arith.divf %1170, %1173 : vector<8x8xf32>
    %1175 = vector.extract_strided_slice %1144 {offsets = [0, 8], sizes = [8, 8], strides = [1, 1]} : vector<8x32xf32> to vector<8x8xf32>
    %cst_484 = arith.constant dense<0.000000e+00> : vector<8x8xf32>
    %1176 = tpu.matmul %1174, %1175, %cst_484 {dimension_numbers = #tpu.dot_dimension_numbers<[1], [0], [0], [1], [0, 0, 1, 1], [], []>} : vector<8x8xf32>, vector<8x8xf32>, vector<8x8xf32> -> vector<8x8xf32>
    %1177 = vector.extract_strided_slice %1142 {offsets = [0, 16], sizes = [8, 8], strides = [1, 1]} : vector<8x32xf32> to vector<8x8xf32>
    %1178 = vector.extract_strided_slice %1143 {offsets = [0, 16], sizes = [8, 8], strides = [1, 1]} : vector<8x32xf32> to vector<8x8xf32>
    %cst_485 = arith.constant dense<0.000000e+00> : vector<8x8xf32>
    %1179 = tpu.matmul %1177, %1178, %cst_485 {dimension_numbers = #tpu.dot_dimension_numbers<[1], [1], [0], [0], [0, 0, 1, 0], [], []>} : vector<8x8xf32>, vector<8x8xf32>, vector<8x8xf32> -> vector<8x8xf32>
    %1180 = arith.addf %1179, %1146 : vector<8x8xf32>
    %cst_486 = arith.constant dense<0xFF800000> : vector<8xf32>
    %1181 = vector.multi_reduction <maximumf>, %1180, %cst_486 [1] : vector<8x8xf32> to vector<8xf32>
    %1182 = vector.shape_cast %1181 : vector<8xf32> to vector<8x1xf32>
    %1183 = vector.broadcast %1182 : vector<8x1xf32> to vector<8x8xf32>
    %1184 = arith.subf %1180, %1183 : vector<8x8xf32>
    %1185 = math.exp %1184 : vector<8x8xf32>
    %cst_487 = arith.constant dense<0.000000e+00> : vector<8xf32>
    %1186 = vector.multi_reduction <add>, %1185, %cst_487 [1] : vector<8x8xf32> to vector<8xf32>
    %1187 = vector.shape_cast %1186 : vector<8xf32> to vector<8x1xf32>
    %1188 = vector.broadcast %1187 : vector<8x1xf32> to vector<8x8xf32>
    %1189 = arith.divf %1185, %1188 : vector<8x8xf32>
    %1190 = vector.extract_strided_slice %1144 {offsets = [0, 16], sizes = [8, 8], strides = [1, 1]} : vector<8x32xf32> to vector<8x8xf32>
    %cst_488 = arith.constant dense<0.000000e+00> : vector<8x8xf32>
    %1191 = tpu.matmul %1189, %1190, %cst_488 {dimension_numbers = #tpu.dot_dimension_numbers<[1], [0], [0], [1], [0, 0, 1, 1], [], []>} : vector<8x8xf32>, vector<8x8xf32>, vector<8x8xf32> -> vector<8x8xf32>
    %1192 = vector.extract_strided_slice %1142 {offsets = [0, 24], sizes = [8, 8], strides = [1, 1]} : vector<8x32xf32> to vector<8x8xf32>
    %1193 = vector.extract_strided_slice %1143 {offsets = [0, 24], sizes = [8, 8], strides = [1, 1]} : vector<8x32xf32> to vector<8x8xf32>
    %cst_489 = arith.constant dense<0.000000e+00> : vector<8x8xf32>
    %1194 = tpu.matmul %1192, %1193, %cst_489 {dimension_numbers = #tpu.dot_dimension_numbers<[1], [1], [0], [0], [0, 0, 1, 0], [], []>} : vector<8x8xf32>, vector<8x8xf32>, vector<8x8xf32> -> vector<8x8xf32>
    %1195 = arith.addf %1194, %1146 : vector<8x8xf32>
    %cst_490 = arith.constant dense<0xFF800000> : vector<8xf32>
    %1196 = vector.multi_reduction <maximumf>, %1195, %cst_490 [1] : vector<8x8xf32> to vector<8xf32>
    %1197 = vector.shape_cast %1196 : vector<8xf32> to vector<8x1xf32>
    %1198 = vector.broadcast %1197 : vector<8x1xf32> to vector<8x8xf32>
    %1199 = arith.subf %1195, %1198 : vector<8x8xf32>
    %1200 = math.exp %1199 : vector<8x8xf32>
    %cst_491 = arith.constant dense<0.000000e+00> : vector<8xf32>
    %1201 = vector.multi_reduction <add>, %1200, %cst_491 [1] : vector<8x8xf32> to vector<8xf32>
    %1202 = vector.shape_cast %1201 : vector<8xf32> to vector<8x1xf32>
    %1203 = vector.broadcast %1202 : vector<8x1xf32> to vector<8x8xf32>
    %1204 = arith.divf %1200, %1203 : vector<8x8xf32>
    %1205 = vector.extract_strided_slice %1144 {offsets = [0, 24], sizes = [8, 8], strides = [1, 1]} : vector<8x32xf32> to vector<8x8xf32>
    %cst_492 = arith.constant dense<0.000000e+00> : vector<8x8xf32>
    %1206 = tpu.matmul %1204, %1205, %cst_492 {dimension_numbers = #tpu.dot_dimension_numbers<[1], [0], [0], [1], [0, 0, 1, 1], [], []>} : vector<8x8xf32>, vector<8x8xf32>, vector<8x8xf32> -> vector<8x8xf32>
    %1207 = tpu.concatenate %1161, %1176, %1191, %1206 in 1 : vector<8x8xf32>, vector<8x8xf32>, vector<8x8xf32>, vector<8x8xf32> -> vector<8x32xf32>
    %1208 = tpu.concatenate %1141, %1207 in 0 : vector<8x32xf32>, vector<8x32xf32> -> vector<16x32xf32>
    %cst_493 = arith.constant dense<0.000000e+00> : vector<16x32xf32>
    %1209 = tpu.matmul %1208, %884, %cst_493 {dimension_numbers = #tpu.dot_dimension_numbers<[1], [0], [0], [1], [0, 0, 1, 1], [], []>} : vector<16x32xf32>, vector<32x32xf32>, vector<16x32xf32> -> vector<16x32xf32>
    %1210 = vector.broadcast %886 : vector<1x32xf32> to vector<16x32xf32>
    %1211 = arith.addf %1209, %1210 : vector<16x32xf32>
    %1212 = arith.addf %1067, %1211 : vector<16x32xf32>
    %cst_494 = arith.constant dense<0.000000e+00> : vector<16xf32>
    %1213 = vector.multi_reduction <add>, %1212, %cst_494 [1] : vector<16x32xf32> to vector<16xf32>
    %1214 = vector.shape_cast %1213 : vector<16xf32> to vector<16x1xf32>
    %cst_495 = arith.constant 3.200000e+01 : f32
    %1215 = vector.broadcast %cst_495 : f32 to vector<16x1xf32>
    %1216 = arith.divf %1214, %1215 : vector<16x1xf32>
    %1217 = vector.broadcast %1216 : vector<16x1xf32> to vector<16x32xf32>
    %1218 = arith.subf %1212, %1217 : vector<16x32xf32>
    %1219 = arith.mulf %1218, %1218 : vector<16x32xf32>
    %cst_496 = arith.constant dense<0.000000e+00> : vector<16xf32>
    %1220 = vector.multi_reduction <add>, %1219, %cst_496 [1] : vector<16x32xf32> to vector<16xf32>
    %1221 = vector.shape_cast %1220 : vector<16xf32> to vector<16x1xf32>
    %cst_497 = arith.constant 3.200000e+01 : f32
    %1222 = vector.broadcast %cst_497 : f32 to vector<16x1xf32>
    %1223 = arith.divf %1221, %1222 : vector<16x1xf32>
    %1224 = vector.broadcast %1216 : vector<16x1xf32> to vector<16x32xf32>
    %1225 = arith.subf %1212, %1224 : vector<16x32xf32>
    %cst_498 = arith.constant 9.99999974E-6 : f32
    %1226 = vector.broadcast %cst_498 : f32 to vector<16x1xf32>
    %1227 = arith.addf %1223, %1226 : vector<16x1xf32>
    %1228 = math.rsqrt %1227 : vector<16x1xf32>
    %1229 = vector.broadcast %1228 : vector<16x1xf32> to vector<16x32xf32>
    %1230 = arith.mulf %1225, %1229 : vector<16x32xf32>
    %1231 = vector.broadcast %888 : vector<1x32xf32> to vector<16x32xf32>
    %1232 = arith.mulf %1230, %1231 : vector<16x32xf32>
    %1233 = vector.broadcast %890 : vector<1x32xf32> to vector<16x32xf32>
    %1234 = arith.addf %1232, %1233 : vector<16x32xf32>
    %cst_499 = arith.constant dense<0.000000e+00> : vector<16x64xf32>
    %1235 = tpu.matmul %1234, %892, %cst_499 {dimension_numbers = #tpu.dot_dimension_numbers<[1], [0], [0], [1], [0, 0, 1, 1], [], []>} : vector<16x32xf32>, vector<32x64xf32>, vector<16x64xf32> -> vector<16x64xf32>
    %1236 = vector.broadcast %894 : vector<1x64xf32> to vector<16x64xf32>
    %1237 = arith.addf %1235, %1236 : vector<16x64xf32>
    %cst_500 = arith.constant 0.000000e+00 : f32
    %1238 = vector.broadcast %cst_500 : f32 to vector<16x64xf32>
    %1239 = arith.maximumf %1237, %1238 : vector<16x64xf32>
    %cst_501 = arith.constant dense<0.000000e+00> : vector<16x32xf32>
    %1240 = tpu.matmul %1239, %896, %cst_501 {dimension_numbers = #tpu.dot_dimension_numbers<[1], [0], [0], [1], [0, 0, 1, 1], [], []>} : vector<16x64xf32>, vector<64x32xf32>, vector<16x32xf32> -> vector<16x32xf32>
    %1241 = vector.broadcast %898 : vector<1x32xf32> to vector<16x32xf32>
    %1242 = arith.addf %1240, %1241 : vector<16x32xf32>
    %1243 = arith.addf %1234, %1242 : vector<16x32xf32>
    %cst_502 = arith.constant dense<0.000000e+00> : vector<16xf32>
    %1244 = vector.multi_reduction <add>, %1243, %cst_502 [1] : vector<16x32xf32> to vector<16xf32>
    %1245 = vector.shape_cast %1244 : vector<16xf32> to vector<16x1xf32>
    %cst_503 = arith.constant 3.200000e+01 : f32
    %1246 = vector.broadcast %cst_503 : f32 to vector<16x1xf32>
    %1247 = arith.divf %1245, %1246 : vector<16x1xf32>
    %1248 = vector.broadcast %1247 : vector<16x1xf32> to vector<16x32xf32>
    %1249 = arith.subf %1243, %1248 : vector<16x32xf32>
    %1250 = arith.mulf %1249, %1249 : vector<16x32xf32>
    %cst_504 = arith.constant dense<0.000000e+00> : vector<16xf32>
    %1251 = vector.multi_reduction <add>, %1250, %cst_504 [1] : vector<16x32xf32> to vector<16xf32>
    %1252 = vector.shape_cast %1251 : vector<16xf32> to vector<16x1xf32>
    %cst_505 = arith.constant 3.200000e+01 : f32
    %1253 = vector.broadcast %cst_505 : f32 to vector<16x1xf32>
    %1254 = arith.divf %1252, %1253 : vector<16x1xf32>
    %1255 = vector.broadcast %1247 : vector<16x1xf32> to vector<16x32xf32>
    %1256 = arith.subf %1243, %1255 : vector<16x32xf32>
    %cst_506 = arith.constant 9.99999974E-6 : f32
    %1257 = vector.broadcast %cst_506 : f32 to vector<16x1xf32>
    %1258 = arith.addf %1254, %1257 : vector<16x1xf32>
    %1259 = math.rsqrt %1258 : vector<16x1xf32>
    %1260 = vector.broadcast %1259 : vector<16x1xf32> to vector<16x32xf32>
    %1261 = arith.mulf %1256, %1260 : vector<16x32xf32>
    %1262 = vector.broadcast %900 : vector<1x32xf32> to vector<16x32xf32>
    %1263 = arith.mulf %1261, %1262 : vector<16x32xf32>
    %1264 = vector.broadcast %902 : vector<1x32xf32> to vector<16x32xf32>
    %1265 = arith.addf %1263, %1264 : vector<16x32xf32>
    %c0_507 = arith.constant 0 : index
    %c0_508 = arith.constant 0 : index
    %1266 = vector.load %arg9[%c0_507, %c0_508] : memref<32x128xf32, #tpu.memory_space<vmem>>, vector<32x128xf32>
    %cst_509 = arith.constant dense<0.000000e+00> : vector<16x128xf32>
    %1267 = tpu.matmul %1265, %1266, %cst_509 {dimension_numbers = #tpu.dot_dimension_numbers<[1], [0], [0], [1], [0, 0, 1, 1], [], []>} : vector<16x32xf32>, vector<32x128xf32>, vector<16x128xf32> -> vector<16x128xf32>
    %c0_510 = arith.constant 0 : index
    %c0_511 = arith.constant 0 : index
    %1268 = vector.load %arg10[%c0_510, %c0_511] : memref<1x128xf32, #tpu.memory_space<vmem>>, vector<1x128xf32>
    %1269 = vector.broadcast %1268 : vector<1x128xf32> to vector<16x128xf32>
    %1270 = arith.addf %1267, %1269 : vector<16x128xf32>
    %c0_512 = arith.constant 0 : index
    %c0_513 = arith.constant 0 : index
    %1271 = vector.load %arg43[%c0_512, %c0_513] : memref<16x128xf32, #tpu.memory_space<vmem>>, vector<16x128xf32>
    tpu.vector_store %arg43[%c0_512, %c0_513], %1270 {strides = array<i32>} : memref<16x128xf32, #tpu.memory_space<vmem>>, vector<16x128xf32>,
    return
  }
}

</mosaic_0001>

<bundles_post_ra>
// kernel: transformer_forward_pallas.1
= control target key start
LH: loop header
LB: loop body
LE: loop exit
PB: predicated region body
PF: predicated region fallthrough
CT: control target
= control target key end

     0   :  { %s14047_s6 = smov 1   ;;  %s14048_s10 = smov 2   ;;  %s15851_s0 = inlined_call_operand.smem [shape: u32[44], index: -1, kind: input, shape index: {}] }
   0x1   :  { %s14140_s5 = sld [smem:[%s15851_s0]]   ;;  %s14049_s14 = smov 3  }
   0x2   :  { %s14145_s9 = sld [smem:[%s15851_s0 + %s14047_s6]]   ;;  %s14050_s18 = smov 4  }
   0x3   :  { %s14150_s13 = sld [smem:[%s15851_s0 + %s14048_s10]]   ;;  %s14051_s22 = smov 5  }
   0x4   :  { %s14155_s17 = sld [smem:[%s15851_s0 + %s14049_s14]]   ;;  %s14052_s26 = smov 6  }
   0x5   :  { %s14160_s21 = sld [smem:[%s15851_s0 + %s14050_s18]]   ;;  %s14053_s30 = smov 7  }
   0x6   :  { %s14165_s25 = sld [smem:[%s15851_s0 + %s14051_s22]]   ;;  %s14054_s4 = smov 8  }
   0x7   :  { %15877 = sst [smem:[#allocation49_spill]] %s14140_s5  ;;  %s14055_s10 = smov 9  }
   0x8   :  { %15878 = sst [smem:[#allocation50_spill]] %s14145_s9  ;;  %s14056_s15 = smov 10  }
   0x9   :  { %15879 = sst [smem:[#allocation51_spill]] %s14150_s13  ;;  %s14057_s20 = smov 11  }
   0xa   :  { %15880 = sst [smem:[#allocation52_spill]] %s14155_s17  ;;  %s14059_s1 = smov 13  }
   0xb   :  { %s14170_s29 = sld [smem:[%s15851_s0 + %s14052_s26]]   ;;  %s14058_s26 = smov 12  }
   0xc   :  { %s14175_s3 = sld [smem:[%s15851_s0 + %s14053_s30]]   ;;  %s14060_s7 = smov 14  }
   0xd   :  { %s14180_s8 = sld [smem:[%s15851_s0 + %s14054_s4]]   ;;  %s14062_s22 = smov 16  }
   0xe   :  { %s14185_s14 = sld [smem:[%s15851_s0 + %s14055_s10]]   ;;  %s14063_s28 = smov 17  }
   0xf   :  { %s14190_s19 = sld [smem:[%s15851_s0 + %s14056_s15]]   ;;  %s14061_s15 = smov 15  }
  0x10   :  { %s14195_s24 = sld [smem:[%s15851_s0 + %s14057_s20]]  }
  0x11   :  { %15881 = sst [smem:[#allocation53_spill]] %s14170_s29 }
  0x12   :  { %15882 = sst [smem:[#allocation54_spill]] %s14175_s3 }
  0x13   :  { %15883 = sst [smem:[#allocation55_spill]] %s14180_s8 }
  0x14   :  { %15884 = sst [smem:[#allocation56_spill]] %s14185_s14 }
  0x15   :  { %15885 = sst [smem:[#allocation57_spill]] %s14190_s19 }
  0x16   :  { %15886 = sst [smem:[#allocation58_spill]] %s14195_s24 }
  0x17   :  { %s14200_s30 = sld [smem:[%s15851_s0 + %s14058_s26]]  }
  0x18   :  { %s14205_s6 = sld [smem:[%s15851_s0 + %s14059_s1]]  }
  0x19   :  { %s14210_s12 = sld [smem:[%s15851_s0 + %s14060_s7]]   ;;  %s14064_s7 = smov 18  }
  0x1a   :  { %s14215_s20 = sld [smem:[%s15851_s0 + %s14061_s15]]   ;;  %s14065_s15 = smov 19  }
  0x1b   :  { %s14220_s27 = sld [smem:[%s15851_s0 + %s14062_s22]]   ;;  %s14066_s22 = smov 20  }
  0x1c   :  { %s14225_s4 = sld [smem:[%s15851_s0 + %s14063_s28]]   ;;  %s14067_s28 = smov 21  }
  0x1d   :  { %s14230_s19 = sld [smem:[%s15851_s0 + %s14064_s7]]   ;;  %s14068_s7 = smov 22  }
  0x1e   :  { %15887 = sst [smem:[#allocation59_spill]] %s14205_s6 }
  0x1f   :  { %s14235_s14 = sld [smem:[%s15851_s0 + %s14065_s15]]   ;;  %s14069_s15 = smov 23  }
  0x20   :  { %s14240_s8 = sld [smem:[%s15851_s0 + %s14066_s22]]   ;;  %s14070_s22 = smov 24  }
  0x21   :  { %s14245_s3 = sld [smem:[%s15851_s0 + %s14067_s28]]   ;;  %s14071_s28 = smov 25  }
  0x22   :  { %15888 = sst [smem:[#allocation60_spill]] %s14225_s4 }
  0x23   :  { %s14250_s4 = sld [smem:[%s15851_s0 + %s14068_s7]]   ;;  %s14072_s7 = smov 26  }
  0x24   :  { %s14260_s6 = sld [smem:[%s15851_s0 + %s14070_s22]]   ;;  %s14074_s22 = smov 28  }
  0x25   :  { %15889 = sst [smem:[#allocation61_spill]] %s14235_s14 }
  0x26   :  { %s14255_s14 = sld [smem:[%s15851_s0 + %s14069_s15]]   ;;  %s14073_s15 = smov 27  }
  0x27   :  { %15890 = sst [smem:[#allocation62_spill]] %s14245_s3 }
  0x28   :  { %s14265_s29 = sld [smem:[%s15851_s0 + %s14071_s28]]   ;;  %s14075_s28 = smov 29  }
  0x29   :  { %s14270_s17 = sld [smem:[%s15851_s0 + %s14072_s7]]   ;;  %s14076_s7 = smov 30  }
  0x2a   :  { %15892 = sst [smem:[#allocation64_spill]] %s14260_s6 }
  0x2b   :  { %s14280_s9 = sld [smem:[%s15851_s0 + %s14074_s22]]   ;;  %s14078_s22 = smov 32  }
  0x2c   :  { %15891 = sst [smem:[#allocation63_spill]] %s14255_s14 }
  0x2d   :  { %s14275_s14 = sld [smem:[%s15851_s0 + %s14073_s15]]   ;;  %s14077_s15 = smov 31  }
  0x2e   :  { %15893 = sst [smem:[#allocation65_spill]] %s14265_s29 }
  0x2f   :  { %s14285_s29 = sld [smem:[%s15851_s0 + %s14075_s28]]   ;;  %s14079_s28 = smov 33  }
  0x30   :  { %s14290_s24 = sld [smem:[%s15851_s0 + %s14076_s7]]   ;;  %s14080_s7 = smov 34  }
  0x31   :  { %s14295_s13 = sld [smem:[%s15851_s0 + %s14077_s15]]   ;;  %s14081_s15 = smov 35  }
  0x32   :  { %s14300_s5 = sld [smem:[%s15851_s0 + %s14078_s22]]   ;;  %s14082_s22 = smov 36  }
  0x33   :  { %15894 = sst [smem:[#allocation66_spill]] %s14275_s14 }
  0x34   :  { %s14320_s14 = sld [smem:[%s15851_s0 + %s14082_s22]]   ;;  %s14086_s22 = smov 40  }
  0x35   :  { %15895 = sst [smem:[#allocation67_spill]] %s14285_s29 }
  0x36   :  { %15896 = sst [smem:[#allocation68_spill]] %s14290_s24 }
  0x37   :  { %15897 = sst [smem:[#allocation69_spill]] %s14295_s13 }
  0x38   :  { %s14305_s29 = sld [smem:[%s15851_s0 + %s14079_s28]]   ;;  %s14083_s28 = smov 37  }
  0x39   :  { %s14310_s24 = sld [smem:[%s15851_s0 + %s14080_s7]]   ;;  %s14084_s7 = smov 38  }
  0x3a   :  { %s14315_s13 = sld [smem:[%s15851_s0 + %s14081_s15]]   ;;  %s14085_s15 = smov 39  }
  0x3b   :  { %15900 = sst [smem:[#allocation72_spill]] %s14320_s14 }
  0x3c   :  { %s14335_s6 = sld [smem:[%s15851_s0 + %s14085_s15]]   ;;  %s14089_s15 = smov 43  }
  0x3d   :  { %s14340_s14 = sld [smem:[%s15851_s0 + %s14086_s22]]  }
  0x3e   :  { %15898 = sst [smem:[#allocation70_spill]] %s14305_s29 }
  0x3f   :  { %15899 = sst [smem:[#allocation71_spill]] %s14310_s24 }
  0x40   :  { %s14325_s29 = sld [smem:[%s15851_s0 + %s14083_s28]]   ;;  %s14087_s28 = smov 41  }
  0x41   :  { %s14330_s24 = sld [smem:[%s15851_s0 + %s14084_s7]]   ;;  %s14088_s7 = smov 42  }
  0x42   :  { %15902 = sst [smem:[#allocation74_spill]] %s14335_s6 }
  0x43   :  { %s14350_s3 = sld [smem:[%s15851_s0 + %s14088_s7]]  }
  0x44   :  { %s14355_s6 = sld [smem:[%s15851_s0 + %s14089_s15]]  }
  0x46   :  { %15901 = sst [smem:[#allocation73_spill]] %s14325_s29 }
  0x47   :  { %s14345_s29 = sld [smem:[%s15851_s0 + %s14087_s28]]  }
  0x48   :  { %92 = vsyncpa [#allocation3], 0 }
  0x49   :  { %93 = vsyncpa [#allocation5], 0 }
  0x4a   :  { %94 = vsyncpa [#allocation8], 0 }
  0x4b   :  { %95 = vsyncpa [#allocation11], 0 }
  0x4c   :  { %96 = vsyncpa [#allocation14], 0 }
  0x4d   :  { %97 = vsyncpa [#allocation17], 0 }
  0x4e   :  { %98 = vsyncpa [#allocation20], 0 }
  0x4f   :  { %99 = vsyncpa [#allocation23], 0 }
  0x50   :  { %100 = vsyncpa [#allocation26], 0 }
  0x51   :  { %101 = vsyncpa [#allocation29], 0 }
  0x52   :  { %102 = vsyncpa [#allocation32], 0 }
  0x53   :  { %103 = vsyncpa [#allocation35], 0  ;;  %s14090_s22 = smov [#allocation4]   ;;  %s13517_s0 = scalar_lea.hbm %s14165_s25, 256 }
  0x54   :  { %s129_s23 = sshll.u32 %s14090_s22, 4  ;;  %p13518_p0 = scmp.ne.s32.totalorder %s14165_s25, %s13517_s0  ;;  %s130_s23 = int_to_ptr.vmem [resolvable:$true] %s129_s23 }
  0x55   :  { %p13521_p1 = scmp.lt.u32.totalorder %s13517_s0, %s14165_s25 }
  0x57   :  { %p13523_p2 = pnand %p13521_p1, %p13518_p0 }
  0x59   :  { %13526 = shalt.err (!%p13523_p2)
}
  0x5a   :  { %s13527_s26 = scalar_lea.vmem %s130_s23, 256  ;;  %p13532_p4 = scmp.lt.s32.totalorder %s130_s23, %s130_s23 }
  0x5b   :  { %p13528_p3 = scmp.ne.s32.totalorder %s130_s23, %s13527_s26  ;;  %p13533_p5 = scmp.lt.s32.totalorder %s13527_s26, %s13527_s26 }
  0x5d   :  { %p13534_p6 = por %p13533_p5, %p13532_p4 }
  0x5f   :  { %p13535_p7 = pnand %p13534_p6, %p13528_p3 }
  0x61   :  { %13538 = shalt.err (!%p13535_p7)
}
  0x62   :  { %s14091_s28 = smov 128   ;;  %s14092_s1 = smov 8  }
  0x63   :  { %135 = dma.hbm_to_vmem [thread:$0]  %s14165_s25, 256, %s130_s23, [#allocation5], %s14091_s28, %s14091_s28, %s14092_s1  }
  0x64   :  { %s14093_s2 = smov [#allocation7]   ;;  %s14094_s10 = smov [#allocation10]  }
  0x65   :  { %s167_s7 = sshll.u32 %s14093_s2, 4  ;;  %s191_s11 = sshll.u32 %s14094_s10, 4  ;;  %s168_s7 = int_to_ptr.vmem [resolvable:$true] %s167_s7  ;;  %s192_s11 = int_to_ptr.vmem [resolvable:$true] %s191_s11 }
  0x66   :  { %s13539_s15 = scalar_lea.hbm %s14210_s12, 32 }
  0x67   :  { %p13540_p8 = scmp.ne.s32.totalorder %s14210_s12, %s13539_s15  ;;  %p13543_p9 = scmp.lt.u32.totalorder %s13539_s15, %s14210_s12 }
  0x69   :  { %p13545_p10 = pnand %p13543_p9, %p13540_p8 }
  0x6b   :  { %13548 = shalt.err (!%p13545_p10)
}
  0x6c   :  { %s13549_s16 = scalar_lea.vmem %s168_s7, 32  ;;  %p13554_p12 = scmp.lt.s32.totalorder %s168_s7, %s168_s7 }
  0x6d   :  { %p13550_p11 = scmp.ne.s32.totalorder %s168_s7, %s13549_s16  ;;  %p13555_p13 = scmp.lt.s32.totalorder %s13549_s16, %s13549_s16 }
  0x6f   :  { %p13556_p0 = por %p13555_p13, %p13554_p12 }
  0x71   :  { %p13557_p1 = pnand %p13556_p0, %p13550_p11 }
  0x73   :  { %13560 = shalt.err (!%p13557_p1)
}
  0x74   :  { %s14095_s18 = smov 16   ;;  %s14096_s25 = smov 1  }
  0x75   :  { %173 = dma.hbm_to_vmem [thread:$0]  %s14210_s12, 32, %s168_s7, [#allocation8], %s14095_s18, %s14095_s18, %s14096_s25  }
  0x76   :  { %s13561_s22 = scalar_lea.hbm %s14220_s27, 32 }
  0x77   :  { %p13562_p2 = scmp.ne.s32.totalorder %s14220_s27, %s13561_s22  ;;  %p13565_p3 = scmp.lt.u32.totalorder %s13561_s22, %s14220_s27 }
  0x79   :  { %p13567_p4 = pnand %p13565_p3, %p13562_p2 }
  0x7b   :  { %13570 = shalt.err (!%p13567_p4)
}
  0x7c   :  { %s13571_s23 = scalar_lea.vmem %s192_s11, 32  ;;  %p13576_p6 = scmp.lt.s32.totalorder %s192_s11, %s192_s11 }
  0x7d   :  { %p13572_p5 = scmp.ne.s32.totalorder %s192_s11, %s13571_s23  ;;  %p13577_p7 = scmp.lt.s32.totalorder %s13571_s23, %s13571_s23 }
  0x7f   :  { %p13578_p8 = por %p13577_p7, %p13576_p6 }
  0x81   :  { %p13579_p9 = pnand %p13578_p8, %p13572_p5 }
  0x83   :  { %13582 = shalt.err (!%p13579_p9)
}
  0x84   :  { %197 = dma.hbm_to_vmem [thread:$0]  %s14220_s27, 32, %s192_s11, [#allocation11], %s14095_s18, %s14095_s18, %s14096_s25  }
  0x85   :  { %s14097_s12 = smov [#allocation13]   ;;  %s14098_s26 = smov [#allocation16]  }
  0x86   :  { %s219_s0 = sshll.u32 %s14097_s12, 4  ;;  %s243_s2 = sshll.u32 %s14098_s26, 4  ;;  %s220_s0 = int_to_ptr.vmem [resolvable:$true] %s219_s0  ;;  %s244_s2 = int_to_ptr.vmem [resolvable:$true] %s243_s2 }
  0x87   :  { %s13583_s7 = scalar_lea.hbm %s14240_s8, 32 }
  0x88   :  { %p13584_p10 = scmp.ne.s32.totalorder %s14240_s8, %s13583_s7  ;;  %p13587_p11 = scmp.lt.u32.totalorder %s13583_s7, %s14240_s8 }
  0x8a   :  { %p13589_p12 = pnand %p13587_p11, %p13584_p10 }
  0x8c   :  { %13592 = shalt.err (!%p13589_p12)
}
  0x8d   :  { %s13593_s10 = scalar_lea.vmem %s220_s0, 32  ;;  %p13598_p0 = scmp.lt.s32.totalorder %s220_s0, %s220_s0 }
  0x8e   :  { %p13594_p13 = scmp.ne.s32.totalorder %s220_s0, %s13593_s10  ;;  %p13599_p1 = scmp.lt.s32.totalorder %s13593_s10, %s13593_s10 }
  0x90   :  { %p13600_p2 = por %p13599_p1, %p13598_p0 }
  0x92   :  { %p13601_p3 = pnand %p13600_p2, %p13594_p13 }
  0x94   :  { %13604 = shalt.err (!%p13601_p3)
}
  0x95   :  { %225 = dma.hbm_to_vmem [thread:$0]  %s14240_s8, 32, %s220_s0, [#allocation14], %s14095_s18, %s14095_s18, %s14096_s25  }
  0x96   :  { %s13605_s27 = scalar_lea.hbm %s14250_s4, 32 }
  0x97   :  { %p13606_p4 = scmp.ne.s32.totalorder %s14250_s4, %s13605_s27  ;;  %p13609_p5 = scmp.lt.u32.totalorder %s13605_s27, %s14250_s4 }
  0x99   :  { %p13611_p6 = pnand %p13609_p5, %p13606_p4 }
  0x9b   :  { %13614 = shalt.err (!%p13611_p6)
}
  0x9c   :  { %s13615_s11 = scalar_lea.vmem %s244_s2, 32  ;;  %p13620_p8 = scmp.lt.s32.totalorder %s244_s2, %s244_s2 }
  0x9d   :  { %p13616_p7 = scmp.ne.s32.totalorder %s244_s2, %s13615_s11  ;;  %p13621_p9 = scmp.lt.s32.totalorder %s13615_s11, %s13615_s11 }
  0x9f   :  { %p13622_p10 = por %p13621_p9, %p13620_p8 }
  0xa1   :  { %p13623_p11 = pnand %p13622_p10, %p13616_p7 }
  0xa3   :  { %13626 = shalt.err (!%p13623_p11)
}
  0xa4   :  { %249 = dma.hbm_to_vmem [thread:$0]  %s14250_s4, 32, %s244_s2, [#allocation17], %s14095_s18, %s14095_s18, %s14096_s25  }
  0xa5   :  { %s14099_s8 = smov [#allocation19]   ;;  %s14100_s16 = smov [#allocation22]  }
  0xa6   :  { %s271_s15 = sshll.u32 %s14099_s8, 4  ;;  %s295_s22 = sshll.u32 %s14100_s16, 4  ;;  %s272_s15 = int_to_ptr.vmem [resolvable:$true] %s271_s15  ;;  %s296_s22 = int_to_ptr.vmem [resolvable:$true] %s295_s22 }
  0xa7   :  { %s13627_s23 = scalar_lea.hbm %s14270_s17, 32 }
  0xa8   :  { %p13628_p12 = scmp.ne.s32.totalorder %s14270_s17, %s13627_s23  ;;  %p13631_p13 = scmp.lt.u32.totalorder %s13627_s23, %s14270_s17 }
  0xaa   :  { %p13633_p0 = pnand %p13631_p13, %p13628_p12 }
  0xac   :  { %13636 = shalt.err (!%p13633_p0)
}
  0xad   :  { %s13637_s12 = scalar_lea.vmem %s272_s15, 32  ;;  %p13642_p2 = scmp.lt.s32.totalorder %s272_s15, %s272_s15 }
  0xae   :  { %p13638_p1 = scmp.ne.s32.totalorder %s272_s15, %s13637_s12  ;;  %p13643_p3 = scmp.lt.s32.totalorder %s13637_s12, %s13637_s12 }
  0xb0   :  { %p13644_p4 = por %p13643_p3, %p13642_p2 }
  0xb2   :  { %p13645_p5 = pnand %p13644_p4, %p13638_p1 }
  0xb4   :  { %13648 = shalt.err (!%p13645_p5)
}
  0xb5   :  { %277 = dma.hbm_to_vmem [thread:$0]  %s14270_s17, 32, %s272_s15, [#allocation20], %s14095_s18, %s14095_s18, %s14096_s25  }
  0xb6   :  { %s13649_s4 = scalar_lea.hbm %s14280_s9, 32 }
  0xb7   :  { %p13650_p6 = scmp.ne.s32.totalorder %s14280_s9, %s13649_s4  ;;  %p13653_p7 = scmp.lt.u32.totalorder %s13649_s4, %s14280_s9 }
  0xb9   :  { %p13655_p8 = pnand %p13653_p7, %p13650_p6 }
  0xbb   :  { %13658 = shalt.err (!%p13655_p8)
}
  0xbc   :  { %s13659_s0 = scalar_lea.vmem %s296_s22, 32  ;;  %p13664_p10 = scmp.lt.s32.totalorder %s296_s22, %s296_s22 }
  0xbd   :  { %p13660_p9 = scmp.ne.s32.totalorder %s296_s22, %s13659_s0  ;;  %p13665_p11 = scmp.lt.s32.totalorder %s13659_s0, %s13659_s0 }
  0xbf   :  { %p13666_p12 = por %p13665_p11, %p13664_p10 }
  0xc1   :  { %p13667_p13 = pnand %p13666_p12, %p13660_p9 }
  0xc3   :  { %13670 = shalt.err (!%p13667_p13)
}
  0xc4   :  { %301 = dma.hbm_to_vmem [thread:$0]  %s14280_s9, 32, %s296_s22, [#allocation23], %s14095_s18, %s14095_s18, %s14096_s25  }
  0xc5   :  { %s14101_s17 = smov [#allocation25]   ;;  %s14102_s2 = smov [#allocation28]  }
  0xc6   :  { %s323_s26 = sshll.u32 %s14101_s17, 4  ;;  %s349_s7 = sshll.u32 %s14102_s2, 4  ;;  %s324_s26 = int_to_ptr.vmem [resolvable:$true] %s323_s26  ;;  %s350_s7 = int_to_ptr.vmem [resolvable:$true] %s349_s7 }
  0xc7   :  { %s13671_s10 = scalar_lea.hbm %s14300_s5, 32 }
  0xc8   :  { %p13672_p0 = scmp.ne.s32.totalorder %s14300_s5, %s13671_s10  ;;  %p13675_p1 = scmp.lt.u32.totalorder %s13671_s10, %s14300_s5 }
  0xca   :  { %p13677_p2 = pnand %p13675_p1, %p13672_p0 }
  0xcc   :  { %13680 = shalt.err (!%p13677_p2)
}
  0xcd   :  { %s13681_s27 = scalar_lea.vmem %s324_s26, 32  ;;  %p13686_p4 = scmp.lt.s32.totalorder %s324_s26, %s324_s26 }
  0xce   :  { %p13682_p3 = scmp.ne.s32.totalorder %s324_s26, %s13681_s27  ;;  %p13687_p5 = scmp.lt.s32.totalorder %s13681_s27, %s13681_s27 }
  0xd0   :  { %p13688_p6 = por %p13687_p5, %p13686_p4 }
  0xd2   :  { %p13689_p7 = pnand %p13688_p6, %p13682_p3 }
  0xd4   :  { %13692 = shalt.err (!%p13689_p7)
}
  0xd5   :  { %329 = dma.hbm_to_vmem [thread:$0]  %s14300_s5, 32, %s324_s26, [#allocation26], %s14095_s18, %s14095_s18, %s14096_s25  }
  0xd6   :  { %s13693_s9 = scalar_lea.hbm %s14315_s13, 32 }
  0xd7   :  { %p13694_p8 = scmp.ne.s32.totalorder %s14315_s13, %s13693_s9  ;;  %p13697_p9 = scmp.lt.u32.totalorder %s13693_s9, %s14315_s13 }
  0xd9   :  { %p13699_p10 = pnand %p13697_p9, %p13694_p8 }
  0xdb   :  { %13702 = shalt.err (!%p13699_p10)
}
  0xdc   :  { %s13703_s11 = scalar_lea.vmem %s350_s7, 32  ;;  %p13708_p12 = scmp.lt.s32.totalorder %s350_s7, %s350_s7 }
  0xdd   :  { %p13704_p11 = scmp.ne.s32.totalorder %s350_s7, %s13703_s11  ;;  %p13709_p13 = scmp.lt.s32.totalorder %s13703_s11, %s13703_s11 }
  0xdf   :  { %p13710_p0 = por %p13709_p13, %p13708_p12 }
  0xe1   :  { %p13711_p1 = pnand %p13710_p0, %p13704_p11 }
  0xe3   :  { %13714 = shalt.err (!%p13711_p1)
}
  0xe4   :  { %355 = dma.hbm_to_vmem [thread:$0]  %s14315_s13, 32, %s350_s7, [#allocation29], %s14095_s18, %s14095_s18, %s14096_s25  }
  0xe5   :  { %s14103_s5 = smov [#allocation31]   ;;  %s14104_s15 = smov [#allocation34]  }
  0xe6   :  { %s375_s8 = sshll.u32 %s14103_s5, 4  ;;  %s401_s16 = sshll.u32 %s14104_s15, 4  ;;  %s376_s8 = int_to_ptr.vmem [resolvable:$true] %s375_s8  ;;  %s402_s16 = int_to_ptr.vmem [resolvable:$true] %s401_s16 }
  0xe7   :  { %s13715_s22 = scalar_lea.hbm %s14330_s24, 32 }
  0xe8   :  { %p13716_p2 = scmp.ne.s32.totalorder %s14330_s24, %s13715_s22  ;;  %p13719_p3 = scmp.lt.u32.totalorder %s13715_s22, %s14330_s24 }
  0xea   :  { %p13721_p4 = pnand %p13719_p3, %p13716_p2 }
  0xec   :  { %13724 = shalt.err (!%p13721_p4)
}
  0xed   :  { %s13725_s23 = scalar_lea.vmem %s376_s8, 32  ;;  %p13730_p6 = scmp.lt.s32.totalorder %s376_s8, %s376_s8 }
  0xee   :  { %p13726_p5 = scmp.ne.s32.totalorder %s376_s8, %s13725_s23  ;;  %p13731_p7 = scmp.lt.s32.totalorder %s13725_s23, %s13725_s23 }
  0xf0   :  { %p13732_p8 = por %p13731_p7, %p13730_p6 }
  0xf2   :  { %p13733_p9 = pnand %p13732_p8, %p13726_p5 }
  0xf4   :  { %13736 = shalt.err (!%p13733_p9)
}
  0xf5   :  { %381 = dma.hbm_to_vmem [thread:$0]  %s14330_s24, 32, %s376_s8, [#allocation32], %s14095_s18, %s14095_s18, %s14096_s25  }
  0xf6   :  { %s13737_s13 = scalar_lea.hbm %s14345_s29, 32 }
  0xf7   :  { %p13738_p10 = scmp.ne.s32.totalorder %s14345_s29, %s13737_s13  ;;  %p13741_p11 = scmp.lt.u32.totalorder %s13737_s13, %s14345_s29 }
  0xf9   :  { %p13743_p12 = pnand %p13741_p11, %p13738_p10 }
  0xfb   :  { %13746 = shalt.err (!%p13743_p12)
}
  0xfc   :  { %s13747_s12 = scalar_lea.vmem %s402_s16, 32  ;;  %p13752_p0 = scmp.lt.s32.totalorder %s402_s16, %s402_s16 }
  0xfd   :  { %p13748_p13 = scmp.ne.s32.totalorder %s402_s16, %s13747_s12  ;;  %p13753_p1 = scmp.lt.s32.totalorder %s13747_s12, %s13747_s12 }
  0xff   :  { %p13754_p2 = por %p13753_p1, %p13752_p0 }
 0x101   :  { %p13755_p3 = pnand %p13754_p2, %p13748_p13 }
 0x103   :  { %13758 = shalt.err (!%p13755_p3)
}
 0x104   :  { %407 = dma.hbm_to_vmem [thread:$0]  %s14345_s29, 32, %s402_s16, [#allocation35], %s14095_s18, %s14095_s18, %s14096_s25  }
 0x105   :  { %s14105_s24 = smov [#allocation2]   ;;  %s14106_s0 = smov [#allocation6]  }
 0x106   :  { %s117_s4 = sshll.u32 %s14105_s24, 4  ;;  %s153_s17 = sshll.u32 %s14106_s0, 4  ;;  %s118_s4 = int_to_ptr.vmem [resolvable:$true] %s117_s4  ;;  %s154_s17 = int_to_ptr.vmem [resolvable:$true] %s153_s17 }
 0x107   :  { %s13759_s26 = scalar_lea.hbm %s14160_s21, 256 }
 0x108   :  { %p13760_p4 = scmp.ne.s32.totalorder %s14160_s21, %s13759_s26  ;;  %p13763_p5 = scmp.lt.u32.totalorder %s13759_s26, %s14160_s21 }
 0x10a   :  { %p13765_p6 = pnand %p13763_p5, %p13760_p4 }
 0x10c   :  { %13768 = shalt.err (!%p13765_p6)
}
 0x10d   :  { %s13769_s2 = scalar_lea.vmem %s118_s4, 256  ;;  %p13774_p8 = scmp.lt.s32.totalorder %s118_s4, %s118_s4 }
 0x10e   :  { %p13770_p7 = scmp.ne.s32.totalorder %s118_s4, %s13769_s2  ;;  %p13775_p9 = scmp.lt.s32.totalorder %s13769_s2, %s13769_s2 }
 0x110   :  { %p13776_p10 = por %p13775_p9, %p13774_p8 }
 0x112   :  { %p13777_p11 = pnand %p13776_p10, %p13770_p7 }
 0x114   :  { %13780 = shalt.err (!%p13777_p11)
}
 0x115   :  { %123 = dma.hbm_to_vmem [thread:$0]  %s14160_s21, 256, %s118_s4, [#allocation3], %s14091_s28, %s14091_s28, %s14092_s1  }
 0x116   :  { %s13781_s29 = scalar_lea.hbm %s14200_s30, 32 }
 0x117   :  { %p13782_p12 = scmp.ne.s32.totalorder %s14200_s30, %s13781_s29  ;;  %p13785_p13 = scmp.lt.u32.totalorder %s13781_s29, %s14200_s30 }
 0x119   :  { %p13787_p0 = pnand %p13785_p13, %p13782_p12 }
 0x11b   :  { %13790 = shalt.err (!%p13787_p0)
}
 0x11c   :  { %s13791_s7 = scalar_lea.vmem %s154_s17, 32  ;;  %p13796_p2 = scmp.lt.s32.totalorder %s154_s17, %s154_s17 }
 0x11d   :  { %p13792_p1 = scmp.ne.s32.totalorder %s154_s17, %s13791_s7  ;;  %p13797_p3 = scmp.lt.s32.totalorder %s13791_s7, %s13791_s7 }
 0x11f   :  { %p13798_p4 = por %p13797_p3, %p13796_p2 }
 0x121   :  { %p13799_p5 = pnand %p13798_p4, %p13792_p1 }
 0x123   :  { %13802 = shalt.err (!%p13799_p5)
}
 0x124   :  { %159 = dma.hbm_to_vmem [thread:$0]  %s14200_s30, 32, %s154_s17, [#allocation5], %s14095_s18, %s14095_s18, %s14096_s25  }
 0x125   :  { %s14107_s21 = smov [#allocation9]   ;;  %s14108_s10 = smov [#allocation12]  }
 0x126   :  { %s179_s28 = sshll.u32 %s14107_s21, 4  ;;  %s205_s27 = sshll.u32 %s14108_s10, 4  ;;  %s180_s28 = int_to_ptr.vmem [resolvable:$true] %s179_s28  ;;  %s206_s27 = int_to_ptr.vmem [resolvable:$true] %s205_s27 }
 0x127   :  { %s13803_s9 = scalar_lea.hbm %s14215_s20, 32 }
 0x128   :  { %p13804_p6 = scmp.ne.s32.totalorder %s14215_s20, %s13803_s9  ;;  %p13807_p7 = scmp.lt.u32.totalorder %s13803_s9, %s14215_s20 }
 0x12a   :  { %p13809_p8 = pnand %p13807_p7, %p13804_p6 }
 0x12c   :  { %13812 = shalt.err (!%p13809_p8)
}
 0x12d   :  { %s13813_s11 = scalar_lea.vmem %s180_s28, 32  ;;  %p13818_p10 = scmp.lt.s32.totalorder %s180_s28, %s180_s28 }
 0x12e   :  { %p13814_p9 = scmp.ne.s32.totalorder %s180_s28, %s13813_s11  ;;  %p13819_p11 = scmp.lt.s32.totalorder %s13813_s11, %s13813_s11 }
 0x130   :  { %p13820_p12 = por %p13819_p11, %p13818_p10 }
 0x132   :  { %p13821_p13 = pnand %p13820_p12, %p13814_p9 }
 0x134   :  { %13824 = shalt.err (!%p13821_p13)
}
 0x135   :  { %185 = dma.hbm_to_vmem [thread:$0]  %s14215_s20, 32, %s180_s28, [#allocation8], %s14095_s18, %s14095_s18, %s14096_s25  }
 0x136   :  { %s13825_s30 = scalar_lea.hbm %s14230_s19, 32 }
 0x137   :  { %p13826_p0 = scmp.ne.s32.totalorder %s14230_s19, %s13825_s30  ;;  %p13829_p1 = scmp.lt.u32.totalorder %s13825_s30, %s14230_s19 }
 0x139   :  { %p13831_p2 = pnand %p13829_p1, %p13826_p0 }
 0x13b   :  { %13834 = shalt.err (!%p13831_p2)
}
 0x13c   :  { %s13835_s5 = scalar_lea.vmem %s206_s27, 32  ;;  %p13840_p4 = scmp.lt.s32.totalorder %s206_s27, %s206_s27 }
 0x13d   :  { %p13836_p3 = scmp.ne.s32.totalorder %s206_s27, %s13835_s5  ;;  %p13841_p5 = scmp.lt.s32.totalorder %s13835_s5, %s13835_s5 }
 0x13f   :  { %p13842_p6 = por %p13841_p5, %p13840_p4 }
 0x141   :  { %p13843_p7 = pnand %p13842_p6, %p13836_p3 }
 0x143   :  { %13846 = shalt.err (!%p13843_p7)
}
 0x144   :  { %s15903_s8 = sld [smem:[#allocation62_spill]]  ;;  %s14109_s20 = smov [#allocation15]  }
 0x145   :  { %211 = dma.hbm_to_vmem [thread:$0]  %s14230_s19, 32, %s206_s27, [#allocation11], %s14095_s18, %s14095_s18, %s14096_s25  }
 0x146   :  { %s231_s15 = sshll.u32 %s14109_s20, 4  ;;  %s14110_s16 = smov [#allocation18]   ;;  %s232_s15 = int_to_ptr.vmem [resolvable:$true] %s231_s15 }
 0x147   :  { %s257_s22 = sshll.u32 %s14110_s16, 4  ;;  %s258_s22 = int_to_ptr.vmem [resolvable:$true] %s257_s22 }
 0x14a   :  { %s13847_s23 = scalar_lea.hbm %s15903_s8, 32 }
 0x14b   :  { %p13848_p8 = scmp.ne.s32.totalorder %s15903_s8, %s13847_s23  ;;  %p13851_p9 = scmp.lt.u32.totalorder %s13847_s23, %s15903_s8 }
 0x14d   :  { %p13853_p10 = pnand %p13851_p9, %p13848_p8 }
 0x14f   :  { %13856 = shalt.err (!%p13853_p10)
}
 0x150   :  { %s13857_s13 = scalar_lea.vmem %s232_s15, 32  ;;  %p13862_p12 = scmp.lt.s32.totalorder %s232_s15, %s232_s15 }
 0x151   :  { %p13858_p11 = scmp.ne.s32.totalorder %s232_s15, %s13857_s13  ;;  %p13863_p13 = scmp.lt.s32.totalorder %s13857_s13, %s13857_s13 }
 0x153   :  { %p13864_p0 = por %p13863_p13, %p13862_p12 }
 0x155   :  { %p13865_p1 = pnand %p13864_p0, %p13858_p11 }
 0x157   :  { %13868 = shalt.err (!%p13865_p1)
}
 0x158   :  { %s15904_s19 = sld [smem:[#allocation64_spill]] }
 0x159   :  { %237 = dma.hbm_to_vmem [thread:$0]  %s15903_s8, 32, %s232_s15, [#allocation14], %s14095_s18, %s14095_s18, %s14096_s25  }
 0x15e   :  { %s13869_s12 = scalar_lea.hbm %s15904_s19, 32 }
 0x15f   :  { %p13870_p2 = scmp.ne.s32.totalorder %s15904_s19, %s13869_s12  ;;  %p13873_p3 = scmp.lt.u32.totalorder %s13869_s12, %s15904_s19 }
 0x161   :  { %p13875_p4 = pnand %p13873_p3, %p13870_p2 }
 0x163   :  { %13878 = shalt.err (!%p13875_p4)
}
 0x164   :  { %s13879_s24 = scalar_lea.vmem %s258_s22, 32  ;;  %p13884_p6 = scmp.lt.s32.totalorder %s258_s22, %s258_s22 }
 0x165   :  { %p13880_p5 = scmp.ne.s32.totalorder %s258_s22, %s13879_s24  ;;  %p13885_p7 = scmp.lt.s32.totalorder %s13879_s24, %s13879_s24 }
 0x167   :  { %p13886_p8 = por %p13885_p7, %p13884_p6 }
 0x169   :  { %p13887_p9 = pnand %p13886_p8, %p13880_p5 }
 0x16b   :  { %13890 = shalt.err (!%p13887_p9)
}
 0x16c   :  { %s15905_s4 = sld [smem:[#allocation66_spill]]  ;;  %s14111_s0 = smov [#allocation21]  }
 0x16d   :  { %263 = dma.hbm_to_vmem [thread:$0]  %s15904_s19, 32, %s258_s22, [#allocation17], %s14095_s18, %s14095_s18, %s14096_s25  }
 0x16e   :  { %s283_s17 = sshll.u32 %s14111_s0, 4  ;;  %s14112_s26 = smov [#allocation24]   ;;  %s284_s17 = int_to_ptr.vmem [resolvable:$true] %s283_s17 }
 0x16f   :  { %s309_s2 = sshll.u32 %s14112_s26, 4  ;;  %s310_s2 = int_to_ptr.vmem [resolvable:$true] %s309_s2 }
 0x172   :  { %s13891_s29 = scalar_lea.hbm %s15905_s4, 32 }
 0x173   :  { %p13892_p10 = scmp.ne.s32.totalorder %s15905_s4, %s13891_s29  ;;  %p13895_p11 = scmp.lt.u32.totalorder %s13891_s29, %s15905_s4 }
 0x175   :  { %p13897_p12 = pnand %p13895_p11, %p13892_p10 }
 0x177   :  { %13900 = shalt.err (!%p13897_p12)
}
 0x178   :  { %s13901_s7 = scalar_lea.vmem %s284_s17, 32  ;;  %p13906_p0 = scmp.lt.s32.totalorder %s284_s17, %s284_s17 }
 0x179   :  { %p13902_p13 = scmp.ne.s32.totalorder %s284_s17, %s13901_s7  ;;  %p13907_p1 = scmp.lt.s32.totalorder %s13901_s7, %s13901_s7 }
 0x17b   :  { %p13908_p2 = por %p13907_p1, %p13906_p0 }
 0x17d   :  { %p13909_p3 = pnand %p13908_p2, %p13902_p13 }
 0x17f   :  { %13912 = shalt.err (!%p13909_p3)
}
 0x180   :  { %s15906_s21 = sld [smem:[#allocation68_spill]] }
 0x181   :  { %289 = dma.hbm_to_vmem [thread:$0]  %s15905_s4, 32, %s284_s17, [#allocation20], %s14095_s18, %s14095_s18, %s14096_s25  }
 0x186   :  { %s13913_s28 = scalar_lea.hbm %s15906_s21, 32 }
 0x187   :  { %p13914_p4 = scmp.ne.s32.totalorder %s15906_s21, %s13913_s28  ;;  %p13917_p5 = scmp.lt.u32.totalorder %s13913_s28, %s15906_s21 }
 0x189   :  { %p13919_p6 = pnand %p13917_p5, %p13914_p4 }
 0x18b   :  { %13922 = shalt.err (!%p13919_p6)
}
 0x18c   :  { %s13923_s10 = scalar_lea.vmem %s310_s2, 32  ;;  %p13928_p8 = scmp.lt.s32.totalorder %s310_s2, %s310_s2 }
 0x18d   :  { %p13924_p7 = scmp.ne.s32.totalorder %s310_s2, %s13923_s10  ;;  %p13929_p9 = scmp.lt.s32.totalorder %s13923_s10, %s13923_s10 }
 0x18f   :  { %p13930_p10 = por %p13929_p9, %p13928_p8 }
 0x191   :  { %p13931_p11 = pnand %p13930_p10, %p13924_p7 }
 0x193   :  { %13934 = shalt.err (!%p13931_p11)
}
 0x194   :  { %s15907_s27 = sld [smem:[#allocation71_spill]]  ;;  %s14113_s9 = smov [#allocation27]  }
 0x195   :  { %315 = dma.hbm_to_vmem [thread:$0]  %s15906_s21, 32, %s310_s2, [#allocation23], %s14095_s18, %s14095_s18, %s14096_s25  }
 0x196   :  { %s337_s11 = sshll.u32 %s14113_s9, 4  ;;  %s14114_s30 = smov [#allocation30]   ;;  %s338_s11 = int_to_ptr.vmem [resolvable:$true] %s337_s11 }
 0x197   :  { %s361_s5 = sshll.u32 %s14114_s30, 4  ;;  %s362_s5 = int_to_ptr.vmem [resolvable:$true] %s361_s5 }
 0x19a   :  { %s13935_s8 = scalar_lea.hbm %s15907_s27, 32 }
 0x19b   :  { %p13936_p12 = scmp.ne.s32.totalorder %s15907_s27, %s13935_s8  ;;  %p13939_p13 = scmp.lt.u32.totalorder %s13935_s8, %s15907_s27 }
 0x19d   :  { %p13941_p0 = pnand %p13939_p13, %p13936_p12 }
 0x19f   :  { %13944 = shalt.err (!%p13941_p0)
}
 0x1a0   :  { %s13945_s20 = scalar_lea.vmem %s338_s11, 32  ;;  %p13950_p2 = scmp.lt.s32.totalorder %s338_s11, %s338_s11 }
 0x1a1   :  { %p13946_p1 = scmp.ne.s32.totalorder %s338_s11, %s13945_s20  ;;  %p13951_p3 = scmp.lt.s32.totalorder %s13945_s20, %s13945_s20 }
 0x1a3   :  { %p13952_p4 = por %p13951_p3, %p13950_p2 }
 0x1a5   :  { %p13953_p5 = pnand %p13952_p4, %p13946_p1 }
 0x1a7   :  { %13956 = shalt.err (!%p13953_p5)
}
 0x1a8   :  { %s15908_s15 = sld [smem:[#allocation72_spill]] }
 0x1a9   :  { %343 = dma.hbm_to_vmem [thread:$0]  %s15907_s27, 32, %s338_s11, [#allocation26], %s14095_s18, %s14095_s18, %s14096_s25  }
 0x1ae   :  { %s13957_s16 = scalar_lea.hbm %s15908_s15, 32 }
 0x1af   :  { %p13958_p6 = scmp.ne.s32.totalorder %s15908_s15, %s13957_s16  ;;  %p13961_p7 = scmp.lt.u32.totalorder %s13957_s16, %s15908_s15 }
 0x1b1   :  { %p13963_p8 = pnand %p13961_p7, %p13958_p6 }
 0x1b3   :  { %13966 = shalt.err (!%p13963_p8)
}
 0x1b4   :  { %s13967_s22 = scalar_lea.vmem %s362_s5, 32  ;;  %p13972_p10 = scmp.lt.s32.totalorder %s362_s5, %s362_s5 }
 0x1b5   :  { %p13968_p9 = scmp.ne.s32.totalorder %s362_s5, %s13967_s22  ;;  %p13973_p11 = scmp.lt.s32.totalorder %s13967_s22, %s13967_s22 }
 0x1b7   :  { %p13974_p12 = por %p13973_p11, %p13972_p10 }
 0x1b9   :  { %p13975_p13 = pnand %p13974_p12, %p13968_p9 }
 0x1bb   :  { %13978 = shalt.err (!%p13975_p13)
}
 0x1bc   :  { %367 = dma.hbm_to_vmem [thread:$0]  %s15908_s15, 32, %s362_s5, [#allocation29], %s14095_s18, %s14095_s18, %s14096_s25  }
 0x1bd   :  { %s14115_s23 = smov [#allocation33]   ;;  %s14116_s19 = smov [#allocation36]  }
 0x1be   :  { %s389_s13 = sshll.u32 %s14115_s23, 4  ;;  %s413_s12 = sshll.u32 %s14116_s19, 4  ;;  %s390_s13 = int_to_ptr.vmem [resolvable:$true] %s389_s13  ;;  %s414_s12 = int_to_ptr.vmem [resolvable:$true] %s413_s12 }
 0x1bf   :  { %s13979_s24 = scalar_lea.hbm %s14340_s14, 32 }
 0x1c0   :  { %p13980_p0 = scmp.ne.s32.totalorder %s14340_s14, %s13979_s24  ;;  %p13983_p1 = scmp.lt.u32.totalorder %s13979_s24, %s14340_s14 }
 0x1c2   :  { %p13985_p2 = pnand %p13983_p1, %p13980_p0 }
 0x1c4   :  { %13988 = shalt.err (!%p13985_p2)
}
 0x1c5   :  { %s13989_s4 = scalar_lea.vmem %s390_s13, 32  ;;  %p13994_p4 = scmp.lt.s32.totalorder %s390_s13, %s390_s13 }
 0x1c6   :  { %p13990_p3 = scmp.ne.s32.totalorder %s390_s13, %s13989_s4  ;;  %p13995_p5 = scmp.lt.s32.totalorder %s13989_s4, %s13989_s4 }
 0x1c8   :  { %p13996_p6 = por %p13995_p5, %p13994_p4 }
 0x1ca   :  { %p13997_p7 = pnand %p13996_p6, %p13990_p3 }
 0x1cc   :  { %14000 = shalt.err (!%p13997_p7)
}
 0x1cd   :  { %395 = dma.hbm_to_vmem [thread:$0]  %s14340_s14, 32, %s390_s13, [#allocation32], %s14095_s18, %s14095_s18, %s14096_s25  }
 0x1ce   :  { %s14001_s0 = scalar_lea.hbm %s14350_s3, 32 }
 0x1cf   :  { %p14002_p8 = scmp.ne.s32.totalorder %s14350_s3, %s14001_s0  ;;  %p14005_p9 = scmp.lt.u32.totalorder %s14001_s0, %s14350_s3 }
 0x1d1   :  { %p14007_p10 = pnand %p14005_p9, %p14002_p8 }
 0x1d3   :  { %14010 = shalt.err (!%p14007_p10)
}
 0x1d4   :  { %s14011_s17 = scalar_lea.vmem %s414_s12, 32  ;;  %p14016_p12 = scmp.lt.s32.totalorder %s414_s12, %s414_s12 }
 0x1d5   :  { %p14012_p11 = scmp.ne.s32.totalorder %s414_s12, %s14011_s17  ;;  %p14017_p13 = scmp.lt.s32.totalorder %s14011_s17, %s14011_s17 }
 0x1d7   :  { %p14018_p0 = por %p14017_p13, %p14016_p12 }
 0x1d9   :  { %p14019_p1 = pnand %p14018_p0, %p14012_p11 }
 0x1db   :  { %14022 = shalt.err (!%p14019_p1)
}
 0x1dc   :  { %419 = dma.hbm_to_vmem [thread:$0]  %s14350_s3, 32, %s414_s12, [#allocation35], %s14095_s18, %s14095_s18, %s14096_s25  }
 0x1dd   :  { %14023 = dma.done.wait [#allocation3], 256  }
 0x1de   :  { %14024 = vsyncadd [#allocation3], 4294967040 }
 0x1df   :  { %14025 = dma.done.wait [#allocation5], 288  }
 0x1e0   :  { %14026 = vsyncadd [#allocation5], 4294967008 }
 0x1e1   :  { %14027 = dma.done.wait [#allocation8], 64  }
 0x1e2   :  { %14028 = vsyncadd [#allocation8], 4294967232 }
 0x1e3   :  { %14029 = dma.done.wait [#allocation11], 64  }
 0x1e4   :  { %14030 = vsyncadd [#allocation11], 4294967232 }
 0x1e5   :  { %14031 = dma.done.wait [#allocation14], 64  }
 0x1e6   :  { %14032 = vsyncadd [#allocation14], 4294967232 }
 0x1e7   :  { %14033 = dma.done.wait [#allocation17], 64  }
 0x1e8   :  { %14034 = vsyncadd [#allocation17], 4294967232 }
 0x1e9   :  { %14035 = dma.done.wait [#allocation20], 64  }
 0x1ea   :  { %14036 = vsyncadd [#allocation20], 4294967232 }
 0x1eb   :  { %14037 = dma.done.wait [#allocation23], 64  }
 0x1ec   :  { %14038 = vsyncadd [#allocation23], 4294967232 }
 0x1ed   :  { %14039 = dma.done.wait [#allocation26], 64  }
 0x1ee   :  { %14040 = vsyncadd [#allocation26], 4294967232 }
 0x1ef   :  { %14041 = dma.done.wait [#allocation29], 64  }
 0x1f0   :  { %14042 = vsyncadd [#allocation29], 4294967232 }
 0x1f1   :  { %14043 = dma.done.wait [#allocation32], 64  }
 0x1f2   :  { %14044 = vsyncadd [#allocation32], 4294967232 }
 0x1f3   :  { %14045 = dma.done.wait [#allocation35], 64  }
 0x1f4   :  { %14046 = vsyncadd [#allocation35], 4294967232  ;;  %s15909_s3 = sld [smem:[#allocation49_spill]]  ;;  %s15910_s14 = sld [smem:[#allocation51_spill]]  ;;  %v14117_v0 = vmov 0   ;;  %vm521_vm0 = vcmask 1041408   ;;  %v491_v16 = vlaneseq }
 0x1f5   :  { %13279 = vset.pattern.permute.xlu0 %v14117_v0  ;;  %13280 = vset.pattern.permute.xlu1 %v14117_v0  ;;  %s15911_s25 = sld [smem:[#allocation58_spill]]  ;;  %vm514_vm1 = vcmask 408576   ;;  %v14118_v19 = vmov 0.0   ;;  %s15913_s2 = sld [smem:[#allocation52_spill]]  ;;  %v512_v28 = vld [vmem:[#allocation2] sm:$0xff]  ;;  %v513_v29 = vld [vmem:[#allocation2 + $0x8] sm:$0xff] }
 0x1f6   :  { %v492_v17 = vand.u32 127, %v491_v16  ;;  %s15912_s26 = sld [smem:[#allocation50_spill]]  ;;  %vm741_vm4 = vcmask 261120   ;;  %vm14119_vm7 = vmmov 0   ;;  %s15914_s29 = sld [smem:[#allocation53_spill]]  ;;  %vm827_vm8 = vcmask 64512  }
 0x1f7   :  { %v11503_v48 = vld [vmem:[#allocation6] ss:$0 sm:$0xff]  ;;  %s14120_s7 = smov 96   ;;  %s14121_s21 = smov 88   ;;  %vm1497_vm9 = vcmask 130048   ;;  %vm1499_vm10 = vcmask 195584  }
 0x1f8   :  { %s14122_s28 = smov 120   ;;  %s14123_s10 = smov 112   ;;  %vm2404_vm11 = vcmask 523264  }
 0x1f9   :  { %s14124_s27 = smov 104   ;;  %s14125_s9 = smov 80  }
 0x1fa   :  { %v489_v1 = vld [vmem:[%s15909_s3] sm:$0xff]  ;;  %v506_v3 = vld [vmem:[%s15910_s14 + $0x8] sm:$0xff]  ;;  %v507_v4 = vld [vmem:[%s15910_s14 + $0x10] sm:$0xff]  ;;  %s14126_s11 = smov 72   ;;  %s14127_s30 = smov 64  }
 0x1fb   :  { %v505_v2 = vld [vmem:[%s15910_s14] sm:$0xff]  ;;  %494 = vperm.xlu0 %13279, %v489_v1   ;;  %v508_v5 = vld [vmem:[%s15910_s14 + $0x18] sm:$0xff]  ;;  %v490_v6 = vld [vmem:[%s15909_s3 + $0x8] sm:$0xff]  ;;  %s14128_s5 = smov 48   ;;  %s14129_s8 = smov 56  }
 0x1fc   :  { %v12954_v7 = vpack.c.bf16 %v506_v3, %v505_v2  ;;  %v12958_v8 = vpack.c.bf16 %v508_v5, %v507_v4  ;;  %v509_v9 = vld [vmem:[%s15910_s14 + $0x20] sm:$0xff]  ;;  %v510_v10 = vld [vmem:[%s15910_s14 + $0x28] sm:$0xff]  ;;  %v511_v12 = vld [vmem:[%s15910_s14 + $0x30] sm:$0x3]  ;;  %s14130_s20 = smov 40   ;;  %s15915_s15 = sld [smem:[#allocation59_spill]] }
 0x1fd   :  { %v12962_v11 = vpack.c.bf16 %v510_v10, %v509_v9  ;;  %v707_v13 = vld [vmem:[%s15911_s25] sm:$0xff]  ;;  %v708_v14 = vld [vmem:[%s15911_s25 + $0x8] sm:$0xff]  ;;  %v709_v23 = vld [vmem:[%s15911_s25 + $0x10] sm:$0xff]  ;;  %s14131_s16 = smov 24   ;;  %s15916_s22 = sld [smem:[#allocation60_spill]] }
 0x1fe   :  { %12955 = vmatprep.subr.bf16.mxu0 %v12954_v7  ;;  %v12978_v15 = vpack.c.bf16 %v708_v14, %v707_v13  ;;  %v710_v24 = vld [vmem:[%s15911_s25 + $0x18] sm:$0xff]  ;;  %v600_v26 = vld [vmem:[%s15912_s26] sm:$0xff]  ;;  %v601_v27 = vld [vmem:[%s15912_s26 + $0x8] sm:$0xff]  ;;  %s15917_s23 = sld [smem:[#allocation61_spill]]  ;;  %s15918_s13 = sld [smem:[#allocation63_spill]] }
 0x1ff   :  { %497 = vperm.xlu0 %13279, %v490_v6   ;;  %12957 = vmatpush3.bf16.msra.mxu0 %v12954_v7  ;;  %v12982_v25 = vpack.c.bf16 %v710_v24, %v709_v23  ;;  %v614_v34 = vld [vmem:[%s15913_s2] sm:$0xff]  ;;  %v615_v35 = vld [vmem:[%s15913_s2 + $0x8] sm:$0xff]  ;;  %v616_v36 = vld [vmem:[%s15913_s2 + $0x10] sm:$0xff]  ;;  %s15919_s19 = sld [smem:[#allocation54_spill]]  ;;  %s15920_s12 = sld [smem:[#allocation65_spill]] }
 0x200   :  { %12959 = vmatprep.subr.bf16.mxu0 %v12958_v8  ;;  %603 = vperm.xlu1 %13280, %v600_v26   ;;  %v12966_v38 = vpack.c.bf16 %v615_v35, %v614_v34  ;;  %v617_v39 = vld [vmem:[%s15913_s2 + $0x18] sm:$0xff]  ;;  %v618_v41 = vld [vmem:[%s15913_s2 + $0x20] sm:$0xff]  ;;  %v619_v42 = vld [vmem:[%s15913_s2 + $0x28] sm:$0xff]  ;;  %s15921_s24 = sld [smem:[#allocation69_spill]]  ;;  %s15922_s4 = sld [smem:[#allocation67_spill]] }
 0x201   :  { %v12970_v40 = vpack.c.bf16 %v617_v39, %v616_v36  ;;  %v12974_v44 = vpack.c.bf16 %v619_v42, %v618_v41  ;;  %v620_v46 = vld [vmem:[%s15913_s2 + $0x30] sm:$0x3]  ;;  %v14583_v56 = vld [vmem:[%s15914_s29] sm:$0xff]  ;;  %s15923_s0 = sld [smem:[#allocation55_spill]]  ;;  %s15924_s17 = sld [smem:[#allocation70_spill]] }
 0x202   :  { %12967 = vmatprep.subr.bf16.mxu1 %v12966_v38  ;;  %s15925_s3 = sld [smem:[#allocation73_spill]]  ;;  %s15926_s14 = sld [smem:[#allocation74_spill]] }
 0x203   :  { %12961 = vmatpush3.bf16.msra.mxu0 %v12958_v8  ;;  %12969 = vmatpush3.bf16.msra.mxu1 %v12966_v38 }
 0x204   :  { %12963 = vmatprep.subr.bf16.mxu0 %v12962_v11  ;;  %606 = vperm.xlu1 %13280, %v601_v27  }
 0x205   :  { %12971 = vmatprep.subr.bf16.mxu1 %v12970_v40 }
 0x207   :  { %12965 = vmatpush3.bf16.msra.mxu0 %v12962_v11  ;;  %12973 = vmatpush3.bf16.msra.mxu1 %v12970_v40 }
 0x208   :  { %12167 = vmatprep.subr.msk.mxu0 %vm521_vm0, %v511_v12  ;;  %12975 = vmatprep.subr.bf16.mxu1 %v12974_v44 }
 0x20b   :  { %12168 = vmatpush3.msk.msra.mxu0 %vm521_vm0, %v511_v12  ;;  %12977 = vmatpush3.bf16.msra.mxu1 %v12974_v44 }
 0x20c   :  { %12979 = vmatprep.subr.bf16.mxu0 %v12978_v15  ;;  %12184 = vmatprep.subr.msk.mxu1 %vm521_vm0, %v620_v46 }
 0x20f   :  { %12185 = vmatpush3.msk.msra.mxu1 %vm521_vm0, %v620_v46 }
 0x210   :  { %12200 = vmatprep.subr.mxu1 %v14118_v19 }
 0x27a   :  { %v495_v18 = vpop.permute.xlu0 %494 }
 0x27b   :  { %vm499_vm2 = vcmp.eq.s32.totalorder %v495_v18, %v492_v17 }
 0x27c   :  { %v11493_v20 = vsel %vm499_vm2, 1.0, %v14118_v19 }
 0x27d   :  { %12169 = vmatprep.mubr.msk.f32.mxu0 %vm514_vm1, %v11493_v20 }
 0x27e   :  { %v498_v21 = vpop.permute.xlu0 %497 }
 0x27f   :  { %vm500_vm3 = vcmp.eq.s32.totalorder %v498_v21, %v492_v17  ;;  %v604_v37 = vpop.permute.xlu1 %603 }
 0x280   :  { %v11494_v22 = vsel %vm500_vm3, 1.0, %v14118_v19  ;;  %vm608_vm5 = vcmp.eq.s32.totalorder %v604_v37, %v492_v17 }
 0x281   :  { %12170 = vmatmul.mubr.msk.f32.vlgmr.msra.gmra.mrb[0].mxu0 %vm514_vm1, %v11494_v22  ;;  %v11498_v43 = vsel %vm608_vm5, 1.0, %v14118_v19 }
 0x282   :  { %12981 = vmatpush3.bf16.msra.mxu0 %v12978_v15  ;;  %12186 = vmatprep.mubr.msk.f32.mxu1 %vm514_vm1, %v11498_v43 }
 0x283   :  { %12983 = vmatprep.subr.bf16.mxu0 %v12982_v25  ;;  %v607_v45 = vpop.permute.xlu1 %606 }
 0x284   :  { %vm609_vm6 = vcmp.eq.s32.totalorder %v607_v45, %v492_v17 }
 0x285   :  { %v11499_v47 = vsel %vm609_vm6, 1.0, %v14118_v19 }
 0x286   :  { %12985 = vmatpush3.bf16.msra.mxu0 %v12982_v25  ;;  %12187 = vmatmul.mubr.msk.f32.vlgmr.msra.gmra.mrb[0].mxu1 %vm514_vm1, %v11499_v47 }
 0x287   :  { %12220 = vmatprep.subr.mxu0 %v14118_v19  ;;  %12202 = vmatprep.mubr.msk.f32.mxu1 %vm14119_vm7, %v14118_v19 }
 0x354   :  { %v12171_v30 = vpop.f32.mrb[0].mxu0 }
 0x355   :  { %v591_v31 = vpop.f32.mrb[1].mxu0  ;;  %v14542_v33 = vadd.f32 %v12171_v30, %v513_v29  ;;  %v14659_v30 = vld [vmem:[%s15914_s29 + $0x8] sm:$0xff] }
 0x356   :  { %v14540_v32 = vadd.f32 %v591_v31, %v512_v28 }
 0x358   :  { %12197 = vmatprep.mubr.msk.f32.mxu0 %vm741_vm4, %v14540_v32 }
 0x359   :  { %12198 = vmatmul.mubr.msk.f32.vlgmr.msra.gmra.mrb[2].mxu0 %vm741_vm4, %v14542_v33  ;;  %v14572_v53 = vpop.f32.mrb[0].mxu1 }
 0x35a   :  { %12222 = vmatprep.mubr.msk.f32.mxu0 %vm14119_vm7, %v14118_v19  ;;  %v14574_v54 = vpop.f32.mrb[1].mxu1 }
 0x42c   :  { %v12199_v49 = vpop.f32.mrb[2].mxu0 }
 0x42d   :  { %v14566_v50 = vadd.f32 %v12199_v49, %v11503_v48  ;;  %v814_v51 = vpop.f32.mrb[3].mxu0 }
 0x42e   :  { %v14568_v52 = vadd.f32 %v11503_v48, %v814_v51 }
 0x430   :  { %825 = vrot.lane.b32.xlu0 %v14568_v52, %s14120_s7 }
 0x4a2   :  { %v826_v55 = vpop.permute.xlu0 %825 }
 0x4a3   :  { %12201 = vmatpush3.xpose.msk.msra.mxu1 %vm827_vm8, %v826_v55 }
 0x4a4   :  { %12205 = vmatprep.subr.mxu1 %v14118_v19 }
 0x4a6   :  { %12203 = vmatmul.mubr.msk.f32.vlgmr.msra.gmra.mrb[2].mxu1 %vm827_vm8, %v14568_v52 }
 0x4a7   :  { %12207 = vmatprep.mubr.msk.f32.mxu1 %vm14119_vm7, %v14118_v19 }
 0x579   :  { %v898_v57 = vpop.f32.mrb[2].mxu1 }
 0x57a   :  { %v899_v58 = vadd.f32 %v898_v57, %v14583_v56  ;;  %v12204_v59 = vpop.f32.mrb[3].mxu1 }
 0x57c   :  { %v902_v60 = vsel %vm827_vm8, %v899_v58, -inf }
 0x57d   :  { %903 = vmax.xlane.f32.xlu1 %v902_v60 }
 0x58e   :  { %991 = vrot.lane.b32.xlu1 %v14568_v52, %s14121_s21 }
 0x592   :  { %989 = vrot.lane.b32.xlu1 %v14568_v52, %s14122_s28 }
 0x596   :  { %1154 = vrot.lane.b32.xlu1 %v14568_v52, %s14123_s10 }
 0x59a   :  { %1319 = vrot.lane.b32.xlu1 %v14568_v52, %s14124_s27 }
 0x59e   :  { %1669 = vrot.lane.b32.xlu1 %v14566_v50, %s14121_s21 }
 0x5a2   :  { %1834 = vrot.lane.b32.xlu1 %v14566_v50, %s14125_s9 }
 0x5a6   :  { %1999 = vrot.lane.b32.xlu1 %v14566_v50, %s14126_s11 }
 0x60a   :  { %v904_v61 = vpop.xlane.xlu1 %903 }
 0x60b   :  { %v905_v62 = vsub.f32 %v899_v58, %v904_v61 }
 0x60d   :  { %v906_v63 = vmul.f32 1.442695, %v905_v62 }
 0x60e   :  { %v992_v2 = vpop.permute.xlu1 %991 }
 0x60f   :  { %13281 = vpow2.f32 %v906_v63 }
 0x612   :  { %v990_v3 = vpop.permute.xlu1 %989 }
 0x616   :  { %v1155_v5 = vpop.permute.xlu1 %1154 }
 0x619   :  { %v13282_v0 = vpop.eup %13281 }
 0x61a   :  { %v908_v1 = vsel %vm827_vm8, %v13282_v0, 0.0  ;;  %v1320_v8 = vpop.permute.xlu1 %1319 }
 0x61b   :  { %909 = vadd.xlane.f32.xlu0 %v908_v1 }
 0x61e   :  { %v1670_v12 = vpop.permute.xlu1 %1669 }
 0x622   :  { %v1835_v15 = vpop.permute.xlu1 %1834 }
 0x626   :  { %v2000_v17 = vpop.permute.xlu1 %1999 }
 0x631   :  { %913 = vrot.lane.b32.xlu0 %v14568_v52, %s14127_s30 }
 0x635   :  { %1156 = vrot.lane.b32.xlu0 %v14568_v52, %s14125_s9 }
 0x639   :  { %1321 = vrot.lane.b32.xlu0 %v14568_v52, %s14126_s11 }
 0x63d   :  { %1504 = vrot.lane.b32.xlu0 %v14566_v50, %s14120_s7 }
 0x641   :  { %1667 = vrot.lane.b32.xlu0 %v14566_v50, %s14122_s28 }
 0x645   :  { %1832 = vrot.lane.b32.xlu0 %v14566_v50, %s14123_s10 }
 0x649   :  { %1997 = vrot.lane.b32.xlu0 %v14566_v50, %s14124_s27 }
 0x6a8   :  { %v910_v4 = vpop.xlane.xlu0 %909 }
 0x6a9   :  { %13283 = vrcp.f32 %v910_v4 }
 0x6ac   :  { %v914_v6 = vpop.permute.xlu0 %913 }
 0x6ad   :  { %12206 = vmatpush3.msra.mxu1 %v914_v6 }
 0x6ae   :  { %12210 = vmatprep.subr.mxu1 %v14118_v19 }
 0x6b0   :  { %v1157_v7 = vpop.permute.xlu0 %1156 }
 0x6b1   :  { %12221 = vmatpush3.xpose.msk.msra.mxu0 %vm827_vm8, %v1157_v7 }
 0x6b2   :  { %12230 = vmatprep.subr.mxu0 %v14118_v19 }
 0x6b3   :  { %v13284_v9 = vpop.eup %13283 }
 0x6b4   :  { %v1322_v10 = vpop.permute.xlu0 %1321  ;;  %12223 = vmatmul.mubr.msk.f32.vlgmr.msra.gmra.mrb[4].mxu0 %vm827_vm8, %v1155_v5  ;;  %v912_v11 = vmul.f32 %v13284_v9, %v13282_v0 }
 0x6b5   :  { %12231 = vmatpush3.xpose.msk.msra.mxu0 %vm827_vm8, %v1322_v10  ;;  %12232 = vmatprep.mubr.msk.f32.mxu0 %vm14119_vm7, %v14118_v19 }
 0x6b6   :  { %12208 = vmatmul.mubr.msk.f32.vlgmr.msra.gmra.mrb[4].mxu1 %vm827_vm8, %v912_v11  ;;  %12240 = vmatprep.subr.mxu0 %v14118_v19 }
 0x6b7   :  { %12211 = vmatpush3.xpose.msk.msra.mxu1 %vm827_vm8, %v992_v2  ;;  %12212 = vmatprep.mubr.msk.f32.mxu1 %vm14119_vm7, %v14118_v19 }
 0x6b8   :  { %v1505_v13 = vpop.permute.xlu0 %1504  ;;  %12233 = vmatmul.mubr.msk.f32.vlgmr.msra.gmra.mrb[6].mxu0 %vm827_vm8, %v1320_v8  ;;  %12215 = vmatprep.subr.mxu1 %v14118_v19 }
 0x6b9   :  { %12241 = vmatpush3.xpose.msk.msra.mxu0 %vm827_vm8, %v1505_v13  ;;  %12242 = vmatprep.mubr.msk.f32.mxu0 %vm14119_vm7, %v14118_v19 }
 0x6ba   :  { %12213 = vmatmul.mubr.msk.f32.vlgmr.msra.gmra.mrb[6].mxu1 %vm827_vm8, %v990_v3  ;;  %12250 = vmatprep.subr.mxu0 %v14118_v19 }
 0x6bb   :  { %12217 = vmatprep.mubr.msk.f32.mxu1 %vm14119_vm7, %v14118_v19 }
 0x6bc   :  { %v1668_v14 = vpop.permute.xlu0 %1667  ;;  %12243 = vmatmul.mubr.msk.f32.vlgmr.msra.gmra.mrb[8].mxu0 %vm827_vm8, %v14566_v50 }
 0x6bd   :  { %12251 = vmatpush3.xpose.msk.msra.mxu0 %vm827_vm8, %v1670_v12  ;;  %12252 = vmatprep.mubr.msk.f32.mxu0 %vm14119_vm7, %v14118_v19 }
 0x6be   :  { %12260 = vmatprep.subr.mxu0 %v14118_v19 }
 0x6c0   :  { %12253 = vmatmul.mubr.msk.f32.vlgmr.msra.gmra.mrb[10].mxu0 %vm827_vm8, %v1668_v14  ;;  %v1833_v16 = vpop.permute.xlu0 %1832 }
 0x6c1   :  { %12261 = vmatpush3.xpose.msk.msra.mxu0 %vm827_vm8, %v1835_v15  ;;  %12262 = vmatprep.mubr.msk.f32.mxu0 %vm14119_vm7, %v14118_v19 }
 0x6c2   :  { %12270 = vmatprep.subr.mxu0 %v14118_v19 }
 0x6c4   :  { %12263 = vmatmul.mubr.msk.f32.vlgmr.msra.gmra.mrb[12].mxu0 %vm827_vm8, %v1833_v16  ;;  %v1998_v18 = vpop.permute.xlu0 %1997 }
 0x6c5   :  { %12271 = vmatpush3.xpose.msk.msra.mxu0 %vm827_vm8, %v2000_v17  ;;  %12272 = vmatprep.mubr.msk.f32.mxu0 %vm14119_vm7, %v14118_v19 }
 0x6c8   :  { %12273 = vmatmul.mubr.msk.f32.vlgmr.msra.gmra.mrb[14].mxu0 %vm827_vm8, %v1998_v18 }
 0x787   :  { %v1228_v20 = vpop.f32.mrb[4].mxu0 }
 0x788   :  { %v1229_v21 = vadd.f32 %v1228_v20, %v14583_v56  ;;  %v12224_v22 = vpop.f32.mrb[5].mxu0 }
 0x789   :  { %v14654_v23 = vpop.f32.mrb[4].mxu1 }
 0x78a   :  { %v12209_v24 = vpop.f32.mrb[5].mxu1  ;;  %v1232_v25 = vsel %vm827_vm8, %v1229_v21, -inf }
 0x78b   :  { %1233 = vmax.xlane.f32.xlu0 %v1232_v25  ;;  %v1393_v26 = vpop.f32.mrb[6].mxu0 }
 0x78c   :  { %v1394_v27 = vadd.f32 %v1393_v26, %v14583_v56  ;;  %v12234_v28 = vpop.f32.mrb[7].mxu0 }
 0x78d   :  { %v1063_v29 = vpop.f32.mrb[6].mxu1 }
 0x78e   :  { %v14662_v31 = vadd.f32 %v1063_v29, %v14583_v56  ;;  %v12214_v34 = vpop.f32.mrb[7].mxu1  ;;  %v1397_v35 = vsel %vm827_vm8, %v1394_v27, -inf }
 0x78f   :  { %1398 = vmax.xlane.f32.xlu0 %v1397_v35  ;;  %v1576_v36 = vpop.f32.mrb[8].mxu0 }
 0x790   :  { %v1577_v37 = vadd.f32 %v14659_v30, %v1576_v36  ;;  %v12244_v38 = vpop.f32.mrb[9].mxu0  ;;  %v1067_v39 = vsel %vm827_vm8, %v14662_v31, -inf }
 0x791   :  { %1068 = vmax.xlane.f32.xlu1 %v1067_v39 }
 0x792   :  { %v1580_v43 = vsel %vm827_vm8, %v1577_v37, -inf }
 0x793   :  { %v1741_v40 = vpop.f32.mrb[10].mxu0 }
 0x794   :  { %v1742_v41 = vadd.f32 %v14659_v30, %v1741_v40  ;;  %v12254_v42 = vpop.f32.mrb[11].mxu0 }
 0x795   :  { %1581 = vmax.xlane.f32.xlu1 %v1580_v43 }
 0x796   :  { %v1745_v44 = vsel %vm827_vm8, %v1742_v41, -inf }
 0x797   :  { %1746 = vmax.xlane.f32.xlu0 %v1745_v44  ;;  %v1906_v45 = vpop.f32.mrb[12].mxu0 }
 0x798   :  { %v1907_v46 = vadd.f32 %v14659_v30, %v1906_v45  ;;  %v12264_v47 = vpop.f32.mrb[13].mxu0 }
 0x79a   :  { %v1910_v48 = vsel %vm827_vm8, %v1907_v46, -inf }
 0x79b   :  { %v2071_v49 = vpop.f32.mrb[14].mxu0  ;;  %1911 = vmax.xlane.f32.xlu1 %v1910_v48 }
 0x79c   :  { %v2072_v51 = vadd.f32 %v14659_v30, %v2071_v49  ;;  %v12274_v55 = vpop.f32.mrb[15].mxu0 }
 0x79e   :  { %v2075_v57 = vsel %vm827_vm8, %v2072_v51, -inf }
 0x79f   :  { %2076 = vmax.xlane.f32.xlu0 %v2075_v57 }
 0x818   :  { %v1234_v58 = vpop.xlane.xlu0 %1233 }
 0x819   :  { %v1235_v59 = vsub.f32 %v1229_v21, %v1234_v58 }
 0x81b   :  { %v1236_v60 = vmul.f32 1.442695, %v1235_v59 }
 0x81c   :  { %v1399_v61 = vpop.xlane.xlu0 %1398 }
 0x81d   :  { %13285 = vpow2.f32 %v1236_v60  ;;  %v1400_v62 = vsub.f32 %v1394_v27, %v1399_v61 }
 0x81e   :  { %v1069_v63 = vpop.xlane.xlu1 %1068 }
 0x81f   :  { %v1401_v0 = vmul.f32 1.442695, %v1400_v62  ;;  %v1070_v27 = vsub.f32 %v14662_v31, %v1069_v63 }
 0x821   :  { %13287 = vpow2.f32 %v1401_v0  ;;  %v1071_v28 = vmul.f32 1.442695, %v1070_v27 }
 0x822   :  { %v1582_v1 = vpop.xlane.xlu1 %1581 }
 0x823   :  { %v1583_v2 = vsub.f32 %v1577_v37, %v1582_v1 }
 0x824   :  { %v1747_v3 = vpop.xlane.xlu0 %1746 }
 0x825   :  { %v1584_v4 = vmul.f32 1.442695, %v1583_v2  ;;  %v1748_v5 = vsub.f32 %v1742_v41, %v1747_v3  ;;  %v712_v3 = vld [vmem:[%s15915_s15] sm:$0xff] }
 0x827   :  { %v14675_v6 = vpop.eup %13285  ;;  %13289 = vpow2.f32 %v1584_v4  ;;  %v1749_v7 = vmul.f32 1.442695, %v1748_v5  ;;  %v713_v4 = vld [vmem:[%s15915_s15 + $0x8] sm:$0xff] }
 0x828   :  { %v1912_v8 = vpop.xlane.xlu1 %1911  ;;  %v1238_v9 = vsel %vm827_vm8, %v14675_v6, 0.0 }
 0x829   :  { %13291 = vpow2.f32 %v1749_v7  ;;  %v1913_v10 = vsub.f32 %v1907_v46, %v1912_v8  ;;  %1239 = vadd.xlane.f32.xlu0 %v1238_v9  ;;  %v714_v8 = vld [vmem:[%s15915_s15 + $0x10] sm:$0xff]  ;;  %v715_v9 = vld [vmem:[%s15915_s15 + $0x18] sm:$0xff] }
 0x82b   :  { %v14679_v11 = vpop.eup %13287  ;;  %v1914_v12 = vmul.f32 1.442695, %v1913_v10 }
 0x82c   :  { %v2077_v13 = vpop.xlane.xlu0 %2076  ;;  %v1403_v14 = vsel %vm827_vm8, %v14679_v11, 0.0 }
 0x82d   :  { %13293 = vpow2.f32 %v1914_v12  ;;  %v2078_v15 = vsub.f32 %v2072_v51, %v2077_v13  ;;  %1404 = vadd.xlane.f32.xlu1 %v1403_v14 }
 0x82f   :  { %v2079_v16 = vmul.f32 1.442695, %v2078_v15 }
 0x831   :  { %v14683_v17 = vpop.eup %13289  ;;  %13295 = vpow2.f32 %v2079_v16 }
 0x832   :  { %v1586_v18 = vsel %vm827_vm8, %v14683_v17, 0.0  ;;  %13297 = vpow2.f32 %v1071_v28 }
 0x833   :  { %v14687_v20 = vpop.eup %13291  ;;  %1587 = vadd.xlane.f32.xlu0 %v1586_v18 }
 0x834   :  { %v1751_v21 = vsel %vm827_vm8, %v14687_v20, 0.0 }
 0x835   :  { %1752 = vadd.xlane.f32.xlu1 %v1751_v21 }
 0x837   :  { %v14691_v22 = vpop.eup %13293 }
 0x838   :  { %v1916_v24 = vsel %vm827_vm8, %v14691_v22, 0.0 }
 0x839   :  { %1917 = vadd.xlane.f32.xlu0 %v1916_v24 }
 0x83b   :  { %v14695_v25 = vpop.eup %13295 }
 0x83c   :  { %v2081_v26 = vsel %vm827_vm8, %v14695_v25, 0.0  ;;  %v13298_v29 = vpop.eup %13297 }
 0x83d   :  { %2082 = vadd.xlane.f32.xlu1 %v2081_v26  ;;  %v1073_v34 = vsel %vm827_vm8, %v13298_v29, 0.0 }
 0x84e   :  { %1243 = vrot.lane.b32.xlu1 %v14568_v52, %s14128_s5 }
 0x84f   :  { %1078 = vrot.lane.b32.xlu0 %v14568_v52, %s14129_s8 }
 0x853   :  { %1591 = vrot.lane.b32.xlu0 %v14566_v50, %s14127_s30 }
 0x857   :  { %1921 = vrot.lane.b32.xlu0 %v14566_v50, %s14128_s5 }
 0x872   :  { %1074 = vadd.xlane.f32.xlu1 %v1073_v34 }
 0x883   :  { %1408 = vrot.lane.b32.xlu1 %v14568_v52, %s14130_s20 }
 0x887   :  { %1756 = vrot.lane.b32.xlu1 %v14566_v50, %s14129_s8 }
 0x88b   :  { %2086 = vrot.lane.b32.xlu1 %v14566_v50, %s14130_s20 }
 0x8b6   :  { %v1240_v35 = vpop.xlane.xlu0 %1239 }
 0x8ba   :  { %v1405_v38 = vpop.xlane.xlu1 %1404 }
 0x8c0   :  { %v1588_v36 = vpop.xlane.xlu0 %1587 }
 0x8c2   :  { %v1753_v39 = vpop.xlane.xlu1 %1752 }
 0x8c6   :  { %v1918_v37 = vpop.xlane.xlu0 %1917 }
 0x8ca   :  { %v1079_v31 = vpop.permute.xlu0 %1078  ;;  %v2083_v40 = vpop.xlane.xlu1 %2082 }
 0x8cb   :  { %12216 = vmatpush3.msra.mxu1 %v1079_v31 }
 0x8cc   :  { %12225 = vmatprep.subr.mxu1 %v14118_v19 }
 0x8ce   :  { %v1244_v41 = vpop.permute.xlu1 %1243  ;;  %v1592_v49 = vpop.permute.xlu0 %1591 }
 0x8d2   :  { %v1922_v60 = vpop.permute.xlu0 %1921 }
 0x8ff   :  { %v1075_v42 = vpop.xlane.xlu1 %1074 }
 0x900   :  { %13299 = vrcp.f32 %v1075_v42 }
 0x901   :  { %13301 = vrcp.f32 %v1240_v35 }
 0x902   :  { %13303 = vrcp.f32 %v1405_v38  ;;  %v11531_v38 = vld [vmem:[#allocation7] ss:$0 sm:$0xff] }
 0x903   :  { %13305 = vrcp.f32 %v1588_v36  ;;  %v1409_v46 = vpop.permute.xlu1 %1408 }
 0x904   :  { %13307 = vrcp.f32 %v1753_v39 }
 0x905   :  { %13309 = vrcp.f32 %v1918_v37 }
 0x906   :  { %13311 = vrcp.f32 %v2083_v40 }
 0x907   :  { %v1757_v57 = vpop.permute.xlu1 %1756 }
 0x90a   :  { %v13300_v52 = vpop.eup %13299 }
 0x90b   :  { %v1077_v43 = vmul.f32 %v13300_v52, %v13298_v29  ;;  %v13302_v44 = vpop.eup %13301  ;;  %v2087_v63 = vpop.permute.xlu1 %2086 }
 0x90c   :  { %v1242_v50 = vmul.f32 %v13302_v44, %v14675_v6  ;;  %v13304_v45 = vpop.eup %13303  ;;  %v12986_v6 = vpack.c.bf16 %v713_v4, %v712_v3  ;;  %v727_v3 = vld [vmem:[%s15917_s23 + $0x18] sm:$0xff] }
 0x90d   :  { %12218 = vmatmul.mubr.msk.f32.vlgmr.msra.gmra.mrb[8].mxu1 %vm827_vm8, %v1077_v43  ;;  %v1407_v47 = vmul.f32 %v13304_v45, %v14679_v11  ;;  %v13306_v48 = vpop.eup %13305  ;;  %v12990_v11 = vpack.c.bf16 %v715_v9, %v714_v8 }
 0x90e   :  { %12226 = vmatpush3.msra.mxu1 %v1244_v41  ;;  %12227 = vmatprep.mubr.msk.f32.mxu1 %vm14119_vm7, %v14118_v19  ;;  %v1590_v51 = vmul.f32 %v13306_v48, %v14683_v17  ;;  %v13308_v55 = vpop.eup %13307 }
 0x90f   :  { %12235 = vmatprep.subr.mxu1 %v14118_v19  ;;  %v1755_v58 = vmul.f32 %v13308_v55, %v14687_v20  ;;  %v13310_v59 = vpop.eup %13309  ;;  %12987 = vmatprep.subr.bf16.mxu0 %v12986_v6 }
 0x910   :  { %v1920_v61 = vmul.f32 %v13310_v59, %v14691_v22  ;;  %v13312_v62 = vpop.eup %13311  ;;  %12989 = vmatpush3.bf16.msra.mxu0 %v12986_v6  ;;  %v721_v59 = vld [vmem:[%s15916_s22 + $0x10] sm:$0xff]  ;;  %v729_v6 = vld [vmem:[%s15917_s23 + $0x28] sm:$0xff] }
 0x911   :  { %12228 = vmatmul.mubr.msk.f32.vlgmr.msra.gmra.mrb[10].mxu1 %vm827_vm8, %v1242_v50  ;;  %v2085_v0 = vmul.f32 %v13312_v62, %v14695_v25  ;;  %12991 = vmatprep.subr.bf16.mxu0 %v12990_v11 }
 0x912   :  { %12236 = vmatpush3.msra.mxu1 %v1409_v46  ;;  %12237 = vmatprep.mubr.msk.f32.mxu1 %vm14119_vm7, %v14118_v19 }
 0x913   :  { %12245 = vmatprep.subr.mxu1 %v14118_v19 }
 0x914   :  { %12993 = vmatpush3.bf16.msra.mxu0 %v12990_v11 }
 0x915   :  { %12238 = vmatmul.mubr.msk.f32.vlgmr.msra.gmra.mrb[12].mxu1 %vm827_vm8, %v1407_v47 }
 0x916   :  { %12246 = vmatpush3.msra.mxu1 %v1592_v49  ;;  %12247 = vmatprep.mubr.msk.f32.mxu1 %vm14119_vm7, %v14118_v19 }
 0x917   :  { %12255 = vmatprep.subr.mxu1 %v14118_v19 }
 0x919   :  { %12248 = vmatmul.mubr.msk.f32.vlgmr.msra.gmra.mrb[14].mxu1 %vm827_vm8, %v1590_v51 }
 0x91a   :  { %12256 = vmatpush3.msra.mxu1 %v1757_v57  ;;  %12257 = vmatprep.mubr.msk.f32.mxu1 %vm14119_vm7, %v14118_v19  ;;  %v719_v57 = vld [vmem:[%s15916_s22] sm:$0xff] }
 0x91b   :  { %12265 = vmatprep.subr.mxu1 %v14118_v19 }
 0x91d   :  { %12258 = vmatmul.mubr.msk.f32.vlgmr.msra.gmra.mrb[16].mxu1 %vm827_vm8, %v1755_v58  ;;  %v720_v58 = vld [vmem:[%s15916_s22 + $0x8] sm:$0xff] }
 0x91e   :  { %12266 = vmatpush3.msra.mxu1 %v1922_v60  ;;  %12267 = vmatprep.mubr.msk.f32.mxu1 %vm14119_vm7, %v14118_v19  ;;  %v12994_v60 = vpack.c.bf16 %v720_v58, %v719_v57  ;;  %v11544_v58 = vld [vmem:[%s15911_s25 + $0x20] sm:$0xff] }
 0x91f   :  { %12275 = vmatprep.subr.mxu1 %v14118_v19 }
 0x921   :  { %12268 = vmatmul.mubr.msk.f32.vlgmr.msra.gmra.mrb[18].mxu1 %vm827_vm8, %v1920_v61  ;;  %v722_v61 = vld [vmem:[%s15916_s22 + $0x18] sm:$0xff] }
 0x922   :  { %12276 = vmatpush3.msra.mxu1 %v2087_v63  ;;  %12277 = vmatprep.mubr.msk.f32.mxu1 %vm14119_vm7, %v14118_v19  ;;  %v12998_v62 = vpack.c.bf16 %v722_v61, %v721_v59  ;;  %v724_v63 = vld [vmem:[%s15917_s23] sm:$0xff]  ;;  %v11545_v59 = vld [vmem:[%s15911_s25 + $0x28] sm:$0xff] }
 0x923   :  { %12995 = vmatprep.subr.bf16.mxu1 %v12994_v60  ;;  %v13018_v61 = vpack.c.bf16 %v11545_v59, %v11544_v58 }
 0x925   :  { %12278 = vmatmul.mubr.msk.f32.vlgmr.msra.gmra.mrb[20].mxu1 %vm827_vm8, %v2085_v0  ;;  %v725_v0 = vld [vmem:[%s15917_s23 + $0x8] sm:$0xff] }
 0x926   :  { %12997 = vmatpush3.bf16.msra.mxu1 %v12994_v60  ;;  %v11546_v60 = vld [vmem:[%s15911_s25 + $0x30] sm:$0xff] }
 0x927   :  { %12999 = vmatprep.subr.bf16.mxu1 %v12998_v62 }
 0x92a   :  { %13001 = vmatpush3.bf16.msra.mxu1 %v12998_v62  ;;  %v11547_v62 = vld [vmem:[%s15911_s25 + $0x38] sm:$0xff] }
 0x92b   :  { %13019 = vmatprep.subr.bf16.mxu1 %v13018_v61 }
 0x9e0   :  { %v1150_v1 = vpop.f32.mrb[8].mxu1 }
 0x9e1   :  { %1485 = vrot.lane.b32.xlu0 %v1150_v1, %s14092_s1  ;;  %v12219_v2 = vpop.f32.mrb[9].mxu1  ;;  %v726_v1 = vld [vmem:[%s15917_s23 + $0x10] sm:$0xff] }
 0x9e2   :  { %v13002_v2 = vpack.c.bf16 %v725_v0, %v724_v63  ;;  %v13006_v4 = vpack.c.bf16 %v727_v3, %v726_v1  ;;  %v13022_v63 = vpack.c.bf16 %v11547_v62, %v11546_v60 }
 0x9e4   :  { %v1315_v5 = vpop.f32.mrb[10].mxu1  ;;  %13003 = vmatprep.subr.bf16.mxu0 %v13002_v2 }
 0x9e5   :  { %1489 = vrot.lane.b32.xlu1 %v1315_v5, %s14095_s18  ;;  %v12229_v7 = vpop.f32.mrb[11].mxu1  ;;  %v728_v5 = vld [vmem:[%s15917_s23 + $0x20] sm:$0xff] }
 0x9e6   :  { %v13010_v7 = vpack.c.bf16 %v729_v6, %v728_v5 }
 0x9e8   :  { %v1480_v10 = vpop.f32.mrb[12].mxu1 }
 0x9e9   :  { %1493 = vrot.lane.b32.xlu1 %v1480_v10, %s14131_s16  ;;  %v12239_v12 = vpop.f32.mrb[13].mxu1 }
 0x9ec   :  { %v1663_v13 = vpop.f32.mrb[14].mxu1 }
 0x9ed   :  { %v12249_v14 = vpop.f32.mrb[15].mxu1 }
 0x9f0   :  { %v1828_v15 = vpop.f32.mrb[16].mxu1 }
 0x9f1   :  { %2163 = vrot.lane.b32.xlu0 %v1828_v15, %s14092_s1  ;;  %v12259_v16 = vpop.f32.mrb[17].mxu1  ;;  %v11534_v15 = vld [vmem:[#allocation9] ss:$0 sm:$0xff] }
 0x9f4   :  { %v1993_v17 = vpop.f32.mrb[18].mxu1 }
 0x9f5   :  { %2167 = vrot.lane.b32.xlu0 %v1993_v17, %s14095_s18  ;;  %v12269_v18 = vpop.f32.mrb[19].mxu1  ;;  %v11535_v17 = vld [vmem:[#allocation10] ss:$0 sm:$0xff] }
 0x9f8   :  { %v2158_v20 = vpop.f32.mrb[20].mxu1 }
 0x9f9   :  { %2171 = vrot.lane.b32.xlu1 %v2158_v20, %s14131_s16  ;;  %v12279_v21 = vpop.f32.mrb[21].mxu1 }
 0xa53   :  { %v1486_v22 = vpop.permute.xlu0 %1485 }
 0xa54   :  { %v1496_v25 = vsel %vm827_vm8, %v14654_v23, %v1486_v22 }
 0xa57   :  { %v1490_v24 = vpop.permute.xlu1 %1489 }
 0xa58   :  { %v1498_v26 = vsel %vm1497_vm9, %v1496_v25, %v1490_v24 }
 0xa5b   :  { %v1494_v27 = vpop.permute.xlu1 %1493 }
 0xa5c   :  { %v1500_v28 = vsel %vm1499_vm10, %v1498_v26, %v1494_v27  ;;  %v730_v26 = vld [vmem:[%s15917_s23 + $0x30] sm:$0xff]  ;;  %v731_v27 = vld [vmem:[%s15917_s23 + $0x38] sm:$0xff] }
 0xa5d   :  { %12288 = vmatprep.mubr.msk.f32.mxu0 %vm741_vm4, %v1500_v28  ;;  %v13014_v28 = vpack.c.bf16 %v731_v27, %v730_v26 }
 0xa63   :  { %v2164_v29 = vpop.permute.xlu0 %2163 }
 0xa64   :  { %v2174_v35 = vsel %vm827_vm8, %v1663_v13, %v2164_v29  ;;  %v11536_v29 = vld [vmem:[#allocation12] ss:$0 sm:$0xff] }
 0xa67   :  { %v2168_v34 = vpop.permute.xlu0 %2167 }
 0xa68   :  { %v2175_v36 = vsel %vm1497_vm9, %v2174_v35, %v2168_v34 }
 0xa6b   :  { %v2172_v37 = vpop.permute.xlu1 %2171 }
 0xa6c   :  { %v2176_v31 = vsel %vm1499_vm10, %v2175_v36, %v2172_v37 }
 0xa6d   :  { %12289 = vmatmul.mubr.msk.f32.vlgmr.msra.gmra.mrb[16].mxu0 %vm741_vm4, %v2176_v31 }
 0xa6e   :  { %13005 = vmatpush3.bf16.msra.mxu0 %v13002_v2 }
 0xa6f   :  { %13007 = vmatprep.subr.bf16.mxu0 %v13006_v4 }
 0xa72   :  { %13009 = vmatpush3.bf16.msra.mxu0 %v13006_v4 }
 0xa73   :  { %13011 = vmatprep.subr.bf16.mxu0 %v13010_v7 }
 0xa76   :  { %13013 = vmatpush3.bf16.msra.mxu0 %v13010_v7  ;;  %v11542_v7 = vld [vmem:[#allocation15] ss:$0 sm:$0xff] }
 0xa77   :  { %13015 = vmatprep.subr.bf16.mxu0 %v13014_v28 }
 0xa7a   :  { %13017 = vmatpush3.bf16.msra.mxu0 %v13014_v28 }
 0xa7b   :  { %12342 = vmatprep.subr.mxu0 %v14118_v19 }
 0xb40   :  { %v12290_v23 = vpop.f32.mrb[16].mxu0 }
 0xb41   :  { %v2261_v39 = vadd.f32 %v12290_v23, %v11531_v38  ;;  %v2255_v40 = vpop.f32.mrb[17].mxu0  ;;  %v11539_v23 = vld [vmem:[#allocation13] ss:$0 sm:$0xff] }
 0xb42   :  { %v2256_v41 = vadd.f32 %v11531_v38, %v2255_v40 }
 0xb43   :  { %v2265_v42 = vadd.f32 %v2261_v39, %v14542_v33 }
 0xb44   :  { %v2264_v52 = vadd.f32 %v2256_v41, %v14540_v32 }
 0xb45   :  { %v2269_v43 = vsel %vm741_vm4, %v2265_v42, 0.0 }
 0xb46   :  { %2270 = vadd.xlane.f32.xlu1 %v2269_v43  ;;  %v2266_v44 = vsel %vm741_vm4, %v2264_v52, 0.0 }
 0xb47   :  { %2267 = vadd.xlane.f32.xlu0 %v2266_v44 }
 0xbd3   :  { %v2271_v50 = vpop.xlane.xlu1 %2270 }
 0xbd4   :  { %v2274_v45 = vmul.f32 0.03125, %v2271_v50  ;;  %v2268_v46 = vpop.xlane.xlu0 %2267 }
 0xbd5   :  { %v2273_v47 = vmul.f32 0.03125, %v2268_v46 }
 0xbd6   :  { %v2276_v48 = vsub.f32 %v2265_v42, %v2274_v45 }
 0xbd7   :  { %v2275_v49 = vsub.f32 %v2264_v52, %v2273_v47 }
 0xbd8   :  { %v2278_v33 = vmul.f32 %v2276_v48, %v2276_v48 }
 0xbd9   :  { %v2277_v51 = vmul.f32 %v2275_v49, %v2275_v49 }
 0xbda   :  { %v2282_v55 = vsel %vm741_vm4, %v2278_v33, 0.0 }
 0xbdb   :  { %v2279_v32 = vsel %vm741_vm4, %v2277_v51, 0.0 }
 0xbdc   :  { %2280 = vadd.xlane.f32.xlu0 %v2279_v32 }
 0xbe0   :  { %2283 = vadd.xlane.f32.xlu0 %v2282_v55 }
 0xc69   :  { %v2281_v8 = vpop.xlane.xlu0 %2280 }
 0xc6a   :  { %v2285_v9 = vmul.f32 0.03125, %v2281_v8 }
 0xc6c   :  { %v2287_v10 = vadd.f32 1e-05, %v2285_v9 }
 0xc6d   :  { %v2284_v11 = vpop.xlane.xlu0 %2283 }
 0xc6e   :  { %13313 = vrsqrt.f32 %v2287_v10  ;;  %v2286_v12 = vmul.f32 0.03125, %v2284_v11  ;;  %v11543_v11 = vld [vmem:[#allocation16] ss:$0 sm:$0xff] }
 0xc70   :  { %v2288_v13 = vadd.f32 1e-05, %v2286_v12 }
 0xc72   :  { %13315 = vrsqrt.f32 %v2288_v13 }
 0xc78   :  { %v13314_v14 = vpop.eup %13313 }
 0xc79   :  { %v2291_v16 = vmul.f32 %v13314_v14, %v2275_v49 }
 0xc7b   :  { %v2299_v18 = vmul.f32 %v11534_v15, %v2291_v16  ;;  %v11564_v16 = vld [vmem:[#allocation6 + $0x1] ss:$0 sm:$0xff] }
 0xc7c   :  { %v13316_v20 = vpop.eup %13315 }
 0xc7d   :  { %v2292_v21 = vmul.f32 %v13316_v20, %v2276_v48  ;;  %v2307_v22 = vadd.f32 %v11535_v17, %v2299_v18 }
 0xc7f   :  { %v2300_v24 = vmul.f32 %v11534_v15, %v2292_v21  ;;  %12299 = vmatprep.mubr.msk.f32.mxu1 %vm741_vm4, %v2307_v22 }
 0xc81   :  { %v2308_v25 = vadd.f32 %v11535_v17, %v2300_v24 }
 0xc83   :  { %12300 = vmatmul.mubr.msk.f32.vlgmr.msra.gmra.mrb[22].mxu1 %vm741_vm4, %v2308_v25 }
 0xc84   :  { %13021 = vmatpush3.bf16.msra.mxu1 %v13018_v61 }
 0xc85   :  { %13023 = vmatprep.subr.bf16.mxu1 %v13022_v63 }
 0xc88   :  { %13025 = vmatpush3.bf16.msra.mxu1 %v13022_v63 }
 0xc89   :  { %12332 = vmatprep.subr.mxu1 %v14118_v19 }
 0xd56   :  { %v12301_v34 = vpop.f32.mrb[22].mxu1 }
 0xd57   :  { %v2393_v35 = vadd.f32 %v12301_v34, %v11536_v29  ;;  %v2387_v36 = vpop.f32.mrb[23].mxu1 }
 0xd58   :  { %v2388_v37 = vadd.f32 %v11536_v29, %v2387_v36 }
 0xd59   :  { %v2397_v38 = vmax.f32 %v2393_v35, 0.0 }
 0xd5a   :  { %v2396_v31 = vmax.f32 %v2388_v37, 0.0 }
 0xd5c   :  { %12318 = vmatprep.mubr.msk.f32.mxu0 %vm2404_vm11, %v2396_v31 }
 0xd5d   :  { %12319 = vmatmul.mubr.msk.f32.vlgmr.msra.gmra.mrb[18].mxu0 %vm2404_vm11, %v2397_v38 }
 0xd5e   :  { %12344 = vmatprep.mubr.msk.f32.mxu0 %vm14119_vm7, %v14118_v19 }
 0xe30   :  { %v12320_v39 = vpop.f32.mrb[18].mxu0 }
 0xe31   :  { %v2483_v40 = vadd.f32 %v12320_v39, %v11539_v23  ;;  %v2477_v41 = vpop.f32.mrb[19].mxu0 }
 0xe32   :  { %v2478_v42 = vadd.f32 %v11539_v23, %v2477_v41 }
 0xe33   :  { %v2487_v52 = vadd.f32 %v2483_v40, %v2308_v25 }
 0xe34   :  { %v2486_v43 = vadd.f32 %v2478_v42, %v2307_v22 }
 0xe35   :  { %v2491_v44 = vsel %vm741_vm4, %v2487_v52, 0.0 }
 0xe36   :  { %2492 = vadd.xlane.f32.xlu0 %v2491_v44  ;;  %v2488_v50 = vsel %vm741_vm4, %v2486_v43, 0.0 }
 0xe37   :  { %2489 = vadd.xlane.f32.xlu1 %v2488_v50 }
 0xec3   :  { %v2493_v45 = vpop.xlane.xlu0 %2492 }
 0xec4   :  { %v2495_v46 = vmul.f32 0.03125, %v2493_v45  ;;  %v2490_v47 = vpop.xlane.xlu1 %2489 }
 0xec5   :  { %v2494_v48 = vmul.f32 0.03125, %v2490_v47 }
 0xec6   :  { %v2497_v49 = vsub.f32 %v2487_v52, %v2495_v46 }
 0xec7   :  { %v2496_v51 = vsub.f32 %v2486_v43, %v2494_v48 }
 0xec8   :  { %v2499_v32 = vmul.f32 %v2497_v49, %v2497_v49 }
 0xec9   :  { %v2498_v33 = vmul.f32 %v2496_v51, %v2496_v51 }
 0xeca   :  { %v2503_v55 = vsel %vm741_vm4, %v2499_v32, 0.0 }
 0xecb   :  { %2504 = vadd.xlane.f32.xlu0 %v2503_v55  ;;  %v2500_v57 = vsel %vm741_vm4, %v2498_v33, 0.0 }
 0xecc   :  { %2501 = vadd.xlane.f32.xlu1 %v2500_v57 }
 0xf58   :  { %v2505_v0 = vpop.xlane.xlu0 %2504 }
 0xf59   :  { %v2507_v1 = vmul.f32 0.03125, %v2505_v0  ;;  %v2502_v2 = vpop.xlane.xlu1 %2501 }
 0xf5a   :  { %v2506_v3 = vmul.f32 0.03125, %v2502_v2 }
 0xf5b   :  { %v2509_v4 = vadd.f32 1e-05, %v2507_v1 }
 0xf5c   :  { %v2508_v5 = vadd.f32 1e-05, %v2506_v3 }
 0xf5d   :  { %13317 = vrsqrt.f32 %v2509_v4 }
 0xf5e   :  { %13319 = vrsqrt.f32 %v2508_v5 }
 0xf67   :  { %v13318_v6 = vpop.eup %13317 }
 0xf68   :  { %v13320_v8 = vpop.eup %13319  ;;  %v2513_v9 = vmul.f32 %v13318_v6, %v2497_v49 }
 0xf69   :  { %v2512_v10 = vmul.f32 %v13320_v8, %v2496_v51 }
 0xf6a   :  { %v2521_v12 = vmul.f32 %v11542_v7, %v2513_v9 }
 0xf6b   :  { %v2520_v13 = vmul.f32 %v11542_v7, %v2512_v10 }
 0xf6c   :  { %v14801_v15 = vadd.f32 %v11543_v11, %v2521_v12 }
 0xf6d   :  { %v14799_v14 = vadd.f32 %v11543_v11, %v2520_v13 }
 0xf6f   :  { %12329 = vmatprep.mubr.msk.f32.mxu1 %vm741_vm4, %v14799_v14 }
 0xf70   :  { %12330 = vmatmul.mubr.msk.f32.vlgmr.msra.gmra.mrb[24].mxu1 %vm741_vm4, %v14801_v15 }
 0xf71   :  { %12334 = vmatprep.mubr.msk.f32.mxu1 %vm14119_vm7, %v14118_v19 }
0x1043   :  { %v12331_v17 = vpop.f32.mrb[24].mxu1 }
0x1044   :  { %v2648_v18 = vpop.f32.mrb[25].mxu1  ;;  %v14823_v21 = vadd.f32 %v12331_v17, %v11564_v16 }
0x1045   :  { %v14809_v20 = vadd.f32 %v11564_v16, %v2648_v18 }
0x1047   :  { %2823 = vrot.lane.b32.xlu0 %v14809_v20, %s14121_s21  ;;  %2658 = vrot.lane.b32.xlu1 %v14809_v20, %s14120_s7 }
0x104b   :  { %2986 = vrot.lane.b32.xlu0 %v14809_v20, %s14123_s10  ;;  %2821 = vrot.lane.b32.xlu1 %v14809_v20, %s14122_s28 }
0x104f   :  { %3151 = vrot.lane.b32.xlu0 %v14809_v20, %s14124_s27  ;;  %2988 = vrot.lane.b32.xlu1 %v14809_v20, %s14125_s9 }
0x1053   :  { %3497 = vrot.lane.b32.xlu0 %v14823_v21, %s14121_s21  ;;  %3153 = vrot.lane.b32.xlu1 %v14809_v20, %s14126_s11 }
0x1057   :  { %3662 = vrot.lane.b32.xlu0 %v14823_v21, %s14125_s9  ;;  %3332 = vrot.lane.b32.xlu1 %v14823_v21, %s14120_s7 }
0x105b   :  { %3827 = vrot.lane.b32.xlu0 %v14823_v21, %s14126_s11  ;;  %3495 = vrot.lane.b32.xlu1 %v14823_v21, %s14122_s28 }
0x105f   :  { %2745 = vrot.lane.b32.xlu0 %v14809_v20, %s14127_s30  ;;  %3660 = vrot.lane.b32.xlu1 %v14823_v21, %s14123_s10 }
0x1063   :  { %3825 = vrot.lane.b32.xlu1 %v14823_v21, %s14124_s27 }
0x1067   :  { %2910 = vrot.lane.b32.xlu1 %v14809_v20, %s14129_s8 }
0x10b9   :  { %v2824_v22 = vpop.permute.xlu0 %2823  ;;  %v2659_v24 = vpop.permute.xlu1 %2658 }
0x10ba   :  { %12333 = vmatpush3.xpose.msk.msra.mxu1 %vm827_vm8, %v2659_v24  ;;  %12343 = vmatpush3.xpose.msk.msra.mxu0 %vm827_vm8, %v2824_v22 }
0x10bb   :  { %12352 = vmatprep.subr.mxu0 %v14118_v19  ;;  %12337 = vmatprep.subr.mxu1 %v14118_v19 }
0x10bd   :  { %v2987_v25 = vpop.permute.xlu0 %2986  ;;  %12335 = vmatmul.mubr.msk.f32.vlgmr.msra.gmra.mrb[26].mxu1 %vm827_vm8, %v14809_v20  ;;  %v2822_v26 = vpop.permute.xlu1 %2821 }
0x10be   :  { %12345 = vmatmul.mubr.msk.f32.vlgmr.msra.gmra.mrb[20].mxu0 %vm827_vm8, %v2822_v26  ;;  %12339 = vmatprep.mubr.msk.f32.mxu1 %vm14119_vm7, %v14118_v19 }
0x10bf   :  { %12354 = vmatprep.mubr.msk.f32.mxu0 %vm14119_vm7, %v14118_v19 }
0x10c1   :  { %v3152_v27 = vpop.permute.xlu0 %3151  ;;  %v2989_v28 = vpop.permute.xlu1 %2988 }
0x10c2   :  { %12353 = vmatpush3.xpose.msk.msra.mxu0 %vm827_vm8, %v2989_v28 }
0x10c3   :  { %12362 = vmatprep.subr.mxu0 %v14118_v19 }
0x10c5   :  { %v3498_v29 = vpop.permute.xlu0 %3497  ;;  %12355 = vmatmul.mubr.msk.f32.vlgmr.msra.gmra.mrb[22].mxu0 %vm827_vm8, %v2987_v25  ;;  %v3154_v34 = vpop.permute.xlu1 %3153 }
0x10c6   :  { %12363 = vmatpush3.xpose.msk.msra.mxu0 %vm827_vm8, %v3154_v34  ;;  %12364 = vmatprep.mubr.msk.f32.mxu0 %vm14119_vm7, %v14118_v19 }
0x10c7   :  { %12372 = vmatprep.subr.mxu0 %v14118_v19 }
0x10c9   :  { %v3663_v35 = vpop.permute.xlu0 %3662  ;;  %12365 = vmatmul.mubr.msk.f32.vlgmr.msra.gmra.mrb[24].mxu0 %vm827_vm8, %v3152_v27  ;;  %v3333_v36 = vpop.permute.xlu1 %3332 }
0x10ca   :  { %12373 = vmatpush3.xpose.msk.msra.mxu0 %vm827_vm8, %v3333_v36  ;;  %12374 = vmatprep.mubr.msk.f32.mxu0 %vm14119_vm7, %v14118_v19 }
0x10cb   :  { %12382 = vmatprep.subr.mxu0 %v14118_v19 }
0x10cd   :  { %v3828_v37 = vpop.permute.xlu0 %3827  ;;  %12375 = vmatmul.mubr.msk.f32.vlgmr.msra.gmra.mrb[26].mxu0 %vm827_vm8, %v14823_v21  ;;  %v3496_v31 = vpop.permute.xlu1 %3495 }
0x10ce   :  { %12383 = vmatpush3.xpose.msk.msra.mxu0 %vm827_vm8, %v3498_v29  ;;  %12384 = vmatprep.mubr.msk.f32.mxu0 %vm14119_vm7, %v14118_v19 }
0x10cf   :  { %12392 = vmatprep.subr.mxu0 %v14118_v19 }
0x10d1   :  { %v2746_v38 = vpop.permute.xlu0 %2745  ;;  %12385 = vmatmul.mubr.msk.f32.vlgmr.msra.gmra.mrb[28].mxu0 %vm827_vm8, %v3496_v31  ;;  %v3661_v23 = vpop.permute.xlu1 %3660 }
0x10d2   :  { %12338 = vmatpush3.msra.mxu1 %v2746_v38  ;;  %12393 = vmatpush3.xpose.msk.msra.mxu0 %vm827_vm8, %v3663_v35 }
0x10d3   :  { %12394 = vmatprep.mubr.msk.f32.mxu0 %vm14119_vm7, %v14118_v19  ;;  %12402 = vmatprep.subr.mxu0 %v14118_v19 }
0x10d4   :  { %12347 = vmatprep.subr.mxu1 %v14118_v19 }
0x10d5   :  { %12395 = vmatmul.mubr.msk.f32.vlgmr.msra.gmra.mrb[30].mxu0 %vm827_vm8, %v3661_v23  ;;  %v3826_v39 = vpop.permute.xlu1 %3825 }
0x10d6   :  { %12403 = vmatpush3.xpose.msk.msra.mxu0 %vm827_vm8, %v3828_v37  ;;  %12404 = vmatprep.mubr.msk.f32.mxu0 %vm14119_vm7, %v14118_v19 }
0x10d9   :  { %12405 = vmatmul.mubr.msk.f32.vlgmr.msra.gmra.mrb[32].mxu0 %vm827_vm8, %v3826_v39  ;;  %v14905_v8 = vpop.permute.xlu1 %2910 }
0x1190   :  { %v2730_v40 = vpop.f32.mrb[26].mxu1 }
0x1191   :  { %v2731_v41 = vadd.f32 %v2730_v40, %v14583_v56  ;;  %v12336_v42 = vpop.f32.mrb[27].mxu1  ;;  %v2895_v52 = vpop.f32.mrb[20].mxu0 }
0x1192   :  { %v2896_v43 = vadd.f32 %v2895_v52, %v14583_v56  ;;  %v12346_v44 = vpop.f32.mrb[21].mxu0 }
0x1193   :  { %v2734_v50 = vsel %vm827_vm8, %v2731_v41, -inf }
0x1194   :  { %2735 = vmax.xlane.f32.xlu0 %v2734_v50  ;;  %v2899_v45 = vsel %vm827_vm8, %v2896_v43, -inf }
0x1195   :  { %2900 = vmax.xlane.f32.xlu1 %v2899_v45 }
0x1198   :  { %v3060_v46 = vpop.f32.mrb[22].mxu0 }
0x1199   :  { %v3061_v47 = vadd.f32 %v3060_v46, %v14583_v56  ;;  %v12356_v48 = vpop.f32.mrb[23].mxu0 }
0x119b   :  { %v3064_v49 = vsel %vm827_vm8, %v3061_v47, -inf }
0x119c   :  { %3065 = vmax.xlane.f32.xlu0 %v3064_v49  ;;  %v3225_v51 = vpop.f32.mrb[24].mxu0 }
0x119d   :  { %v3226_v32 = vadd.f32 %v3225_v51, %v14583_v56  ;;  %v12366_v33 = vpop.f32.mrb[25].mxu0 }
0x119f   :  { %v3229_v55 = vsel %vm827_vm8, %v3226_v32, -inf }
0x11a0   :  { %3230 = vmax.xlane.f32.xlu0 %v3229_v55  ;;  %v3404_v57 = vpop.f32.mrb[26].mxu0 }
0x11a1   :  { %v3405_v58 = vadd.f32 %v14659_v30, %v3404_v57  ;;  %v12376_v59 = vpop.f32.mrb[27].mxu0 }
0x11a3   :  { %v3408_v60 = vsel %vm827_vm8, %v3405_v58, -inf }
0x11a4   :  { %3409 = vmax.xlane.f32.xlu1 %v3408_v60  ;;  %v3569_v61 = vpop.f32.mrb[28].mxu0 }
0x11a5   :  { %v3570_v62 = vadd.f32 %v14659_v30, %v3569_v61  ;;  %v12386_v63 = vpop.f32.mrb[29].mxu0 }
0x11a7   :  { %v3573_v0 = vsel %vm827_vm8, %v3570_v62, -inf }
0x11a8   :  { %3574 = vmax.xlane.f32.xlu0 %v3573_v0  ;;  %v3734_v1 = vpop.f32.mrb[30].mxu0 }
0x11a9   :  { %v3735_v56 = vadd.f32 %v14659_v30, %v3734_v1  ;;  %v12396_v2 = vpop.f32.mrb[31].mxu0 }
0x11ab   :  { %v3738_v3 = vsel %vm827_vm8, %v3735_v56, -inf }
0x11ac   :  { %3739 = vmax.xlane.f32.xlu1 %v3738_v3  ;;  %v3899_v4 = vpop.f32.mrb[32].mxu0 }
0x11ad   :  { %v3900_v5 = vadd.f32 %v14659_v30, %v3899_v4  ;;  %v12406_v6 = vpop.f32.mrb[33].mxu0 }
0x11af   :  { %v3903_v7 = vsel %vm827_vm8, %v3900_v5, -inf }
0x11b0   :  { %3904 = vmax.xlane.f32.xlu0 %v3903_v7 }
0x11bd   :  { %3240 = vrot.lane.b32.xlu1 %v14809_v20, %s14130_s20 }
0x11c6   :  { %3075 = vrot.lane.b32.xlu0 %v14809_v20, %s14128_s5 }
0x1221   :  { %v2736_v9 = vpop.xlane.xlu0 %2735 }
0x1222   :  { %v2737_v10 = vsub.f32 %v2731_v41, %v2736_v9  ;;  %v2901_v11 = vpop.xlane.xlu1 %2900 }
0x1223   :  { %v2902_v12 = vsub.f32 %v2896_v43, %v2901_v11 }
0x1224   :  { %v2738_v13 = vmul.f32 1.442695, %v2737_v10 }
0x1225   :  { %v2903_v16 = vmul.f32 1.442695, %v2902_v12 }
0x1226   :  { %13321 = vpow2.f32 %v2738_v13 }
0x1227   :  { %13323 = vpow2.f32 %v2903_v16 }
0x1229   :  { %v3066_v30 = vpop.xlane.xlu0 %3065 }
0x122a   :  { %v3067_v17 = vsub.f32 %v3061_v47, %v3066_v30 }
0x122c   :  { %v3068_v18 = vmul.f32 1.442695, %v3067_v17 }
0x122d   :  { %v3231_v22 = vpop.xlane.xlu0 %3230 }
0x122e   :  { %13325 = vpow2.f32 %v3068_v18  ;;  %v3232_v24 = vsub.f32 %v3226_v32, %v3231_v22 }
0x1230   :  { %v13322_v25 = vpop.eup %13321  ;;  %v3233_v26 = vmul.f32 1.442695, %v3232_v24 }
0x1231   :  { %v13324_v27 = vpop.eup %13323  ;;  %v2740_v20 = vsel %vm827_vm8, %v13322_v25, 0.0  ;;  %v3410_v37 = vpop.xlane.xlu1 %3409 }
0x1232   :  { %13327 = vpow2.f32 %v3233_v26  ;;  %2741 = vadd.xlane.f32.xlu1 %v2740_v20  ;;  %v2905_v28 = vsel %vm827_vm8, %v13324_v27, 0.0  ;;  %v3411_v31 = vsub.f32 %v3405_v58, %v3410_v37  ;;  %v11549_v37 = vld [vmem:[%s15915_s15 + $0x28] sm:$0xff] }
0x1233   :  { %2906 = vadd.xlane.f32.xlu0 %v2905_v28 }
0x1234   :  { %v3412_v40 = vmul.f32 1.442695, %v3411_v31 }
0x1235   :  { %v3575_v38 = vpop.xlane.xlu0 %3574 }
0x1236   :  { %v3576_v39 = vsub.f32 %v3570_v62, %v3575_v38  ;;  %13329 = vpow2.f32 %v3412_v40  ;;  %v11550_v38 = vld [vmem:[%s15915_s15 + $0x30] sm:$0xff] }
0x1238   :  { %v13326_v29 = vpop.eup %13325  ;;  %v3577_v52 = vmul.f32 1.442695, %v3576_v39 }
0x1239   :  { %v3070_v34 = vsel %vm827_vm8, %v13326_v29, 0.0  ;;  %v3740_v23 = vpop.xlane.xlu1 %3739 }
0x123a   :  { %3071 = vadd.xlane.f32.xlu1 %v3070_v34  ;;  %v3741_v41 = vsub.f32 %v3735_v56, %v3740_v23  ;;  %13331 = vpow2.f32 %v3577_v52  ;;  %v11551_v23 = vld [vmem:[%s15915_s15 + $0x38] sm:$0xff] }
0x123b   :  { %v13030_v39 = vpack.c.bf16 %v11551_v23, %v11550_v38 }
0x123c   :  { %v14910_v35 = vpop.eup %13327  ;;  %v3742_v43 = vmul.f32 1.442695, %v3741_v41 }
0x123d   :  { %v3235_v36 = vsel %vm827_vm8, %v14910_v35, 0.0  ;;  %v3905_v42 = vpop.xlane.xlu0 %3904  ;;  %v3241_v55 = vpop.permute.xlu1 %3240 }
0x123e   :  { %3236 = vadd.xlane.f32.xlu0 %v3235_v36  ;;  %v3906_v44 = vsub.f32 %v3900_v5, %v3905_v42  ;;  %13333 = vpow2.f32 %v3742_v43  ;;  %v11548_v36 = vld [vmem:[%s15915_s15 + $0x20] sm:$0xff] }
0x123f   :  { %v13026_v31 = vpack.c.bf16 %v11549_v37, %v11548_v36  ;;  %v11561_v36 = vld [vmem:[%s15917_s23 + $0x68] sm:$0xff] }
0x1240   :  { %v3907_v50 = vmul.f32 1.442695, %v3906_v44  ;;  %v13330_v45 = vpop.eup %13329 }
0x1241   :  { %v3414_v47 = vsel %vm827_vm8, %v13330_v45, 0.0  ;;  %v3076_v57 = vpop.permute.xlu0 %3075  ;;  %13027 = vmatprep.subr.bf16.mxu0 %v13026_v31 }
0x1242   :  { %13335 = vpow2.f32 %v3907_v50  ;;  %13029 = vmatpush3.bf16.msra.mxu0 %v13026_v31 }
0x1243   :  { %13031 = vmatprep.subr.bf16.mxu0 %v13030_v39 }
0x1244   :  { %v14918_v46 = vpop.eup %13331 }
0x1245   :  { %v3579_v49 = vsel %vm827_vm8, %v14918_v46, 0.0 }
0x1246   :  { %13033 = vmatpush3.bf16.msra.mxu0 %v13030_v39 }
0x1248   :  { %v14921_v48 = vpop.eup %13333 }
0x1249   :  { %v3744_v51 = vsel %vm827_vm8, %v14921_v48, 0.0 }
0x124b   :  { %3584 = vrot.lane.b32.xlu1 %v14823_v21, %s14129_s8 }
0x124c   :  { %v14927_v32 = vpop.eup %13335 }
0x124d   :  { %v3909_v33 = vsel %vm827_vm8, %v14927_v32, 0.0 }
0x1254   :  { %3419 = vrot.lane.b32.xlu0 %v14823_v21, %s14127_s30 }
0x126f   :  { %3415 = vadd.xlane.f32.xlu1 %v3414_v47 }
0x1273   :  { %3580 = vadd.xlane.f32.xlu0 %v3579_v49  ;;  %3745 = vadd.xlane.f32.xlu1 %v3744_v51 }
0x1277   :  { %3910 = vadd.xlane.f32.xlu1 %v3909_v33 }
0x1288   :  { %3914 = vrot.lane.b32.xlu1 %v14823_v21, %s14130_s20 }
0x1289   :  { %3749 = vrot.lane.b32.xlu0 %v14823_v21, %s14128_s5 }
0x12bf   :  { %v2742_v58 = vpop.xlane.xlu1 %2741 }
0x12c0   :  { %13337 = vrcp.f32 %v2742_v58  ;;  %v2907_v59 = vpop.xlane.xlu0 %2906 }
0x12c1   :  { %13339 = vrcp.f32 %v2907_v59 }
0x12c7   :  { %v3072_v60 = vpop.xlane.xlu1 %3071 }
0x12c8   :  { %13341 = vrcp.f32 %v3072_v60 }
0x12ca   :  { %v13338_v61 = vpop.eup %13337 }
0x12cb   :  { %v3237_v62 = vpop.xlane.xlu0 %3236  ;;  %v2744_v63 = vmul.f32 %v13338_v61, %v13322_v25  ;;  %v13340_v0 = vpop.eup %13339  ;;  %v11591_v61 = vld [vmem:[#allocation7 + $0x1] ss:$0 sm:$0xff] }
0x12cc   :  { %13343 = vrcp.f32 %v3237_v62  ;;  %v2909_v21 = vmul.f32 %v13340_v0, %v13324_v27  ;;  %v3585_v5 = vpop.permute.xlu1 %3584 }
0x12cd   :  { %12340 = vmatmul.mubr.msk.f32.vlgmr.msra.gmra.mrb[28].mxu1 %vm827_vm8, %v2744_v63 }
0x12ce   :  { %12348 = vmatpush3.msra.mxu1 %v14905_v8  ;;  %12349 = vmatprep.mubr.msk.f32.mxu1 %vm14119_vm7, %v14118_v19 }
0x12cf   :  { %12357 = vmatprep.subr.mxu1 %v14118_v19  ;;  %v3420_v4 = vpop.permute.xlu0 %3419 }
0x12d1   :  { %12350 = vmatmul.mubr.msk.f32.vlgmr.msra.gmra.mrb[30].mxu1 %vm827_vm8, %v2909_v21 }
0x12d2   :  { %v13342_v1 = vpop.eup %13341  ;;  %12358 = vmatpush3.msra.mxu1 %v3076_v57  ;;  %12359 = vmatprep.mubr.msk.f32.mxu1 %vm14119_vm7, %v14118_v19 }
0x12d3   :  { %12367 = vmatprep.subr.mxu1 %v14118_v19  ;;  %v3074_v56 = vmul.f32 %v13342_v1, %v13326_v29 }
0x12d5   :  { %12360 = vmatmul.mubr.msk.f32.vlgmr.msra.gmra.mrb[32].mxu1 %vm827_vm8, %v3074_v56 }
0x12d6   :  { %v13344_v2 = vpop.eup %13343  ;;  %12368 = vmatpush3.msra.mxu1 %v3241_v55  ;;  %12369 = vmatprep.mubr.msk.f32.mxu1 %vm14119_vm7, %v14118_v19 }
0x12d7   :  { %12377 = vmatprep.subr.mxu1 %v14118_v19  ;;  %v3239_v3 = vmul.f32 %v13344_v2, %v14910_v35 }
0x12d9   :  { %12370 = vmatmul.mubr.msk.f32.vlgmr.msra.gmra.mrb[34].mxu1 %vm827_vm8, %v3239_v3 }
0x12da   :  { %12378 = vmatpush3.msra.mxu1 %v3420_v4  ;;  %12379 = vmatprep.mubr.msk.f32.mxu1 %vm14119_vm7, %v14118_v19 }
0x12db   :  { %12387 = vmatprep.subr.mxu1 %v14118_v19 }
0x12fc   :  { %v3416_v6 = vpop.xlane.xlu1 %3415 }
0x12fd   :  { %13345 = vrcp.f32 %v3416_v6 }
0x1300   :  { %v3581_v7 = vpop.xlane.xlu0 %3580  ;;  %v3746_v8 = vpop.xlane.xlu1 %3745 }
0x1301   :  { %13347 = vrcp.f32 %v3581_v7 }
0x1302   :  { %13349 = vrcp.f32 %v3746_v8 }
0x1304   :  { %v3911_v9 = vpop.xlane.xlu1 %3910  ;;  %v3750_v30 = vpop.permute.xlu0 %3749 }
0x1305   :  { %13351 = vrcp.f32 %v3911_v9 }
0x1307   :  { %v13346_v10 = vpop.eup %13345 }
0x1308   :  { %v3418_v11 = vmul.f32 %v13346_v10, %v13330_v45  ;;  %v3915_v22 = vpop.permute.xlu1 %3914 }
0x130a   :  { %12380 = vmatmul.mubr.msk.f32.vlgmr.msra.gmra.mrb[36].mxu1 %vm827_vm8, %v3418_v11 }
0x130b   :  { %v13348_v12 = vpop.eup %13347  ;;  %12388 = vmatpush3.msra.mxu1 %v3585_v5  ;;  %12389 = vmatprep.mubr.msk.f32.mxu1 %vm14119_vm7, %v14118_v19 }
0x130c   :  { %12397 = vmatprep.subr.mxu1 %v14118_v19  ;;  %v3583_v13 = vmul.f32 %v13348_v12, %v14918_v46  ;;  %v13350_v16 = vpop.eup %13349  ;;  %v11552_v12 = vld [vmem:[%s15916_s22 + $0x20] sm:$0xff] }
0x130d   :  { %v3748_v17 = vmul.f32 %v13350_v16, %v14921_v48  ;;  %v11554_v16 = vld [vmem:[%s15916_s22 + $0x30] sm:$0xff] }
0x130e   :  { %12390 = vmatmul.mubr.msk.f32.vlgmr.msra.gmra.mrb[38].mxu1 %vm827_vm8, %v3583_v13  ;;  %v11553_v13 = vld [vmem:[%s15916_s22 + $0x28] sm:$0xff] }
0x130f   :  { %12398 = vmatpush3.msra.mxu1 %v3750_v30  ;;  %12399 = vmatprep.mubr.msk.f32.mxu1 %vm14119_vm7, %v14118_v19  ;;  %v13352_v18 = vpop.eup %13351  ;;  %v13034_v30 = vpack.c.bf16 %v11553_v13, %v11552_v12 }
0x1310   :  { %12407 = vmatprep.subr.mxu1 %v14118_v19  ;;  %v3913_v24 = vmul.f32 %v13352_v18, %v14927_v32 }
0x1312   :  { %12400 = vmatmul.mubr.msk.f32.vlgmr.msra.gmra.mrb[40].mxu1 %vm827_vm8, %v3748_v17  ;;  %v11555_v17 = vld [vmem:[%s15916_s22 + $0x38] sm:$0xff] }
0x1313   :  { %12408 = vmatpush3.msra.mxu1 %v3915_v22  ;;  %12409 = vmatprep.mubr.msk.f32.mxu1 %vm14119_vm7, %v14118_v19  ;;  %v13038_v18 = vpack.c.bf16 %v11555_v17, %v11554_v16  ;;  %v4356_v22 = vld [vmem:[%s15918_s13] sm:$0xff] }
0x1314   :  { %13035 = vmatprep.subr.bf16.mxu1 %v13034_v30 }
0x1316   :  { %12410 = vmatmul.mubr.msk.f32.vlgmr.msra.gmra.mrb[42].mxu1 %vm827_vm8, %v3913_v24  ;;  %v4357_v24 = vld [vmem:[%s15918_s13 + $0x8] sm:$0xff] }
0x1317   :  { %13037 = vmatpush3.bf16.msra.mxu1 %v13034_v30 }
0x1318   :  { %13039 = vmatprep.subr.bf16.mxu1 %v13038_v18 }
0x131b   :  { %13041 = vmatpush3.bf16.msra.mxu1 %v13038_v18 }
0x13a0   :  { %v2817_v25 = vpop.f32.mrb[28].mxu1 }
0x13a1   :  { %v12341_v26 = vpop.f32.mrb[29].mxu1 }
0x13a2   :  { %v11556_v26 = vld [vmem:[%s15917_s23 + $0x40] sm:$0xff] }
0x13a4   :  { %v2982_v27 = vpop.f32.mrb[30].mxu1 }
0x13a5   :  { %3317 = vrot.lane.b32.xlu0 %v2982_v27, %s14092_s1  ;;  %v12351_v20 = vpop.f32.mrb[31].mxu1  ;;  %v11557_v27 = vld [vmem:[%s15917_s23 + $0x48] sm:$0xff] }
0x13a6   :  { %v11558_v20 = vld [vmem:[%s15917_s23 + $0x50] sm:$0xff] }
0x13a8   :  { %v3147_v28 = vpop.f32.mrb[32].mxu1 }
0x13a9   :  { %3321 = vrot.lane.b32.xlu1 %v3147_v28, %s14095_s18  ;;  %v12361_v29 = vpop.f32.mrb[33].mxu1  ;;  %v13042_v28 = vpack.c.bf16 %v11557_v27, %v11556_v26  ;;  %v4488_v27 = vld [vmem:[%s15919_s19] sm:$0xff] }
0x13aa   :  { %v11559_v29 = vld [vmem:[%s15917_s23 + $0x58] sm:$0xff] }
0x13ab   :  { %13043 = vmatprep.subr.bf16.mxu0 %v13042_v28 }
0x13ac   :  { %v3312_v34 = vpop.f32.mrb[34].mxu1 }
0x13ad   :  { %3325 = vrot.lane.b32.xlu1 %v3312_v34, %s14131_s16  ;;  %v12371_v35 = vpop.f32.mrb[35].mxu1  ;;  %v13046_v34 = vpack.c.bf16 %v11559_v29, %v11558_v20 }
0x13ae   :  { %v11560_v35 = vld [vmem:[%s15917_s23 + $0x60] sm:$0xff] }
0x13af   :  { %v13050_v37 = vpack.c.bf16 %v11561_v36, %v11560_v35 }
0x13dd   :  { %v3491_v40 = vpop.f32.mrb[36].mxu1 }
0x13de   :  { %v12381_v41 = vpop.f32.mrb[37].mxu1 }
0x13e1   :  { %v3656_v42 = vpop.f32.mrb[38].mxu1 }
0x13e2   :  { %3991 = vrot.lane.b32.xlu0 %v3656_v42, %s14092_s1  ;;  %v12391_v52 = vpop.f32.mrb[39].mxu1 }
0x13e3   :  { %v11594_v52 = vld [vmem:[#allocation9 + $0x1] ss:$0 sm:$0xff] }
0x13e5   :  { %v3821_v43 = vpop.f32.mrb[40].mxu1 }
0x13e6   :  { %3995 = vrot.lane.b32.xlu0 %v3821_v43, %s14095_s18  ;;  %v12401_v44 = vpop.f32.mrb[41].mxu1 }
0x13e7   :  { %v11595_v44 = vld [vmem:[#allocation10 + $0x1] ss:$0 sm:$0xff] }
0x13e9   :  { %v3986_v50 = vpop.f32.mrb[42].mxu1 }
0x13ea   :  { %3999 = vrot.lane.b32.xlu1 %v3986_v50, %s14131_s16  ;;  %v12411_v45 = vpop.f32.mrb[43].mxu1 }
0x1417   :  { %v3318_v46 = vpop.permute.xlu0 %3317 }
0x1418   :  { %v3328_v48 = vsel %vm827_vm8, %v2817_v25, %v3318_v46  ;;  %v13058_v25 = vpack.c.bf16 %v4357_v24, %v4356_v22 }
0x141a   :  { %13059 = vmatprep.subr.bf16.mxu1 %v13058_v25 }
0x141b   :  { %v3322_v47 = vpop.permute.xlu1 %3321 }
0x141c   :  { %v3329_v49 = vsel %vm1497_vm9, %v3328_v48, %v3322_v47  ;;  %v4358_v48 = vld [vmem:[%s15918_s13 + $0x10] sm:$0xff] }
0x141f   :  { %v3326_v51 = vpop.permute.xlu1 %3325 }
0x1420   :  { %v3330_v32 = vsel %vm1499_vm10, %v3329_v49, %v3326_v51  ;;  %v4359_v49 = vld [vmem:[%s15918_s13 + $0x18] sm:$0xff]  ;;  %v621_v51 = vld [vmem:[#allocation4] sm:$0xff] }
0x1421   :  { %12420 = vmatprep.mubr.msk.f32.mxu0 %vm741_vm4, %v3330_v32 }
0x1454   :  { %v3992_v33 = vpop.permute.xlu0 %3991 }
0x1455   :  { %v4002_v57 = vsel %vm827_vm8, %v3491_v40, %v3992_v33 }
0x1458   :  { %v3996_v55 = vpop.permute.xlu0 %3995 }
0x1459   :  { %v4003_v58 = vsel %vm1497_vm9, %v4002_v57, %v3996_v55  ;;  %v13062_v55 = vpack.c.bf16 %v4359_v49, %v4358_v48  ;;  %v15013_v57 = vadd.f32 %v14574_v54, %v621_v51  ;;  %v11562_v54 = vld [vmem:[%s15917_s23 + $0x70] sm:$0xff] }
0x145c   :  { %v4000_v59 = vpop.permute.xlu1 %3999 }
0x145d   :  { %v4004_v60 = vsel %vm1499_vm10, %v4003_v58, %v4000_v59  ;;  %v622_v58 = vld [vmem:[#allocation4 + $0x8] sm:$0xff] }
0x145e   :  { %12421 = vmatmul.mubr.msk.f32.vlgmr.msra.gmra.mrb[34].mxu0 %vm741_vm4, %v4004_v60  ;;  %v15020_v59 = vadd.f32 %v14572_v53, %v622_v58  ;;  %v11563_v60 = vld [vmem:[%s15917_s23 + $0x78] sm:$0xff] }
0x145f   :  { %13045 = vmatpush3.bf16.msra.mxu0 %v13042_v28 }
0x1460   :  { %13047 = vmatprep.subr.bf16.mxu0 %v13046_v34 }
0x1463   :  { %13049 = vmatpush3.bf16.msra.mxu0 %v13046_v34 }
0x1464   :  { %13051 = vmatprep.subr.bf16.mxu0 %v13050_v37 }
0x1467   :  { %13053 = vmatpush3.bf16.msra.mxu0 %v13050_v37 }
0x1531   :  { %v12422_v62 = vpop.f32.mrb[34].mxu0 }
0x1532   :  { %v4089_v63 = vadd.f32 %v12422_v62, %v11591_v61  ;;  %v4083_v0 = vpop.f32.mrb[35].mxu0  ;;  %v11596_v62 = vld [vmem:[#allocation12 + $0x1] ss:$0 sm:$0xff] }
0x1533   :  { %v4084_v21 = vadd.f32 %v11591_v61, %v4083_v0  ;;  %v13054_v61 = vpack.c.bf16 %v11563_v60, %v11562_v54 }
0x1534   :  { %v4093_v1 = vadd.f32 %v4089_v63, %v14801_v15 }
0x1535   :  { %v4092_v56 = vadd.f32 %v4084_v21, %v14799_v14  ;;  %13055 = vmatprep.subr.bf16.mxu0 %v13054_v61 }
0x1536   :  { %v4097_v2 = vsel %vm741_vm4, %v4093_v1, 0.0  ;;  %13057 = vmatpush3.bf16.msra.mxu0 %v13054_v61 }
0x1537   :  { %4098 = vadd.xlane.f32.xlu1 %v4097_v2  ;;  %v4094_v3 = vsel %vm741_vm4, %v4092_v56, 0.0  ;;  %12474 = vmatprep.subr.mxu0 %v14118_v19  ;;  %v11604_v2 = vld [vmem:[#allocation18] ss:$0 sm:$0xff] }
0x1538   :  { %4095 = vadd.xlane.f32.xlu0 %v4094_v3 }
0x15c4   :  { %v4099_v4 = vpop.xlane.xlu1 %4098 }
0x15c5   :  { %v4101_v5 = vmul.f32 0.03125, %v4099_v4  ;;  %v4096_v6 = vpop.xlane.xlu0 %4095 }
0x15c6   :  { %v4100_v7 = vmul.f32 0.03125, %v4096_v6 }
0x15c7   :  { %v4103_v8 = vsub.f32 %v4093_v1, %v4101_v5 }
0x15c8   :  { %v4102_v9 = vsub.f32 %v4092_v56, %v4100_v7 }
0x15c9   :  { %v4105_v15 = vmul.f32 %v4103_v8, %v4103_v8 }
0x15ca   :  { %v4104_v10 = vmul.f32 %v4102_v9, %v4102_v9 }
0x15cb   :  { %v4109_v11 = vsel %vm741_vm4, %v4105_v15, 0.0 }
0x15cc   :  { %v4106_v14 = vsel %vm741_vm4, %v4104_v10, 0.0 }
0x15cd   :  { %4107 = vadd.xlane.f32.xlu0 %v4106_v14 }
0x15d1   :  { %4110 = vadd.xlane.f32.xlu0 %v4109_v11 }
0x165a   :  { %v4108_v31 = vpop.xlane.xlu0 %4107 }
0x165b   :  { %v4112_v38 = vmul.f32 0.03125, %v4108_v31 }
0x165d   :  { %v4114_v23 = vadd.f32 1e-05, %v4112_v38 }
0x165e   :  { %v4111_v39 = vpop.xlane.xlu0 %4110 }
0x165f   :  { %13353 = vrsqrt.f32 %v4114_v23  ;;  %v4113_v40 = vmul.f32 0.03125, %v4111_v39 }
0x1661   :  { %v4115_v41 = vadd.f32 1e-05, %v4113_v40 }
0x1663   :  { %13355 = vrsqrt.f32 %v4115_v41 }
0x1669   :  { %v13354_v42 = vpop.eup %13353 }
0x166a   :  { %v4118_v43 = vmul.f32 %v13354_v42, %v4102_v9 }
0x166c   :  { %v4126_v50 = vmul.f32 %v11594_v52, %v4118_v43  ;;  %v11619_v43 = vld [vmem:[%s15919_s19 + $0x8] sm:$0xff] }
0x166d   :  { %v13356_v45 = vpop.eup %13355 }
0x166e   :  { %v4119_v46 = vmul.f32 %v13356_v45, %v4103_v8  ;;  %v15004_v47 = vadd.f32 %v11595_v44, %v4126_v50 }
0x1670   :  { %v4127_v32 = vmul.f32 %v11594_v52, %v4119_v46  ;;  %12431 = vmatprep.mubr.msk.f32.mxu1 %vm741_vm4, %v15004_v47 }
0x1672   :  { %v15010_v33 = vadd.f32 %v11595_v44, %v4127_v32 }
0x1674   :  { %12432 = vmatmul.mubr.msk.f32.vlgmr.msra.gmra.mrb[44].mxu1 %vm741_vm4, %v15010_v33 }
0x1675   :  { %13061 = vmatpush3.bf16.msra.mxu1 %v13058_v25  ;;  %12461 = vmatprep.mubr.msk.f32.mxu1 %vm741_vm4, %v15013_v57 }
0x1676   :  { %13063 = vmatprep.subr.bf16.mxu1 %v13062_v55 }
0x1679   :  { %13065 = vmatpush3.bf16.msra.mxu1 %v13062_v55 }
0x167a   :  { %12464 = vmatprep.subr.mxu1 %v14118_v19 }
0x167c   :  { %12462 = vmatmul.mubr.msk.f32.vlgmr.msra.gmra.mrb[46].mxu1 %vm741_vm4, %v15020_v59 }
0x167d   :  { %12466 = vmatprep.mubr.msk.f32.mxu1 %vm14119_vm7, %v14118_v19 }
0x1747   :  { %v12433_v63 = vpop.f32.mrb[44].mxu1 }
0x1748   :  { %v4220_v0 = vadd.f32 %v12433_v63, %v11596_v62  ;;  %v4214_v53 = vpop.f32.mrb[45].mxu1 }
0x1749   :  { %v4215_v21 = vadd.f32 %v11596_v62, %v4214_v53 }
0x174a   :  { %v4224_v56 = vmax.f32 %v4220_v0, 0.0 }
0x174b   :  { %v4223_v1 = vmax.f32 %v4215_v21, 0.0 }
0x174d   :  { %12450 = vmatprep.mubr.msk.f32.mxu0 %vm2404_vm11, %v4223_v1 }
0x174e   :  { %12451 = vmatmul.mubr.msk.f32.vlgmr.msra.gmra.mrb[36].mxu0 %vm2404_vm11, %v4224_v56 }
0x174f   :  { %v12463_v3 = vpop.f32.mrb[46].mxu1  ;;  %12476 = vmatprep.mubr.msk.f32.mxu0 %vm14119_vm7, %v14118_v19 }
0x1750   :  { %v4479_v4 = vpop.f32.mrb[47].mxu1  ;;  %v15048_v6 = vadd.f32 %v12463_v3, %v11604_v2 }
0x1751   :  { %v15034_v5 = vadd.f32 %v11604_v2, %v4479_v4 }
0x1753   :  { %4655 = vrot.lane.b32.xlu0 %v15034_v5, %s14121_s21  ;;  %4490 = vrot.lane.b32.xlu1 %v15034_v5, %s14120_s7 }
0x1757   :  { %4818 = vrot.lane.b32.xlu0 %v15034_v5, %s14123_s10  ;;  %4653 = vrot.lane.b32.xlu1 %v15034_v5, %s14122_s28 }
0x175b   :  { %4983 = vrot.lane.b32.xlu0 %v15034_v5, %s14124_s27  ;;  %4820 = vrot.lane.b32.xlu1 %v15034_v5, %s14125_s9 }
0x175f   :  { %5331 = vrot.lane.b32.xlu0 %v15048_v6, %s14121_s21  ;;  %4985 = vrot.lane.b32.xlu1 %v15034_v5, %s14126_s11 }
0x1763   :  { %5496 = vrot.lane.b32.xlu0 %v15048_v6, %s14125_s9  ;;  %5166 = vrot.lane.b32.xlu1 %v15048_v6, %s14120_s7 }
0x1767   :  { %5661 = vrot.lane.b32.xlu0 %v15048_v6, %s14126_s11  ;;  %5329 = vrot.lane.b32.xlu1 %v15048_v6, %s14122_s28 }
0x176b   :  { %4577 = vrot.lane.b32.xlu0 %v15034_v5, %s14127_s30  ;;  %5494 = vrot.lane.b32.xlu1 %v15048_v6, %s14123_s10 }
0x176f   :  { %5659 = vrot.lane.b32.xlu1 %v15048_v6, %s14124_s27 }
0x1773   :  { %4742 = vrot.lane.b32.xlu1 %v15034_v5, %s14129_s8 }
0x17c5   :  { %v4656_v7 = vpop.permute.xlu0 %4655  ;;  %v4491_v8 = vpop.permute.xlu1 %4490 }
0x17c6   :  { %12465 = vmatpush3.xpose.msk.msra.mxu1 %vm827_vm8, %v4491_v8  ;;  %12475 = vmatpush3.xpose.msk.msra.mxu0 %vm827_vm8, %v4656_v7 }
0x17c7   :  { %12484 = vmatprep.subr.mxu0 %v14118_v19  ;;  %12469 = vmatprep.subr.mxu1 %v14118_v19 }
0x17c9   :  { %v4819_v9 = vpop.permute.xlu0 %4818  ;;  %12467 = vmatmul.mubr.msk.f32.vlgmr.msra.gmra.mrb[48].mxu1 %vm827_vm8, %v15034_v5  ;;  %v4654_v10 = vpop.permute.xlu1 %4653 }
0x17ca   :  { %12477 = vmatmul.mubr.msk.f32.vlgmr.msra.gmra.mrb[38].mxu0 %vm827_vm8, %v4654_v10  ;;  %12471 = vmatprep.mubr.msk.f32.mxu1 %vm14119_vm7, %v14118_v19 }
0x17cb   :  { %12486 = vmatprep.mubr.msk.f32.mxu0 %vm14119_vm7, %v14118_v19 }
0x17cd   :  { %v4984_v14 = vpop.permute.xlu0 %4983  ;;  %v4821_v15 = vpop.permute.xlu1 %4820 }
0x17ce   :  { %12485 = vmatpush3.xpose.msk.msra.mxu0 %vm827_vm8, %v4821_v15 }
0x17cf   :  { %12494 = vmatprep.subr.mxu0 %v14118_v19 }
0x17d1   :  { %v5332_v11 = vpop.permute.xlu0 %5331  ;;  %v4986_v12 = vpop.permute.xlu1 %4985  ;;  %12487 = vmatmul.mubr.msk.f32.vlgmr.msra.gmra.mrb[40].mxu0 %vm827_vm8, %v4819_v9 }
0x17d2   :  { %12495 = vmatpush3.xpose.msk.msra.mxu0 %vm827_vm8, %v4986_v12  ;;  %12496 = vmatprep.mubr.msk.f32.mxu0 %vm14119_vm7, %v14118_v19 }
0x17d3   :  { %12504 = vmatprep.subr.mxu0 %v14118_v19 }
0x17d5   :  { %v5497_v13 = vpop.permute.xlu0 %5496  ;;  %v5167_v16 = vpop.permute.xlu1 %5166  ;;  %12497 = vmatmul.mubr.msk.f32.vlgmr.msra.gmra.mrb[42].mxu0 %vm827_vm8, %v4984_v14 }
0x17d6   :  { %12505 = vmatpush3.xpose.msk.msra.mxu0 %vm827_vm8, %v5167_v16  ;;  %12506 = vmatprep.mubr.msk.f32.mxu0 %vm14119_vm7, %v14118_v19 }
0x17d7   :  { %12514 = vmatprep.subr.mxu0 %v14118_v19 }
0x17d9   :  { %v5662_v30 = vpop.permute.xlu0 %5661  ;;  %v5330_v17 = vpop.permute.xlu1 %5329  ;;  %12507 = vmatmul.mubr.msk.f32.vlgmr.msra.gmra.mrb[44].mxu0 %vm827_vm8, %v15048_v6 }
0x17da   :  { %12515 = vmatpush3.xpose.msk.msra.mxu0 %vm827_vm8, %v5332_v11  ;;  %12516 = vmatprep.mubr.msk.f32.mxu0 %vm14119_vm7, %v14118_v19 }
0x17db   :  { %12524 = vmatprep.subr.mxu0 %v14118_v19 }
0x17dd   :  { %v4578_v18 = vpop.permute.xlu0 %4577  ;;  %12517 = vmatmul.mubr.msk.f32.vlgmr.msra.gmra.mrb[46].mxu0 %vm827_vm8, %v5330_v17  ;;  %v5495_v22 = vpop.permute.xlu1 %5494 }
0x17de   :  { %12470 = vmatpush3.msra.mxu1 %v4578_v18  ;;  %12525 = vmatpush3.xpose.msk.msra.mxu0 %vm827_vm8, %v5497_v13 }
0x17df   :  { %12526 = vmatprep.mubr.msk.f32.mxu0 %vm14119_vm7, %v14118_v19  ;;  %12534 = vmatprep.subr.mxu0 %v14118_v19 }
0x17e0   :  { %12479 = vmatprep.subr.mxu1 %v14118_v19 }
0x17e1   :  { %12527 = vmatmul.mubr.msk.f32.vlgmr.msra.gmra.mrb[48].mxu0 %vm827_vm8, %v5495_v22  ;;  %v5660_v24 = vpop.permute.xlu1 %5659 }
0x17e2   :  { %12535 = vmatpush3.xpose.msk.msra.mxu0 %vm827_vm8, %v5662_v30  ;;  %12536 = vmatprep.mubr.msk.f32.mxu0 %vm14119_vm7, %v14118_v19 }
0x17e5   :  { %12537 = vmatmul.mubr.msk.f32.vlgmr.msra.gmra.mrb[50].mxu0 %vm827_vm8, %v5660_v24  ;;  %v15128_v21 = vpop.permute.xlu1 %4742 }
0x1821   :  { %v15110_v25 = vpop.f32.mrb[36].mxu0 }
0x1822   :  { %v15112_v26 = vpop.f32.mrb[37].mxu0 }
0x189c   :  { %v4562_v20 = vpop.f32.mrb[48].mxu1 }
0x189d   :  { %v4563_v28 = vadd.f32 %v4562_v20, %v4488_v27  ;;  %v12468_v29 = vpop.f32.mrb[49].mxu1  ;;  %v4727_v34 = vpop.f32.mrb[38].mxu0 }
0x189e   :  { %v4728_v35 = vadd.f32 %v4727_v34, %v4488_v27  ;;  %v12478_v36 = vpop.f32.mrb[39].mxu0 }
0x189f   :  { %v4566_v37 = vsel %vm827_vm8, %v4563_v28, -inf }
0x18a0   :  { %4567 = vmax.xlane.f32.xlu0 %v4566_v37  ;;  %v4731_v31 = vsel %vm827_vm8, %v4728_v35, -inf }
0x18a1   :  { %4732 = vmax.xlane.f32.xlu1 %v4731_v31 }
0x18a4   :  { %v4892_v38 = vpop.f32.mrb[40].mxu0 }
0x18a5   :  { %v4893_v23 = vadd.f32 %v4892_v38, %v4488_v27  ;;  %v12488_v39 = vpop.f32.mrb[41].mxu0 }
0x18a7   :  { %v4896_v40 = vsel %vm827_vm8, %v4893_v23, -inf }
0x18a8   :  { %4897 = vmax.xlane.f32.xlu0 %v4896_v40  ;;  %v5057_v41 = vpop.f32.mrb[42].mxu0 }
0x18a9   :  { %v5058_v42 = vadd.f32 %v5057_v41, %v4488_v27  ;;  %v12498_v52 = vpop.f32.mrb[43].mxu0 }
0x18ab   :  { %v5061_v44 = vsel %vm827_vm8, %v5058_v42, -inf }
0x18ac   :  { %5062 = vmax.xlane.f32.xlu0 %v5061_v44  ;;  %v5238_v50 = vpop.f32.mrb[44].mxu0 }
0x18ad   :  { %v5239_v45 = vadd.f32 %v11619_v43, %v5238_v50  ;;  %v12508_v46 = vpop.f32.mrb[45].mxu0 }
0x18af   :  { %v5242_v48 = vsel %vm827_vm8, %v5239_v45, -inf }
0x18b0   :  { %5243 = vmax.xlane.f32.xlu1 %v5242_v48  ;;  %v5403_v49 = vpop.f32.mrb[46].mxu0 }
0x18b1   :  { %v5404_v51 = vadd.f32 %v11619_v43, %v5403_v49  ;;  %v12518_v32 = vpop.f32.mrb[47].mxu0 }
0x18b3   :  { %v5407_v55 = vsel %vm827_vm8, %v5404_v51, -inf }
0x18b4   :  { %5408 = vmax.xlane.f32.xlu0 %v5407_v55  ;;  %v5568_v58 = vpop.f32.mrb[48].mxu0 }
0x18b5   :  { %v5569_v54 = vadd.f32 %v11619_v43, %v5568_v58  ;;  %v12528_v60 = vpop.f32.mrb[49].mxu0 }
0x18b7   :  { %v5572_v61 = vsel %vm827_vm8, %v5569_v54, -inf }
0x18b8   :  { %5573 = vmax.xlane.f32.xlu1 %v5572_v61  ;;  %v5733_v62 = vpop.f32.mrb[50].mxu0 }
0x18b9   :  { %v5734_v63 = vadd.f32 %v11619_v43, %v5733_v62  ;;  %v12538_v0 = vpop.f32.mrb[51].mxu0 }
0x18bb   :  { %v5737_v53 = vsel %vm827_vm8, %v5734_v63, -inf }
0x18bc   :  { %5738 = vmax.xlane.f32.xlu0 %v5737_v53 }
0x18c9   :  { %5072 = vrot.lane.b32.xlu1 %v15034_v5, %s14130_s20 }
0x18d2   :  { %4907 = vrot.lane.b32.xlu0 %v15034_v5, %s14128_s5 }
0x192d   :  { %v4568_v1 = vpop.xlane.xlu0 %4567 }
0x192e   :  { %v4569_v56 = vsub.f32 %v4563_v28, %v4568_v1  ;;  %v4733_v2 = vpop.xlane.xlu1 %4732 }
0x192f   :  { %v4734_v3 = vsub.f32 %v4728_v35, %v4733_v2 }
0x1930   :  { %v4570_v4 = vmul.f32 1.442695, %v4569_v56 }
0x1931   :  { %v4735_v7 = vmul.f32 1.442695, %v4734_v3 }
0x1932   :  { %13357 = vpow2.f32 %v4570_v4 }
0x1933   :  { %13359 = vpow2.f32 %v4735_v7 }
0x1935   :  { %v4898_v8 = vpop.xlane.xlu0 %4897 }
0x1936   :  { %v4899_v9 = vsub.f32 %v4893_v23, %v4898_v8 }
0x1938   :  { %v4900_v10 = vmul.f32 1.442695, %v4899_v9 }
0x1939   :  { %v5063_v14 = vpop.xlane.xlu0 %5062 }
0x193a   :  { %13361 = vpow2.f32 %v4900_v10  ;;  %v5064_v15 = vsub.f32 %v5058_v42, %v5063_v14 }
0x193c   :  { %v13358_v11 = vpop.eup %13357  ;;  %v5065_v12 = vmul.f32 1.442695, %v5064_v15 }
0x193d   :  { %v13360_v13 = vpop.eup %13359  ;;  %v4572_v5 = vsel %vm827_vm8, %v13358_v11, 0.0  ;;  %v5244_v24 = vpop.xlane.xlu1 %5243 }
0x193e   :  { %13363 = vpow2.f32 %v5065_v12  ;;  %4573 = vadd.xlane.f32.xlu1 %v4572_v5  ;;  %v4737_v16 = vsel %vm827_vm8, %v13360_v13, 0.0  ;;  %v5245_v27 = vsub.f32 %v5239_v45, %v5244_v24 }
0x193f   :  { %4738 = vadd.xlane.f32.xlu0 %v4737_v16 }
0x1940   :  { %v5246_v34 = vmul.f32 1.442695, %v5245_v27  ;;  %v4361_v27 = vld [vmem:[%s15920_s12] sm:$0xff] }
0x1941   :  { %v5409_v20 = vpop.xlane.xlu0 %5408 }
0x1942   :  { %v5410_v29 = vsub.f32 %v5404_v51, %v5409_v20  ;;  %13365 = vpow2.f32 %v5246_v34  ;;  %v4362_v20 = vld [vmem:[%s15920_s12 + $0x8] sm:$0xff]  ;;  %v4364_v34 = vld [vmem:[%s15920_s12 + $0x18] sm:$0xff] }
0x1944   :  { %v13362_v30 = vpop.eup %13361  ;;  %v5411_v37 = vmul.f32 1.442695, %v5410_v29  ;;  %v4363_v29 = vld [vmem:[%s15920_s12 + $0x10] sm:$0xff] }
0x1945   :  { %v4902_v17 = vsel %vm827_vm8, %v13362_v30, 0.0  ;;  %v5574_v28 = vpop.xlane.xlu1 %5573 }
0x1946   :  { %4903 = vadd.xlane.f32.xlu1 %v4902_v17  ;;  %v5575_v35 = vsub.f32 %v5569_v54, %v5574_v28  ;;  %13367 = vpow2.f32 %v5411_v37  ;;  %v13066_v28 = vpack.c.bf16 %v4362_v20, %v4361_v27  ;;  %v4375_v20 = vld [vmem:[%s15921_s24 + $0x10] sm:$0xff] }
0x1948   :  { %v15133_v18 = vpop.eup %13363  ;;  %v5576_v31 = vmul.f32 1.442695, %v5575_v35  ;;  %13067 = vmatprep.subr.bf16.mxu0 %v13066_v28  ;;  %v13070_v35 = vpack.c.bf16 %v4364_v34, %v4363_v29 }
0x1949   :  { %v5067_v22 = vsel %vm827_vm8, %v15133_v18, 0.0  ;;  %v5739_v36 = vpop.xlane.xlu0 %5738  ;;  %v5073_v45 = vpop.permute.xlu1 %5072  ;;  %13069 = vmatpush3.bf16.msra.mxu0 %v13066_v28  ;;  %v4376_v28 = vld [vmem:[%s15921_s24 + $0x18] sm:$0xff] }
0x194a   :  { %5068 = vadd.xlane.f32.xlu0 %v5067_v22  ;;  %v5740_v38 = vsub.f32 %v5734_v63, %v5739_v36  ;;  %13369 = vpow2.f32 %v5576_v31  ;;  %13071 = vmatprep.subr.bf16.mxu0 %v13070_v35  ;;  %v13086_v29 = vpack.c.bf16 %v4376_v28, %v4375_v20 }
0x194c   :  { %v5741_v23 = vmul.f32 1.442695, %v5740_v38  ;;  %v13366_v39 = vpop.eup %13365 }
0x194d   :  { %v5248_v41 = vsel %vm827_vm8, %v13366_v39, 0.0  ;;  %v4908_v46 = vpop.permute.xlu0 %4907  ;;  %13073 = vmatpush3.bf16.msra.mxu0 %v13070_v35 }
0x194e   :  { %13371 = vpow2.f32 %v5741_v23 }
0x1950   :  { %v15141_v40 = vpop.eup %13367 }
0x1951   :  { %v5413_v43 = vsel %vm827_vm8, %v15141_v40, 0.0 }
0x1954   :  { %v15144_v42 = vpop.eup %13369 }
0x1955   :  { %v5578_v52 = vsel %vm827_vm8, %v15144_v42, 0.0 }
0x1957   :  { %5418 = vrot.lane.b32.xlu1 %v15048_v6, %s14129_s8 }
0x1958   :  { %v15150_v44 = vpop.eup %13371 }
0x1959   :  { %v5743_v50 = vsel %vm827_vm8, %v15150_v44, 0.0 }
0x1960   :  { %5253 = vrot.lane.b32.xlu0 %v15048_v6, %s14127_s30 }
0x197b   :  { %5249 = vadd.xlane.f32.xlu1 %v5248_v41 }
0x197f   :  { %5579 = vadd.xlane.f32.xlu1 %v5578_v52  ;;  %5414 = vadd.xlane.f32.xlu0 %v5413_v43 }
0x1983   :  { %5744 = vadd.xlane.f32.xlu1 %v5743_v50 }
0x1994   :  { %5748 = vrot.lane.b32.xlu1 %v15048_v6, %s14130_s20 }
0x1995   :  { %5583 = vrot.lane.b32.xlu0 %v15048_v6, %s14128_s5 }
0x19cb   :  { %v4574_v48 = vpop.xlane.xlu1 %4573 }
0x19cc   :  { %13373 = vrcp.f32 %v4574_v48  ;;  %v4739_v49 = vpop.xlane.xlu0 %4738 }
0x19cd   :  { %13375 = vrcp.f32 %v4739_v49 }
0x19d3   :  { %v4904_v51 = vpop.xlane.xlu1 %4903 }
0x19d4   :  { %13377 = vrcp.f32 %v4904_v51 }
0x19d6   :  { %v13374_v32 = vpop.eup %13373 }
0x19d7   :  { %v5069_v55 = vpop.xlane.xlu0 %5068  ;;  %v4576_v58 = vmul.f32 %v13374_v32, %v13358_v11  ;;  %v13376_v54 = vpop.eup %13375 }
0x19d8   :  { %13379 = vrcp.f32 %v5069_v55  ;;  %v4741_v6 = vmul.f32 %v13376_v54, %v13360_v13  ;;  %v5419_v53 = vpop.permute.xlu1 %5418 }
0x19d9   :  { %12472 = vmatmul.mubr.msk.f32.vlgmr.msra.gmra.mrb[50].mxu1 %vm827_vm8, %v4576_v58 }
0x19da   :  { %12480 = vmatpush3.msra.mxu1 %v15128_v21  ;;  %12481 = vmatprep.mubr.msk.f32.mxu1 %vm14119_vm7, %v14118_v19 }
0x19db   :  { %12489 = vmatprep.subr.mxu1 %v14118_v19  ;;  %v5254_v0 = vpop.permute.xlu0 %5253 }
0x19dd   :  { %12482 = vmatmul.mubr.msk.f32.vlgmr.msra.gmra.mrb[52].mxu1 %vm827_vm8, %v4741_v6 }
0x19de   :  { %v13378_v60 = vpop.eup %13377  ;;  %12490 = vmatpush3.msra.mxu1 %v4908_v46  ;;  %12491 = vmatprep.mubr.msk.f32.mxu1 %vm14119_vm7, %v14118_v19 }
0x19df   :  { %12499 = vmatprep.subr.mxu1 %v14118_v19  ;;  %v4906_v61 = vmul.f32 %v13378_v60, %v13362_v30 }
0x19e1   :  { %12492 = vmatmul.mubr.msk.f32.vlgmr.msra.gmra.mrb[54].mxu1 %vm827_vm8, %v4906_v61 }
0x19e2   :  { %v13380_v62 = vpop.eup %13379  ;;  %12500 = vmatpush3.msra.mxu1 %v5073_v45  ;;  %12501 = vmatprep.mubr.msk.f32.mxu1 %vm14119_vm7, %v14118_v19 }
0x19e3   :  { %12509 = vmatprep.subr.mxu1 %v14118_v19  ;;  %v5071_v63 = vmul.f32 %v13380_v62, %v15133_v18 }
0x19e5   :  { %12502 = vmatmul.mubr.msk.f32.vlgmr.msra.gmra.mrb[56].mxu1 %vm827_vm8, %v5071_v63 }
0x19e6   :  { %12510 = vmatpush3.msra.mxu1 %v5254_v0  ;;  %12511 = vmatprep.mubr.msk.f32.mxu1 %vm14119_vm7, %v14118_v19 }
0x19e7   :  { %12519 = vmatprep.subr.mxu1 %v14118_v19 }
0x1a08   :  { %v5250_v21 = vpop.xlane.xlu1 %5249 }
0x1a09   :  { %13381 = vrcp.f32 %v5250_v21 }
0x1a0c   :  { %v5580_v1 = vpop.xlane.xlu1 %5579  ;;  %v5415_v56 = vpop.xlane.xlu0 %5414 }
0x1a0d   :  { %13383 = vrcp.f32 %v5415_v56 }
0x1a0e   :  { %13385 = vrcp.f32 %v5580_v1 }
0x1a10   :  { %v5745_v2 = vpop.xlane.xlu1 %5744  ;;  %v5584_v10 = vpop.permute.xlu0 %5583 }
0x1a11   :  { %13387 = vrcp.f32 %v5745_v2  ;;  %v11632_v2 = vld [vmem:[#allocation19] ss:$0 sm:$0xff] }
0x1a13   :  { %v13382_v3 = vpop.eup %13381 }
0x1a14   :  { %v5252_v4 = vmul.f32 %v13382_v3, %v13366_v39  ;;  %v5749_v11 = vpop.permute.xlu1 %5748 }
0x1a16   :  { %12512 = vmatmul.mubr.msk.f32.vlgmr.msra.gmra.mrb[58].mxu1 %vm827_vm8, %v5252_v4 }
0x1a17   :  { %12520 = vmatpush3.msra.mxu1 %v5419_v53  ;;  %12521 = vmatprep.mubr.msk.f32.mxu1 %vm14119_vm7, %v14118_v19  ;;  %v13384_v7 = vpop.eup %13383 }
0x1a18   :  { %12529 = vmatprep.subr.mxu1 %v14118_v19  ;;  %v5417_v8 = vmul.f32 %v13384_v7, %v15141_v40  ;;  %v13386_v9 = vpop.eup %13385 }
0x1a19   :  { %v5582_v14 = vmul.f32 %v13386_v9, %v15144_v42  ;;  %v11599_v42 = vld [vmem:[#allocation13 + $0x1] ss:$0 sm:$0xff] }
0x1a1a   :  { %12522 = vmatmul.mubr.msk.f32.vlgmr.msra.gmra.mrb[60].mxu1 %vm827_vm8, %v5417_v8  ;;  %v4304_v52 = vadd.f32 %v11599_v42, %v15112_v26  ;;  %v4309_v50 = vadd.f32 %v15110_v25, %v11599_v42 }
0x1a1b   :  { %12530 = vmatpush3.msra.mxu1 %v5584_v10  ;;  %12531 = vmatprep.mubr.msk.f32.mxu1 %vm14119_vm7, %v14118_v19  ;;  %v13388_v15 = vpop.eup %13387 }
0x1a1c   :  { %12539 = vmatprep.subr.mxu1 %v14118_v19  ;;  %v5747_v12 = vmul.f32 %v13388_v15, %v15150_v44  ;;  %v4312_v43 = vadd.f32 %v4304_v52, %v15004_v47  ;;  %v4313_v45 = vadd.f32 %v4309_v50, %v15010_v33  ;;  %v11602_v15 = vld [vmem:[#allocation15 + $0x1] ss:$0 sm:$0xff] }
0x1a1e   :  { %12532 = vmatmul.mubr.msk.f32.vlgmr.msra.gmra.mrb[62].mxu1 %vm827_vm8, %v5582_v14  ;;  %v4314_v44 = vsel %vm741_vm4, %v4312_v43, 0.0  ;;  %v4317_v46 = vsel %vm741_vm4, %v4313_v45, 0.0 }
0x1a1f   :  { %12540 = vmatpush3.msra.mxu1 %v5749_v11  ;;  %12541 = vmatprep.mubr.msk.f32.mxu1 %vm14119_vm7, %v14118_v19 }
0x1a22   :  { %12542 = vmatmul.mubr.msk.f32.vlgmr.msra.gmra.mrb[64].mxu1 %vm827_vm8, %v5747_v12 }
0x1aac   :  { %v4649_v13 = vpop.f32.mrb[50].mxu1 }
0x1aad   :  { %v12473_v5 = vpop.f32.mrb[51].mxu1 }
0x1ab0   :  { %v4814_v16 = vpop.f32.mrb[52].mxu1 }
0x1ab1   :  { %5149 = vrot.lane.b32.xlu0 %v4814_v16, %s14092_s1  ;;  %v12483_v30 = vpop.f32.mrb[53].mxu1  ;;  %v11603_v16 = vld [vmem:[#allocation16 + $0x1] ss:$0 sm:$0xff] }
0x1ab4   :  { %v4979_v17 = vpop.f32.mrb[54].mxu1 }
0x1ab5   :  { %5153 = vrot.lane.b32.xlu1 %v4979_v17, %s14095_s18  ;;  %v12493_v18 = vpop.f32.mrb[55].mxu1 }
0x1ab8   :  { %v5144_v22 = vpop.f32.mrb[56].mxu1 }
0x1ab9   :  { %5157 = vrot.lane.b32.xlu1 %v5144_v22, %s14131_s16  ;;  %v12503_v24 = vpop.f32.mrb[57].mxu1 }
0x1aba   :  { %v4374_v24 = vld [vmem:[%s15921_s24 + $0x8] sm:$0xff] }
0x1ae9   :  { %v5325_v36 = vpop.f32.mrb[58].mxu1 }
0x1aea   :  { %v12513_v37 = vpop.f32.mrb[59].mxu1 }
0x1aed   :  { %v5490_v31 = vpop.f32.mrb[60].mxu1 }
0x1aee   :  { %5825 = vrot.lane.b32.xlu0 %v5490_v31, %s14092_s1  ;;  %v12523_v38 = vpop.f32.mrb[61].mxu1 }
0x1af1   :  { %v5655_v23 = vpop.f32.mrb[62].mxu1 }
0x1af2   :  { %5829 = vrot.lane.b32.xlu0 %v5655_v23, %s14095_s18  ;;  %v12533_v39 = vpop.f32.mrb[63].mxu1 }
0x1af5   :  { %v5820_v40 = vpop.f32.mrb[64].mxu1 }
0x1af6   :  { %5833 = vrot.lane.b32.xlu1 %v5820_v40, %s14131_s16  ;;  %v12543_v41 = vpop.f32.mrb[65].mxu1 }
0x1b11   :  { %4315 = vadd.xlane.f32.xlu0 %v4314_v44 }
0x1b1a   :  { %4318 = vadd.xlane.f32.xlu1 %v4317_v46 }
0x1b23   :  { %v5150_v48 = vpop.permute.xlu0 %5149 }
0x1b24   :  { %v5160_v51 = vsel %vm827_vm8, %v4649_v13, %v5150_v48  ;;  %v4368_v48 = vld [vmem:[%s15922_s4] sm:$0xff] }
0x1b27   :  { %v5154_v49 = vpop.permute.xlu1 %5153 }
0x1b28   :  { %v5161_v32 = vsel %vm1497_vm9, %v5160_v51, %v5154_v49  ;;  %v4369_v49 = vld [vmem:[%s15922_s4 + $0x8] sm:$0xff]  ;;  %v4370_v51 = vld [vmem:[%s15922_s4 + $0x10] sm:$0xff] }
0x1b2b   :  { %v5158_v55 = vpop.permute.xlu1 %5157 }
0x1b2c   :  { %v5162_v26 = vsel %vm1499_vm10, %v5161_v32, %v5158_v55  ;;  %v13074_v32 = vpack.c.bf16 %v4369_v49, %v4368_v48  ;;  %v4371_v55 = vld [vmem:[%s15922_s4 + $0x18] sm:$0xff]  ;;  %v11655_v48 = vld [vmem:[%s15923_s0 + $0x8] sm:$0xff] }
0x1b2d   :  { %12552 = vmatprep.mubr.msk.f32.mxu0 %vm741_vm4, %v5162_v26  ;;  %v13078_v26 = vpack.c.bf16 %v4371_v55, %v4370_v51 }
0x1b2e   :  { %13075 = vmatprep.subr.bf16.mxu1 %v13074_v32 }
0x1b2f   :  { %13077 = vmatpush3.bf16.msra.mxu1 %v13074_v32 }
0x1b30   :  { %13079 = vmatprep.subr.bf16.mxu1 %v13078_v26 }
0x1b33   :  { %13081 = vmatpush3.bf16.msra.mxu1 %v13078_v26 }
0x1b34   :  { %12577 = vmatprep.subr.mxu1 %v14118_v19 }
0x1b60   :  { %v5826_v47 = vpop.permute.xlu0 %5825 }
0x1b61   :  { %v5836_v25 = vsel %vm827_vm8, %v5325_v36, %v5826_v47 }
0x1b64   :  { %v5830_v58 = vpop.permute.xlu0 %5829 }
0x1b65   :  { %v5837_v33 = vsel %vm1497_vm9, %v5836_v25, %v5830_v58 }
0x1b68   :  { %v5834_v54 = vpop.permute.xlu1 %5833 }
0x1b69   :  { %v5838_v6 = vsel %vm1499_vm10, %v5837_v33, %v5834_v54 }
0x1b6a   :  { %12553 = vmatmul.mubr.msk.f32.vlgmr.msra.gmra.mrb[52].mxu0 %vm741_vm4, %v5838_v6 }
0x1b9e   :  { %v4316_v60 = vpop.xlane.xlu0 %4315 }
0x1b9f   :  { %v4320_v61 = vmul.f32 0.03125, %v4316_v60 }
0x1ba1   :  { %v4322_v62 = vsub.f32 %v4312_v43, %v4320_v61  ;;  %v11635_v61 = vld [vmem:[#allocation21] ss:$0 sm:$0xff] }
0x1ba3   :  { %v4324_v63 = vmul.f32 %v4322_v62, %v4322_v62 }
0x1ba5   :  { %v4326_v0 = vsel %vm741_vm4, %v4324_v63, 0.0  ;;  %v11636_v63 = vld [vmem:[#allocation22] ss:$0 sm:$0xff] }
0x1ba6   :  { %4327 = vadd.xlane.f32.xlu1 %v4326_v0 }
0x1ba7   :  { %v4319_v53 = vpop.xlane.xlu1 %4318 }
0x1ba8   :  { %v4321_v7 = vmul.f32 0.03125, %v4319_v53 }
0x1baa   :  { %v4323_v11 = vsub.f32 %v4313_v45, %v4321_v7 }
0x1c33   :  { %v4328_v21 = vpop.xlane.xlu1 %4327 }
0x1c34   :  { %v4332_v1 = vmul.f32 0.03125, %v4328_v21 }
0x1c36   :  { %v4334_v56 = vadd.f32 1e-05, %v4332_v1 }
0x1c38   :  { %13389 = vrsqrt.f32 %v4334_v56 }
0x1c3d   :  { %v12554_v3 = vpop.f32.mrb[52].mxu0 }
0x1c3e   :  { %v5917_v4 = vpop.f32.mrb[53].mxu0  ;;  %v5923_v8 = vadd.f32 %v12554_v3, %v11632_v2  ;;  %v11640_v3 = vld [vmem:[#allocation25] ss:$0 sm:$0xff] }
0x1c3f   :  { %v5918_v9 = vadd.f32 %v11632_v2, %v5917_v4 }
0x1c40   :  { %v5927_v12 = vadd.f32 %v5923_v8, %v15020_v59  ;;  %v4373_v59 = vld [vmem:[%s15921_s24] sm:$0xff] }
0x1c41   :  { %v5926_v10 = vadd.f32 %v5918_v9, %v15013_v57  ;;  %v4325_v57 = vmul.f32 %v4323_v11, %v4323_v11  ;;  %v13082_v27 = vpack.c.bf16 %v4374_v24, %v4373_v59 }
0x1c42   :  { %v13390_v14 = vpop.eup %13389  ;;  %v5931_v17 = vsel %vm741_vm4, %v5927_v12, 0.0 }
0x1c43   :  { %v5928_v13 = vsel %vm741_vm4, %v5926_v10, 0.0  ;;  %v4338_v5 = vmul.f32 %v13390_v14, %v4322_v62  ;;  %v4329_v22 = vsel %vm741_vm4, %v4325_v57, 0.0  ;;  %13083 = vmatprep.subr.bf16.mxu0 %v13082_v27  ;;  %v11637_v14 = vld [vmem:[#allocation24] ss:$0 sm:$0xff] }
0x1c44   :  { %5929 = vadd.xlane.f32.xlu0 %v5928_v13  ;;  %13085 = vmatpush3.bf16.msra.mxu0 %v13082_v27 }
0x1c45   :  { %v4346_v30 = vmul.f32 %v11602_v15, %v4338_v5  ;;  %13087 = vmatprep.subr.bf16.mxu0 %v13086_v29 }
0x1c47   :  { %v15220_v18 = vadd.f32 %v11603_v16, %v4346_v30 }
0x1c48   :  { %5932 = vadd.xlane.f32.xlu0 %v5931_v17  ;;  %13089 = vmatpush3.bf16.msra.mxu0 %v13086_v29 }
0x1c49   :  { %12574 = vmatprep.mubr.msk.f32.mxu0 %vm741_vm4, %v15220_v18  ;;  %12587 = vmatprep.subr.mxu0 %v14118_v19 }
0x1c4c   :  { %4330 = vadd.xlane.f32.xlu0 %v4329_v22 }
0x1cd1   :  { %v5930_v34 = vpop.xlane.xlu0 %5929 }
0x1cd2   :  { %v5934_v35 = vmul.f32 0.03125, %v5930_v34  ;;  %v6144_v34 = vld [vmem:[%s15923_s0] sm:$0xff] }
0x1cd4   :  { %v5936_v36 = vsub.f32 %v5926_v10, %v5934_v35 }
0x1cd5   :  { %v5933_v37 = vpop.xlane.xlu0 %5932 }
0x1cd6   :  { %v5935_v31 = vmul.f32 0.03125, %v5933_v37  ;;  %v5938_v38 = vmul.f32 %v5936_v36, %v5936_v36 }
0x1cd8   :  { %v5937_v23 = vsub.f32 %v5927_v12, %v5935_v31  ;;  %v5940_v39 = vsel %vm741_vm4, %v5938_v38, 0.0 }
0x1cd9   :  { %5941 = vadd.xlane.f32.xlu1 %v5940_v39  ;;  %v4331_v40 = vpop.xlane.xlu0 %4330 }
0x1cda   :  { %v4333_v41 = vmul.f32 0.03125, %v4331_v40  ;;  %v5939_v42 = vmul.f32 %v5937_v23, %v5937_v23 }
0x1cdc   :  { %v4335_v52 = vadd.f32 1e-05, %v4333_v41  ;;  %v5943_v43 = vsel %vm741_vm4, %v5939_v42, 0.0 }
0x1cdd   :  { %5944 = vadd.xlane.f32.xlu0 %v5943_v43 }
0x1cde   :  { %13391 = vrsqrt.f32 %v4335_v52 }
0x1ce8   :  { %v13392_v44 = vpop.eup %13391 }
0x1ce9   :  { %v4339_v50 = vmul.f32 %v13392_v44, %v4323_v11 }
0x1ceb   :  { %v4347_v45 = vmul.f32 %v11602_v15, %v4339_v50 }
0x1ced   :  { %v15232_v46 = vadd.f32 %v11603_v16, %v4347_v45 }
0x1cef   :  { %12575 = vmatmul.mubr.msk.f32.vlgmr.msra.gmra.mrb[54].mxu0 %vm741_vm4, %v15232_v46 }
0x1cf0   :  { %12589 = vmatprep.mubr.msk.f32.mxu0 %vm14119_vm7, %v14118_v19 }
0x1d66   :  { %v5942_v47 = vpop.xlane.xlu1 %5941 }
0x1d67   :  { %v5946_v58 = vmul.f32 0.03125, %v5942_v47 }
0x1d69   :  { %v5948_v25 = vadd.f32 1e-05, %v5946_v58 }
0x1d6a   :  { %v5945_v33 = vpop.xlane.xlu0 %5944 }
0x1d6b   :  { %13393 = vrsqrt.f32 %v5948_v25  ;;  %v5947_v54 = vmul.f32 0.03125, %v5945_v33 }
0x1d6d   :  { %v5949_v6 = vadd.f32 1e-05, %v5947_v54 }
0x1d6f   :  { %13395 = vrsqrt.f32 %v5949_v6 }
0x1d75   :  { %v13394_v60 = vpop.eup %13393 }
0x1d76   :  { %v5952_v62 = vmul.f32 %v13394_v60, %v5936_v36 }
0x1d78   :  { %v5960_v0 = vmul.f32 %v11635_v61, %v5952_v62 }
0x1d79   :  { %v13396_v53 = vpop.eup %13395 }
0x1d7a   :  { %v5953_v21 = vmul.f32 %v13396_v53, %v5937_v23  ;;  %v15243_v1 = vadd.f32 %v11636_v63, %v5960_v0 }
0x1d7c   :  { %v5961_v56 = vmul.f32 %v11635_v61, %v5953_v21  ;;  %12563 = vmatprep.mubr.msk.f32.mxu1 %vm741_vm4, %v15243_v1 }
0x1d7e   :  { %v15247_v2 = vadd.f32 %v11636_v63, %v5961_v56 }
0x1d80   :  { %12564 = vmatmul.mubr.msk.f32.vlgmr.msra.gmra.mrb[66].mxu1 %vm741_vm4, %v15247_v2 }
0x1d81   :  { %12579 = vmatprep.mubr.msk.f32.mxu1 %vm14119_vm7, %v14118_v19 }
0x1dc2   :  { %v12576_v4 = vpop.f32.mrb[54].mxu0 }
0x1dc3   :  { %v15253_v7 = vadd.f32 %v12576_v4, %v11640_v3  ;;  %v6135_v8 = vpop.f32.mrb[55].mxu0 }
0x1dc4   :  { %v15255_v9 = vadd.f32 %v11640_v3, %v6135_v8 }
0x1dc6   :  { %6310 = vrot.lane.b32.xlu1 %v15255_v9, %s14122_s28  ;;  %12578 = vmatpush3.xpose.msk.msra.mxu1 %vm827_vm8, %v15255_v9 }
0x1dc7   :  { %12582 = vmatprep.subr.mxu1 %v14118_v19 }
0x1dca   :  { %6475 = vrot.lane.b32.xlu1 %v15255_v9, %s14123_s10 }
0x1e38   :  { %v6311_v10 = vpop.permute.xlu1 %6310 }
0x1e39   :  { %12588 = vmatpush3.xpose.msk.msra.mxu0 %vm827_vm8, %v6311_v10 }
0x1e3a   :  { %12597 = vmatprep.subr.mxu0 %v14118_v19 }
0x1e3c   :  { %v6476_v5 = vpop.permute.xlu1 %6475 }
0x1e53   :  { %v12565_v15 = vpop.f32.mrb[66].mxu1 }
0x1e54   :  { %v6048_v11 = vpop.f32.mrb[67].mxu1  ;;  %v6054_v13 = vadd.f32 %v12565_v15, %v11637_v14 }
0x1e55   :  { %v6049_v12 = vadd.f32 %v11637_v14, %v6048_v11 }
0x1e57   :  { %6473 = vrot.lane.b32.xlu1 %v6049_v12, %s14123_s10  ;;  %6308 = vrot.lane.b32.xlu0 %v6049_v12, %s14122_s28 }
0x1e58   :  { %12580 = vmatmul.mubr.msk.f32.vlgmr.msra.gmra.mrb[68].mxu1 %vm827_vm8, %v6049_v12 }
0x1e59   :  { %12584 = vmatprep.mubr.msk.f32.mxu1 %vm14119_vm7, %v14118_v19 }
0x1e5b   :  { %6638 = vrot.lane.b32.xlu1 %v6049_v12, %s14124_s27  ;;  %6640 = vrot.lane.b32.xlu0 %v15255_v9, %s14124_s27 }
0x1e5f   :  { %6983 = vrot.lane.b32.xlu1 %v6054_v13, %s14122_s28  ;;  %6985 = vrot.lane.b32.xlu0 %v15253_v7, %s14122_s28 }
0x1e63   :  { %7148 = vrot.lane.b32.xlu1 %v6054_v13, %s14123_s10  ;;  %7150 = vrot.lane.b32.xlu0 %v15253_v7, %s14123_s10 }
0x1e67   :  { %7313 = vrot.lane.b32.xlu1 %v6054_v13, %s14124_s27  ;;  %7315 = vrot.lane.b32.xlu0 %v15253_v7, %s14124_s27 }
0x1e6b   :  { %6397 = vrot.lane.b32.xlu1 %v15255_v9, %s14121_s21  ;;  %6232 = vrot.lane.b32.xlu0 %v15255_v9, %s14120_s7 }
0x1ec9   :  { %v6474_v16 = vpop.permute.xlu1 %6473  ;;  %v6309_v30 = vpop.permute.xlu0 %6308 }
0x1eca   :  { %12590 = vmatmul.mubr.msk.f32.vlgmr.msra.gmra.mrb[56].mxu0 %vm827_vm8, %v6309_v30 }
0x1ecb   :  { %12598 = vmatpush3.xpose.msk.msra.mxu0 %vm827_vm8, %v6476_v5  ;;  %12599 = vmatprep.mubr.msk.f32.mxu0 %vm14119_vm7, %v14118_v19 }
0x1ecc   :  { %12607 = vmatprep.subr.mxu0 %v14118_v19 }
0x1ecd   :  { %v6641_v17 = vpop.permute.xlu0 %6640  ;;  %v6639_v57 = vpop.permute.xlu1 %6638 }
0x1ece   :  { %12600 = vmatmul.mubr.msk.f32.vlgmr.msra.gmra.mrb[58].mxu0 %vm827_vm8, %v6474_v16 }
0x1ecf   :  { %12608 = vmatpush3.xpose.msk.msra.mxu0 %vm827_vm8, %v6641_v17  ;;  %12609 = vmatprep.mubr.msk.f32.mxu0 %vm14119_vm7, %v14118_v19 }
0x1ed0   :  { %12617 = vmatprep.subr.mxu0 %v14118_v19 }
0x1ed1   :  { %v6986_v22 = vpop.permute.xlu0 %6985  ;;  %v6984_v59 = vpop.permute.xlu1 %6983 }
0x1ed2   :  { %12610 = vmatmul.mubr.msk.f32.vlgmr.msra.gmra.mrb[60].mxu0 %vm827_vm8, %v6639_v57 }
0x1ed3   :  { %12618 = vmatpush3.xpose.msk.msra.mxu0 %vm827_vm8, %v15253_v7  ;;  %12619 = vmatprep.mubr.msk.f32.mxu0 %vm14119_vm7, %v14118_v19 }
0x1ed4   :  { %12627 = vmatprep.subr.mxu0 %v14118_v19 }
0x1ed5   :  { %v7151_v24 = vpop.permute.xlu0 %7150  ;;  %v7149_v20 = vpop.permute.xlu1 %7148 }
0x1ed6   :  { %12620 = vmatmul.mubr.msk.f32.vlgmr.msra.gmra.mrb[62].mxu0 %vm827_vm8, %v6054_v13 }
0x1ed7   :  { %12628 = vmatpush3.xpose.msk.msra.mxu0 %vm827_vm8, %v6986_v22  ;;  %12629 = vmatprep.mubr.msk.f32.mxu0 %vm14119_vm7, %v14118_v19 }
0x1ed8   :  { %12637 = vmatprep.subr.mxu0 %v14118_v19 }
0x1ed9   :  { %v7316_v27 = vpop.permute.xlu0 %7315  ;;  %v7314_v29 = vpop.permute.xlu1 %7313 }
0x1eda   :  { %12630 = vmatmul.mubr.msk.f32.vlgmr.msra.gmra.mrb[64].mxu0 %vm827_vm8, %v6984_v59 }
0x1edb   :  { %12638 = vmatpush3.xpose.msk.msra.mxu0 %vm827_vm8, %v7151_v24  ;;  %12639 = vmatprep.mubr.msk.f32.mxu0 %vm14119_vm7, %v14118_v19 }
0x1edc   :  { %12647 = vmatprep.subr.mxu0 %v14118_v19 }
0x1edd   :  { %v6233_v28 = vpop.permute.xlu0 %6232  ;;  %v6398_v10 = vpop.permute.xlu1 %6397 }
0x1ede   :  { %12583 = vmatpush3.msra.mxu1 %v6233_v28  ;;  %12640 = vmatmul.mubr.msk.f32.vlgmr.msra.gmra.mrb[66].mxu0 %vm827_vm8, %v7149_v20 }
0x1edf   :  { %12648 = vmatpush3.xpose.msk.msra.mxu0 %vm827_vm8, %v7316_v27  ;;  %12649 = vmatprep.mubr.msk.f32.mxu0 %vm14119_vm7, %v14118_v19 }
0x1ee0   :  { %12592 = vmatprep.subr.mxu1 %v14118_v19 }
0x1ee2   :  { %12650 = vmatmul.mubr.msk.f32.vlgmr.msra.gmra.mrb[68].mxu0 %vm827_vm8, %v7314_v29 }
0x1f2b   :  { %v6217_v35 = vpop.f32.mrb[68].mxu1 }
0x1f2c   :  { %v6218_v36 = vadd.f32 %v6217_v35, %v6144_v34  ;;  %v12581_v37 = vpop.f32.mrb[69].mxu1 }
0x1f2e   :  { %v6221_v31 = vsel %vm827_vm8, %v6218_v36, -inf }
0x1f2f   :  { %6222 = vmax.xlane.f32.xlu0 %v6221_v31 }
0x1f9d   :  { %v6382_v38 = vpop.f32.mrb[56].mxu0 }
0x1f9e   :  { %v6383_v23 = vadd.f32 %v6382_v38, %v6144_v34  ;;  %v12591_v39 = vpop.f32.mrb[57].mxu0 }
0x1fa0   :  { %v6386_v40 = vsel %vm827_vm8, %v6383_v23, -inf }
0x1fa1   :  { %6387 = vmax.xlane.f32.xlu1 %v6386_v40  ;;  %v6547_v41 = vpop.f32.mrb[58].mxu0 }
0x1fa2   :  { %v6548_v42 = vadd.f32 %v6547_v41, %v6144_v34  ;;  %v12601_v52 = vpop.f32.mrb[59].mxu0 }
0x1fa4   :  { %v6551_v43 = vsel %vm827_vm8, %v6548_v42, -inf }
0x1fa5   :  { %v6712_v44 = vpop.f32.mrb[60].mxu0  ;;  %6552 = vmax.xlane.f32.xlu0 %v6551_v43 }
0x1fa6   :  { %v6713_v50 = vadd.f32 %v6712_v44, %v6144_v34  ;;  %v12611_v45 = vpop.f32.mrb[61].mxu0 }
0x1fa8   :  { %v6716_v49 = vsel %vm827_vm8, %v6713_v50, -inf }
0x1fa9   :  { %v6892_v51 = vpop.f32.mrb[62].mxu0  ;;  %6717 = vmax.xlane.f32.xlu0 %v6716_v49 }
0x1faa   :  { %v6893_v32 = vadd.f32 %v11655_v48, %v6892_v51  ;;  %v12621_v55 = vpop.f32.mrb[63].mxu0 }
0x1fac   :  { %v6896_v26 = vsel %vm827_vm8, %v6893_v32, -inf }
0x1fad   :  { %6897 = vmax.xlane.f32.xlu1 %v6896_v26  ;;  %v7057_v47 = vpop.f32.mrb[64].mxu0 }
0x1fae   :  { %v7058_v58 = vadd.f32 %v11655_v48, %v7057_v47  ;;  %v12631_v25 = vpop.f32.mrb[65].mxu0 }
0x1fb0   :  { %v7061_v33 = vsel %vm827_vm8, %v7058_v58, -inf }
0x1fb1   :  { %v7222_v54 = vpop.f32.mrb[66].mxu0  ;;  %7062 = vmax.xlane.f32.xlu0 %v7061_v33 }
0x1fb2   :  { %v7223_v6 = vadd.f32 %v11655_v48, %v7222_v54  ;;  %v12641_v60 = vpop.f32.mrb[67].mxu0 }
0x1fb4   :  { %v7226_v61 = vsel %vm827_vm8, %v7223_v6, -inf }
0x1fb5   :  { %7227 = vmax.xlane.f32.xlu1 %v7226_v61  ;;  %v7387_v62 = vpop.f32.mrb[68].mxu0 }
0x1fb6   :  { %v7388_v63 = vadd.f32 %v11655_v48, %v7387_v62  ;;  %v12651_v0 = vpop.f32.mrb[69].mxu0 }
0x1fb8   :  { %v7391_v53 = vsel %vm827_vm8, %v7388_v63, -inf }
0x1fb9   :  { %7392 = vmax.xlane.f32.xlu0 %v7391_v53 }
0x1fbc   :  { %v6223_v21 = vpop.xlane.xlu0 %6222 }
0x1fbd   :  { %v6224_v56 = vsub.f32 %v6218_v36, %v6223_v21 }
0x1fbf   :  { %v6225_v3 = vmul.f32 1.442695, %v6224_v56 }
0x1fc1   :  { %13397 = vpow2.f32 %v6225_v3 }
0x1fc6   :  { %6727 = vrot.lane.b32.xlu1 %v15255_v9, %s14126_s11 }
0x1fcb   :  { %v13398_v4 = vpop.eup %13397 }
0x1fcc   :  { %v6227_v8 = vsel %vm827_vm8, %v13398_v4, 0.0 }
0x1fcf   :  { %6562 = vrot.lane.b32.xlu0 %v15255_v9, %s14125_s9 }
0x1fea   :  { %6228 = vadd.xlane.f32.xlu1 %v6227_v8 }
0x202e   :  { %v6388_v14 = vpop.xlane.xlu1 %6387 }
0x202f   :  { %v6389_v15 = vsub.f32 %v6383_v23, %v6388_v14 }
0x2031   :  { %v6390_v11 = vmul.f32 1.442695, %v6389_v15 }
0x2032   :  { %v6553_v12 = vpop.xlane.xlu0 %6552 }
0x2033   :  { %13399 = vpow2.f32 %v6390_v11  ;;  %v6554_v13 = vsub.f32 %v6548_v42, %v6553_v12 }
0x2035   :  { %v6555_v5 = vmul.f32 1.442695, %v6554_v13 }
0x2036   :  { %v6718_v16 = vpop.xlane.xlu0 %6717 }
0x2037   :  { %13401 = vpow2.f32 %v6555_v5  ;;  %v6719_v30 = vsub.f32 %v6713_v50, %v6718_v16 }
0x2039   :  { %v6720_v9 = vmul.f32 1.442695, %v6719_v30 }
0x203a   :  { %v6898_v20 = vpop.xlane.xlu1 %6897 }
0x203b   :  { %13403 = vpow2.f32 %v6720_v9  ;;  %v6899_v28 = vsub.f32 %v6893_v32, %v6898_v20  ;;  %v4379_v20 = vld [vmem:[%s15924_s17 + $0x8] sm:$0xff] }
0x203d   :  { %v13400_v17 = vpop.eup %13399  ;;  %v6900_v36 = vmul.f32 1.442695, %v6899_v28 }
0x203e   :  { %v6392_v57 = vsel %vm827_vm8, %v13400_v17, 0.0  ;;  %v7063_v29 = vpop.xlane.xlu0 %7062 }
0x203f   :  { %6393 = vadd.xlane.f32.xlu0 %v6392_v57  ;;  %v7064_v35 = vsub.f32 %v7058_v58, %v7063_v29  ;;  %13405 = vpow2.f32 %v6900_v36  ;;  %v4380_v29 = vld [vmem:[%s15924_s17 + $0x10] sm:$0xff] }
0x2041   :  { %v13402_v22 = vpop.eup %13401  ;;  %v7065_v38 = vmul.f32 1.442695, %v7064_v35 }
0x2042   :  { %v6557_v59 = vsel %vm827_vm8, %v13402_v22, 0.0  ;;  %v7228_v34 = vpop.xlane.xlu1 %7227 }
0x2043   :  { %6558 = vadd.xlane.f32.xlu1 %v6557_v59  ;;  %v7229_v37 = vsub.f32 %v7223_v6, %v7228_v34  ;;  %13407 = vpow2.f32 %v7065_v38  ;;  %v4381_v34 = vld [vmem:[%s15924_s17 + $0x18] sm:$0xff] }
0x2044   :  { %v13094_v35 = vpack.c.bf16 %v4381_v34, %v4380_v29 }
0x2045   :  { %v15336_v24 = vpop.eup %13403  ;;  %v7230_v23 = vmul.f32 1.442695, %v7229_v37 }
0x2046   :  { %v6722_v27 = vsel %vm827_vm8, %v15336_v24, 0.0  ;;  %v7393_v31 = vpop.xlane.xlu0 %7392  ;;  %v6728_v41 = vpop.permute.xlu1 %6727 }
0x2047   :  { %6723 = vadd.xlane.f32.xlu0 %v6722_v27  ;;  %v7394_v39 = vsub.f32 %v7388_v63, %v7393_v31  ;;  %13409 = vpow2.f32 %v7230_v23  ;;  %v4378_v27 = vld [vmem:[%s15924_s17] sm:$0xff] }
0x2048   :  { %v13090_v28 = vpack.c.bf16 %v4379_v20, %v4378_v27 }
0x2049   :  { %v7395_v40 = vmul.f32 1.442695, %v7394_v39  ;;  %v13406_v42 = vpop.eup %13405 }
0x204a   :  { %v6902_v44 = vsel %vm827_vm8, %v13406_v42, 0.0  ;;  %v6563_v26 = vpop.permute.xlu0 %6562  ;;  %13091 = vmatprep.subr.bf16.mxu0 %v13090_v28 }
0x204b   :  { %13411 = vpow2.f32 %v7395_v40  ;;  %13093 = vmatpush3.bf16.msra.mxu0 %v13090_v28 }
0x204c   :  { %13095 = vmatprep.subr.bf16.mxu0 %v13094_v35 }
0x204d   :  { %v15344_v52 = vpop.eup %13407 }
0x204e   :  { %v7067_v48 = vsel %vm827_vm8, %v15344_v52, 0.0 }
0x204f   :  { %13097 = vmatpush3.bf16.msra.mxu0 %v13094_v35 }
0x2051   :  { %v15347_v50 = vpop.eup %13409 }
0x2052   :  { %v7232_v45 = vsel %vm827_vm8, %v15347_v50, 0.0 }
0x2054   :  { %7072 = vrot.lane.b32.xlu1 %v15253_v7, %s14121_s21 }
0x2055   :  { %v15353_v49 = vpop.eup %13411 }
0x2056   :  { %v7397_v51 = vsel %vm827_vm8, %v15353_v49, 0.0 }
0x205d   :  { %6907 = vrot.lane.b32.xlu0 %v15253_v7, %s14120_s7 }
0x2077   :  { %v6229_v43 = vpop.xlane.xlu1 %6228 }
0x2078   :  { %13413 = vrcp.f32 %v6229_v43  ;;  %6903 = vadd.xlane.f32.xlu1 %v6902_v44 }
0x207c   :  { %7233 = vadd.xlane.f32.xlu1 %v7232_v45  ;;  %7068 = vadd.xlane.f32.xlu0 %v7067_v48 }
0x2080   :  { %7398 = vadd.xlane.f32.xlu1 %v7397_v51 }
0x2082   :  { %v13414_v32 = vpop.eup %13413 }
0x2083   :  { %v6231_v55 = vmul.f32 %v13414_v32, %v13398_v4 }
0x2085   :  { %12585 = vmatmul.mubr.msk.f32.vlgmr.msra.gmra.mrb[70].mxu1 %vm827_vm8, %v6231_v55 }
0x2086   :  { %12593 = vmatpush3.msra.mxu1 %v6398_v10  ;;  %12594 = vmatprep.mubr.msk.f32.mxu1 %vm14119_vm7, %v14118_v19 }
0x2087   :  { %12602 = vmatprep.subr.mxu1 %v14118_v19 }
0x2091   :  { %7402 = vrot.lane.b32.xlu1 %v15253_v7, %s14126_s11 }
0x2092   :  { %7237 = vrot.lane.b32.xlu0 %v15253_v7, %s14125_s9 }
0x20cc   :  { %v6394_v47 = vpop.xlane.xlu0 %6393 }
0x20cd   :  { %13415 = vrcp.f32 %v6394_v47  ;;  %v11668_v47 = vld [vmem:[#allocation27] ss:$0 sm:$0xff] }
0x20d0   :  { %v6559_v58 = vpop.xlane.xlu1 %6558 }
0x20d1   :  { %13417 = vrcp.f32 %v6559_v58 }
0x20d4   :  { %v6724_v25 = vpop.xlane.xlu0 %6723  ;;  %v7073_v63 = vpop.permute.xlu1 %7072 }
0x20d5   :  { %13419 = vrcp.f32 %v6724_v25 }
0x20d7   :  { %v13416_v33 = vpop.eup %13415 }
0x20d8   :  { %v6396_v54 = vmul.f32 %v13416_v33, %v13400_v17  ;;  %v6908_v62 = vpop.permute.xlu0 %6907 }
0x20da   :  { %12595 = vmatmul.mubr.msk.f32.vlgmr.msra.gmra.mrb[72].mxu1 %vm827_vm8, %v6396_v54 }
0x20db   :  { %v13418_v6 = vpop.eup %13417  ;;  %12603 = vmatpush3.msra.mxu1 %v6563_v26  ;;  %12604 = vmatprep.mubr.msk.f32.mxu1 %vm14119_vm7, %v14118_v19 }
0x20dc   :  { %12612 = vmatprep.subr.mxu1 %v14118_v19  ;;  %v6561_v60 = vmul.f32 %v13418_v6, %v13402_v22 }
0x20de   :  { %12605 = vmatmul.mubr.msk.f32.vlgmr.msra.gmra.mrb[74].mxu1 %vm827_vm8, %v6561_v60 }
0x20df   :  { %v13420_v7 = vpop.eup %13419  ;;  %12613 = vmatpush3.msra.mxu1 %v6728_v41  ;;  %12614 = vmatprep.mubr.msk.f32.mxu1 %vm14119_vm7, %v14118_v19 }
0x20e0   :  { %12622 = vmatprep.subr.mxu1 %v14118_v19  ;;  %v6726_v61 = vmul.f32 %v13420_v7, %v15336_v24 }
0x20e2   :  { %12615 = vmatmul.mubr.msk.f32.vlgmr.msra.gmra.mrb[76].mxu1 %vm827_vm8, %v6726_v61 }
0x20e3   :  { %12623 = vmatpush3.msra.mxu1 %v6908_v62  ;;  %12624 = vmatprep.mubr.msk.f32.mxu1 %vm14119_vm7, %v14118_v19 }
0x20e4   :  { %12632 = vmatprep.subr.mxu1 %v14118_v19 }
0x2105   :  { %v6904_v0 = vpop.xlane.xlu1 %6903 }
0x2106   :  { %13421 = vrcp.f32 %v6904_v0 }
0x2109   :  { %v7234_v53 = vpop.xlane.xlu1 %7233  ;;  %v7069_v21 = vpop.xlane.xlu0 %7068 }
0x210a   :  { %13423 = vrcp.f32 %v7069_v21 }
0x210b   :  { %13425 = vrcp.f32 %v7234_v53 }
0x210d   :  { %v7399_v56 = vpop.xlane.xlu1 %7398  ;;  %v7238_v15 = vpop.permute.xlu0 %7237 }
0x210e   :  { %13427 = vrcp.f32 %v7399_v56 }
0x2110   :  { %v13422_v3 = vpop.eup %13421 }
0x2111   :  { %v6906_v4 = vmul.f32 %v13422_v3, %v13406_v42  ;;  %v7403_v13 = vpop.permute.xlu1 %7402 }
0x2113   :  { %12625 = vmatmul.mubr.msk.f32.vlgmr.msra.gmra.mrb[78].mxu1 %vm827_vm8, %v6906_v4 }
0x2114   :  { %12633 = vmatpush3.msra.mxu1 %v7073_v63  ;;  %12634 = vmatprep.mubr.msk.f32.mxu1 %vm14119_vm7, %v14118_v19  ;;  %v13424_v8 = vpop.eup %13423 }
0x2115   :  { %12642 = vmatprep.subr.mxu1 %v14118_v19  ;;  %v7071_v10 = vmul.f32 %v13424_v8, %v15344_v52  ;;  %v13426_v14 = vpop.eup %13425  ;;  %v4385_v8 = vld [vmem:[%s15925_s3] sm:$0xff] }
0x2116   :  { %v7236_v11 = vmul.f32 %v13426_v14, %v15347_v50  ;;  %v4387_v14 = vld [vmem:[%s15925_s3 + $0x10] sm:$0xff] }
0x2117   :  { %12635 = vmatmul.mubr.msk.f32.vlgmr.msra.gmra.mrb[80].mxu1 %vm827_vm8, %v7071_v10  ;;  %v4386_v10 = vld [vmem:[%s15925_s3 + $0x8] sm:$0xff] }
0x2118   :  { %12643 = vmatpush3.msra.mxu1 %v7238_v15  ;;  %12644 = vmatprep.mubr.msk.f32.mxu1 %vm14119_vm7, %v14118_v19  ;;  %v13428_v12 = vpop.eup %13427  ;;  %v13098_v15 = vpack.c.bf16 %v4386_v10, %v4385_v8  ;;  %v11682_v8 = vld [vmem:[%s15918_s13 + $0x28] sm:$0xff]  ;;  %v11683_v10 = vld [vmem:[%s15918_s13 + $0x30] sm:$0xff] }
0x2119   :  { %12652 = vmatprep.subr.mxu1 %v14118_v19  ;;  %v7401_v5 = vmul.f32 %v13428_v12, %v15353_v49 }
0x211b   :  { %12645 = vmatmul.mubr.msk.f32.vlgmr.msra.gmra.mrb[82].mxu1 %vm827_vm8, %v7236_v11  ;;  %v4388_v11 = vld [vmem:[%s15925_s3 + $0x18] sm:$0xff] }
0x211c   :  { %12653 = vmatpush3.msra.mxu1 %v7403_v13  ;;  %12654 = vmatprep.mubr.msk.f32.mxu1 %vm14119_vm7, %v14118_v19  ;;  %v13102_v12 = vpack.c.bf16 %v4388_v11, %v4387_v14  ;;  %v4390_v13 = vld [vmem:[%s15926_s14] sm:$0xff] }
0x211d   :  { %13099 = vmatprep.subr.bf16.mxu1 %v13098_v15 }
0x211f   :  { %12655 = vmatmul.mubr.msk.f32.vlgmr.msra.gmra.mrb[84].mxu1 %vm827_vm8, %v7401_v5  ;;  %v4391_v5 = vld [vmem:[%s15926_s14 + $0x8] sm:$0xff] }
0x2120   :  { %13101 = vmatpush3.bf16.msra.mxu1 %v13098_v15  ;;  %v11684_v15 = vld [vmem:[%s15918_s13 + $0x38] sm:$0xff] }
0x2121   :  { %13103 = vmatprep.subr.bf16.mxu1 %v13102_v12  ;;  %v13126_v11 = vpack.c.bf16 %v11684_v15, %v11683_v10 }
0x2124   :  { %13105 = vmatpush3.bf16.msra.mxu1 %v13102_v12 }
0x2158   :  { %v6304_v16 = vpop.f32.mrb[70].mxu1 }
0x2159   :  { %v12586_v30 = vpop.f32.mrb[71].mxu1 }
0x215a   :  { %v13106_v30 = vpack.c.bf16 %v4391_v5, %v4390_v13 }
0x215c   :  { %13107 = vmatprep.subr.bf16.mxu0 %v13106_v30 }
0x21ad   :  { %v6469_v9 = vpop.f32.mrb[72].mxu1 }
0x21ae   :  { %6804 = vrot.lane.b32.xlu0 %v6469_v9, %s14092_s1  ;;  %v12596_v17 = vpop.f32.mrb[73].mxu1  ;;  %v4393_v9 = vld [vmem:[%s15926_s14 + $0x18] sm:$0xff] }
0x21b1   :  { %v6634_v57 = vpop.f32.mrb[74].mxu1 }
0x21b2   :  { %6808 = vrot.lane.b32.xlu1 %v6634_v57, %s14095_s18  ;;  %v12606_v22 = vpop.f32.mrb[75].mxu1  ;;  %v4394_v57 = vld [vmem:[%s15926_s14 + $0x20] sm:$0xff] }
0x21b3   :  { %v4395_v22 = vld [vmem:[%s15926_s14 + $0x28] sm:$0xff] }
0x21b5   :  { %v6799_v59 = vpop.f32.mrb[76].mxu1 }
0x21b6   :  { %6812 = vrot.lane.b32.xlu1 %v6799_v59, %s14131_s16  ;;  %v12616_v24 = vpop.f32.mrb[77].mxu1  ;;  %v13114_v59 = vpack.c.bf16 %v4395_v22, %v4394_v57  ;;  %v11679_v57 = vld [vmem:[#allocation34] ss:$0 sm:$0xff] }
0x21e6   :  { %v6979_v36 = vpop.f32.mrb[78].mxu1 }
0x21e7   :  { %v12626_v37 = vpop.f32.mrb[79].mxu1 }
0x21ea   :  { %v7144_v31 = vpop.f32.mrb[80].mxu1 }
0x21eb   :  { %7479 = vrot.lane.b32.xlu0 %v7144_v31, %s14092_s1  ;;  %v12636_v38 = vpop.f32.mrb[81].mxu1  ;;  %v11672_v31 = vld [vmem:[#allocation30] ss:$0 sm:$0xff] }
0x21ee   :  { %v7309_v23 = vpop.f32.mrb[82].mxu1 }
0x21ef   :  { %7483 = vrot.lane.b32.xlu0 %v7309_v23, %s14095_s18  ;;  %v12646_v39 = vpop.f32.mrb[83].mxu1 }
0x21f2   :  { %v7474_v40 = vpop.f32.mrb[84].mxu1 }
0x21f3   :  { %7487 = vrot.lane.b32.xlu1 %v7474_v40, %s14131_s16  ;;  %v12656_v41 = vpop.f32.mrb[85].mxu1 }
0x2220   :  { %v6805_v42 = vpop.permute.xlu0 %6804 }
0x2221   :  { %v6815_v43 = vsel %vm827_vm8, %v6304_v16, %v6805_v42  ;;  %v4392_v16 = vld [vmem:[%s15926_s14 + $0x10] sm:$0xff] }
0x2222   :  { %v13110_v17 = vpack.c.bf16 %v4393_v9, %v4392_v16 }
0x2224   :  { %v6809_v52 = vpop.permute.xlu1 %6808 }
0x2225   :  { %v6816_v44 = vsel %vm1497_vm9, %v6815_v43, %v6809_v52  ;;  %v4396_v52 = vld [vmem:[%s15926_s14 + $0x30] sm:$0xff]  ;;  %v4397_v43 = vld [vmem:[%s15926_s14 + $0x38] sm:$0xff] }
0x2228   :  { %v6813_v50 = vpop.permute.xlu1 %6812 }
0x2229   :  { %v6817_v45 = vsel %vm1499_vm10, %v6816_v44, %v6813_v50  ;;  %v13118_v44 = vpack.c.bf16 %v4397_v43, %v4396_v52  ;;  %v11673_v50 = vld [vmem:[#allocation31] ss:$0 sm:$0xff] }
0x222a   :  { %12665 = vmatprep.mubr.msk.f32.mxu0 %vm741_vm4, %v6817_v45 }
0x225d   :  { %v7480_v48 = vpop.permute.xlu0 %7479 }
0x225e   :  { %v7490_v51 = vsel %vm827_vm8, %v6979_v36, %v7480_v48  ;;  %v11671_v36 = vld [vmem:[#allocation28] ss:$0 sm:$0xff] }
0x2261   :  { %v7484_v49 = vpop.permute.xlu0 %7483 }
0x2262   :  { %v7491_v32 = vsel %vm1497_vm9, %v7490_v51, %v7484_v49 }
0x2265   :  { %v7488_v55 = vpop.permute.xlu1 %7487 }
0x2266   :  { %v7492_v26 = vsel %vm1499_vm10, %v7491_v32, %v7488_v55 }
0x2267   :  { %12666 = vmatmul.mubr.msk.f32.vlgmr.msra.gmra.mrb[70].mxu0 %vm741_vm4, %v7492_v26  ;;  %v11676_v26 = vld [vmem:[#allocation33] ss:$0 sm:$0xff] }
0x2268   :  { %13109 = vmatpush3.bf16.msra.mxu0 %v13106_v30 }
0x2269   :  { %13111 = vmatprep.subr.bf16.mxu0 %v13110_v17 }
0x226c   :  { %13113 = vmatpush3.bf16.msra.mxu0 %v13110_v17 }
0x226d   :  { %13115 = vmatprep.subr.bf16.mxu0 %v13114_v59 }
0x2270   :  { %13117 = vmatpush3.bf16.msra.mxu0 %v13114_v59 }
0x2271   :  { %13119 = vmatprep.subr.bf16.mxu0 %v13118_v44 }
0x2274   :  { %13121 = vmatpush3.bf16.msra.mxu0 %v13118_v44 }
0x2275   :  { %12719 = vmatprep.subr.mxu0 %v14118_v19 }
0x233a   :  { %v12667_v58 = vpop.f32.mrb[70].mxu0 }
0x233b   :  { %v7577_v25 = vadd.f32 %v12667_v58, %v11668_v47  ;;  %v7571_v33 = vpop.f32.mrb[71].mxu0 }
0x233c   :  { %v7572_v54 = vadd.f32 %v11668_v47, %v7571_v33 }
0x233d   :  { %v7581_v6 = vadd.f32 %v7577_v25, %v15247_v2 }
0x233e   :  { %v7580_v60 = vadd.f32 %v7572_v54, %v15243_v1 }
0x233f   :  { %v7585_v7 = vsel %vm741_vm4, %v7581_v6, 0.0 }
0x2340   :  { %7586 = vadd.xlane.f32.xlu1 %v7585_v7  ;;  %v7582_v61 = vsel %vm741_vm4, %v7580_v60, 0.0 }
0x2341   :  { %7583 = vadd.xlane.f32.xlu0 %v7582_v61 }
0x23cd   :  { %v7587_v62 = vpop.xlane.xlu1 %7586 }
0x23ce   :  { %v7589_v63 = vmul.f32 0.03125, %v7587_v62  ;;  %v7584_v0 = vpop.xlane.xlu0 %7583 }
0x23cf   :  { %v7588_v53 = vmul.f32 0.03125, %v7584_v0 }
0x23d0   :  { %v7591_v21 = vsub.f32 %v7581_v6, %v7589_v63 }
0x23d1   :  { %v7590_v56 = vsub.f32 %v7580_v60, %v7588_v53 }
0x23d2   :  { %v7593_v2 = vmul.f32 %v7591_v21, %v7591_v21 }
0x23d3   :  { %v7592_v3 = vmul.f32 %v7590_v56, %v7590_v56 }
0x23d4   :  { %v7597_v4 = vsel %vm741_vm4, %v7593_v2, 0.0 }
0x23d5   :  { %v7594_v1 = vsel %vm741_vm4, %v7592_v3, 0.0 }
0x23d6   :  { %7595 = vadd.xlane.f32.xlu0 %v7594_v1 }
0x23da   :  { %7598 = vadd.xlane.f32.xlu0 %v7597_v4  ;;  %v11681_v4 = vld [vmem:[%s15918_s13 + $0x20] sm:$0xff] }
0x23db   :  { %v13122_v14 = vpack.c.bf16 %v11682_v8, %v11681_v4 }
0x23dd   :  { %13123 = vmatprep.subr.bf16.mxu1 %v13122_v14 }
0x2463   :  { %v7596_v24 = vpop.xlane.xlu0 %7595 }
0x2464   :  { %v7600_v27 = vmul.f32 0.03125, %v7596_v24 }
0x2466   :  { %v7602_v20 = vadd.f32 1e-05, %v7600_v27  ;;  %v11680_v27 = vld [vmem:[#allocation36] ss:$0 sm:$0xff] }
0x2467   :  { %v7599_v28 = vpop.xlane.xlu0 %7598 }
0x2468   :  { %13429 = vrsqrt.f32 %v7602_v20  ;;  %v7601_v29 = vmul.f32 0.03125, %v7599_v28 }
0x246a   :  { %v7603_v34 = vadd.f32 1e-05, %v7601_v29 }
0x246c   :  { %13431 = vrsqrt.f32 %v7603_v34 }
0x2472   :  { %v13430_v35 = vpop.eup %13429 }
0x2473   :  { %v7606_v37 = vmul.f32 %v13430_v35, %v7590_v56  ;;  %v11713_v35 = vld [vmem:[#allocation18 + $0x1] ss:$0 sm:$0xff] }
0x2475   :  { %v7614_v38 = vmul.f32 %v11671_v36, %v7606_v37 }
0x2476   :  { %v13432_v23 = vpop.eup %13431 }
0x2477   :  { %v7607_v39 = vmul.f32 %v13432_v23, %v7591_v21  ;;  %v7622_v40 = vadd.f32 %v11672_v31, %v7614_v38 }
0x2479   :  { %v7615_v41 = vmul.f32 %v11671_v36, %v7607_v39  ;;  %12676 = vmatprep.mubr.msk.f32.mxu1 %vm741_vm4, %v7622_v40 }
0x247b   :  { %v7623_v42 = vadd.f32 %v11672_v31, %v7615_v41 }
0x247d   :  { %12677 = vmatmul.mubr.msk.f32.vlgmr.msra.gmra.mrb[86].mxu1 %vm741_vm4, %v7623_v42 }
0x247e   :  { %13125 = vmatpush3.bf16.msra.mxu1 %v13122_v14 }
0x247f   :  { %13127 = vmatprep.subr.bf16.mxu1 %v13126_v11 }
0x2482   :  { %13129 = vmatpush3.bf16.msra.mxu1 %v13126_v11 }
0x2483   :  { %12709 = vmatprep.subr.mxu1 %v14118_v19 }
0x2550   :  { %v12678_v45 = vpop.f32.mrb[86].mxu1 }
0x2551   :  { %v7708_v48 = vadd.f32 %v12678_v45, %v11673_v50  ;;  %v7702_v49 = vpop.f32.mrb[87].mxu1 }
0x2552   :  { %v7703_v51 = vadd.f32 %v11673_v50, %v7702_v49 }
0x2553   :  { %v7712_v55 = vmax.f32 %v7708_v48, 0.0 }
0x2554   :  { %v7711_v32 = vmax.f32 %v7703_v51, 0.0 }
0x2556   :  { %12695 = vmatprep.mubr.msk.f32.mxu0 %vm2404_vm11, %v7711_v32 }
0x2557   :  { %12696 = vmatmul.mubr.msk.f32.vlgmr.msra.gmra.mrb[72].mxu0 %vm2404_vm11, %v7712_v55 }
0x2558   :  { %12721 = vmatprep.mubr.msk.f32.mxu0 %vm14119_vm7, %v14118_v19 }
0x262a   :  { %v12697_v47 = vpop.f32.mrb[72].mxu0 }
0x262b   :  { %v7797_v58 = vadd.f32 %v12697_v47, %v11676_v26  ;;  %v7791_v25 = vpop.f32.mrb[73].mxu0  ;;  %v13513_v47 = vld [vmem:[%s15919_s19] sm:$0xff] }
0x262c   :  { %v7792_v33 = vadd.f32 %v11676_v26, %v7791_v25 }
0x262d   :  { %v7801_v54 = vadd.f32 %v7797_v58, %v7623_v42 }
0x262e   :  { %v7800_v6 = vadd.f32 %v7792_v33, %v7622_v40 }
0x262f   :  { %v7805_v60 = vsel %vm741_vm4, %v7801_v54, 0.0 }
0x2630   :  { %7806 = vadd.xlane.f32.xlu0 %v7805_v60  ;;  %v7802_v7 = vsel %vm741_vm4, %v7800_v6, 0.0 }
0x2631   :  { %7803 = vadd.xlane.f32.xlu1 %v7802_v7 }
0x26bd   :  { %v7807_v61 = vpop.xlane.xlu0 %7806 }
0x26be   :  { %v7809_v62 = vmul.f32 0.03125, %v7807_v61  ;;  %v7804_v63 = vpop.xlane.xlu1 %7803 }
0x26bf   :  { %v7808_v0 = vmul.f32 0.03125, %v7804_v63 }
0x26c0   :  { %v7811_v53 = vsub.f32 %v7801_v54, %v7809_v62 }
0x26c1   :  { %v7810_v21 = vsub.f32 %v7800_v6, %v7808_v0 }
0x26c2   :  { %v7813_v56 = vmul.f32 %v7811_v53, %v7811_v53 }
0x26c3   :  { %v7812_v3 = vmul.f32 %v7810_v21, %v7810_v21 }
0x26c4   :  { %v7817_v1 = vsel %vm741_vm4, %v7813_v56, 0.0 }
0x26c5   :  { %7818 = vadd.xlane.f32.xlu0 %v7817_v1  ;;  %v7814_v2 = vsel %vm741_vm4, %v7812_v3, 0.0 }
0x26c6   :  { %7815 = vadd.xlane.f32.xlu1 %v7814_v2  ;;  %v13514_v2 = vld [vmem:[%s15919_s19 + $0x8] sm:$0xff] }
0x2752   :  { %v7819_v12 = vpop.xlane.xlu0 %7818 }
0x2753   :  { %v7821_v13 = vmul.f32 0.03125, %v7819_v12  ;;  %v7816_v5 = vpop.xlane.xlu1 %7815 }
0x2754   :  { %v7820_v16 = vmul.f32 0.03125, %v7816_v5 }
0x2755   :  { %v7823_v30 = vadd.f32 1e-05, %v7821_v13 }
0x2756   :  { %v7822_v9 = vadd.f32 1e-05, %v7820_v16 }
0x2757   :  { %13433 = vrsqrt.f32 %v7823_v30 }
0x2758   :  { %13435 = vrsqrt.f32 %v7822_v9 }
0x2761   :  { %v13434_v17 = vpop.eup %13433 }
0x2762   :  { %v13436_v22 = vpop.eup %13435  ;;  %v7827_v59 = vmul.f32 %v13434_v17, %v7811_v53 }
0x2763   :  { %v7826_v24 = vmul.f32 %v13436_v22, %v7810_v21 }
0x2764   :  { %v7835_v20 = vmul.f32 %v11679_v57, %v7827_v59 }
0x2765   :  { %v7834_v28 = vmul.f32 %v11679_v57, %v7826_v24 }
0x2766   :  { %v15447_v34 = vadd.f32 %v11680_v27, %v7835_v20 }
0x2767   :  { %v15445_v29 = vadd.f32 %v11680_v27, %v7834_v28 }
0x2769   :  { %12706 = vmatprep.mubr.msk.f32.mxu1 %vm741_vm4, %v15445_v29 }
0x276a   :  { %12707 = vmatmul.mubr.msk.f32.vlgmr.msra.gmra.mrb[88].mxu1 %vm741_vm4, %v15447_v34 }
0x276b   :  { %12711 = vmatprep.mubr.msk.f32.mxu1 %vm14119_vm7, %v14118_v19 }
0x283d   :  { %v12708_v36 = vpop.f32.mrb[88].mxu1 }
0x283e   :  { %v7987_v37 = vpop.f32.mrb[89].mxu1  ;;  %v15469_v38 = vadd.f32 %v12708_v36, %v11713_v35 }
0x283f   :  { %v15455_v31 = vadd.f32 %v11713_v35, %v7987_v37 }
0x2841   :  { %8162 = vrot.lane.b32.xlu0 %v15455_v31, %s14121_s21  ;;  %7997 = vrot.lane.b32.xlu1 %v15455_v31, %s14120_s7 }
0x2845   :  { %8325 = vrot.lane.b32.xlu0 %v15455_v31, %s14123_s10  ;;  %8160 = vrot.lane.b32.xlu1 %v15455_v31, %s14122_s28 }
0x2849   :  { %8490 = vrot.lane.b32.xlu0 %v15455_v31, %s14124_s27  ;;  %8327 = vrot.lane.b32.xlu1 %v15455_v31, %s14125_s9 }
0x284d   :  { %8836 = vrot.lane.b32.xlu0 %v15469_v38, %s14121_s21  ;;  %8492 = vrot.lane.b32.xlu1 %v15455_v31, %s14126_s11 }
0x2851   :  { %9001 = vrot.lane.b32.xlu0 %v15469_v38, %s14125_s9  ;;  %8671 = vrot.lane.b32.xlu1 %v15469_v38, %s14120_s7 }
0x2855   :  { %9166 = vrot.lane.b32.xlu0 %v15469_v38, %s14126_s11  ;;  %8834 = vrot.lane.b32.xlu1 %v15469_v38, %s14122_s28 }
0x2859   :  { %8084 = vrot.lane.b32.xlu0 %v15455_v31, %s14127_s30  ;;  %8999 = vrot.lane.b32.xlu1 %v15469_v38, %s14123_s10 }
0x285d   :  { %9164 = vrot.lane.b32.xlu1 %v15469_v38, %s14124_s27 }
0x2861   :  { %8249 = vrot.lane.b32.xlu1 %v15455_v31, %s14129_s8 }
0x28b3   :  { %v8163_v23 = vpop.permute.xlu0 %8162  ;;  %v7998_v39 = vpop.permute.xlu1 %7997 }
0x28b4   :  { %12710 = vmatpush3.xpose.msk.msra.mxu1 %vm827_vm8, %v7998_v39  ;;  %12720 = vmatpush3.xpose.msk.msra.mxu0 %vm827_vm8, %v8163_v23 }
0x28b5   :  { %12729 = vmatprep.subr.mxu0 %v14118_v19  ;;  %12714 = vmatprep.subr.mxu1 %v14118_v19 }
0x28b7   :  { %v8326_v40 = vpop.permute.xlu0 %8325  ;;  %12712 = vmatmul.mubr.msk.f32.vlgmr.msra.gmra.mrb[90].mxu1 %vm827_vm8, %v15455_v31  ;;  %v8161_v41 = vpop.permute.xlu1 %8160 }
0x28b8   :  { %12722 = vmatmul.mubr.msk.f32.vlgmr.msra.gmra.mrb[74].mxu0 %vm827_vm8, %v8161_v41  ;;  %12716 = vmatprep.mubr.msk.f32.mxu1 %vm14119_vm7, %v14118_v19 }
0x28b9   :  { %12731 = vmatprep.mubr.msk.f32.mxu0 %vm14119_vm7, %v14118_v19 }
0x28bb   :  { %v8491_v42 = vpop.permute.xlu0 %8490  ;;  %v8328_v52 = vpop.permute.xlu1 %8327 }
0x28bc   :  { %12730 = vmatpush3.xpose.msk.msra.mxu0 %vm827_vm8, %v8328_v52 }
0x28bd   :  { %12739 = vmatprep.subr.mxu0 %v14118_v19 }
0x28bf   :  { %v8837_v43 = vpop.permute.xlu0 %8836  ;;  %12732 = vmatmul.mubr.msk.f32.vlgmr.msra.gmra.mrb[76].mxu0 %vm827_vm8, %v8326_v40  ;;  %v8493_v44 = vpop.permute.xlu1 %8492 }
0x28c0   :  { %12740 = vmatpush3.xpose.msk.msra.mxu0 %vm827_vm8, %v8493_v44  ;;  %12741 = vmatprep.mubr.msk.f32.mxu0 %vm14119_vm7, %v14118_v19 }
0x28c1   :  { %12749 = vmatprep.subr.mxu0 %v14118_v19 }
0x28c3   :  { %v9002_v50 = vpop.permute.xlu0 %9001  ;;  %12742 = vmatmul.mubr.msk.f32.vlgmr.msra.gmra.mrb[78].mxu0 %vm827_vm8, %v8491_v42  ;;  %v8672_v45 = vpop.permute.xlu1 %8671 }
0x28c4   :  { %12750 = vmatpush3.xpose.msk.msra.mxu0 %vm827_vm8, %v8672_v45  ;;  %12751 = vmatprep.mubr.msk.f32.mxu0 %vm14119_vm7, %v14118_v19 }
0x28c5   :  { %12759 = vmatprep.subr.mxu0 %v14118_v19 }
0x28c7   :  { %v9167_v48 = vpop.permute.xlu0 %9166  ;;  %12752 = vmatmul.mubr.msk.f32.vlgmr.msra.gmra.mrb[80].mxu0 %vm827_vm8, %v15469_v38  ;;  %v8835_v49 = vpop.permute.xlu1 %8834 }
0x28c8   :  { %12760 = vmatpush3.xpose.msk.msra.mxu0 %vm827_vm8, %v8837_v43  ;;  %12761 = vmatprep.mubr.msk.f32.mxu0 %vm14119_vm7, %v14118_v19 }
0x28c9   :  { %12769 = vmatprep.subr.mxu0 %v14118_v19 }
0x28cb   :  { %v8085_v51 = vpop.permute.xlu0 %8084  ;;  %12762 = vmatmul.mubr.msk.f32.vlgmr.msra.gmra.mrb[82].mxu0 %vm827_vm8, %v8835_v49  ;;  %v9000_v32 = vpop.permute.xlu1 %8999 }
0x28cc   :  { %12715 = vmatpush3.msra.mxu1 %v8085_v51  ;;  %12770 = vmatpush3.xpose.msk.msra.mxu0 %vm827_vm8, %v9002_v50 }
0x28cd   :  { %12771 = vmatprep.mubr.msk.f32.mxu0 %vm14119_vm7, %v14118_v19  ;;  %12779 = vmatprep.subr.mxu0 %v14118_v19 }
0x28ce   :  { %12724 = vmatprep.subr.mxu1 %v14118_v19 }
0x28cf   :  { %12772 = vmatmul.mubr.msk.f32.vlgmr.msra.gmra.mrb[84].mxu0 %vm827_vm8, %v9000_v32  ;;  %v9165_v55 = vpop.permute.xlu1 %9164 }
0x28d0   :  { %12780 = vmatpush3.xpose.msk.msra.mxu0 %vm827_vm8, %v9167_v48  ;;  %12781 = vmatprep.mubr.msk.f32.mxu0 %vm14119_vm7, %v14118_v19 }
0x28d3   :  { %12782 = vmatmul.mubr.msk.f32.vlgmr.msra.gmra.mrb[86].mxu0 %vm827_vm8, %v9165_v55  ;;  %v15545_v59 = vpop.permute.xlu1 %8249 }
0x298a   :  { %v8069_v26 = vpop.f32.mrb[90].mxu1 }
0x298b   :  { %v8070_v58 = vadd.f32 %v13513_v47, %v8069_v26  ;;  %v12713_v25 = vpop.f32.mrb[91].mxu1  ;;  %v8234_v33 = vpop.f32.mrb[74].mxu0 }
0x298c   :  { %v8235_v54 = vadd.f32 %v13513_v47, %v8234_v33  ;;  %v12723_v6 = vpop.f32.mrb[75].mxu0 }
0x298d   :  { %v8073_v60 = vsel %vm827_vm8, %v8070_v58, -inf }
0x298e   :  { %8074 = vmax.xlane.f32.xlu0 %v8073_v60  ;;  %v8238_v7 = vsel %vm827_vm8, %v8235_v54, -inf }
0x298f   :  { %8239 = vmax.xlane.f32.xlu1 %v8238_v7 }
0x2992   :  { %v8399_v61 = vpop.f32.mrb[76].mxu0 }
0x2993   :  { %v8400_v62 = vadd.f32 %v13513_v47, %v8399_v61  ;;  %v12733_v63 = vpop.f32.mrb[77].mxu0 }
0x2995   :  { %v8403_v0 = vsel %vm827_vm8, %v8400_v62, -inf }
0x2996   :  { %8404 = vmax.xlane.f32.xlu0 %v8403_v0  ;;  %v8564_v53 = vpop.f32.mrb[78].mxu0 }
0x2997   :  { %v8565_v21 = vadd.f32 %v13513_v47, %v8564_v53  ;;  %v12743_v56 = vpop.f32.mrb[79].mxu0 }
0x2999   :  { %v8568_v3 = vsel %vm827_vm8, %v8565_v21, -inf }
0x299a   :  { %8569 = vmax.xlane.f32.xlu0 %v8568_v3  ;;  %v8743_v1 = vpop.f32.mrb[80].mxu0 }
0x299b   :  { %v8744_v4 = vadd.f32 %v13514_v2, %v8743_v1  ;;  %v12753_v8 = vpop.f32.mrb[81].mxu0 }
0x299d   :  { %v8747_v10 = vsel %vm827_vm8, %v8744_v4, -inf }
0x299e   :  { %8748 = vmax.xlane.f32.xlu1 %v8747_v10  ;;  %v8908_v14 = vpop.f32.mrb[82].mxu0 }
0x299f   :  { %v8909_v15 = vadd.f32 %v13514_v2, %v8908_v14  ;;  %v12763_v11 = vpop.f32.mrb[83].mxu0 }
0x29a1   :  { %v8912_v12 = vsel %vm827_vm8, %v8909_v15, -inf }
0x29a2   :  { %8913 = vmax.xlane.f32.xlu0 %v8912_v12  ;;  %v9073_v13 = vpop.f32.mrb[84].mxu0 }
0x29a3   :  { %v9074_v5 = vadd.f32 %v13514_v2, %v9073_v13  ;;  %v12773_v16 = vpop.f32.mrb[85].mxu0 }
0x29a5   :  { %v9077_v30 = vsel %vm827_vm8, %v9074_v5, -inf }
0x29a6   :  { %9078 = vmax.xlane.f32.xlu1 %v9077_v30  ;;  %v9238_v9 = vpop.f32.mrb[86].mxu0 }
0x29a7   :  { %v9239_v17 = vadd.f32 %v13514_v2, %v9238_v9  ;;  %v12783_v57 = vpop.f32.mrb[87].mxu0 }
0x29a9   :  { %v9242_v22 = vsel %vm827_vm8, %v9239_v17, -inf }
0x29aa   :  { %9243 = vmax.xlane.f32.xlu0 %v9242_v22 }
0x29b7   :  { %8579 = vrot.lane.b32.xlu1 %v15455_v31, %s14130_s20 }
0x29c0   :  { %8414 = vrot.lane.b32.xlu0 %v15455_v31, %s14128_s5 }
0x2a1b   :  { %v8075_v24 = vpop.xlane.xlu0 %8074 }
0x2a1c   :  { %v8076_v27 = vsub.f32 %v8070_v58, %v8075_v24  ;;  %v8240_v20 = vpop.xlane.xlu1 %8239 }
0x2a1d   :  { %v8241_v28 = vsub.f32 %v8235_v54, %v8240_v20 }
0x2a1e   :  { %v8077_v35 = vmul.f32 1.442695, %v8076_v27 }
0x2a1f   :  { %v8242_v36 = vmul.f32 1.442695, %v8241_v28 }
0x2a20   :  { %13437 = vpow2.f32 %v8077_v35 }
0x2a21   :  { %13439 = vpow2.f32 %v8242_v36 }
0x2a23   :  { %v8405_v37 = vpop.xlane.xlu0 %8404 }
0x2a24   :  { %v8406_v23 = vsub.f32 %v8400_v62, %v8405_v37 }
0x2a26   :  { %v8407_v39 = vmul.f32 1.442695, %v8406_v23 }
0x2a27   :  { %v8570_v40 = vpop.xlane.xlu0 %8569 }
0x2a28   :  { %13441 = vpow2.f32 %v8407_v39  ;;  %v8571_v41 = vsub.f32 %v8565_v21, %v8570_v40 }
0x2a2a   :  { %v13438_v42 = vpop.eup %13437  ;;  %v8572_v52 = vmul.f32 1.442695, %v8571_v41 }
0x2a2b   :  { %v13440_v43 = vpop.eup %13439  ;;  %v8079_v31 = vsel %vm827_vm8, %v13438_v42, 0.0  ;;  %v8749_v51 = vpop.xlane.xlu1 %8748 }
0x2a2c   :  { %13443 = vpow2.f32 %v8572_v52  ;;  %8080 = vadd.xlane.f32.xlu1 %v8079_v31  ;;  %v8244_v44 = vsel %vm827_vm8, %v13440_v43, 0.0  ;;  %v8750_v32 = vsub.f32 %v8744_v4, %v8749_v51  ;;  %v11686_v51 = vld [vmem:[%s15920_s12 + $0x28] sm:$0xff] }
0x2a2d   :  { %8245 = vadd.xlane.f32.xlu0 %v8244_v44 }
0x2a2e   :  { %v8751_v58 = vmul.f32 1.442695, %v8750_v32 }
0x2a2f   :  { %v8914_v55 = vpop.xlane.xlu0 %8913 }
0x2a30   :  { %v8915_v47 = vsub.f32 %v8909_v15, %v8914_v55  ;;  %13445 = vpow2.f32 %v8751_v58  ;;  %v11687_v55 = vld [vmem:[%s15920_s12 + $0x30] sm:$0xff]  ;;  %v11693_v58 = vld [vmem:[%s15921_s24 + $0x20] sm:$0xff] }
0x2a32   :  { %v13442_v50 = vpop.eup %13441  ;;  %v8916_v54 = vmul.f32 1.442695, %v8915_v47 }
0x2a33   :  { %v8409_v45 = vsel %vm827_vm8, %v13442_v50, 0.0  ;;  %v9079_v26 = vpop.xlane.xlu1 %9078 }
0x2a34   :  { %8410 = vadd.xlane.f32.xlu1 %v8409_v45  ;;  %v9080_v25 = vsub.f32 %v9074_v5, %v9079_v26  ;;  %13447 = vpow2.f32 %v8916_v54  ;;  %v11688_v26 = vld [vmem:[%s15920_s12 + $0x38] sm:$0xff] }
0x2a35   :  { %v13134_v47 = vpack.c.bf16 %v11688_v26, %v11687_v55 }
0x2a36   :  { %v15550_v48 = vpop.eup %13443  ;;  %v9081_v6 = vmul.f32 1.442695, %v9080_v25  ;;  %v11694_v25 = vld [vmem:[%s15921_s24 + $0x28] sm:$0xff] }
0x2a37   :  { %v8574_v49 = vsel %vm827_vm8, %v15550_v48, 0.0  ;;  %v9244_v33 = vpop.xlane.xlu0 %9243  ;;  %v8580_v1 = vpop.permute.xlu1 %8579 }
0x2a38   :  { %8575 = vadd.xlane.f32.xlu0 %v8574_v49  ;;  %v9245_v60 = vsub.f32 %v9239_v17, %v9244_v33  ;;  %13449 = vpow2.f32 %v9081_v6  ;;  %v11685_v49 = vld [vmem:[%s15920_s12 + $0x20] sm:$0xff]  ;;  %v13146_v33 = vpack.c.bf16 %v11694_v25, %v11693_v58  ;;  %v11743_v25 = vld [vmem:[#allocation21 + $0x1] ss:$0 sm:$0xff] }
0x2a39   :  { %v13130_v32 = vpack.c.bf16 %v11686_v51, %v11685_v49 }
0x2a3a   :  { %v9246_v7 = vmul.f32 1.442695, %v9245_v60  ;;  %v13446_v61 = vpop.eup %13445 }
0x2a3b   :  { %v8753_v63 = vsel %vm827_vm8, %v13446_v61, 0.0  ;;  %v8415_v2 = vpop.permute.xlu0 %8414  ;;  %13131 = vmatprep.subr.bf16.mxu0 %v13130_v32 }
0x2a3c   :  { %13451 = vpow2.f32 %v9246_v7  ;;  %13133 = vmatpush3.bf16.msra.mxu0 %v13130_v32 }
0x2a3d   :  { %13135 = vmatprep.subr.bf16.mxu0 %v13134_v47 }
0x2a3e   :  { %v15558_v62 = vpop.eup %13447 }
0x2a3f   :  { %v8918_v53 = vsel %vm827_vm8, %v15558_v62, 0.0 }
0x2a40   :  { %13137 = vmatpush3.bf16.msra.mxu0 %v13134_v47 }
0x2a41   :  { %13147 = vmatprep.subr.bf16.mxu0 %v13146_v33 }
0x2a42   :  { %v15561_v0 = vpop.eup %13449 }
0x2a43   :  { %v9083_v21 = vsel %vm827_vm8, %v15561_v0, 0.0 }
0x2a45   :  { %8923 = vrot.lane.b32.xlu1 %v15469_v38, %s14129_s8 }
0x2a46   :  { %v15567_v56 = vpop.eup %13451 }
0x2a47   :  { %v9248_v3 = vsel %vm827_vm8, %v15567_v56, 0.0 }
0x2a4e   :  { %8758 = vrot.lane.b32.xlu0 %v15469_v38, %s14127_s30 }
0x2a69   :  { %8754 = vadd.xlane.f32.xlu1 %v8753_v63 }
0x2a6d   :  { %8919 = vadd.xlane.f32.xlu0 %v8918_v53  ;;  %9084 = vadd.xlane.f32.xlu1 %v9083_v21 }
0x2a71   :  { %9249 = vadd.xlane.f32.xlu1 %v9248_v3 }
0x2a82   :  { %9253 = vrot.lane.b32.xlu1 %v15469_v38, %s14130_s20 }
0x2a83   :  { %9088 = vrot.lane.b32.xlu0 %v15469_v38, %s14128_s5 }
0x2ab9   :  { %v8081_v4 = vpop.xlane.xlu1 %8080 }
0x2aba   :  { %13453 = vrcp.f32 %v8081_v4  ;;  %v8246_v8 = vpop.xlane.xlu0 %8245 }
0x2abb   :  { %13455 = vrcp.f32 %v8246_v8 }
0x2ac1   :  { %v8411_v10 = vpop.xlane.xlu1 %8410 }
0x2ac2   :  { %13457 = vrcp.f32 %v8411_v10  ;;  %v11695_v10 = vld [vmem:[%s15921_s24 + $0x30] sm:$0xff] }
0x2ac4   :  { %v13454_v14 = vpop.eup %13453 }
0x2ac5   :  { %v8083_v15 = vmul.f32 %v13454_v14, %v13438_v42  ;;  %v8576_v11 = vpop.xlane.xlu0 %8575  ;;  %v13456_v12 = vpop.eup %13455  ;;  %v11696_v14 = vld [vmem:[%s15921_s24 + $0x38] sm:$0xff] }
0x2ac6   :  { %13459 = vrcp.f32 %v8576_v11  ;;  %v8248_v38 = vmul.f32 %v13456_v12, %v13440_v43  ;;  %v8924_v17 = vpop.permute.xlu1 %8923 }
0x2ac7   :  { %12717 = vmatmul.mubr.msk.f32.vlgmr.msra.gmra.mrb[92].mxu1 %vm827_vm8, %v8083_v15 }
0x2ac8   :  { %12725 = vmatpush3.msra.mxu1 %v15545_v59  ;;  %12726 = vmatprep.mubr.msk.f32.mxu1 %vm14119_vm7, %v14118_v19 }
0x2ac9   :  { %12734 = vmatprep.subr.mxu1 %v14118_v19  ;;  %v8759_v9 = vpop.permute.xlu0 %8758 }
0x2acb   :  { %12727 = vmatmul.mubr.msk.f32.vlgmr.msra.gmra.mrb[94].mxu1 %vm827_vm8, %v8248_v38  ;;  %v13150_v38 = vpack.c.bf16 %v11696_v14, %v11695_v10 }
0x2acc   :  { %v13458_v13 = vpop.eup %13457  ;;  %12735 = vmatpush3.msra.mxu1 %v8415_v2  ;;  %12736 = vmatprep.mubr.msk.f32.mxu1 %vm14119_vm7, %v14118_v19 }
0x2acd   :  { %v8413_v5 = vmul.f32 %v13458_v13, %v13442_v50  ;;  %12744 = vmatprep.subr.mxu1 %v14118_v19 }
0x2acf   :  { %12737 = vmatmul.mubr.msk.f32.vlgmr.msra.gmra.mrb[96].mxu1 %vm827_vm8, %v8413_v5  ;;  %v11740_v5 = vld [vmem:[#allocation19 + $0x1] ss:$0 sm:$0xff] }
0x2ad0   :  { %v13460_v16 = vpop.eup %13459  ;;  %12745 = vmatpush3.msra.mxu1 %v8580_v1  ;;  %12746 = vmatprep.mubr.msk.f32.mxu1 %vm14119_vm7, %v14118_v19 }
0x2ad1   :  { %v8578_v30 = vmul.f32 %v13460_v16, %v15550_v48  ;;  %12754 = vmatprep.subr.mxu1 %v14118_v19 }
0x2ad3   :  { %12747 = vmatmul.mubr.msk.f32.vlgmr.msra.gmra.mrb[98].mxu1 %vm827_vm8, %v8578_v30 }
0x2ad4   :  { %12755 = vmatpush3.msra.mxu1 %v8759_v9  ;;  %12756 = vmatprep.mubr.msk.f32.mxu1 %vm14119_vm7, %v14118_v19 }
0x2ad5   :  { %12764 = vmatprep.subr.mxu1 %v14118_v19 }
0x2af6   :  { %v8755_v57 = vpop.xlane.xlu1 %8754 }
0x2af7   :  { %13461 = vrcp.f32 %v8755_v57 }
0x2afa   :  { %v8920_v22 = vpop.xlane.xlu0 %8919  ;;  %v9085_v59 = vpop.xlane.xlu1 %9084 }
0x2afb   :  { %13463 = vrcp.f32 %v8920_v22 }
0x2afc   :  { %13465 = vrcp.f32 %v9085_v59  ;;  %v11748_v59 = vld [vmem:[#allocation25 + $0x1] ss:$0 sm:$0xff] }
0x2afe   :  { %v9250_v24 = vpop.xlane.xlu1 %9249  ;;  %v9089_v37 = vpop.permute.xlu0 %9088 }
0x2aff   :  { %13467 = vrcp.f32 %v9250_v24 }
0x2b01   :  { %v13462_v27 = vpop.eup %13461 }
0x2b02   :  { %v8757_v20 = vmul.f32 %v13462_v27, %v13446_v61  ;;  %v9254_v40 = vpop.permute.xlu1 %9253 }
0x2b04   :  { %12757 = vmatmul.mubr.msk.f32.vlgmr.msra.gmra.mrb[100].mxu1 %vm827_vm8, %v8757_v20 }
0x2b05   :  { %v13464_v28 = vpop.eup %13463  ;;  %12765 = vmatpush3.msra.mxu1 %v8924_v17  ;;  %12766 = vmatprep.mubr.msk.f32.mxu1 %vm14119_vm7, %v14118_v19 }
0x2b06   :  { %v8922_v35 = vmul.f32 %v13464_v28, %v15558_v62  ;;  %12774 = vmatprep.subr.mxu1 %v14118_v19  ;;  %v13466_v36 = vpop.eup %13465 }
0x2b07   :  { %v9087_v23 = vmul.f32 %v13466_v36, %v15561_v0 }
0x2b08   :  { %12767 = vmatmul.mubr.msk.f32.vlgmr.msra.gmra.mrb[102].mxu1 %vm827_vm8, %v8922_v35 }
0x2b09   :  { %12775 = vmatpush3.msra.mxu1 %v9089_v37  ;;  %12776 = vmatprep.mubr.msk.f32.mxu1 %vm14119_vm7, %v14118_v19  ;;  %v13468_v39 = vpop.eup %13467 }
0x2b0a   :  { %12784 = vmatprep.subr.mxu1 %v14118_v19  ;;  %v9252_v41 = vmul.f32 %v13468_v39, %v15567_v56 }
0x2b0c   :  { %12777 = vmatmul.mubr.msk.f32.vlgmr.msra.gmra.mrb[104].mxu1 %vm827_vm8, %v9087_v23 }
0x2b0d   :  { %12785 = vmatpush3.msra.mxu1 %v9254_v40  ;;  %12786 = vmatprep.mubr.msk.f32.mxu1 %vm14119_vm7, %v14118_v19 }
0x2b10   :  { %12787 = vmatmul.mubr.msk.f32.vlgmr.msra.gmra.mrb[106].mxu1 %vm827_vm8, %v9252_v41 }
0x2b9a   :  { %v8156_v42 = vpop.f32.mrb[92].mxu1 }
0x2b9b   :  { %v12718_v52 = vpop.f32.mrb[93].mxu1 }
0x2b9e   :  { %v8321_v43 = vpop.f32.mrb[94].mxu1 }
0x2b9f   :  { %8656 = vrot.lane.b32.xlu0 %v8321_v43, %s14092_s1  ;;  %v12728_v31 = vpop.f32.mrb[95].mxu1  ;;  %v11689_v43 = vld [vmem:[%s15922_s4 + $0x20] sm:$0xff] }
0x2ba0   :  { %v11690_v31 = vld [vmem:[%s15922_s4 + $0x28] sm:$0xff] }
0x2ba2   :  { %v8486_v44 = vpop.f32.mrb[96].mxu1 }
0x2ba3   :  { %8660 = vrot.lane.b32.xlu1 %v8486_v44, %s14095_s18  ;;  %v12738_v50 = vpop.f32.mrb[97].mxu1  ;;  %v13138_v44 = vpack.c.bf16 %v11690_v31, %v11689_v43 }
0x2ba4   :  { %v11691_v50 = vld [vmem:[%s15922_s4 + $0x30] sm:$0xff] }
0x2ba5   :  { %13139 = vmatprep.subr.bf16.mxu1 %v13138_v44 }
0x2ba6   :  { %v8651_v45 = vpop.f32.mrb[98].mxu1  ;;  %13141 = vmatpush3.bf16.msra.mxu1 %v13138_v44 }
0x2ba7   :  { %8664 = vrot.lane.b32.xlu1 %v8651_v45, %s14131_s16  ;;  %v12748_v48 = vpop.f32.mrb[99].mxu1  ;;  %v11692_v45 = vld [vmem:[%s15922_s4 + $0x38] sm:$0xff] }
0x2ba8   :  { %v13142_v48 = vpack.c.bf16 %v11692_v45, %v11691_v50 }
0x2baa   :  { %13143 = vmatprep.subr.bf16.mxu1 %v13142_v48 }
0x2bab   :  { %13145 = vmatpush3.bf16.msra.mxu1 %v13142_v48 }
0x2bac   :  { %12822 = vmatprep.subr.mxu1 %v14118_v19 }
0x2bd7   :  { %v8830_v54 = vpop.f32.mrb[100].mxu1 }
0x2bd8   :  { %v12758_v6 = vpop.f32.mrb[101].mxu1 }
0x2bdb   :  { %v8995_v60 = vpop.f32.mrb[102].mxu1 }
0x2bdc   :  { %9330 = vrot.lane.b32.xlu0 %v8995_v60, %s14092_s1  ;;  %v12768_v7 = vpop.f32.mrb[103].mxu1 }
0x2bdf   :  { %v9160_v61 = vpop.f32.mrb[104].mxu1 }
0x2be0   :  { %9334 = vrot.lane.b32.xlu0 %v9160_v61, %s14095_s18  ;;  %v12778_v62 = vpop.f32.mrb[105].mxu1 }
0x2be3   :  { %v9325_v63 = vpop.f32.mrb[106].mxu1 }
0x2be4   :  { %9338 = vrot.lane.b32.xlu1 %v9325_v63, %s14131_s16  ;;  %v12788_v0 = vpop.f32.mrb[107].mxu1 }
0x2be5   :  { %v11745_v0 = vld [vmem:[#allocation24 + $0x1] ss:$0 sm:$0xff] }
0x2c11   :  { %v8657_v53 = vpop.permute.xlu0 %8656 }
0x2c12   :  { %v8667_v56 = vsel %vm827_vm8, %v8156_v42, %v8657_v53 }
0x2c15   :  { %v8661_v21 = vpop.permute.xlu1 %8660 }
0x2c16   :  { %v8668_v3 = vsel %vm1497_vm9, %v8667_v56, %v8661_v21 }
0x2c19   :  { %v8665_v1 = vpop.permute.xlu1 %8664 }
0x2c1a   :  { %v8669_v2 = vsel %vm1499_vm10, %v8668_v3, %v8665_v1 }
0x2c1b   :  { %12797 = vmatprep.mubr.msk.f32.mxu0 %vm741_vm4, %v8669_v2 }
0x2c4e   :  { %v9331_v4 = vpop.permute.xlu0 %9330 }
0x2c4f   :  { %v9341_v15 = vsel %vm827_vm8, %v8830_v54, %v9331_v4  ;;  %v11744_v54 = vld [vmem:[#allocation22 + $0x1] ss:$0 sm:$0xff] }
0x2c52   :  { %v9335_v8 = vpop.permute.xlu0 %9334 }
0x2c53   :  { %v9342_v11 = vsel %vm1497_vm9, %v9341_v15, %v9335_v8 }
0x2c56   :  { %v9339_v12 = vpop.permute.xlu1 %9338 }
0x2c57   :  { %v9343_v13 = vsel %vm1499_vm10, %v9342_v11, %v9339_v12 }
0x2c58   :  { %12798 = vmatmul.mubr.msk.f32.vlgmr.msra.gmra.mrb[88].mxu0 %vm741_vm4, %v9343_v13 }
0x2c59   :  { %13149 = vmatpush3.bf16.msra.mxu0 %v13146_v33  ;;  %12819 = vmatprep.mubr.msk.f32.mxu0 %vm741_vm4, %v15220_v18 }
0x2c5a   :  { %13151 = vmatprep.subr.bf16.mxu0 %v13150_v38 }
0x2c5d   :  { %13153 = vmatpush3.bf16.msra.mxu0 %v13150_v38 }
0x2c5e   :  { %12832 = vmatprep.subr.mxu0 %v14118_v19 }
0x2c60   :  { %12820 = vmatmul.mubr.msk.f32.vlgmr.msra.gmra.mrb[90].mxu0 %vm741_vm4, %v15232_v46 }
0x2c61   :  { %12834 = vmatprep.mubr.msk.f32.mxu0 %vm14119_vm7, %v14118_v19 }
0x2d2b   :  { %v12799_v16 = vpop.f32.mrb[88].mxu0 }
0x2d2c   :  { %v9428_v30 = vadd.f32 %v12799_v16, %v11740_v5  ;;  %v9422_v9 = vpop.f32.mrb[89].mxu0 }
0x2d2d   :  { %v9423_v17 = vadd.f32 %v11740_v5, %v9422_v9 }
0x2d2e   :  { %v9432_v57 = vadd.f32 %v9428_v30, %v15447_v34  ;;  %v13515_v30 = vld [vmem:[%s15923_s0] sm:$0xff] }
0x2d2f   :  { %v9431_v22 = vadd.f32 %v9423_v17, %v15445_v29 }
0x2d30   :  { %v9436_v18 = vsel %vm741_vm4, %v9432_v57, 0.0 }
0x2d31   :  { %9437 = vadd.xlane.f32.xlu1 %v9436_v18  ;;  %v9433_v24 = vsel %vm741_vm4, %v9431_v22, 0.0 }
0x2d32   :  { %9434 = vadd.xlane.f32.xlu0 %v9433_v24 }
0x2d33   :  { %v12821_v46 = vpop.f32.mrb[90].mxu0 }
0x2d34   :  { %v15641_v27 = vadd.f32 %v12821_v46, %v11748_v59  ;;  %v9634_v20 = vpop.f32.mrb[91].mxu0 }
0x2d35   :  { %v15643_v28 = vadd.f32 %v11748_v59, %v9634_v20 }
0x2d42   :  { %9808 = vrot.lane.b32.xlu1 %v15643_v28, %s14122_s28 }
0x2d46   :  { %9973 = vrot.lane.b32.xlu1 %v15643_v28, %s14123_s10 }
0x2dbe   :  { %v9438_v29 = vpop.xlane.xlu1 %9437 }
0x2dbf   :  { %v9440_v34 = vmul.f32 0.03125, %v9438_v29  ;;  %v9435_v35 = vpop.xlane.xlu0 %9434 }
0x2dc0   :  { %v9439_v36 = vmul.f32 0.03125, %v9435_v35 }
0x2dc1   :  { %v9442_v37 = vsub.f32 %v9432_v57, %v9440_v34 }
0x2dc2   :  { %v9441_v23 = vsub.f32 %v9431_v22, %v9439_v36  ;;  %v9809_v39 = vpop.permute.xlu1 %9808 }
0x2dc3   :  { %12833 = vmatpush3.xpose.msk.msra.mxu0 %vm827_vm8, %v9809_v39  ;;  %v9444_v42 = vmul.f32 %v9442_v37, %v9442_v37 }
0x2dc4   :  { %v9443_v40 = vmul.f32 %v9441_v23, %v9441_v23  ;;  %12842 = vmatprep.subr.mxu0 %v14118_v19 }
0x2dc5   :  { %v9448_v52 = vsel %vm741_vm4, %v9444_v42, 0.0 }
0x2dc6   :  { %v9445_v41 = vsel %vm741_vm4, %v9443_v40, 0.0  ;;  %v9974_v1 = vpop.permute.xlu1 %9973  ;;  %v13516_v40 = vld [vmem:[%s15923_s0 + $0x8] sm:$0xff] }
0x2dc7   :  { %9446 = vadd.xlane.f32.xlu0 %v9445_v41 }
0x2dcb   :  { %9449 = vadd.xlane.f32.xlu0 %v9448_v52 }
0x2e54   :  { %v9447_v49 = vpop.xlane.xlu0 %9446 }
0x2e55   :  { %v9451_v51 = vmul.f32 0.03125, %v9447_v49 }
0x2e57   :  { %v9453_v32 = vadd.f32 1e-05, %v9451_v51 }
0x2e58   :  { %v9450_v55 = vpop.xlane.xlu0 %9449 }
0x2e59   :  { %13469 = vrsqrt.f32 %v9453_v32  ;;  %v9452_v26 = vmul.f32 0.03125, %v9450_v55 }
0x2e5b   :  { %v9454_v47 = vadd.f32 1e-05, %v9452_v26 }
0x2e5d   :  { %13471 = vrsqrt.f32 %v9454_v47 }
0x2e63   :  { %v13470_v58 = vpop.eup %13469 }
0x2e64   :  { %v9457_v33 = vmul.f32 %v13470_v58, %v9441_v23 }
0x2e66   :  { %v9465_v6 = vmul.f32 %v11743_v25, %v9457_v33 }
0x2e67   :  { %v13472_v60 = vpop.eup %13471 }
0x2e68   :  { %v9458_v7 = vmul.f32 %v13472_v60, %v9442_v37  ;;  %v15658_v61 = vadd.f32 %v11744_v54, %v9465_v6 }
0x2e6a   :  { %v9466_v62 = vmul.f32 %v11743_v25, %v9458_v7  ;;  %12808 = vmatprep.mubr.msk.f32.mxu1 %vm741_vm4, %v15658_v61 }
0x2e6c   :  { %v15662_v63 = vadd.f32 %v11744_v54, %v9466_v62 }
0x2e6e   :  { %12809 = vmatmul.mubr.msk.f32.vlgmr.msra.gmra.mrb[108].mxu1 %vm741_vm4, %v15662_v63 }
0x2e6f   :  { %12823 = vmatpush3.xpose.msk.msra.mxu1 %vm827_vm8, %v15643_v28  ;;  %12824 = vmatprep.mubr.msk.f32.mxu1 %vm14119_vm7, %v14118_v19 }
0x2e70   :  { %12827 = vmatprep.subr.mxu1 %v14118_v19 }
0x2f41   :  { %v12810_v53 = vpop.f32.mrb[108].mxu1 }
0x2f42   :  { %v9553_v21 = vpop.f32.mrb[109].mxu1  ;;  %v9559_v3 = vadd.f32 %v12810_v53, %v11745_v0 }
0x2f43   :  { %v9554_v56 = vadd.f32 %v11745_v0, %v9553_v21 }
0x2f45   :  { %9971 = vrot.lane.b32.xlu1 %v9554_v56, %s14123_s10  ;;  %9806 = vrot.lane.b32.xlu0 %v9554_v56, %s14122_s28 }
0x2f46   :  { %12825 = vmatmul.mubr.msk.f32.vlgmr.msra.gmra.mrb[110].mxu1 %vm827_vm8, %v9554_v56 }
0x2f47   :  { %12829 = vmatprep.mubr.msk.f32.mxu1 %vm14119_vm7, %v14118_v19 }
0x2f49   :  { %10136 = vrot.lane.b32.xlu1 %v9554_v56, %s14124_s27  ;;  %10138 = vrot.lane.b32.xlu0 %v15643_v28, %s14124_s27 }
0x2f4d   :  { %10479 = vrot.lane.b32.xlu1 %v9559_v3, %s14122_s28  ;;  %10481 = vrot.lane.b32.xlu0 %v15641_v27, %s14122_s28 }
0x2f51   :  { %10644 = vrot.lane.b32.xlu1 %v9559_v3, %s14123_s10  ;;  %10646 = vrot.lane.b32.xlu0 %v15641_v27, %s14123_s10 }
0x2f55   :  { %10809 = vrot.lane.b32.xlu1 %v9559_v3, %s14124_s27  ;;  %10811 = vrot.lane.b32.xlu0 %v15641_v27, %s14124_s27 }
0x2f59   :  { %9895 = vrot.lane.b32.xlu1 %v15643_v28, %s14121_s21  ;;  %9730 = vrot.lane.b32.xlu0 %v15643_v28, %s14120_s7 }
0x2fb7   :  { %v9972_v2 = vpop.permute.xlu1 %9971  ;;  %v9807_v4 = vpop.permute.xlu0 %9806 }
0x2fb8   :  { %12835 = vmatmul.mubr.msk.f32.vlgmr.msra.gmra.mrb[92].mxu0 %vm827_vm8, %v9807_v4 }
0x2fb9   :  { %12843 = vmatpush3.xpose.msk.msra.mxu0 %vm827_vm8, %v9974_v1  ;;  %12844 = vmatprep.mubr.msk.f32.mxu0 %vm14119_vm7, %v14118_v19 }
0x2fba   :  { %12852 = vmatprep.subr.mxu0 %v14118_v19 }
0x2fbb   :  { %v10139_v8 = vpop.permute.xlu0 %10138  ;;  %v10137_v10 = vpop.permute.xlu1 %10136 }
0x2fbc   :  { %12845 = vmatmul.mubr.msk.f32.vlgmr.msra.gmra.mrb[94].mxu0 %vm827_vm8, %v9972_v2 }
0x2fbd   :  { %12853 = vmatpush3.xpose.msk.msra.mxu0 %vm827_vm8, %v10139_v8  ;;  %12854 = vmatprep.mubr.msk.f32.mxu0 %vm14119_vm7, %v14118_v19 }
0x2fbe   :  { %12862 = vmatprep.subr.mxu0 %v14118_v19 }
0x2fbf   :  { %v10482_v14 = vpop.permute.xlu0 %10481  ;;  %v10480_v15 = vpop.permute.xlu1 %10479 }
0x2fc0   :  { %12855 = vmatmul.mubr.msk.f32.vlgmr.msra.gmra.mrb[96].mxu0 %vm827_vm8, %v10137_v10 }
0x2fc1   :  { %12863 = vmatpush3.xpose.msk.msra.mxu0 %vm827_vm8, %v15641_v27  ;;  %12864 = vmatprep.mubr.msk.f32.mxu0 %vm14119_vm7, %v14118_v19 }
0x2fc2   :  { %12872 = vmatprep.subr.mxu0 %v14118_v19 }
0x2fc3   :  { %v10647_v11 = vpop.permute.xlu0 %10646  ;;  %v10645_v38 = vpop.permute.xlu1 %10644 }
0x2fc4   :  { %12865 = vmatmul.mubr.msk.f32.vlgmr.msra.gmra.mrb[98].mxu0 %vm827_vm8, %v9559_v3 }
0x2fc5   :  { %12873 = vmatpush3.xpose.msk.msra.mxu0 %vm827_vm8, %v10482_v14  ;;  %12874 = vmatprep.mubr.msk.f32.mxu0 %vm14119_vm7, %v14118_v19 }
0x2fc6   :  { %12882 = vmatprep.subr.mxu0 %v14118_v19 }
0x2fc7   :  { %v10812_v12 = vpop.permute.xlu0 %10811  ;;  %v10810_v5 = vpop.permute.xlu1 %10809 }
0x2fc8   :  { %12875 = vmatmul.mubr.msk.f32.vlgmr.msra.gmra.mrb[100].mxu0 %vm827_vm8, %v10480_v15 }
0x2fc9   :  { %12883 = vmatpush3.xpose.msk.msra.mxu0 %vm827_vm8, %v10647_v11  ;;  %12884 = vmatprep.mubr.msk.f32.mxu0 %vm14119_vm7, %v14118_v19 }
0x2fca   :  { %12892 = vmatprep.subr.mxu0 %v14118_v19 }
0x2fcb   :  { %v9731_v13 = vpop.permute.xlu0 %9730  ;;  %v9896_v60 = vpop.permute.xlu1 %9895 }
0x2fcc   :  { %12828 = vmatpush3.msra.mxu1 %v9731_v13  ;;  %12885 = vmatmul.mubr.msk.f32.vlgmr.msra.gmra.mrb[102].mxu0 %vm827_vm8, %v10645_v38 }
0x2fcd   :  { %12893 = vmatpush3.xpose.msk.msra.mxu0 %vm827_vm8, %v10812_v12  ;;  %12894 = vmatprep.mubr.msk.f32.mxu0 %vm14119_vm7, %v14118_v19 }
0x2fce   :  { %12837 = vmatprep.subr.mxu1 %v14118_v19 }
0x2fd0   :  { %12895 = vmatmul.mubr.msk.f32.vlgmr.msra.gmra.mrb[104].mxu0 %vm827_vm8, %v10810_v5 }
0x3019   :  { %v9715_v16 = vpop.f32.mrb[110].mxu1 }
0x301a   :  { %v9716_v9 = vadd.f32 %v13515_v30, %v9715_v16  ;;  %v12826_v17 = vpop.f32.mrb[111].mxu1 }
0x301c   :  { %v9719_v57 = vsel %vm827_vm8, %v9716_v9, -inf }
0x301d   :  { %9720 = vmax.xlane.f32.xlu0 %v9719_v57 }
0x308b   :  { %v9880_v22 = vpop.f32.mrb[92].mxu0 }
0x308c   :  { %v9881_v18 = vadd.f32 %v13515_v30, %v9880_v22  ;;  %v12836_v59 = vpop.f32.mrb[93].mxu0 }
0x308e   :  { %v9884_v24 = vsel %vm827_vm8, %v9881_v18, -inf }
0x308f   :  { %9885 = vmax.xlane.f32.xlu1 %v9884_v24  ;;  %v10045_v46 = vpop.f32.mrb[94].mxu0 }
0x3090   :  { %v10046_v20 = vadd.f32 %v13515_v30, %v10045_v46  ;;  %v12846_v29 = vpop.f32.mrb[95].mxu0 }
0x3092   :  { %v10049_v34 = vsel %vm827_vm8, %v10046_v20, -inf }
0x3093   :  { %v10210_v35 = vpop.f32.mrb[96].mxu0  ;;  %10050 = vmax.xlane.f32.xlu0 %v10049_v34 }
0x3094   :  { %v10211_v36 = vadd.f32 %v13515_v30, %v10210_v35  ;;  %v12856_v37 = vpop.f32.mrb[97].mxu0 }
0x3096   :  { %v10214_v23 = vsel %vm827_vm8, %v10211_v36, -inf }
0x3097   :  { %v10388_v39 = vpop.f32.mrb[98].mxu0  ;;  %10215 = vmax.xlane.f32.xlu0 %v10214_v23 }
0x3098   :  { %v10389_v41 = vadd.f32 %v13516_v40, %v10388_v39  ;;  %v12866_v42 = vpop.f32.mrb[99].mxu0 }
0x309a   :  { %v10392_v52 = vsel %vm827_vm8, %v10389_v41, -inf }
0x309b   :  { %10393 = vmax.xlane.f32.xlu1 %v10392_v52  ;;  %v10553_v43 = vpop.f32.mrb[100].mxu0 }
0x309c   :  { %v10554_v31 = vadd.f32 %v13516_v40, %v10553_v43  ;;  %v12876_v44 = vpop.f32.mrb[101].mxu0 }
0x309e   :  { %v10557_v50 = vsel %vm827_vm8, %v10554_v31, -inf }
0x309f   :  { %v10718_v45 = vpop.f32.mrb[102].mxu0  ;;  %10558 = vmax.xlane.f32.xlu0 %v10557_v50 }
0x30a0   :  { %v10719_v48 = vadd.f32 %v13516_v40, %v10718_v45  ;;  %v12886_v49 = vpop.f32.mrb[103].mxu0 }
0x30a2   :  { %v10722_v51 = vsel %vm827_vm8, %v10719_v48, -inf }
0x30a3   :  { %10723 = vmax.xlane.f32.xlu1 %v10722_v51  ;;  %v10883_v32 = vpop.f32.mrb[104].mxu0 }
0x30a4   :  { %v10884_v55 = vadd.f32 %v13516_v40, %v10883_v32  ;;  %v12896_v26 = vpop.f32.mrb[105].mxu0 }
0x30a6   :  { %v10887_v47 = vsel %vm827_vm8, %v10884_v55, -inf }
0x30a7   :  { %10888 = vmax.xlane.f32.xlu0 %v10887_v47 }
0x30aa   :  { %v9721_v58 = vpop.xlane.xlu0 %9720 }
0x30ab   :  { %v9722_v25 = vsub.f32 %v9716_v9, %v9721_v58 }
0x30ad   :  { %v9723_v33 = vmul.f32 1.442695, %v9722_v25 }
0x30af   :  { %13473 = vpow2.f32 %v9723_v33 }
0x30b4   :  { %10225 = vrot.lane.b32.xlu1 %v15643_v28, %s14126_s11 }
0x30b9   :  { %v13474_v54 = vpop.eup %13473 }
0x30ba   :  { %v9725_v6 = vsel %vm827_vm8, %v13474_v54, 0.0 }
0x30bd   :  { %10060 = vrot.lane.b32.xlu0 %v15643_v28, %s14125_s9 }
0x30d8   :  { %9726 = vadd.xlane.f32.xlu1 %v9725_v6 }
0x311c   :  { %v9886_v7 = vpop.xlane.xlu1 %9885 }
0x311d   :  { %v9887_v62 = vsub.f32 %v9881_v18, %v9886_v7 }
0x311f   :  { %v9888_v0 = vmul.f32 1.442695, %v9887_v62 }
0x3120   :  { %v10051_v53 = vpop.xlane.xlu0 %10050 }
0x3121   :  { %13475 = vpow2.f32 %v9888_v0  ;;  %v10052_v21 = vsub.f32 %v10046_v20, %v10051_v53 }
0x3123   :  { %v10053_v56 = vmul.f32 1.442695, %v10052_v21 }
0x3124   :  { %v10216_v3 = vpop.xlane.xlu0 %10215 }
0x3125   :  { %13477 = vpow2.f32 %v10053_v56  ;;  %v10217_v1 = vsub.f32 %v10211_v36, %v10216_v3 }
0x3127   :  { %v10218_v28 = vmul.f32 1.442695, %v10217_v1 }
0x3128   :  { %v10394_v11 = vpop.xlane.xlu1 %10393 }
0x3129   :  { %13479 = vpow2.f32 %v10218_v28  ;;  %v10395_v12 = vsub.f32 %v10389_v41, %v10394_v11  ;;  %v11700_v11 = vld [vmem:[%s15924_s17 + $0x38] sm:$0xff] }
0x312b   :  { %v13476_v2 = vpop.eup %13475  ;;  %v10396_v16 = vmul.f32 1.442695, %v10395_v12 }
0x312c   :  { %v9890_v4 = vsel %vm827_vm8, %v13476_v2, 0.0  ;;  %v10559_v38 = vpop.xlane.xlu0 %10558 }
0x312d   :  { %9891 = vadd.xlane.f32.xlu0 %v9890_v4  ;;  %v10560_v5 = vsub.f32 %v10554_v31, %v10559_v38  ;;  %13481 = vpow2.f32 %v10396_v16 }
0x312f   :  { %v13478_v8 = vpop.eup %13477  ;;  %v10561_v17 = vmul.f32 1.442695, %v10560_v5 }
0x3130   :  { %v10055_v10 = vsel %vm827_vm8, %v13478_v8, 0.0  ;;  %v10724_v13 = vpop.xlane.xlu1 %10723 }
0x3131   :  { %10056 = vadd.xlane.f32.xlu1 %v10055_v10  ;;  %v10725_v30 = vsub.f32 %v10719_v48, %v10724_v13  ;;  %13483 = vpow2.f32 %v10561_v17  ;;  %v11698_v10 = vld [vmem:[%s15924_s17 + $0x28] sm:$0xff] }
0x3133   :  { %v15741_v14 = vpop.eup %13479  ;;  %v10726_v57 = vmul.f32 1.442695, %v10725_v30 }
0x3134   :  { %v10220_v15 = vsel %vm827_vm8, %v15741_v14, 0.0  ;;  %v10889_v9 = vpop.xlane.xlu0 %10888  ;;  %v10226_v59 = vpop.permute.xlu1 %10225 }
0x3135   :  { %10221 = vadd.xlane.f32.xlu0 %v10220_v15  ;;  %v10890_v22 = vsub.f32 %v10884_v55, %v10889_v9  ;;  %13485 = vpow2.f32 %v10726_v57  ;;  %v11699_v15 = vld [vmem:[%s15924_s17 + $0x30] sm:$0xff] }
0x3136   :  { %v13158_v12 = vpack.c.bf16 %v11700_v11, %v11699_v15  ;;  %v11778_v15 = vld [vmem:[#allocation28 + $0x1] ss:$0 sm:$0xff] }
0x3137   :  { %v10891_v18 = vmul.f32 1.442695, %v10890_v22  ;;  %v13482_v24 = vpop.eup %13481 }
0x3138   :  { %v10398_v29 = vsel %vm827_vm8, %v13482_v24, 0.0  ;;  %v10061_v41 = vpop.permute.xlu0 %10060 }
0x3139   :  { %13487 = vpow2.f32 %v10891_v18 }
0x313b   :  { %v15749_v46 = vpop.eup %13483 }
0x313c   :  { %v10563_v36 = vsel %vm827_vm8, %v15749_v46, 0.0 }
0x313f   :  { %v15752_v34 = vpop.eup %13485 }
0x3140   :  { %v10728_v35 = vsel %vm827_vm8, %v15752_v34, 0.0 }
0x3142   :  { %10568 = vrot.lane.b32.xlu1 %v15641_v27, %s14121_s21 }
0x3143   :  { %v15758_v37 = vpop.eup %13487 }
0x3144   :  { %v10893_v23 = vsel %vm827_vm8, %v15758_v37, 0.0 }
0x314b   :  { %10403 = vrot.lane.b32.xlu0 %v15641_v27, %s14120_s7 }
0x3165   :  { %v9727_v20 = vpop.xlane.xlu1 %9726 }
0x3166   :  { %13489 = vrcp.f32 %v9727_v20  ;;  %10399 = vadd.xlane.f32.xlu1 %v10398_v29 }
0x316a   :  { %10729 = vadd.xlane.f32.xlu1 %v10728_v35  ;;  %10564 = vadd.xlane.f32.xlu0 %v10563_v36 }
0x316e   :  { %10894 = vadd.xlane.f32.xlu1 %v10893_v23 }
0x3170   :  { %v13490_v39 = vpop.eup %13489 }
0x3171   :  { %v9729_v40 = vmul.f32 %v13490_v39, %v13474_v54  ;;  %v11775_v39 = vld [vmem:[#allocation27 + $0x1] ss:$0 sm:$0xff] }
0x3173   :  { %12830 = vmatmul.mubr.msk.f32.vlgmr.msra.gmra.mrb[112].mxu1 %vm827_vm8, %v9729_v40 }
0x3174   :  { %12838 = vmatpush3.msra.mxu1 %v9896_v60  ;;  %12839 = vmatprep.mubr.msk.f32.mxu1 %vm14119_vm7, %v14118_v19 }
0x3175   :  { %12847 = vmatprep.subr.mxu1 %v14118_v19 }
0x317f   :  { %10898 = vrot.lane.b32.xlu1 %v15641_v27, %s14126_s11 }
0x3180   :  { %10733 = vrot.lane.b32.xlu0 %v15641_v27, %s14125_s9 }
0x31ba   :  { %v9892_v42 = vpop.xlane.xlu0 %9891 }
0x31bb   :  { %13491 = vrcp.f32 %v9892_v42 }
0x31be   :  { %v10057_v52 = vpop.xlane.xlu1 %10056 }
0x31bf   :  { %13493 = vrcp.f32 %v10057_v52 }
0x31c2   :  { %v10222_v43 = vpop.xlane.xlu0 %10221  ;;  %v10569_v51 = vpop.permute.xlu1 %10568 }
0x31c3   :  { %13495 = vrcp.f32 %v10222_v43 }
0x31c5   :  { %v13492_v31 = vpop.eup %13491 }
0x31c6   :  { %v9894_v44 = vmul.f32 %v13492_v31, %v13476_v2  ;;  %v10404_v49 = vpop.permute.xlu0 %10403 }
0x31c8   :  { %12840 = vmatmul.mubr.msk.f32.vlgmr.msra.gmra.mrb[114].mxu1 %vm827_vm8, %v9894_v44 }
0x31c9   :  { %v13494_v50 = vpop.eup %13493  ;;  %12848 = vmatpush3.msra.mxu1 %v10061_v41  ;;  %12849 = vmatprep.mubr.msk.f32.mxu1 %vm14119_vm7, %v14118_v19 }
0x31ca   :  { %v10059_v45 = vmul.f32 %v13494_v50, %v13478_v8  ;;  %12857 = vmatprep.subr.mxu1 %v14118_v19  ;;  %v11697_v8 = vld [vmem:[%s15924_s17 + $0x20] sm:$0xff] }
0x31cc   :  { %12850 = vmatmul.mubr.msk.f32.vlgmr.msra.gmra.mrb[116].mxu1 %vm827_vm8, %v10059_v45 }
0x31cd   :  { %v13496_v27 = vpop.eup %13495  ;;  %12858 = vmatpush3.msra.mxu1 %v10226_v59  ;;  %12859 = vmatprep.mubr.msk.f32.mxu1 %vm14119_vm7, %v14118_v19 }
0x31ce   :  { %v10224_v48 = vmul.f32 %v13496_v27, %v15741_v14  ;;  %12867 = vmatprep.subr.mxu1 %v14118_v19  ;;  %v13154_v14 = vpack.c.bf16 %v11698_v10, %v11697_v8 }
0x31d0   :  { %12860 = vmatmul.mubr.msk.f32.vlgmr.msra.gmra.mrb[118].mxu1 %vm827_vm8, %v10224_v48  ;;  %13155 = vmatprep.subr.bf16.mxu0 %v13154_v14 }
0x31d1   :  { %12868 = vmatpush3.msra.mxu1 %v10404_v49  ;;  %12869 = vmatprep.mubr.msk.f32.mxu1 %vm14119_vm7, %v14118_v19 }
0x31d2   :  { %12877 = vmatprep.subr.mxu1 %v14118_v19  ;;  %13157 = vmatpush3.bf16.msra.mxu0 %v13154_v14 }
0x31d3   :  { %13159 = vmatprep.subr.bf16.mxu0 %v13158_v12 }
0x31d6   :  { %13161 = vmatpush3.bf16.msra.mxu0 %v13158_v12  ;;  %v11779_v12 = vld [vmem:[#allocation30 + $0x1] ss:$0 sm:$0xff] }
0x31f3   :  { %v10400_v32 = vpop.xlane.xlu1 %10399 }
0x31f4   :  { %13497 = vrcp.f32 %v10400_v32 }
0x31f7   :  { %v10730_v55 = vpop.xlane.xlu1 %10729  ;;  %v10565_v26 = vpop.xlane.xlu0 %10564 }
0x31f8   :  { %13499 = vrcp.f32 %v10565_v26 }
0x31f9   :  { %13501 = vrcp.f32 %v10730_v55 }
0x31fb   :  { %v10895_v47 = vpop.xlane.xlu1 %10894  ;;  %v10734_v60 = vpop.permute.xlu0 %10733 }
0x31fc   :  { %13503 = vrcp.f32 %v10895_v47  ;;  %v11701_v47 = vld [vmem:[%s15925_s3 + $0x20] sm:$0xff] }
0x31fe   :  { %v13498_v58 = vpop.eup %13497 }
0x31ff   :  { %v10402_v25 = vmul.f32 %v13498_v58, %v13482_v24  ;;  %v10899_v0 = vpop.permute.xlu1 %10898  ;;  %v11702_v58 = vld [vmem:[%s15925_s3 + $0x28] sm:$0xff] }
0x3201   :  { %12870 = vmatmul.mubr.msk.f32.vlgmr.msra.gmra.mrb[120].mxu1 %vm827_vm8, %v10402_v25  ;;  %v13162_v25 = vpack.c.bf16 %v11702_v58, %v11701_v47 }
0x3202   :  { %12878 = vmatpush3.msra.mxu1 %v10569_v51  ;;  %12879 = vmatprep.mubr.msk.f32.mxu1 %vm14119_vm7, %v14118_v19  ;;  %v13500_v33 = vpop.eup %13499 }
0x3203   :  { %12887 = vmatprep.subr.mxu1 %v14118_v19  ;;  %v10567_v54 = vmul.f32 %v13500_v33, %v15749_v46  ;;  %v13502_v6 = vpop.eup %13501  ;;  %v11703_v33 = vld [vmem:[%s15925_s3 + $0x30] sm:$0xff] }
0x3204   :  { %v10732_v7 = vmul.f32 %v13502_v6, %v15752_v34 }
0x3205   :  { %12880 = vmatmul.mubr.msk.f32.vlgmr.msra.gmra.mrb[122].mxu1 %vm827_vm8, %v10567_v54  ;;  %v11704_v54 = vld [vmem:[%s15925_s3 + $0x38] sm:$0xff] }
0x3206   :  { %12888 = vmatpush3.msra.mxu1 %v10734_v60  ;;  %12889 = vmatprep.mubr.msk.f32.mxu1 %vm14119_vm7, %v14118_v19  ;;  %v13504_v62 = vpop.eup %13503  ;;  %v13166_v6 = vpack.c.bf16 %v11704_v54, %v11703_v33  ;;  %v11705_v60 = vld [vmem:[%s15926_s14 + $0x40] sm:$0xff] }
0x3207   :  { %12897 = vmatprep.subr.mxu1 %v14118_v19  ;;  %v10897_v53 = vmul.f32 %v13504_v62, %v15758_v37  ;;  %v11707_v62 = vld [vmem:[%s15926_s14 + $0x50] sm:$0xff] }
0x3209   :  { %12890 = vmatmul.mubr.msk.f32.vlgmr.msra.gmra.mrb[124].mxu1 %vm827_vm8, %v10732_v7  ;;  %v11706_v7 = vld [vmem:[%s15926_s14 + $0x48] sm:$0xff] }
0x320a   :  { %12898 = vmatpush3.msra.mxu1 %v10899_v0  ;;  %12899 = vmatprep.mubr.msk.f32.mxu1 %vm14119_vm7, %v14118_v19  ;;  %v13170_v0 = vpack.c.bf16 %v11706_v7, %v11705_v60 }
0x320b   :  { %13163 = vmatprep.subr.bf16.mxu1 %v13162_v25 }
0x320c   :  { %13171 = vmatprep.subr.bf16.mxu0 %v13170_v0 }
0x320d   :  { %12900 = vmatmul.mubr.msk.f32.vlgmr.msra.gmra.mrb[126].mxu1 %vm827_vm8, %v10897_v53  ;;  %v11708_v53 = vld [vmem:[%s15926_s14 + $0x58] sm:$0xff] }
0x320e   :  { %13165 = vmatpush3.bf16.msra.mxu1 %v13162_v25 }
0x320f   :  { %13167 = vmatprep.subr.bf16.mxu1 %v13166_v6 }
0x3212   :  { %13169 = vmatpush3.bf16.msra.mxu1 %v13166_v6 }
0x3246   :  { %v9802_v21 = vpop.f32.mrb[112].mxu1 }
0x3247   :  { %v12831_v56 = vpop.f32.mrb[113].mxu1 }
0x3248   :  { %v11709_v56 = vld [vmem:[%s15926_s14 + $0x60] sm:$0xff] }
0x329b   :  { %v9967_v3 = vpop.f32.mrb[114].mxu1 }
0x329c   :  { %10302 = vrot.lane.b32.xlu0 %v9967_v3, %s14092_s1  ;;  %v12841_v1 = vpop.f32.mrb[115].mxu1  ;;  %v11710_v3 = vld [vmem:[%s15926_s14 + $0x68] sm:$0xff] }
0x329d   :  { %v13178_v1 = vpack.c.bf16 %v11710_v3, %v11709_v56  ;;  %v11787_v3 = vld [vmem:[#allocation36 + $0x1] ss:$0 sm:$0xff] }
0x329f   :  { %v10132_v28 = vpop.f32.mrb[116].mxu1 }
0x32a0   :  { %10306 = vrot.lane.b32.xlu1 %v10132_v28, %s14095_s18  ;;  %v12851_v2 = vpop.f32.mrb[117].mxu1 }
0x32a3   :  { %v10297_v4 = vpop.f32.mrb[118].mxu1 }
0x32a4   :  { %10310 = vrot.lane.b32.xlu1 %v10297_v4, %s14131_s16  ;;  %v12861_v19 = vpop.f32.mrb[119].mxu1 }
0x32d4   :  { %v10475_v38 = vpop.f32.mrb[120].mxu1 }
0x32d5   :  { %v12871_v13 = vpop.f32.mrb[121].mxu1 }
0x32d8   :  { %v10640_v5 = vpop.f32.mrb[122].mxu1 }
0x32d9   :  { %10975 = vrot.lane.b32.xlu0 %v10640_v5, %s14092_s1  ;;  %v12881_v16 = vpop.f32.mrb[123].mxu1  ;;  %s15927_s1 = sld [smem:[#allocation56_spill]] }
0x32dc   :  { %v10805_v30 = vpop.f32.mrb[124].mxu1 }
0x32dd   :  { %10979 = vrot.lane.b32.xlu0 %v10805_v30, %s14095_s18  ;;  %v12891_v9 = vpop.f32.mrb[125].mxu1  ;;  %s15928_s18 = sld [smem:[#allocation57_spill]] }
0x32df   :  { %v11343_v47 = vld [vmem:[%s15927_s1 + $0x18] sm:$0xff] }
0x32e0   :  { %v10970_v17 = vpop.f32.mrb[126].mxu1 }
0x32e1   :  { %10983 = vrot.lane.b32.xlu1 %v10970_v17, %s14131_s16  ;;  %v12901_v57 = vpop.f32.mrb[127].mxu1  ;;  %v11711_v17 = vld [vmem:[%s15926_s14 + $0x70] sm:$0xff] }
0x32e2   :  { %v11712_v57 = vld [vmem:[%s15926_s14 + $0x78] sm:$0xff] }
0x330e   :  { %v10303_v22 = vpop.permute.xlu0 %10302 }
0x330f   :  { %v10313_v59 = vsel %vm827_vm8, %v9802_v21, %v10303_v22  ;;  %v13174_v21 = vpack.c.bf16 %v11708_v53, %v11707_v62  ;;  %v13182_v22 = vpack.c.bf16 %v11712_v57, %v11711_v17 }
0x3312   :  { %v10307_v18 = vpop.permute.xlu1 %10306 }
0x3313   :  { %v10314_v24 = vsel %vm1497_vm9, %v10313_v59, %v10307_v18  ;;  %v11780_v18 = vld [vmem:[#allocation31 + $0x1] ss:$0 sm:$0xff] }
0x3316   :  { %v10311_v46 = vpop.permute.xlu1 %10310 }
0x3317   :  { %v10315_v20 = vsel %vm1499_vm10, %v10314_v24, %v10311_v46 }
0x3318   :  { %12910 = vmatprep.mubr.msk.f32.mxu0 %vm741_vm4, %v10315_v20 }
0x334b   :  { %v10976_v29 = vpop.permute.xlu0 %10975 }
0x334c   :  { %v10986_v35 = vsel %vm827_vm8, %v10475_v38, %v10976_v29 }
0x334f   :  { %v10980_v34 = vpop.permute.xlu0 %10979 }
0x3350   :  { %v10987_v36 = vsel %vm1497_vm9, %v10986_v35, %v10980_v34  ;;  %v11783_v35 = vld [vmem:[#allocation33 + $0x1] ss:$0 sm:$0xff] }
0x3353   :  { %v10984_v37 = vpop.permute.xlu1 %10983 }
0x3354   :  { %v10988_v23 = vsel %vm1499_vm10, %v10987_v36, %v10984_v37 }
0x3355   :  { %12911 = vmatmul.mubr.msk.f32.vlgmr.msra.gmra.mrb[106].mxu0 %vm741_vm4, %v10988_v23 }
0x3356   :  { %13173 = vmatpush3.bf16.msra.mxu0 %v13170_v0  ;;  %v11786_v0 = vld [vmem:[#allocation34 + $0x1] ss:$0 sm:$0xff] }
0x3357   :  { %13175 = vmatprep.subr.bf16.mxu0 %v13174_v21 }
0x335a   :  { %13177 = vmatpush3.bf16.msra.mxu0 %v13174_v21 }
0x335b   :  { %13179 = vmatprep.subr.bf16.mxu0 %v13178_v1 }
0x335e   :  { %13181 = vmatpush3.bf16.msra.mxu0 %v13178_v1 }
0x335f   :  { %13183 = vmatprep.subr.bf16.mxu0 %v13182_v22 }
0x3362   :  { %13185 = vmatpush3.bf16.msra.mxu0 %v13182_v22 }
0x3428   :  { %v12912_v40 = vpop.f32.mrb[106].mxu0 }
0x3429   :  { %v11073_v41 = vadd.f32 %v12912_v40, %v11775_v39  ;;  %v11067_v42 = vpop.f32.mrb[107].mxu0 }
0x342a   :  { %v11068_v52 = vadd.f32 %v11775_v39, %v11067_v42 }
0x342b   :  { %v11077_v43 = vadd.f32 %v11073_v41, %v15662_v63 }
0x342c   :  { %v11076_v31 = vadd.f32 %v11068_v52, %v15658_v61 }
0x342d   :  { %v11081_v44 = vsel %vm741_vm4, %v11077_v43, 0.0 }
0x342e   :  { %11082 = vadd.xlane.f32.xlu1 %v11081_v44  ;;  %v11078_v50 = vsel %vm741_vm4, %v11076_v31, 0.0 }
0x342f   :  { %11079 = vadd.xlane.f32.xlu0 %v11078_v50 }
0x34bb   :  { %v11083_v45 = vpop.xlane.xlu1 %11082 }
0x34bc   :  { %v11085_v27 = vmul.f32 0.03125, %v11083_v45  ;;  %v11080_v48 = vpop.xlane.xlu0 %11079 }
0x34bd   :  { %v11084_v49 = vmul.f32 0.03125, %v11080_v48 }
0x34be   :  { %v11087_v51 = vsub.f32 %v11077_v43, %v11085_v27 }
0x34bf   :  { %v11086_v32 = vsub.f32 %v11076_v31, %v11084_v49 }
0x34c0   :  { %v11089_v63 = vmul.f32 %v11087_v51, %v11087_v51 }
0x34c1   :  { %v11088_v55 = vmul.f32 %v11086_v32, %v11086_v32 }
0x34c2   :  { %v11093_v26 = vsel %vm741_vm4, %v11089_v63, 0.0 }
0x34c3   :  { %v11090_v61 = vsel %vm741_vm4, %v11088_v55, 0.0  ;;  %v11340_v55 = vld [vmem:[%s15927_s1] sm:$0xff] }
0x34c4   :  { %11091 = vadd.xlane.f32.xlu0 %v11090_v61  ;;  %v11341_v61 = vld [vmem:[%s15927_s1 + $0x8] sm:$0xff] }
0x34c5   :  { %v13186_v63 = vpack.c.bf16 %v11341_v61, %v11340_v55 }
0x34c7   :  { %13187 = vmatprep.subr.bf16.mxu1 %v13186_v63 }
0x34c8   :  { %11094 = vadd.xlane.f32.xlu0 %v11093_v26  ;;  %v11342_v26 = vld [vmem:[%s15927_s1 + $0x10] sm:$0xff] }
0x34c9   :  { %v13190_v58 = vpack.c.bf16 %v11343_v47, %v11342_v26 }
0x3551   :  { %v11092_v28 = vpop.xlane.xlu0 %11091 }
0x3552   :  { %v11096_v2 = vmul.f32 0.03125, %v11092_v28 }
0x3554   :  { %v11098_v4 = vadd.f32 1e-05, %v11096_v2 }
0x3555   :  { %v11095_v19 = vpop.xlane.xlu0 %11094 }
0x3556   :  { %13505 = vrsqrt.f32 %v11098_v4  ;;  %v11097_v8 = vmul.f32 0.03125, %v11095_v19  ;;  %v11788_v19 = vld [vmem:[%s15928_s18] ss:$0 sm:$0xff] }
0x3558   :  { %v11099_v10 = vadd.f32 1e-05, %v11097_v8 }
0x355a   :  { %13507 = vrsqrt.f32 %v11099_v10 }
0x3560   :  { %v13506_v14 = vpop.eup %13505 }
0x3561   :  { %v11102_v11 = vmul.f32 %v13506_v14, %v11086_v32 }
0x3563   :  { %v11110_v38 = vmul.f32 %v11778_v15, %v11102_v11 }
0x3564   :  { %v13508_v13 = vpop.eup %13507 }
0x3565   :  { %v11103_v5 = vmul.f32 %v13508_v13, %v11087_v51  ;;  %v11118_v16 = vadd.f32 %v11779_v12, %v11110_v38 }
0x3567   :  { %v11111_v30 = vmul.f32 %v11778_v15, %v11103_v5  ;;  %12921 = vmatprep.mubr.msk.f32.mxu1 %vm741_vm4, %v11118_v16 }
0x3569   :  { %v11119_v9 = vadd.f32 %v11779_v12, %v11111_v30 }
0x356b   :  { %12922 = vmatmul.mubr.msk.f32.vlgmr.msra.gmra.mrb[128].mxu1 %vm741_vm4, %v11119_v9 }
0x356c   :  { %13189 = vmatpush3.bf16.msra.mxu1 %v13186_v63 }
0x356d   :  { %13191 = vmatprep.subr.bf16.mxu1 %v13190_v58 }
0x3570   :  { %13193 = vmatpush3.bf16.msra.mxu1 %v13190_v58 }
0x363e   :  { %v12923_v59 = vpop.f32.mrb[128].mxu1 }
0x363f   :  { %v11204_v24 = vadd.f32 %v12923_v59, %v11780_v18  ;;  %v11198_v46 = vpop.f32.mrb[129].mxu1 }
0x3640   :  { %v11199_v20 = vadd.f32 %v11780_v18, %v11198_v46 }
0x3641   :  { %v11208_v34 = vmax.f32 %v11204_v24, 0.0 }
0x3642   :  { %v11207_v29 = vmax.f32 %v11199_v20, 0.0 }
0x3644   :  { %12940 = vmatprep.mubr.msk.f32.mxu0 %vm2404_vm11, %v11207_v29 }
0x3645   :  { %12941 = vmatmul.mubr.msk.f32.vlgmr.msra.gmra.mrb[108].mxu0 %vm2404_vm11, %v11208_v34 }
0x3718   :  { %v12942_v36 = vpop.f32.mrb[108].mxu0 }
0x3719   :  { %v11293_v37 = vadd.f32 %v12942_v36, %v11783_v35  ;;  %v11287_v23 = vpop.f32.mrb[109].mxu0 }
0x371a   :  { %v11288_v39 = vadd.f32 %v11783_v35, %v11287_v23 }
0x371b   :  { %v11297_v40 = vadd.f32 %v11293_v37, %v11119_v9 }
0x371c   :  { %v11296_v41 = vadd.f32 %v11288_v39, %v11118_v16 }
0x371d   :  { %v11301_v42 = vsel %vm741_vm4, %v11297_v40, 0.0 }
0x371e   :  { %11302 = vadd.xlane.f32.xlu0 %v11301_v42  ;;  %v11298_v52 = vsel %vm741_vm4, %v11296_v41, 0.0 }
0x371f   :  { %11299 = vadd.xlane.f32.xlu1 %v11298_v52 }
0x37ab   :  { %v11303_v43 = vpop.xlane.xlu0 %11302 }
0x37ac   :  { %v11305_v31 = vmul.f32 0.03125, %v11303_v43  ;;  %v11300_v44 = vpop.xlane.xlu1 %11299 }
0x37ad   :  { %v11304_v50 = vmul.f32 0.03125, %v11300_v44 }
0x37ae   :  { %v11307_v45 = vsub.f32 %v11297_v40, %v11305_v31 }
0x37af   :  { %v11306_v27 = vsub.f32 %v11296_v41, %v11304_v50 }
0x37b0   :  { %v11309_v48 = vmul.f32 %v11307_v45, %v11307_v45 }
0x37b1   :  { %v11308_v49 = vmul.f32 %v11306_v27, %v11306_v27 }
0x37b2   :  { %v11313_v51 = vsel %vm741_vm4, %v11309_v48, 0.0 }
0x37b3   :  { %11314 = vadd.xlane.f32.xlu0 %v11313_v51  ;;  %v11310_v32 = vsel %vm741_vm4, %v11308_v49, 0.0 }
0x37b4   :  { %11311 = vadd.xlane.f32.xlu1 %v11310_v32 }
0x3840   :  { %v11315_v25 = vpop.xlane.xlu0 %11314 }
0x3841   :  { %v11317_v33 = vmul.f32 0.03125, %v11315_v25  ;;  %v11312_v54 = vpop.xlane.xlu1 %11311 }
0x3842   :  { %v11316_v6 = vmul.f32 0.03125, %v11312_v54 }
0x3843   :  { %v11319_v60 = vadd.f32 1e-05, %v11317_v33 }
0x3844   :  { %v11318_v7 = vadd.f32 1e-05, %v11316_v6 }
0x3845   :  { %13509 = vrsqrt.f32 %v11319_v60 }
0x3846   :  { %13511 = vrsqrt.f32 %v11318_v7 }
0x384f   :  { %v13510_v62 = vpop.eup %13509 }
0x3850   :  { %v13512_v53 = vpop.eup %13511  ;;  %v11323_v21 = vmul.f32 %v13510_v62, %v11307_v45 }
0x3851   :  { %v11322_v56 = vmul.f32 %v13512_v53, %v11306_v27 }
0x3852   :  { %v11331_v1 = vmul.f32 %v11786_v0, %v11323_v21 }
0x3853   :  { %v11330_v28 = vmul.f32 %v11786_v0, %v11322_v56 }
0x3854   :  { %v11339_v4 = vadd.f32 %v11787_v3, %v11331_v1 }
0x3855   :  { %v11338_v2 = vadd.f32 %v11787_v3, %v11330_v28 }
0x3857   :  { %12951 = vmatprep.mubr.msk.f32.mxu1 %vm741_vm4, %v11338_v2 }
0x3858   :  { %12952 = vmatmul.mubr.msk.f32.vlgmr.msra.gmra.mrb[130].mxu1 %vm741_vm4, %v11339_v4 }
0x392b   :  { %v12953_v8 = vpop.f32.mrb[130].mxu1 }
0x392c   :  { %v11429_v10 = vadd.f32 %v12953_v8, %v11788_v19  ;;  %v11423_v14 = vpop.f32.mrb[131].mxu1 }
0x392d   :  { %v11424_v15 = vadd.f32 %v11788_v19, %v11423_v14 }
0x392e   :  { %11433 = vst [vmem:[%s14355_s6 + $0x8] sm:$0xff] %v11429_v10 }
0x392f   :  { %11432 = vst [vmem:[%s14355_s6] sm:$0xff] %v11424_v15 }
0x3930   :  { %11438 = vsyncpa [#allocation3], 1 }
0x3931   :  { %11439 = vsyncpa [#allocation5], 1 }
0x3932   :  { %11440 = vsyncpa [#allocation8], 1 }
0x3933   :  { %11441 = vsyncpa [#allocation11], 1 }
0x3934   :  { %11442 = vsyncpa [#allocation14], 1 }
0x3935   :  { %11443 = vsyncpa [#allocation17], 1 }
0x3936   :  { %11444 = vsyncpa [#allocation20], 1 }
0x3937   :  { %11445 = vsyncpa [#allocation23], 1 }
0x3938   :  { %11446 = vsyncpa [#allocation26], 1 }
0x3939   :  { %11447 = vsyncpa [#allocation29], 1 }
0x393a   :  { %11448 = vsyncpa [#allocation32], 1 }
0x393b   :  { %11449 = vsyncpa [#allocation35], 1 }

</bundles_post_ra>
